<compile_context>
chip_gen: v6e
topology: v6e:2x2x1
jax: 0.10.0
libtpu: 0.0.40
codegen_flags: <defaults>
</compile_context>

<pallas_src>
import functools

import jax
import jax.numpy as jnp
import numpy as np
from jax.experimental import pallas as pl
from jax.experimental.pallas import tpu as pltpu


# ----------------------------------------------------------------------------
# Fused kernel: one batch element per grid step, whole network in VMEM.
# ----------------------------------------------------------------------------
def _fused_superres_kernel(patch1_ref, w1_ref, b1_ref, w2_ref, b2_ref,
                           w3_ref, b3_ref, w4_ref, b4_ref,
                           out_ref,
                           a1_ref, a2_ref, a3_ref,
                           *, H, W):
    # patch1_ref : (1, HW, 25)       conv1 im2col patches (Cin = 1)
    # wX_ref     : (KH*KW*Cin, Cout) matmul-layout weights, bX_ref: (1, Cout)
    # out_ref    : (1, HW, r*r)      conv4 output (channels last)
    # aX_ref     : (H+2, W+2, C)     zero-halo'd VMEM activations for 3x3 layers
    HW = H * W

    def conv3x3(apad_ref, w_ref, b_ref):
        # im2col from the zero-halo'd activation: 9 static shifted windows,
        # concatenated along lanes -> one fat MXU matmul (K = 9*cin).
        cin = apad_ref.shape[-1]
        cols = []
        for kh in range(3):                      # static unroll; taps ordered
            for kw in range(3):                  # (kh, kw, ci) to match w layout
                cols.append(apad_ref[kh:kh + H, kw:kw + W, :].reshape(HW, cin))
        patch = jnp.concatenate(cols, axis=1)    # (HW, 9*cin)
        acc = jnp.dot(patch, w_ref[...], preferred_element_type=jnp.float32)
        return acc + b_ref[...]                  # (HW, cout)

    def store_padded(apad_ref, act):
        # Re-establish the zero halo + interior every step.  Only the four
        # 1-px border strips are zeroed (the interior is fully overwritten),
        # avoiding a full-buffer zero splat per step, and no state is assumed
        # to persist from earlier grid steps (megacore-safe).
        cout = apad_ref.shape[-1]
        zrow = jnp.zeros((1, W + 2, cout), jnp.float32)
        zcol = jnp.zeros((H, 1, cout), jnp.float32)
        apad_ref[0:1, :, :] = zrow                       # top halo row
        apad_ref[H + 1:H + 2, :, :] = zrow               # bottom halo row
        apad_ref[1:1 + H, 0:1, :] = zcol                 # left halo column
        apad_ref[1:1 + H, W + 1:W + 2, :] = zcol         # right halo column
        apad_ref[1:1 + H, 1:1 + W, :] = act.reshape(H, W, cout)   # interior

    # conv1 (5x5, Cin=1): single im2col matmul, K=25
    a1 = jnp.dot(patch1_ref[0], w1_ref[...],
                 preferred_element_type=jnp.float32) + b1_ref[...]
    store_padded(a1_ref, jnp.maximum(a1, 0.0))

    # conv2 (3x3, 64->64) + ReLU
    store_padded(a2_ref, jnp.maximum(conv3x3(a1_ref, w2_ref, b2_ref), 0.0))

    # conv3 (3x3, 64->32) + ReLU
    store_padded(a3_ref, jnp.maximum(conv3x3(a2_ref, w3_ref, b3_ref), 0.0))

    # conv4 (3x3, 32->r^2), no ReLU
    out_ref[0] = conv3x3(a3_ref, w4_ref, b4_ref).astype(out_ref.dtype)


def _w_as_matrix(w):
    # (Cout, Cin, KH, KW) -> (KH*KW*Cin, Cout); rows ordered (kh, kw, ci)
    cout, cin, kh, kw = w.shape
    return jnp.transpose(w, (2, 3, 1, 0)).reshape(kh * kw * cin, cout)


# ----------------------------------------------------------------------------
# Full forward pass (one Pallas call + tiny XLA layout glue)
# ----------------------------------------------------------------------------
def super_resolution_forward(x_nchw, params, upscale_factor):
    N, Cin, H, W = x_nchw.shape
    assert Cin == 1
    r = upscale_factor
    rr = r * r
    HW = H * W

    # conv1 im2col patches (Cin == 1): tiny (N, HW, 25) tensor, built with XLA.
    xp = jnp.pad(x_nchw[:, 0], ((0, 0), (2, 2), (2, 2)))
    patch1 = jnp.concatenate(
        [xp[:, kh:kh + H, kw:kw + W].reshape(N, HW, 1)
         for kh in range(5) for kw in range(5)], axis=-1)        # (N, HW, 25)

    w1 = _w_as_matrix(params["w1"]); b1 = params["b1"].reshape(1, -1)
    w2 = _w_as_matrix(params["w2"]); b2 = params["b2"].reshape(1, -1)
    w3 = _w_as_matrix(params["w3"]); b3 = params["b3"].reshape(1, -1)
    w4 = _w_as_matrix(params["w4"]); b4 = params["b4"].reshape(1, -1)
    c1, c2, c3 = w1.shape[1], w2.shape[1], w3.shape[1]

    flops = 2 * N * HW * (w1.shape[0] * c1 + w2.shape[0] * c2
                          + w3.shape[0] * c3 + w4.shape[0] * rr)
    bytes_accessed = 4 * (patch1.size + w1.size + w2.size + w3.size + w4.size
                          + b1.size + b2.size + b3.size + b4.size + N * HW * rr)

    kernel = functools.partial(_fused_superres_kernel, H=H, W=W)

    y = pl.pallas_call(
        kernel,
        out_shape=jax.ShapeDtypeStruct((N, HW, rr), jnp.float32),
        grid_spec=pltpu.PrefetchScalarGridSpec(
            num_scalar_prefetch=0,
            grid=(N,),
            in_specs=[
                pl.BlockSpec((1, HW, 25), lambda n: (n, 0, 0)),
                pl.BlockSpec(w1.shape, lambda n: (0, 0)),   # constant index_map:
                pl.BlockSpec(b1.shape, lambda n: (0, 0)),   # weights fetched once,
                pl.BlockSpec(w2.shape, lambda n: (0, 0)),   # stay VMEM-resident
                pl.BlockSpec(b2.shape, lambda n: (0, 0)),
                pl.BlockSpec(w3.shape, lambda n: (0, 0)),
                pl.BlockSpec(b3.shape, lambda n: (0, 0)),
                pl.BlockSpec(w4.shape, lambda n: (0, 0)),
                pl.BlockSpec(b4.shape, lambda n: (0, 0)),
            ],
            out_specs=pl.BlockSpec((1, HW, rr), lambda n: (n, 0, 0)),
            scratch_shapes=[
                pltpu.VMEM((H + 2, W + 2, c1), jnp.float32),
                pltpu.VMEM((H + 2, W + 2, c2), jnp.float32),
                pltpu.VMEM((H + 2, W + 2, c3), jnp.float32),
            ]),
        compiler_params=pltpu.CompilerParams(
            dimension_semantics=("parallel",)),
        cost_estimate=pl.CostEstimate(flops=flops, transcendentals=0,
                                      bytes_accessed=bytes_accessed),
    )(patch1, w1, b1, w2, b2, w3, b3, w4, b4)

    # pixel shuffle: y[n, h*W+w, rh*r+rw] -> out[n, 0, h*r+rh, w*r+rw]
    y = y.reshape(N, H, W, r, r)
    y = jnp.transpose(y, (0, 1, 3, 2, 4))
    return y.reshape(N, 1, H * r, W * r)


# ----------------------------------------------------------------------------
# Parameter init (deterministic orthogonal, as in the PyTorch module)
# ----------------------------------------------------------------------------
def orthogonal_init(key, shape, gain=1.0):
    rows = shape[0]
    cols = int(np.prod(shape[1:]))
    if rows < cols:
        a = jax.random.normal(key, (cols, rows), jnp.float32)
    else:
        a = jax.random.normal(key, (rows, cols), jnp.float32)
    q, r = jnp.linalg.qr(a)
    q = q * jnp.sign(jnp.diagonal(r))
    if rows < cols:
        q = q.T
    return (gain * q[:rows, :cols]).reshape(shape).astype(jnp.float32)


def make_params(key, upscale_factor):
    gain_relu = float(np.sqrt(2.0))
    k1, k2, k3, k4 = jax.random.split(key, 4)
    return {
        "w1": orthogonal_init(k1, (64, 1, 5, 5), gain_relu),
        "b1": jnp.zeros((64,), jnp.float32),
        "w2": orthogonal_init(k2, (64, 64, 3, 3), gain_relu),
        "b2": jnp.zeros((64,), jnp.float32),
        "w3": orthogonal_init(k3, (32, 64, 3, 3), gain_relu),
        "b3": jnp.zeros((32,), jnp.float32),
        "w4": orthogonal_init(k4, (upscale_factor ** 2, 32, 3, 3), 1.0),
        "b4": jnp.zeros((upscale_factor ** 2,), jnp.float32),
    }


# ----------------------------------------------------------------------------
# Pure-JAX reference for correctness checking
# ----------------------------------------------------------------------------
def pixel_shuffle_nchw(x_nchw, r):
    N, C, H, W = x_nchw.shape
    Cout = C // (r * r)
    x = x_nchw.reshape(N, Cout, r, r, H, W)
    x = jnp.transpose(x, (0, 1, 4, 2, 5, 3))
    return x.reshape(N, Cout, H * r, W * r)


def _conv_ref(x, w, b, pad, relu):
    y = jax.lax.conv_general_dilated(
        x, w, window_strides=(1, 1), padding=[(pad, pad), (pad, pad)],
        dimension_numbers=("NCHW", "OIHW", "NCHW"))
    y = y + b[None, :, None, None]
    return jnp.maximum(y, 0.0) if relu else y


def super_resolution_ref(x_nchw, params, upscale_factor):
    x = _conv_ref(x_nchw, params["w1"], params["b1"], 2, True)
    x = _conv_ref(x, params["w2"], params["b2"], 1, True)
    x = _conv_ref(x, params["w3"], params["b3"], 1, True)
    x = _conv_ref(x, params["w4"], params["b4"], 1, False)
    return pixel_shuffle_nchw(x, upscale_factor)


if __name__ == "__main__":
    upscale_factor = 3
    N, C, H, W = 2, 1, 16, 16

    key = jax.random.PRNGKey(0)
    kx, kp = jax.random.split(key)
    x = jax.random.normal(kx, (N, C, H, W), jnp.float32)
    params = make_params(kp, upscale_factor)

    fwd = jax.jit(functools.partial(super_resolution_forward,
                                    upscale_factor=upscale_factor))
    out = jax.block_until_ready(fwd(x, params))

    ref = super_resolution_ref(x, params, upscale_factor)
    assert out.shape == (N, 1, H * upscale_factor, W * upscale_factor), out.shape
    np.testing.assert_allclose(np.asarray(out), np.asarray(ref),
                               rtol=1e-4, atol=1e-4)
    print("KERNEL_OK")
</pallas_src>

<mosaic_0001>
module attributes {stable_mosaic.version = 11 : i64} {
  func.func @_fused_superres_kernel(%arg0: i32, %arg1: memref<1x256x25xf32, #tpu.memory_space<vmem>>, %arg2: memref<25x64xf32, #tpu.memory_space<vmem>>, %arg3: memref<1x64xf32, #tpu.memory_space<vmem>>, %arg4: memref<576x64xf32, #tpu.memory_space<vmem>>, %arg5: memref<1x64xf32, #tpu.memory_space<vmem>>, %arg6: memref<576x32xf32, #tpu.memory_space<vmem>>, %arg7: memref<1x32xf32, #tpu.memory_space<vmem>>, %arg8: memref<288x9xf32, #tpu.memory_space<vmem>>, %arg9: memref<1x9xf32, #tpu.memory_space<vmem>>, %arg10: memref<1x256x9xf32, #tpu.memory_space<vmem>>, %arg11: memref<18x18x64xf32, #tpu.memory_space<vmem>>, %arg12: memref<18x18x64xf32, #tpu.memory_space<vmem>>, %arg13: memref<18x18x32xf32, #tpu.memory_space<vmem>>) attributes {dimension_semantics = [#tpu.dimension_semantics<parallel>], iteration_bounds = array<i64: 2>, scalar_prefetch = 0 : i64, scratch_operands = 3 : i64, tpu.core_type = #tpu.core_type<tc>, window_params = [{transform_indices = @transform_0, window_bounds = array<i64: 1, 256, 25>}, {pipeline_mode = #tpu.pipeline_mode<synchronous>, transform_indices = @transform_1, window_bounds = array<i64: 25, 64>}, {pipeline_mode = #tpu.pipeline_mode<synchronous>, transform_indices = @transform_2, window_bounds = array<i64: 1, 64>}, {pipeline_mode = #tpu.pipeline_mode<synchronous>, transform_indices = @transform_3, window_bounds = array<i64: 576, 64>}, {pipeline_mode = #tpu.pipeline_mode<synchronous>, transform_indices = @transform_4, window_bounds = array<i64: 1, 64>}, {pipeline_mode = #tpu.pipeline_mode<synchronous>, transform_indices = @transform_5, window_bounds = array<i64: 576, 32>}, {pipeline_mode = #tpu.pipeline_mode<synchronous>, transform_indices = @transform_6, window_bounds = array<i64: 1, 32>}, {pipeline_mode = #tpu.pipeline_mode<synchronous>, transform_indices = @transform_7, window_bounds = array<i64: 288, 9>}, {pipeline_mode = #tpu.pipeline_mode<synchronous>, transform_indices = @transform_8, window_bounds = array<i64: 1, 9>}, {transform_indices = @transform_9, window_bounds = array<i64: 1, 256, 9>}]} {
    %c0 = arith.constant 0 : index
    %c0_0 = arith.constant 0 : index
    %c0_1 = arith.constant 0 : index
    %0 = vector.load %arg1[%c0, %c0_0, %c0_1] : memref<1x256x25xf32, #tpu.memory_space<vmem>>, vector<1x256x25xf32>
    %1 = vector.shape_cast %0 : vector<1x256x25xf32> to vector<256x25xf32>
    %c0_2 = arith.constant 0 : index
    %c0_3 = arith.constant 0 : index
    %2 = vector.load %arg2[%c0_2, %c0_3] : memref<25x64xf32, #tpu.memory_space<vmem>>, vector<25x64xf32>
    %cst = arith.constant dense<0.000000e+00> : vector<256x64xf32>
    %3 = tpu.matmul %1, %2, %cst {dimension_numbers = #tpu.dot_dimension_numbers<[1], [0], [0], [1], [0, 0, 1, 1], [], []>} : vector<256x25xf32>, vector<25x64xf32>, vector<256x64xf32> -> vector<256x64xf32>
    %c0_4 = arith.constant 0 : index
    %c0_5 = arith.constant 0 : index
    %4 = vector.load %arg3[%c0_4, %c0_5] : memref<1x64xf32, #tpu.memory_space<vmem>>, vector<1x64xf32>
    %5 = vector.broadcast %4 : vector<1x64xf32> to vector<256x64xf32>
    %6 = arith.addf %3, %5 : vector<256x64xf32>
    %cst_6 = arith.constant 0.000000e+00 : f32
    %7 = vector.broadcast %cst_6 : f32 to vector<256x64xf32>
    %8 = arith.maximumf %6, %7 : vector<256x64xf32>
    %cst_7 = arith.constant 0.000000e+00 : f32
    %9 = vector.broadcast %cst_7 : f32 to vector<1x18x64xf32>
    %cst_8 = arith.constant 0.000000e+00 : f32
    %10 = vector.broadcast %cst_8 : f32 to vector<16x1x64xf32>
    %c0_9 = arith.constant 0 : index
    %c0_10 = arith.constant 0 : index
    %c0_11 = arith.constant 0 : index
    %11 = vector.load %arg11[%c0_9, %c0_10, %c0_11] : memref<18x18x64xf32, #tpu.memory_space<vmem>>, vector<1x18x64xf32>
    tpu.vector_store %arg11[%c0_9, %c0_10, %c0_11], %9 {strides = array<i32>} : memref<18x18x64xf32, #tpu.memory_space<vmem>>, vector<1x18x64xf32>,
    %c17 = arith.constant 17 : index
    %c0_12 = arith.constant 0 : index
    %c0_13 = arith.constant 0 : index
    %12 = vector.load %arg11[%c17, %c0_12, %c0_13] : memref<18x18x64xf32, #tpu.memory_space<vmem>>, vector<1x18x64xf32>
    tpu.vector_store %arg11[%c17, %c0_12, %c0_13], %9 {strides = array<i32>} : memref<18x18x64xf32, #tpu.memory_space<vmem>>, vector<1x18x64xf32>,
    %c1 = arith.constant 1 : index
    %c0_14 = arith.constant 0 : index
    %c0_15 = arith.constant 0 : index
    %13 = vector.load %arg11[%c1, %c0_14, %c0_15] : memref<18x18x64xf32, #tpu.memory_space<vmem>>, vector<16x1x64xf32>
    tpu.vector_store %arg11[%c1, %c0_14, %c0_15], %10 {strides = array<i32>} : memref<18x18x64xf32, #tpu.memory_space<vmem>>, vector<16x1x64xf32>,
    %c1_16 = arith.constant 1 : index
    %c17_17 = arith.constant 17 : index
    %c0_18 = arith.constant 0 : index
    %14 = vector.load %arg11[%c1_16, %c17_17, %c0_18] : memref<18x18x64xf32, #tpu.memory_space<vmem>>, vector<16x1x64xf32>
    tpu.vector_store %arg11[%c1_16, %c17_17, %c0_18], %10 {strides = array<i32>} : memref<18x18x64xf32, #tpu.memory_space<vmem>>, vector<16x1x64xf32>,
    %15 = vector.shape_cast %8 : vector<256x64xf32> to vector<16x16x64xf32>
    %c1_19 = arith.constant 1 : index
    %c1_20 = arith.constant 1 : index
    %c0_21 = arith.constant 0 : index
    %16 = vector.load %arg11[%c1_19, %c1_20, %c0_21] : memref<18x18x64xf32, #tpu.memory_space<vmem>>, vector<16x16x64xf32>
    tpu.vector_store %arg11[%c1_19, %c1_20, %c0_21], %15 {strides = array<i32>} : memref<18x18x64xf32, #tpu.memory_space<vmem>>, vector<16x16x64xf32>,
    %c0_22 = arith.constant 0 : index
    %c0_23 = arith.constant 0 : index
    %c0_24 = arith.constant 0 : index
    %17 = vector.load %arg11[%c0_22, %c0_23, %c0_24] : memref<18x18x64xf32, #tpu.memory_space<vmem>>, vector<16x16x64xf32>
    %18 = vector.shape_cast %17 : vector<16x16x64xf32> to vector<256x64xf32>
    %c0_25 = arith.constant 0 : index
    %c1_26 = arith.constant 1 : index
    %c0_27 = arith.constant 0 : index
    %19 = vector.load %arg11[%c0_25, %c1_26, %c0_27] : memref<18x18x64xf32, #tpu.memory_space<vmem>>, vector<16x16x64xf32>
    %20 = vector.shape_cast %19 : vector<16x16x64xf32> to vector<256x64xf32>
    %c0_28 = arith.constant 0 : index
    %c2 = arith.constant 2 : index
    %c0_29 = arith.constant 0 : index
    %21 = vector.load %arg11[%c0_28, %c2, %c0_29] : memref<18x18x64xf32, #tpu.memory_space<vmem>>, vector<16x16x64xf32>
    %22 = vector.shape_cast %21 : vector<16x16x64xf32> to vector<256x64xf32>
    %c1_30 = arith.constant 1 : index
    %c0_31 = arith.constant 0 : index
    %c0_32 = arith.constant 0 : index
    %23 = vector.load %arg11[%c1_30, %c0_31, %c0_32] : memref<18x18x64xf32, #tpu.memory_space<vmem>>, vector<16x16x64xf32>
    %24 = vector.shape_cast %23 : vector<16x16x64xf32> to vector<256x64xf32>
    %c1_33 = arith.constant 1 : index
    %c1_34 = arith.constant 1 : index
    %c0_35 = arith.constant 0 : index
    %25 = vector.load %arg11[%c1_33, %c1_34, %c0_35] : memref<18x18x64xf32, #tpu.memory_space<vmem>>, vector<16x16x64xf32>
    %26 = vector.shape_cast %25 : vector<16x16x64xf32> to vector<256x64xf32>
    %c1_36 = arith.constant 1 : index
    %c2_37 = arith.constant 2 : index
    %c0_38 = arith.constant 0 : index
    %27 = vector.load %arg11[%c1_36, %c2_37, %c0_38] : memref<18x18x64xf32, #tpu.memory_space<vmem>>, vector<16x16x64xf32>
    %28 = vector.shape_cast %27 : vector<16x16x64xf32> to vector<256x64xf32>
    %c2_39 = arith.constant 2 : index
    %c0_40 = arith.constant 0 : index
    %c0_41 = arith.constant 0 : index
    %29 = vector.load %arg11[%c2_39, %c0_40, %c0_41] : memref<18x18x64xf32, #tpu.memory_space<vmem>>, vector<16x16x64xf32>
    %30 = vector.shape_cast %29 : vector<16x16x64xf32> to vector<256x64xf32>
    %c2_42 = arith.constant 2 : index
    %c1_43 = arith.constant 1 : index
    %c0_44 = arith.constant 0 : index
    %31 = vector.load %arg11[%c2_42, %c1_43, %c0_44] : memref<18x18x64xf32, #tpu.memory_space<vmem>>, vector<16x16x64xf32>
    %32 = vector.shape_cast %31 : vector<16x16x64xf32> to vector<256x64xf32>
    %c2_45 = arith.constant 2 : index
    %c2_46 = arith.constant 2 : index
    %c0_47 = arith.constant 0 : index
    %33 = vector.load %arg11[%c2_45, %c2_46, %c0_47] : memref<18x18x64xf32, #tpu.memory_space<vmem>>, vector<16x16x64xf32>
    %34 = vector.shape_cast %33 : vector<16x16x64xf32> to vector<256x64xf32>
    %35 = tpu.concatenate %18, %20, %22, %24, %26, %28, %30, %32, %34 in 1 : vector<256x64xf32>, vector<256x64xf32>, vector<256x64xf32>, vector<256x64xf32>, vector<256x64xf32>, vector<256x64xf32>, vector<256x64xf32>, vector<256x64xf32>, vector<256x64xf32> -> vector<256x576xf32>
    %c0_48 = arith.constant 0 : index
    %c0_49 = arith.constant 0 : index
    %36 = vector.load %arg4[%c0_48, %c0_49] : memref<576x64xf32, #tpu.memory_space<vmem>>, vector<576x64xf32>
    %cst_50 = arith.constant dense<0.000000e+00> : vector<256x64xf32>
    %37 = tpu.matmul %35, %36, %cst_50 {dimension_numbers = #tpu.dot_dimension_numbers<[1], [0], [0], [1], [0, 0, 1, 1], [], []>} : vector<256x576xf32>, vector<576x64xf32>, vector<256x64xf32> -> vector<256x64xf32>
    %c0_51 = arith.constant 0 : index
    %c0_52 = arith.constant 0 : index
    %38 = vector.load %arg5[%c0_51, %c0_52] : memref<1x64xf32, #tpu.memory_space<vmem>>, vector<1x64xf32>
    %39 = vector.broadcast %38 : vector<1x64xf32> to vector<256x64xf32>
    %40 = arith.addf %37, %39 : vector<256x64xf32>
    %cst_53 = arith.constant 0.000000e+00 : f32
    %41 = vector.broadcast %cst_53 : f32 to vector<256x64xf32>
    %42 = arith.maximumf %40, %41 : vector<256x64xf32>
    %cst_54 = arith.constant 0.000000e+00 : f32
    %43 = vector.broadcast %cst_54 : f32 to vector<1x18x64xf32>
    %cst_55 = arith.constant 0.000000e+00 : f32
    %44 = vector.broadcast %cst_55 : f32 to vector<16x1x64xf32>
    %c0_56 = arith.constant 0 : index
    %c0_57 = arith.constant 0 : index
    %c0_58 = arith.constant 0 : index
    %45 = vector.load %arg12[%c0_56, %c0_57, %c0_58] : memref<18x18x64xf32, #tpu.memory_space<vmem>>, vector<1x18x64xf32>
    tpu.vector_store %arg12[%c0_56, %c0_57, %c0_58], %43 {strides = array<i32>} : memref<18x18x64xf32, #tpu.memory_space<vmem>>, vector<1x18x64xf32>,
    %c17_59 = arith.constant 17 : index
    %c0_60 = arith.constant 0 : index
    %c0_61 = arith.constant 0 : index
    %46 = vector.load %arg12[%c17_59, %c0_60, %c0_61] : memref<18x18x64xf32, #tpu.memory_space<vmem>>, vector<1x18x64xf32>
    tpu.vector_store %arg12[%c17_59, %c0_60, %c0_61], %43 {strides = array<i32>} : memref<18x18x64xf32, #tpu.memory_space<vmem>>, vector<1x18x64xf32>,
    %c1_62 = arith.constant 1 : index
    %c0_63 = arith.constant 0 : index
    %c0_64 = arith.constant 0 : index
    %47 = vector.load %arg12[%c1_62, %c0_63, %c0_64] : memref<18x18x64xf32, #tpu.memory_space<vmem>>, vector<16x1x64xf32>
    tpu.vector_store %arg12[%c1_62, %c0_63, %c0_64], %44 {strides = array<i32>} : memref<18x18x64xf32, #tpu.memory_space<vmem>>, vector<16x1x64xf32>,
    %c1_65 = arith.constant 1 : index
    %c17_66 = arith.constant 17 : index
    %c0_67 = arith.constant 0 : index
    %48 = vector.load %arg12[%c1_65, %c17_66, %c0_67] : memref<18x18x64xf32, #tpu.memory_space<vmem>>, vector<16x1x64xf32>
    tpu.vector_store %arg12[%c1_65, %c17_66, %c0_67], %44 {strides = array<i32>} : memref<18x18x64xf32, #tpu.memory_space<vmem>>, vector<16x1x64xf32>,
    %49 = vector.shape_cast %42 : vector<256x64xf32> to vector<16x16x64xf32>
    %c1_68 = arith.constant 1 : index
    %c1_69 = arith.constant 1 : index
    %c0_70 = arith.constant 0 : index
    %50 = vector.load %arg12[%c1_68, %c1_69, %c0_70] : memref<18x18x64xf32, #tpu.memory_space<vmem>>, vector<16x16x64xf32>
    tpu.vector_store %arg12[%c1_68, %c1_69, %c0_70], %49 {strides = array<i32>} : memref<18x18x64xf32, #tpu.memory_space<vmem>>, vector<16x16x64xf32>,
    %c0_71 = arith.constant 0 : index
    %c0_72 = arith.constant 0 : index
    %c0_73 = arith.constant 0 : index
    %51 = vector.load %arg12[%c0_71, %c0_72, %c0_73] : memref<18x18x64xf32, #tpu.memory_space<vmem>>, vector<16x16x64xf32>
    %52 = vector.shape_cast %51 : vector<16x16x64xf32> to vector<256x64xf32>
    %c0_74 = arith.constant 0 : index
    %c1_75 = arith.constant 1 : index
    %c0_76 = arith.constant 0 : index
    %53 = vector.load %arg12[%c0_74, %c1_75, %c0_76] : memref<18x18x64xf32, #tpu.memory_space<vmem>>, vector<16x16x64xf32>
    %54 = vector.shape_cast %53 : vector<16x16x64xf32> to vector<256x64xf32>
    %c0_77 = arith.constant 0 : index
    %c2_78 = arith.constant 2 : index
    %c0_79 = arith.constant 0 : index
    %55 = vector.load %arg12[%c0_77, %c2_78, %c0_79] : memref<18x18x64xf32, #tpu.memory_space<vmem>>, vector<16x16x64xf32>
    %56 = vector.shape_cast %55 : vector<16x16x64xf32> to vector<256x64xf32>
    %c1_80 = arith.constant 1 : index
    %c0_81 = arith.constant 0 : index
    %c0_82 = arith.constant 0 : index
    %57 = vector.load %arg12[%c1_80, %c0_81, %c0_82] : memref<18x18x64xf32, #tpu.memory_space<vmem>>, vector<16x16x64xf32>
    %58 = vector.shape_cast %57 : vector<16x16x64xf32> to vector<256x64xf32>
    %c1_83 = arith.constant 1 : index
    %c1_84 = arith.constant 1 : index
    %c0_85 = arith.constant 0 : index
    %59 = vector.load %arg12[%c1_83, %c1_84, %c0_85] : memref<18x18x64xf32, #tpu.memory_space<vmem>>, vector<16x16x64xf32>
    %60 = vector.shape_cast %59 : vector<16x16x64xf32> to vector<256x64xf32>
    %c1_86 = arith.constant 1 : index
    %c2_87 = arith.constant 2 : index
    %c0_88 = arith.constant 0 : index
    %61 = vector.load %arg12[%c1_86, %c2_87, %c0_88] : memref<18x18x64xf32, #tpu.memory_space<vmem>>, vector<16x16x64xf32>
    %62 = vector.shape_cast %61 : vector<16x16x64xf32> to vector<256x64xf32>
    %c2_89 = arith.constant 2 : index
    %c0_90 = arith.constant 0 : index
    %c0_91 = arith.constant 0 : index
    %63 = vector.load %arg12[%c2_89, %c0_90, %c0_91] : memref<18x18x64xf32, #tpu.memory_space<vmem>>, vector<16x16x64xf32>
    %64 = vector.shape_cast %63 : vector<16x16x64xf32> to vector<256x64xf32>
    %c2_92 = arith.constant 2 : index
    %c1_93 = arith.constant 1 : index
    %c0_94 = arith.constant 0 : index
    %65 = vector.load %arg12[%c2_92, %c1_93, %c0_94] : memref<18x18x64xf32, #tpu.memory_space<vmem>>, vector<16x16x64xf32>
    %66 = vector.shape_cast %65 : vector<16x16x64xf32> to vector<256x64xf32>
    %c2_95 = arith.constant 2 : index
    %c2_96 = arith.constant 2 : index
    %c0_97 = arith.constant 0 : index
    %67 = vector.load %arg12[%c2_95, %c2_96, %c0_97] : memref<18x18x64xf32, #tpu.memory_space<vmem>>, vector<16x16x64xf32>
    %68 = vector.shape_cast %67 : vector<16x16x64xf32> to vector<256x64xf32>
    %69 = tpu.concatenate %52, %54, %56, %58, %60, %62, %64, %66, %68 in 1 : vector<256x64xf32>, vector<256x64xf32>, vector<256x64xf32>, vector<256x64xf32>, vector<256x64xf32>, vector<256x64xf32>, vector<256x64xf32>, vector<256x64xf32>, vector<256x64xf32> -> vector<256x576xf32>
    %c0_98 = arith.constant 0 : index
    %c0_99 = arith.constant 0 : index
    %70 = vector.load %arg6[%c0_98, %c0_99] : memref<576x32xf32, #tpu.memory_space<vmem>>, vector<576x32xf32>
    %cst_100 = arith.constant dense<0.000000e+00> : vector<256x32xf32>
    %71 = tpu.matmul %69, %70, %cst_100 {dimension_numbers = #tpu.dot_dimension_numbers<[1], [0], [0], [1], [0, 0, 1, 1], [], []>} : vector<256x576xf32>, vector<576x32xf32>, vector<256x32xf32> -> vector<256x32xf32>
    %c0_101 = arith.constant 0 : index
    %c0_102 = arith.constant 0 : index
    %72 = vector.load %arg7[%c0_101, %c0_102] : memref<1x32xf32, #tpu.memory_space<vmem>>, vector<1x32xf32>
    %73 = vector.broadcast %72 : vector<1x32xf32> to vector<256x32xf32>
    %74 = arith.addf %71, %73 : vector<256x32xf32>
    %cst_103 = arith.constant 0.000000e+00 : f32
    %75 = vector.broadcast %cst_103 : f32 to vector<256x32xf32>
    %76 = arith.maximumf %74, %75 : vector<256x32xf32>
    %cst_104 = arith.constant 0.000000e+00 : f32
    %77 = vector.broadcast %cst_104 : f32 to vector<1x18x32xf32>
    %cst_105 = arith.constant 0.000000e+00 : f32
    %78 = vector.broadcast %cst_105 : f32 to vector<16x1x32xf32>
    %c0_106 = arith.constant 0 : index
    %c0_107 = arith.constant 0 : index
    %c0_108 = arith.constant 0 : index
    %79 = vector.load %arg13[%c0_106, %c0_107, %c0_108] : memref<18x18x32xf32, #tpu.memory_space<vmem>>, vector<1x18x32xf32>
    tpu.vector_store %arg13[%c0_106, %c0_107, %c0_108], %77 {strides = array<i32>} : memref<18x18x32xf32, #tpu.memory_space<vmem>>, vector<1x18x32xf32>,
    %c17_109 = arith.constant 17 : index
    %c0_110 = arith.constant 0 : index
    %c0_111 = arith.constant 0 : index
    %80 = vector.load %arg13[%c17_109, %c0_110, %c0_111] : memref<18x18x32xf32, #tpu.memory_space<vmem>>, vector<1x18x32xf32>
    tpu.vector_store %arg13[%c17_109, %c0_110, %c0_111], %77 {strides = array<i32>} : memref<18x18x32xf32, #tpu.memory_space<vmem>>, vector<1x18x32xf32>,
    %c1_112 = arith.constant 1 : index
    %c0_113 = arith.constant 0 : index
    %c0_114 = arith.constant 0 : index
    %81 = vector.load %arg13[%c1_112, %c0_113, %c0_114] : memref<18x18x32xf32, #tpu.memory_space<vmem>>, vector<16x1x32xf32>
    tpu.vector_store %arg13[%c1_112, %c0_113, %c0_114], %78 {strides = array<i32>} : memref<18x18x32xf32, #tpu.memory_space<vmem>>, vector<16x1x32xf32>,
    %c1_115 = arith.constant 1 : index
    %c17_116 = arith.constant 17 : index
    %c0_117 = arith.constant 0 : index
    %82 = vector.load %arg13[%c1_115, %c17_116, %c0_117] : memref<18x18x32xf32, #tpu.memory_space<vmem>>, vector<16x1x32xf32>
    tpu.vector_store %arg13[%c1_115, %c17_116, %c0_117], %78 {strides = array<i32>} : memref<18x18x32xf32, #tpu.memory_space<vmem>>, vector<16x1x32xf32>,
    %83 = vector.shape_cast %76 : vector<256x32xf32> to vector<16x16x32xf32>
    %c1_118 = arith.constant 1 : index
    %c1_119 = arith.constant 1 : index
    %c0_120 = arith.constant 0 : index
    %84 = vector.load %arg13[%c1_118, %c1_119, %c0_120] : memref<18x18x32xf32, #tpu.memory_space<vmem>>, vector<16x16x32xf32>
    tpu.vector_store %arg13[%c1_118, %c1_119, %c0_120], %83 {strides = array<i32>} : memref<18x18x32xf32, #tpu.memory_space<vmem>>, vector<16x16x32xf32>,
    %c0_121 = arith.constant 0 : index
    %c0_122 = arith.constant 0 : index
    %c0_123 = arith.constant 0 : index
    %85 = vector.load %arg13[%c0_121, %c0_122, %c0_123] : memref<18x18x32xf32, #tpu.memory_space<vmem>>, vector<16x16x32xf32>
    %86 = vector.shape_cast %85 : vector<16x16x32xf32> to vector<256x32xf32>
    %c0_124 = arith.constant 0 : index
    %c1_125 = arith.constant 1 : index
    %c0_126 = arith.constant 0 : index
    %87 = vector.load %arg13[%c0_124, %c1_125, %c0_126] : memref<18x18x32xf32, #tpu.memory_space<vmem>>, vector<16x16x32xf32>
    %88 = vector.shape_cast %87 : vector<16x16x32xf32> to vector<256x32xf32>
    %c0_127 = arith.constant 0 : index
    %c2_128 = arith.constant 2 : index
    %c0_129 = arith.constant 0 : index
    %89 = vector.load %arg13[%c0_127, %c2_128, %c0_129] : memref<18x18x32xf32, #tpu.memory_space<vmem>>, vector<16x16x32xf32>
    %90 = vector.shape_cast %89 : vector<16x16x32xf32> to vector<256x32xf32>
    %c1_130 = arith.constant 1 : index
    %c0_131 = arith.constant 0 : index
    %c0_132 = arith.constant 0 : index
    %91 = vector.load %arg13[%c1_130, %c0_131, %c0_132] : memref<18x18x32xf32, #tpu.memory_space<vmem>>, vector<16x16x32xf32>
    %92 = vector.shape_cast %91 : vector<16x16x32xf32> to vector<256x32xf32>
    %c1_133 = arith.constant 1 : index
    %c1_134 = arith.constant 1 : index
    %c0_135 = arith.constant 0 : index
    %93 = vector.load %arg13[%c1_133, %c1_134, %c0_135] : memref<18x18x32xf32, #tpu.memory_space<vmem>>, vector<16x16x32xf32>
    %94 = vector.shape_cast %93 : vector<16x16x32xf32> to vector<256x32xf32>
    %c1_136 = arith.constant 1 : index
    %c2_137 = arith.constant 2 : index
    %c0_138 = arith.constant 0 : index
    %95 = vector.load %arg13[%c1_136, %c2_137, %c0_138] : memref<18x18x32xf32, #tpu.memory_space<vmem>>, vector<16x16x32xf32>
    %96 = vector.shape_cast %95 : vector<16x16x32xf32> to vector<256x32xf32>
    %c2_139 = arith.constant 2 : index
    %c0_140 = arith.constant 0 : index
    %c0_141 = arith.constant 0 : index
    %97 = vector.load %arg13[%c2_139, %c0_140, %c0_141] : memref<18x18x32xf32, #tpu.memory_space<vmem>>, vector<16x16x32xf32>
    %98 = vector.shape_cast %97 : vector<16x16x32xf32> to vector<256x32xf32>
    %c2_142 = arith.constant 2 : index
    %c1_143 = arith.constant 1 : index
    %c0_144 = arith.constant 0 : index
    %99 = vector.load %arg13[%c2_142, %c1_143, %c0_144] : memref<18x18x32xf32, #tpu.memory_space<vmem>>, vector<16x16x32xf32>
    %100 = vector.shape_cast %99 : vector<16x16x32xf32> to vector<256x32xf32>
    %c2_145 = arith.constant 2 : index
    %c2_146 = arith.constant 2 : index
    %c0_147 = arith.constant 0 : index
    %101 = vector.load %arg13[%c2_145, %c2_146, %c0_147] : memref<18x18x32xf32, #tpu.memory_space<vmem>>, vector<16x16x32xf32>
    %102 = vector.shape_cast %101 : vector<16x16x32xf32> to vector<256x32xf32>
    %103 = tpu.concatenate %86, %88, %90, %92, %94, %96, %98, %100, %102 in 1 : vector<256x32xf32>, vector<256x32xf32>, vector<256x32xf32>, vector<256x32xf32>, vector<256x32xf32>, vector<256x32xf32>, vector<256x32xf32>, vector<256x32xf32>, vector<256x32xf32> -> vector<256x288xf32>
    %c0_148 = arith.constant 0 : index
    %c0_149 = arith.constant 0 : index
    %104 = vector.load %arg8[%c0_148, %c0_149] : memref<288x9xf32, #tpu.memory_space<vmem>>, vector<288x9xf32>
    %cst_150 = arith.constant dense<0.000000e+00> : vector<256x9xf32>
    %105 = tpu.matmul %103, %104, %cst_150 {dimension_numbers = #tpu.dot_dimension_numbers<[1], [0], [0], [1], [0, 0, 1, 1], [], []>} : vector<256x288xf32>, vector<288x9xf32>, vector<256x9xf32> -> vector<256x9xf32>
    %c0_151 = arith.constant 0 : index
    %c0_152 = arith.constant 0 : index
    %106 = vector.load %arg9[%c0_151, %c0_152] : memref<1x9xf32, #tpu.memory_space<vmem>>, vector<1x9xf32>
    %107 = vector.broadcast %106 : vector<1x9xf32> to vector<256x9xf32>
    %108 = arith.addf %105, %107 : vector<256x9xf32>
    %c0_153 = arith.constant 0 : index
    %c0_154 = arith.constant 0 : index
    %c0_155 = arith.constant 0 : index
    %109 = vector.load %arg10[%c0_153, %c0_154, %c0_155] : memref<1x256x9xf32, #tpu.memory_space<vmem>>, vector<1x256x9xf32>
    %110 = vector.shape_cast %109 : vector<1x256x9xf32> to vector<256x9xf32>
    %111 = vector.shape_cast %108 : vector<256x9xf32> to vector<1x256x9xf32>
    tpu.vector_store %arg10[%c0_153, %c0_154, %c0_155], %111 {strides = array<i32>} : memref<1x256x9xf32, #tpu.memory_space<vmem>>, vector<1x256x9xf32>,
    return
  }
  func.func @transform_0(%arg0: i32) -> (i32, i32, i32) {
    %c0_i32 = arith.constant 0 : i32
    %c0_i32_0 = arith.constant 0 : i32
    %c0_i32_1 = arith.constant 0 : i32
    return %arg0, %c0_i32, %c0_i32_0 : i32, i32, i32
  }
  func.func @transform_1(%arg0: i32) -> (i32, i32) {
    %c0_i32 = arith.constant 0 : i32
    %c0_i32_0 = arith.constant 0 : i32
    %c0_i32_1 = arith.constant 0 : i32
    return %c0_i32, %c0_i32_0 : i32, i32
  }
  func.func @transform_2(%arg0: i32) -> (i32, i32) {
    %c0_i32 = arith.constant 0 : i32
    %c0_i32_0 = arith.constant 0 : i32
    %c0_i32_1 = arith.constant 0 : i32
    return %c0_i32, %c0_i32_0 : i32, i32
  }
  func.func @transform_3(%arg0: i32) -> (i32, i32) {
    %c0_i32 = arith.constant 0 : i32
    %c0_i32_0 = arith.constant 0 : i32
    %c0_i32_1 = arith.constant 0 : i32
    return %c0_i32, %c0_i32_0 : i32, i32
  }
  func.func @transform_4(%arg0: i32) -> (i32, i32) {
    %c0_i32 = arith.constant 0 : i32
    %c0_i32_0 = arith.constant 0 : i32
    %c0_i32_1 = arith.constant 0 : i32
    return %c0_i32, %c0_i32_0 : i32, i32
  }
  func.func @transform_5(%arg0: i32) -> (i32, i32) {
    %c0_i32 = arith.constant 0 : i32
    %c0_i32_0 = arith.constant 0 : i32
    %c0_i32_1 = arith.constant 0 : i32
    return %c0_i32, %c0_i32_0 : i32, i32
  }
  func.func @transform_6(%arg0: i32) -> (i32, i32) {
    %c0_i32 = arith.constant 0 : i32
    %c0_i32_0 = arith.constant 0 : i32
    %c0_i32_1 = arith.constant 0 : i32
    return %c0_i32, %c0_i32_0 : i32, i32
  }
  func.func @transform_7(%arg0: i32) -> (i32, i32) {
    %c0_i32 = arith.constant 0 : i32
    %c0_i32_0 = arith.constant 0 : i32
    %c0_i32_1 = arith.constant 0 : i32
    return %c0_i32, %c0_i32_0 : i32, i32
  }
  func.func @transform_8(%arg0: i32) -> (i32, i32) {
    %c0_i32 = arith.constant 0 : i32
    %c0_i32_0 = arith.constant 0 : i32
    %c0_i32_1 = arith.constant 0 : i32
    return %c0_i32, %c0_i32_0 : i32, i32
  }
  func.func @transform_9(%arg0: i32) -> (i32, i32, i32) {
    %c0_i32 = arith.constant 0 : i32
    %c0_i32_0 = arith.constant 0 : i32
    %c0_i32_1 = arith.constant 0 : i32
    return %arg0, %c0_i32, %c0_i32_0 : i32, i32, i32
  }
}

</mosaic_0001>

<bundles_post_ra>
// kernel: super_resolution_forward.1
= control target key start
LH: loop header
LB: loop body
LE: loop exit
PB: predicated region body
PF: predicated region fallthrough
CT: control target
= control target key end

     0   :  { %s8307_s30 = smov 0   ;;  %s12133_s0 = inlined_call_operand.vmem [shape: f32[2,256,25], index: 0, kind: input, shape index: {}]   ;;  %s12134_s1 = inlined_call_operand.vmem [shape: f32[25,64], index: 1, kind: input, shape index: {}]   ;;  %s12135_s2 = inlined_call_operand.vmem [shape: f32[1,64], index: 2, kind: input, shape index: {}]   ;;  %s12136_s3 = inlined_call_operand.vmem [shape: f32[576,64], index: 3, kind: input, shape index: {}]   ;;  %s12137_s4 = inlined_call_operand.vmem [shape: f32[1,64], index: 4, kind: input, shape index: {}]   ;;  %s12138_s5 = inlined_call_operand.vmem [shape: f32[576,32], index: 5, kind: input, shape index: {}]   ;;  %s12139_s6 = inlined_call_operand.vmem [shape: f32[1,32], index: 6, kind: input, shape index: {}]   ;;  %s12140_s7 = inlined_call_operand.vmem [shape: f32[288,9], index: 7, kind: input, shape index: {}]   ;;  %s12141_s8 = inlined_call_operand.vmem [shape: f32[1,9], index: 8, kind: input, shape index: {}]   ;;  %s12142_s9 = inlined_call_operand.vmem [shape: f32[2,256,9], index: 9, kind: output, shape index: {}]  }
   0x1 LB: > { %s6505_s10 = sadd.s32 4294967295, %s8251_s30   ;;  %p6509_p0 = scmp.ge.s32.totalorder %s8251_s30, 1  ;;  %s8251_s30 = sphi %s8307_s30, %s19_s30  }
   0x2   : > { %p287_p1 = scmp.lt.s32.totalorder %s8251_s30, 3 }
   0x4   : > { %p288_p2 = pnand %p6509_p0, %p287_p1 }
   0x6   : > { %291 = sbr.rel (%p288_p2) target bundleno = 1676 (0x68c), region = 56 }
   0xb   : > { %v368_v0 = vld [vmem:[%s12134_s1 + $0x18] sm:$0x1]  ;;  %vm473_vm0 = vcmask 1040384   ;;  %v367_v1 = vld [vmem:[%s12134_s1 + $0x10] sm:$0xff]  ;;  %p323_p3 = scmp.lt.s32.totalorder %s6505_s10, 1  ;;  %v366_v2 = vld [vmem:[%s12134_s1 + $0x8] sm:$0xff] }
   0xc   : > { %6803 = vmatprep.subr.msk.mxu0 %vm473_vm0, %v368_v0  ;;  %v365_v3 = vld [vmem:[%s12134_s1] sm:$0xff]  ;;  %vm376_vm1 = vcmask 203776   ;;  %vm734_vm2 = vcmask 523264   ;;  %vm744_vm3 = vcmask 516096   ;;  %v12144_v36 = vmov 0.0   ;;  %v1753_v37 = vld [vmem:[%s12136_s3 + $0x78] sm:$0xff] }
   0xd   : > { %6804 = vmatpush3.msk.msra.mxu0 %vm473_vm0, %v368_v0  ;;  %s12177_s10 = smov (!%p323_p3, %s6505_s10), 1  ;;  %735 = vst.msk [vmem:[#allocation2] sm:$0xff] %vm734_vm2, %v12144_v36  ;;  %736 = vst.msk [vmem:[#allocation2 + $0x8] sm:$0xff] %vm734_vm2, %v12144_v36  ;;  %1913 = vmatprep.subr.mxu1 %v12144_v36  ;;  %vm737_vm4 = vcmask 517120   ;;  %v1752_v38 = vld [vmem:[%s12136_s3 + $0x70] sm:$0xff]  ;;  %v1751_v39 = vld [vmem:[%s12136_s3 + $0x68] sm:$0xff] }
   0xe   : > { %6805 = vmatprep.subr.mxu0 %v367_v1  ;;  %s6649_s19 = sshll.u32 %s12177_s10, 8  ;;  %745 = vst.msk [vmem:[#allocation2 + $0x18] sm:$0x1] %vm744_vm3, %v12144_v36  ;;  %746 = vst.msk [vmem:[#allocation2 + $0x30] sm:$0x1] %vm744_vm3, %v12144_v36  ;;  %1914 = vmatpush1.msra.mxu1 %v1753_v37  ;;  %v1750_v40 = vld [vmem:[%s12136_s3 + $0x60] sm:$0xff] }
   0xf   : > { %6806 = vmatpush3.msra.mxu0 %v367_v1  ;;  %s8335_s22 = scalar_lea.vmem %s12133_s0, %s6649_s19  ;;  %740 = vst.msk [vmem:[#allocation2 + $0x198] sm:$0xff] %vm734_vm2, %v12144_v36  ;;  %741 = vst.msk [vmem:[#allocation2 + $0x1a0] sm:$0xff] %vm734_vm2, %v12144_v36  ;;  %1915 = vmatprep.subr.mxu1 %v12144_v36  ;;  %v1749_v41 = vld [vmem:[%s12136_s3 + $0x58] sm:$0xff]  ;;  %v1748_v42 = vld [vmem:[%s12136_s3 + $0x50] sm:$0xff]  ;;  %s8254_s29 = smov 64   ;;  %vm4503_vm5 = vcmask 261120  }
  0x10   : > { %6807 = vmatprep.subr.mxu0 %v366_v2  ;;  %v333_v4 = vld [vmem:[%s8335_s22] sm:$0xff]  ;;  %v334_v5 = vld [vmem:[%s8335_s22 + $0x8] sm:$0xff]  ;;  %v335_v6 = vld [vmem:[%s8335_s22 + $0x10] sm:$0xff]  ;;  %747 = vst.msk [vmem:[#allocation2 + $0x48] sm:$0x1] %vm744_vm3, %v12144_v36  ;;  %1916 = vmatpush1.msra.mxu1 %v1752_v38  ;;  %vm4506_vm6 = vcmask 254976  }
  0x11   : > { %6808 = vmatpush3.msra.mxu0 %v366_v2  ;;  %6811 = vmatprep.mubr.msk.f32.mxu0 %vm376_vm1, %v333_v4  ;;  %v336_v7 = vld [vmem:[%s8335_s22 + $0x18] sm:$0xff]  ;;  %v337_v8 = vld [vmem:[%s8335_s22 + $0x20] sm:$0xff]  ;;  %v338_v9 = vld [vmem:[%s8335_s22 + $0x28] sm:$0xff]  ;;  %748 = vst.msk [vmem:[#allocation2 + $0x60] sm:$0x1] %vm744_vm3, %v12144_v36  ;;  %vm4513_vm7 = vcmask 253952  }
  0x12   : > { %6809 = vmatprep.subr.mxu0 %v365_v3  ;;  %v339_v10 = vld [vmem:[%s8335_s22 + $0x30] sm:$0xff]  ;;  %v340_v11 = vld [vmem:[%s8335_s22 + $0x38] sm:$0xff]  ;;  %v341_v12 = vld [vmem:[%s8335_s22 + $0x40] sm:$0xff]  ;;  %749 = vst.msk [vmem:[#allocation2 + $0x78] sm:$0x1] %vm744_vm3, %v12144_v36  ;;  %1917 = vmatprep.subr.mxu1 %v12144_v36  ;;  %s8255_s28 = smov 32  }
  0x13   : > { %6810 = vmatpush3.msra.mxu0 %v365_v3  ;;  %v342_v13 = vld [vmem:[%s8335_s22 + $0x48] sm:$0xff]  ;;  %v343_v14 = vld [vmem:[%s8335_s22 + $0x50] sm:$0xff]  ;;  %v344_v15 = vld [vmem:[%s8335_s22 + $0x58] sm:$0xff]  ;;  %750 = vst.msk [vmem:[#allocation2 + $0x90] sm:$0x1] %vm744_vm3, %v12144_v36  ;;  %1918 = vmatpush1.msra.mxu1 %v1751_v39  ;;  %s8256_s13 = smov 96  }
  0x14   : > { %6812 = vmatmul.mubr.msk.f32.vlgmr.msra.gmra.mxu0 %vm376_vm1, %v334_v5  ;;  %v345_v16 = vld [vmem:[%s8335_s22 + $0x60] sm:$0xff]  ;;  %v346_v17 = vld [vmem:[%s8335_s22 + $0x68] sm:$0xff]  ;;  %v347_v18 = vld [vmem:[%s8335_s22 + $0x70] sm:$0xff]  ;;  %751 = vst.msk [vmem:[#allocation2 + $0xa8] sm:$0x1] %vm744_vm3, %v12144_v36  ;;  %2138 = vmatprep.subr.mxu0 %v12144_v36  ;;  %vm5699_vm8 = vcmask 785408  }
  0x15   : > { %6814 = vmatprep.mubr.msk.f32.mxu0 %vm376_vm1, %v335_v6  ;;  %v348_v19 = vld [vmem:[%s8335_s22 + $0x78] sm:$0xff]  ;;  %v349_v20 = vld [vmem:[%s8335_s22 + $0x80] sm:$0xff]  ;;  %v350_v21 = vld [vmem:[%s8335_s22 + $0x88] sm:$0xff]  ;;  %752 = vst.msk [vmem:[#allocation2 + $0xc0] sm:$0x1] %vm744_vm3, %v12144_v36  ;;  %1919 = vmatprep.subr.mxu1 %v12144_v36  ;;  %vm6417_vm9 = vcmask 72704  }
  0x16   : > { %v351_v22 = vld [vmem:[%s8335_s22 + $0x90] sm:$0xff]  ;;  %v352_v23 = vld [vmem:[%s8335_s22 + $0x98] sm:$0xff]  ;;  %v353_v24 = vld [vmem:[%s8335_s22 + $0xa0] sm:$0xff]  ;;  %753 = vst.msk [vmem:[#allocation2 + $0xd8] sm:$0x1] %vm744_vm3, %v12144_v36  ;;  %1920 = vmatpush1.msra.mxu1 %v1750_v40 }
  0x17   : > { %v354_v25 = vld [vmem:[%s8335_s22 + $0xa8] sm:$0xff]  ;;  %v355_v26 = vld [vmem:[%s8335_s22 + $0xb0] sm:$0xff]  ;;  %v356_v27 = vld [vmem:[%s8335_s22 + $0xb8] sm:$0xff]  ;;  %754 = vst.msk [vmem:[#allocation2 + $0xf0] sm:$0x1] %vm744_vm3, %v12144_v36  ;;  %1921 = vmatprep.subr.mxu1 %v12144_v36 }
  0x18   : > { %6815 = vmatmul.mubr.msk.f32.gmra.mxu0 %vm376_vm1, %v336_v7  ;;  %v357_v28 = vld [vmem:[%s8335_s22 + $0xc0] sm:$0xff]  ;;  %v358_v29 = vld [vmem:[%s8335_s22 + $0xc8] sm:$0xff]  ;;  %v359_v30 = vld [vmem:[%s8335_s22 + $0xd0] sm:$0xff]  ;;  %755 = vst.msk [vmem:[#allocation2 + $0x108] sm:$0x1] %vm744_vm3, %v12144_v36  ;;  %1922 = vmatpush1.msra.mxu1 %v1749_v41 }
  0x19   : > { %6817 = vmatprep.mubr.msk.f32.mxu0 %vm376_vm1, %v337_v8  ;;  %v360_v31 = vld [vmem:[%s8335_s22 + $0xd8] sm:$0xff]  ;;  %v361_v32 = vld [vmem:[%s8335_s22 + $0xe0] sm:$0xff]  ;;  %v362_v33 = vld [vmem:[%s8335_s22 + $0xe8] sm:$0xff]  ;;  %756 = vst.msk [vmem:[#allocation2 + $0x120] sm:$0x1] %vm744_vm3, %v12144_v36  ;;  %1923 = vmatprep.subr.mxu1 %v12144_v36 }
  0x1a   : > { %v363_v34 = vld [vmem:[%s8335_s22 + $0xf0] sm:$0xff]  ;;  %v364_v35 = vld [vmem:[%s8335_s22 + $0xf8] sm:$0xff]  ;;  %757 = vst.msk [vmem:[#allocation2 + $0x138] sm:$0x1] %vm744_vm3, %v12144_v36  ;;  %758 = vst.msk [vmem:[#allocation2 + $0x150] sm:$0x1] %vm744_vm3, %v12144_v36  ;;  %1924 = vmatpush1.msra.mxu1 %v1748_v42  ;;  %s12033_s22 = scalar_lea.vmem %s12142_s9, %s6649_s19 }
  0x1b   : > { %759 = vst.msk [vmem:[#allocation2 + $0x168] sm:$0x1] %vm744_vm3, %v12144_v36  ;;  %760 = vst.msk [vmem:[#allocation2 + $0x180] sm:$0x1] %vm744_vm3, %v12144_v36  ;;  %v1747_v43 = vld [vmem:[%s12136_s3 + $0x48] sm:$0xff]  ;;  %1925 = vmatprep.subr.mxu1 %v12144_v36  ;;  %v1746_v44 = vld [vmem:[%s12136_s3 + $0x40] sm:$0xff] }
  0x1c   : > { %6818 = vmatmul.mubr.msk.f32.gmra.mxu0 %vm376_vm1, %v338_v9  ;;  %761 = vst.msk [vmem:[#allocation2 + $0x29] sm:$0x1] %vm744_vm3, %v12144_v36  ;;  %762 = vst.msk [vmem:[#allocation2 + $0x41] sm:$0x1] %vm744_vm3, %v12144_v36  ;;  %1926 = vmatpush1.msra.mxu1 %v1747_v43  ;;  %v1745_v45 = vld [vmem:[%s12136_s3 + $0x38] sm:$0xff]  ;;  %v1744_v46 = vld [vmem:[%s12136_s3 + $0x30] sm:$0xff] }
  0x1d   : > { %6820 = vmatprep.mubr.msk.f32.mxu0 %vm376_vm1, %v339_v10  ;;  %763 = vst.msk [vmem:[#allocation2 + $0x59] sm:$0x1] %vm744_vm3, %v12144_v36  ;;  %764 = vst.msk [vmem:[#allocation2 + $0x71] sm:$0x1] %vm744_vm3, %v12144_v36  ;;  %1927 = vmatprep.subr.mxu1 %v12144_v36  ;;  %v1743_v47 = vld [vmem:[%s12136_s3 + $0x28] sm:$0xff]  ;;  %v1742_v48 = vld [vmem:[%s12136_s3 + $0x20] sm:$0xff] }
  0x1e   : > { %765 = vst.msk [vmem:[#allocation2 + $0x89] sm:$0x1] %vm744_vm3, %v12144_v36  ;;  %766 = vst.msk [vmem:[#allocation2 + $0xa1] sm:$0x1] %vm744_vm3, %v12144_v36  ;;  %1928 = vmatpush1.msra.mxu1 %v1746_v44  ;;  %v1741_v49 = vld [vmem:[%s12136_s3 + $0x18] sm:$0xff]  ;;  %v1740_v50 = vld [vmem:[%s12136_s3 + $0x10] sm:$0xff] }
  0x1f   : > { %767 = vst.msk [vmem:[#allocation2 + $0xb9] sm:$0x1] %vm744_vm3, %v12144_v36  ;;  %768 = vst.msk [vmem:[#allocation2 + $0xd1] sm:$0x1] %vm744_vm3, %v12144_v36  ;;  %1929 = vmatprep.subr.mxu1 %v12144_v36  ;;  %v1739_v51 = vld [vmem:[%s12136_s3 + $0x8] sm:$0xff]  ;;  %v1738_v52 = vld [vmem:[%s12136_s3] sm:$0xff] }
  0x20   : > { %6821 = vmatmul.mubr.msk.f32.gmra.mxu0 %vm376_vm1, %v340_v11  ;;  %769 = vst.msk [vmem:[#allocation2 + $0xe9] sm:$0x1] %vm744_vm3, %v12144_v36  ;;  %770 = vst.msk [vmem:[#allocation2 + $0x101] sm:$0x1] %vm744_vm3, %v12144_v36  ;;  %1930 = vmatpush1.msra.mxu1 %v1745_v45  ;;  %v1769_v53 = vld [vmem:[%s12136_s3 + $0xf8] sm:$0xff]  ;;  %v1768_v54 = vld [vmem:[%s12136_s3 + $0xf0] sm:$0xff] }
  0x21   : > { %6823 = vmatprep.mubr.msk.f32.mxu0 %vm376_vm1, %v341_v12  ;;  %771 = vst.msk [vmem:[#allocation2 + $0x119] sm:$0x1] %vm744_vm3, %v12144_v36  ;;  %772 = vst.msk [vmem:[#allocation2 + $0x131] sm:$0x1] %vm744_vm3, %v12144_v36  ;;  %1931 = vmatprep.subr.mxu1 %v12144_v36  ;;  %v1767_v55 = vld [vmem:[%s12136_s3 + $0xe8] sm:$0xff]  ;;  %v1766_v56 = vld [vmem:[%s12136_s3 + $0xe0] sm:$0xff] }
  0x22   : > { %773 = vst.msk [vmem:[#allocation2 + $0x149] sm:$0x1] %vm744_vm3, %v12144_v36  ;;  %774 = vst.msk [vmem:[#allocation2 + $0x161] sm:$0x1] %vm744_vm3, %v12144_v36  ;;  %1932 = vmatpush1.msra.mxu1 %v1744_v46  ;;  %v1765_v57 = vld [vmem:[%s12136_s3 + $0xd8] sm:$0xff]  ;;  %v1764_v58 = vld [vmem:[%s12136_s3 + $0xd0] sm:$0xff] }
  0x23   : > { %775 = vst.msk [vmem:[#allocation2 + $0x179] sm:$0x1] %vm744_vm3, %v12144_v36  ;;  %776 = vst.msk [vmem:[#allocation2 + $0x191] sm:$0x1] %vm744_vm3, %v12144_v36  ;;  %1933 = vmatprep.subr.mxu1 %v12144_v36  ;;  %v1763_v59 = vld [vmem:[%s12136_s3 + $0xc8] sm:$0xff]  ;;  %v1762_v60 = vld [vmem:[%s12136_s3 + $0xc0] sm:$0xff] }
  0x24   : > { %6824 = vmatmul.mubr.msk.f32.gmra.mxu0 %vm376_vm1, %v342_v13  ;;  %2620 = vst.msk [vmem:[#allocation3] sm:$0xff] %vm734_vm2, %v12144_v36  ;;  %2621 = vst.msk [vmem:[#allocation3 + $0x8] sm:$0xff] %vm734_vm2, %v12144_v36  ;;  %1934 = vmatpush1.msra.mxu1 %v1743_v47  ;;  %v1761_v61 = vld [vmem:[%s12136_s3 + $0xb8] sm:$0xff]  ;;  %v1760_v62 = vld [vmem:[%s12136_s3 + $0xb0] sm:$0xff] }
  0x25   : > { %6826 = vmatprep.mubr.msk.f32.mxu0 %vm376_vm1, %v343_v14  ;;  %2624 = vst.msk [vmem:[#allocation3 + $0x198] sm:$0xff] %vm734_vm2, %v12144_v36  ;;  %2625 = vst.msk [vmem:[#allocation3 + $0x1a0] sm:$0xff] %vm734_vm2, %v12144_v36  ;;  %1935 = vmatprep.subr.mxu1 %v12144_v36  ;;  %v1759_v63 = vld [vmem:[%s12136_s3 + $0xa8] sm:$0xff]  ;;  %v1758_v0 = vld [vmem:[%s12136_s3 + $0xa0] sm:$0xff] }
  0x26   : > { %2628 = vst.msk [vmem:[#allocation3 + $0x18] sm:$0x1] %vm744_vm3, %v12144_v36  ;;  %2629 = vst.msk [vmem:[#allocation3 + $0x30] sm:$0x1] %vm744_vm3, %v12144_v36  ;;  %1936 = vmatpush1.msra.mxu1 %v1742_v48  ;;  %v1757_v1 = vld [vmem:[%s12136_s3 + $0x98] sm:$0xff]  ;;  %v1756_v5 = vld [vmem:[%s12136_s3 + $0x90] sm:$0xff] }
  0x27   : > { %2630 = vst.msk [vmem:[#allocation3 + $0x48] sm:$0x1] %vm744_vm3, %v12144_v36  ;;  %2631 = vst.msk [vmem:[#allocation3 + $0x60] sm:$0x1] %vm744_vm3, %v12144_v36  ;;  %1937 = vmatprep.subr.mxu1 %v12144_v36  ;;  %v8668_v2 = vld [vmem:[%s12135_s2] ss:$0 sm:$0xff] }
  0x28   : > { %6827 = vmatmul.mubr.msk.f32.gmra.mxu0 %vm376_vm1, %v344_v15  ;;  %2632 = vst.msk [vmem:[#allocation3 + $0x78] sm:$0x1] %vm744_vm3, %v12144_v36  ;;  %2633 = vst.msk [vmem:[#allocation3 + $0x90] sm:$0x1] %vm744_vm3, %v12144_v36  ;;  %1938 = vmatpush1.msra.mxu1 %v1741_v49  ;;  %v1755_v10 = vld [vmem:[%s12136_s3 + $0x88] sm:$0xff]  ;;  %v1754_v13 = vld [vmem:[%s12136_s3 + $0x80] sm:$0xff] }
  0x29   : > { %6829 = vmatprep.mubr.msk.f32.mxu0 %vm376_vm1, %v345_v16  ;;  %2634 = vst.msk [vmem:[#allocation3 + $0xa8] sm:$0x1] %vm744_vm3, %v12144_v36  ;;  %2635 = vst.msk [vmem:[#allocation3 + $0xc0] sm:$0x1] %vm744_vm3, %v12144_v36  ;;  %1939 = vmatprep.subr.mxu1 %v12144_v36  ;;  %v8689_v14 = vld [vmem:[%s12136_s3 + $0x238] sm:$0xff]  ;;  %v1782_v37 = vld [vmem:[%s12136_s3 + $0x160] sm:$0xff] }
  0x2a   : > { %2636 = vst.msk [vmem:[#allocation3 + $0xd8] sm:$0x1] %vm744_vm3, %v12144_v36  ;;  %2637 = vst.msk [vmem:[#allocation3 + $0xf0] sm:$0x1] %vm744_vm3, %v12144_v36  ;;  %1940 = vmatpush1.msra.mxu1 %v1740_v50  ;;  %v1781_v41 = vld [vmem:[%s12136_s3 + $0x158] sm:$0xff] }
  0x2b   : > { %2638 = vst.msk [vmem:[#allocation3 + $0x108] sm:$0x1] %vm744_vm3, %v12144_v36  ;;  %2639 = vst.msk [vmem:[#allocation3 + $0x120] sm:$0x1] %vm744_vm3, %v12144_v36  ;;  %1941 = vmatprep.subr.mxu1 %v12144_v36 }
  0x2c   : > { %6830 = vmatmul.mubr.msk.f32.gmra.mxu0 %vm376_vm1, %v346_v17  ;;  %2640 = vst.msk [vmem:[#allocation3 + $0x138] sm:$0x1] %vm744_vm3, %v12144_v36  ;;  %2641 = vst.msk [vmem:[#allocation3 + $0x150] sm:$0x1] %vm744_vm3, %v12144_v36  ;;  %1942 = vmatpush1.msra.mxu1 %v1739_v51  ;;  %v1780_v51 = vld [vmem:[%s12136_s3 + $0x150] sm:$0xff] }
  0x2d   : > { %6832 = vmatprep.mubr.msk.f32.mxu0 %vm376_vm1, %v347_v18  ;;  %2642 = vst.msk [vmem:[#allocation3 + $0x168] sm:$0x1] %vm744_vm3, %v12144_v36  ;;  %2643 = vst.msk [vmem:[#allocation3 + $0x180] sm:$0x1] %vm744_vm3, %v12144_v36  ;;  %1943 = vmatprep.subr.mxu1 %v12144_v36 }
  0x2e   : > { %2644 = vst.msk [vmem:[#allocation3 + $0x29] sm:$0x1] %vm744_vm3, %v12144_v36  ;;  %2645 = vst.msk [vmem:[#allocation3 + $0x41] sm:$0x1] %vm744_vm3, %v12144_v36  ;;  %1944 = vmatpush1.msra.mxu1 %v1738_v52 }
  0x2f   : > { %2646 = vst.msk [vmem:[#allocation3 + $0x59] sm:$0x1] %vm744_vm3, %v12144_v36  ;;  %2647 = vst.msk [vmem:[#allocation3 + $0x71] sm:$0x1] %vm744_vm3, %v12144_v36  ;;  %1945 = vmatprep.subr.mxu1 %v12144_v36 }
  0x30   : > { %6833 = vmatmul.mubr.msk.f32.gmra.mxu0 %vm376_vm1, %v348_v19  ;;  %2648 = vst.msk [vmem:[#allocation3 + $0x89] sm:$0x1] %vm744_vm3, %v12144_v36  ;;  %2649 = vst.msk [vmem:[#allocation3 + $0xa1] sm:$0x1] %vm744_vm3, %v12144_v36  ;;  %1946 = vmatpush2.msra.mxu1 %v1769_v53 }
  0x31   : > { %6835 = vmatprep.mubr.msk.f32.mxu0 %vm376_vm1, %v349_v20  ;;  %2650 = vst.msk [vmem:[#allocation3 + $0xb9] sm:$0x1] %vm744_vm3, %v12144_v36  ;;  %2651 = vst.msk [vmem:[#allocation3 + $0xd1] sm:$0x1] %vm744_vm3, %v12144_v36  ;;  %1947 = vmatprep.subr.mxu1 %v12144_v36 }
  0x32   : > { %2652 = vst.msk [vmem:[#allocation3 + $0xe9] sm:$0x1] %vm744_vm3, %v12144_v36  ;;  %2653 = vst.msk [vmem:[#allocation3 + $0x101] sm:$0x1] %vm744_vm3, %v12144_v36  ;;  %1948 = vmatpush2.msra.mxu1 %v1768_v54 }
  0x33   : > { %2654 = vst.msk [vmem:[#allocation3 + $0x119] sm:$0x1] %vm744_vm3, %v12144_v36  ;;  %2655 = vst.msk [vmem:[#allocation3 + $0x131] sm:$0x1] %vm744_vm3, %v12144_v36  ;;  %1949 = vmatprep.subr.mxu1 %v12144_v36 }
  0x34   : > { %6836 = vmatmul.mubr.msk.f32.gmra.mxu0 %vm376_vm1, %v350_v21  ;;  %2656 = vst.msk [vmem:[#allocation3 + $0x149] sm:$0x1] %vm744_vm3, %v12144_v36  ;;  %2657 = vst.msk [vmem:[#allocation3 + $0x161] sm:$0x1] %vm744_vm3, %v12144_v36  ;;  %1950 = vmatpush2.msra.mxu1 %v1767_v55  ;;  %v1785_v21 = vld [vmem:[%s12136_s3 + $0x178] sm:$0xff] }
  0x35   : > { %6838 = vmatprep.mubr.msk.f32.mxu0 %vm376_vm1, %v351_v22  ;;  %2658 = vst.msk [vmem:[#allocation3 + $0x179] sm:$0x1] %vm744_vm3, %v12144_v36  ;;  %2659 = vst.msk [vmem:[#allocation3 + $0x191] sm:$0x1] %vm744_vm3, %v12144_v36  ;;  %1951 = vmatprep.subr.mxu1 %v12144_v36 }
  0x36   : > { %738 = vst.msk [vmem:[#allocation2 + $0x10] sm:$0x3] %vm737_vm4, %v12144_v36  ;;  %742 = vst.msk [vmem:[#allocation2 + $0x1a8] sm:$0x3] %vm737_vm4, %v12144_v36  ;;  %1952 = vmatpush2.msra.mxu1 %v1766_v56  ;;  %2139 = vmatpush1.msra.mxu0 %v1785_v21  ;;  %v1779_v56 = vld [vmem:[%s12136_s3 + $0x148] sm:$0xff] }
  0x37   : > { %2622 = vst.msk [vmem:[#allocation3 + $0x10] sm:$0x3] %vm737_vm4, %v12144_v36  ;;  %2626 = vst.msk [vmem:[#allocation3 + $0x1a8] sm:$0x3] %vm737_vm4, %v12144_v36  ;;  %1953 = vmatprep.subr.mxu1 %v12144_v36  ;;  %2140 = vmatprep.subr.mxu0 %v12144_v36 }
  0x38   : > { %6839 = vmatmul.mubr.msk.f32.gmra.mxu0 %vm376_vm1, %v352_v23  ;;  %1954 = vmatpush2.msra.mxu1 %v1765_v57  ;;  %v1784_v23 = vld [vmem:[%s12136_s3 + $0x170] sm:$0xff] }
  0x39   : > { %6841 = vmatprep.mubr.msk.f32.mxu0 %vm376_vm1, %v353_v24  ;;  %1955 = vmatprep.subr.mxu1 %v12144_v36 }
  0x3a   : > { %1956 = vmatpush2.msra.mxu1 %v1764_v58  ;;  %2141 = vmatpush1.msra.mxu0 %v1784_v23 }
  0x3b   : > { %1957 = vmatprep.subr.mxu1 %v12144_v36  ;;  %2142 = vmatprep.subr.mxu0 %v12144_v36 }
  0x3c   : > { %6842 = vmatmul.mubr.msk.f32.gmra.mxu0 %vm376_vm1, %v354_v25  ;;  %1958 = vmatpush2.msra.mxu1 %v1763_v59 }
  0x3d   : > { %6844 = vmatprep.mubr.msk.f32.mxu0 %vm376_vm1, %v355_v26  ;;  %1959 = vmatprep.subr.mxu1 %v12144_v36  ;;  %v842_v39 = vld [vmem:[#allocation2 + $0x9] sm:$0xff] }
  0x3e   : > { %1960 = vmatpush2.msra.mxu1 %v1762_v60 }
  0x3f   : > { %1961 = vmatprep.subr.mxu1 %v12144_v36 }
  0x40   : > { %6845 = vmatmul.mubr.msk.f32.gmra.mxu0 %vm376_vm1, %v356_v27  ;;  %1962 = vmatpush2.msra.mxu1 %v1761_v61  ;;  %v841_v27 = vld [vmem:[#allocation2 + $0x1] sm:$0xff] }
  0x41   : > { %6847 = vmatprep.mubr.msk.f32.mxu0 %vm376_vm1, %v357_v28  ;;  %1963 = vmatprep.subr.mxu1 %v12144_v36  ;;  %v1783_v28 = vld [vmem:[%s12136_s3 + $0x168] sm:$0xff] }
  0x42   : > { %1964 = vmatpush2.msra.mxu1 %v1760_v62  ;;  %2143 = vmatpush1.msra.mxu0 %v1783_v28 }
  0x43   : > { %1965 = vmatprep.subr.mxu1 %v12144_v36  ;;  %2144 = vmatprep.subr.mxu0 %v12144_v36 }
  0x44   : > { %6848 = vmatmul.mubr.msk.f32.gmra.mxu0 %vm376_vm1, %v358_v29  ;;  %1966 = vmatpush2.msra.mxu1 %v1759_v63 }
  0x45   : > { %6850 = vmatprep.mubr.msk.f32.mxu0 %vm376_vm1, %v359_v30  ;;  %1967 = vmatprep.subr.mxu1 %v12144_v36 }
  0x46   : > { %1968 = vmatpush2.msra.mxu1 %v1758_v0  ;;  %2145 = vmatpush1.msra.mxu0 %v1782_v37 }
  0x47   : > { %1969 = vmatprep.subr.mxu1 %v12144_v36  ;;  %2146 = vmatprep.subr.mxu0 %v12144_v36 }
  0x48   : > { %6851 = vmatmul.mubr.msk.f32.gmra.mxu0 %vm376_vm1, %v360_v31  ;;  %1970 = vmatpush2.msra.mxu1 %v1757_v1  ;;  %v1778_v1 = vld [vmem:[%s12136_s3 + $0x140] sm:$0xff] }
  0x49   : > { %6853 = vmatprep.mubr.msk.f32.mxu0 %vm376_vm1, %v361_v32  ;;  %1971 = vmatprep.subr.mxu1 %v12144_v36 }
  0x4a   : > { %1972 = vmatpush2.msra.mxu1 %v1756_v5  ;;  %2147 = vmatpush1.msra.mxu0 %v1781_v41 }
  0x4b   : > { %1973 = vmatprep.subr.mxu1 %v12144_v36  ;;  %2148 = vmatprep.subr.mxu0 %v12144_v36 }
  0x4c   : > { %6854 = vmatmul.mubr.msk.f32.gmra.mxu0 %vm376_vm1, %v362_v33  ;;  %1974 = vmatpush2.msra.mxu1 %v1755_v10 }
  0x4d   : > { %6856 = vmatprep.mubr.msk.f32.mxu0 %vm376_vm1, %v363_v34  ;;  %1975 = vmatprep.subr.mxu1 %v12144_v36 }
  0x4e   : > { %1976 = vmatpush2.msra.mxu1 %v1754_v13  ;;  %2149 = vmatpush1.msra.mxu0 %v1780_v51 }
  0x4f   : > { %6859 = vmatprep.subr.mxu1 %v8689_v14  ;;  %2150 = vmatprep.subr.mxu0 %v12144_v36 }
  0x50   : > { %6857 = vmatmul.mubr.msk.f32.gmra.mxu0 %vm376_vm1, %v364_v35 }
  0x51   : > { %2151 = vmatpush1.msra.mxu0 %v1779_v56 }
  0x52   : > { %2152 = vmatprep.subr.mxu0 %v12144_v36 }
  0x53   : > { %2153 = vmatpush1.msra.mxu0 %v1778_v1 }
  0x54   : > { %2154 = vmatprep.subr.mxu0 %v12144_v36 }
  0xd4   : > { %v6813_v3 = vpop.f32.mrf.mxu0 }
  0xd5   : > { %v549_v4 = vadd.f32 %v6813_v3, %v8668_v2 }
  0xd6   : > { %v543_v6 = vpop.f32.mrf.mxu0 }
  0xd7   : > { %v703_v7 = vmax.f32 %v549_v4, 0.0  ;;  %v544_v8 = vadd.f32 %v8668_v2, %v543_v6 }
  0xd8   : > { %v6816_v9 = vpop.f32.mrf.mxu0 }
  0xd9   : > { %778 = vst.msk [vmem:[#allocation2 + $0x21] sm:$0xff] %vm734_vm2, %v703_v7  ;;  %v702_v11 = vmax.f32 %v544_v8, 0.0  ;;  %v559_v12 = vadd.f32 %v6816_v9, %v8668_v2  ;;  %v1777_v7 = vld [vmem:[%s12136_s3 + $0x138] sm:$0xff] }
  0xda   : > { %v553_v15 = vpop.f32.mrf.mxu0  ;;  %2155 = vmatpush1.msra.mxu0 %v1777_v7 }
  0xdb   : > { %777 = vst.msk [vmem:[#allocation2 + $0x19] sm:$0xff] %vm734_vm2, %v702_v11  ;;  %v705_v16 = vmax.f32 %v559_v12, 0.0  ;;  %v554_v17 = vadd.f32 %v8668_v2, %v553_v15  ;;  %2156 = vmatprep.subr.mxu0 %v12144_v36 }
  0xdc   : > { %v6819_v18 = vpop.f32.mrf.mxu0 }
  0xdd   : > { %780 = vst.msk [vmem:[#allocation2 + $0x39] sm:$0xff] %vm734_vm2, %v705_v16  ;;  %v704_v19 = vmax.f32 %v554_v17, 0.0  ;;  %v569_v20 = vadd.f32 %v6819_v18, %v8668_v2 }
  0xde   : > { %v563_v22 = vpop.f32.mrf.mxu0 }
  0xdf   : > { %779 = vst.msk [vmem:[#allocation2 + $0x31] sm:$0xff] %vm734_vm2, %v704_v19  ;;  %v707_v24 = vmax.f32 %v569_v20, 0.0  ;;  %v564_v25 = vadd.f32 %v8668_v2, %v563_v22  ;;  %v1776_v19 = vld [vmem:[%s12136_s3 + $0x130] sm:$0xff] }
  0xe0   : > { %v6822_v26 = vpop.f32.mrf.mxu0  ;;  %v844_v60 = vld [vmem:[#allocation2 + $0x21] sm:$0xff]  ;;  %2157 = vmatpush1.msra.mxu0 %v1776_v19 }
  0xe1   : > { %782 = vst.msk [vmem:[#allocation2 + $0x51] sm:$0xff] %vm734_vm2, %v707_v24  ;;  %v706_v29 = vmax.f32 %v564_v25, 0.0  ;;  %v579_v30 = vadd.f32 %v6822_v26, %v8668_v2  ;;  %2158 = vmatprep.subr.mxu0 %v12144_v36 }
  0xe2   : > { %v573_v31 = vpop.f32.mrf.mxu0  ;;  %v905_v32 = vld [vmem:[#allocation2 + $0x18] sm:$0xff]  ;;  %v8718_v40 = vld [vmem:[#allocation2 + $0x20] sm:$0xff] }
  0xe3   : > { %781 = vst.msk [vmem:[#allocation2 + $0x49] sm:$0xff] %vm734_vm2, %v706_v29  ;;  %v709_v33 = vmax.f32 %v579_v30, 0.0  ;;  %v574_v34 = vadd.f32 %v8668_v2, %v573_v31  ;;  %v7119_v35 = vpack.i.bf16 %v841_v27, %v905_v32  ;;  %v843_v45 = vld [vmem:[#allocation2 + $0x19] sm:$0xff]  ;;  %v7124_v49 = vpack.i.bf16 %v842_v39, %v8718_v40  ;;  %v1775_v31 = vld [vmem:[%s12136_s3 + $0x128] sm:$0xff] }
  0xe4   : > { %v6825_v38 = vpop.f32.mrf.mxu0  ;;  %v8760_v11 = vld [vmem:[#allocation2 + $0x39] sm:$0xff]  ;;  %2159 = vmatpush1.msra.mxu0 %v1775_v31 }
  0xe5   : > { %784 = vst.msk [vmem:[#allocation2 + $0x69] sm:$0xff] %vm734_vm2, %v709_v33  ;;  %v708_v42 = vmax.f32 %v574_v34, 0.0  ;;  %v589_v43 = vadd.f32 %v6825_v38, %v8668_v2  ;;  %7120 = vrot.lane.b32.xlu0 %v7119_v35, %s8254_s29  ;;  %v1774_v39 = vld [vmem:[%s12136_s3 + $0x120] sm:$0xff]  ;;  %2160 = vmatprep.subr.mxu0 %v12144_v36  ;;  %v1801_v31 = vld [vmem:[%s12136_s3 + $0x1f8] sm:$0xff] }
  0xe6   : > { %v583_v44 = vpop.f32.mrf.mxu0  ;;  %v907_v46 = vld [vmem:[#allocation2 + $0x30] sm:$0xff]  ;;  %v908_v53 = vld [vmem:[#allocation2 + $0x38] sm:$0xff]  ;;  %2161 = vmatpush1.msra.mxu0 %v1774_v39 }
  0xe7   : > { %783 = vst.msk [vmem:[#allocation2 + $0x61] sm:$0xff] %vm734_vm2, %v708_v42  ;;  %v711_v47 = vmax.f32 %v589_v43, 0.0  ;;  %v584_v48 = vadd.f32 %v8668_v2, %v583_v44  ;;  %v7129_v50 = vpack.i.bf16 %v843_v45, %v907_v46  ;;  %v8741_v58 = vld [vmem:[#allocation2 + $0x31] sm:$0xff]  ;;  %v7134_v0 = vpack.i.bf16 %v844_v60, %v908_v53  ;;  %2162 = vmatprep.subr.mxu0 %v12144_v36 }
  0xe8   : > { %v6828_v52 = vpop.f32.mrf.mxu0  ;;  %v8774_v22 = vld [vmem:[#allocation2 + $0x51] sm:$0xff] }
  0xe9   : > { %786 = vst.msk [vmem:[#allocation2 + $0x81] sm:$0xff] %vm734_vm2, %v711_v47  ;;  %v710_v54 = vmax.f32 %v584_v48, 0.0  ;;  %v599_v55 = vadd.f32 %v6828_v52, %v8668_v2  ;;  %7125 = vrot.lane.b32.xlu0 %v7124_v49, %s8254_s29  ;;  %7130 = vrot.lane.b32.xlu1 %v7129_v50, %s8254_s29  ;;  %v1773_v50 = vld [vmem:[%s12136_s3 + $0x118] sm:$0xff] }
  0xea   : > { %v593_v57 = vpop.f32.mrf.mxu0  ;;  %v909_v59 = vld [vmem:[#allocation2 + $0x48] sm:$0xff]  ;;  %v910_v4 = vld [vmem:[#allocation2 + $0x50] sm:$0xff]  ;;  %2163 = vmatpush1.msra.mxu0 %v1773_v50 }
  0xeb   : > { %785 = vst.msk [vmem:[#allocation2 + $0x79] sm:$0xff] %vm734_vm2, %v710_v54  ;;  %v713_v61 = vmax.f32 %v599_v55, 0.0  ;;  %v594_v62 = vadd.f32 %v8668_v2, %v593_v57  ;;  %v7139_v63 = vpack.i.bf16 %v8741_v58, %v909_v59  ;;  %v8758_v9 = vld [vmem:[#allocation2 + $0x49] sm:$0xff]  ;;  %v7144_v16 = vpack.i.bf16 %v8760_v11, %v910_v4  ;;  %2164 = vmatprep.subr.mxu0 %v12144_v36 }
  0xec   : > { %v6831_v3 = vpop.f32.mrf.mxu0  ;;  %v8788_v34 = vld [vmem:[#allocation2 + $0x69] sm:$0xff] }
  0xed   : > { %788 = vst.msk [vmem:[#allocation2 + $0x99] sm:$0xff] %vm734_vm2, %v713_v61  ;;  %v712_v5 = vmax.f32 %v594_v62, 0.0  ;;  %v609_v6 = vadd.f32 %v6831_v3, %v8668_v2  ;;  %7140 = vrot.lane.b32.xlu0 %v7139_v63, %s8254_s29  ;;  %7135 = vrot.lane.b32.xlu1 %v7134_v0, %s8254_s29  ;;  %v1772_v62 = vld [vmem:[%s12136_s3 + $0x110] sm:$0xff] }
  0xee   : > { %v603_v8 = vpop.f32.mrf.mxu0  ;;  %v911_v10 = vld [vmem:[#allocation2 + $0x60] sm:$0xff]  ;;  %v912_v18 = vld [vmem:[#allocation2 + $0x68] sm:$0xff]  ;;  %2165 = vmatpush1.msra.mxu0 %v1772_v62 }
  0xef   : > { %787 = vst.msk [vmem:[#allocation2 + $0x91] sm:$0xff] %vm734_vm2, %v712_v5  ;;  %v715_v12 = vmax.f32 %v609_v6, 0.0  ;;  %v604_v13 = vadd.f32 %v8668_v2, %v603_v8  ;;  %v7149_v15 = vpack.i.bf16 %v8758_v9, %v911_v10  ;;  %v8776_v24 = vld [vmem:[#allocation2 + $0x61] sm:$0xff]  ;;  %v7154_v30 = vpack.i.bf16 %v8774_v22, %v912_v18  ;;  %2166 = vmatprep.subr.mxu0 %v12144_v36 }
  0xf0   : > { %v6834_v17 = vpop.f32.mrf.mxu0  ;;  %v8805_v49 = vld [vmem:[#allocation2 + $0x81] sm:$0xff] }
  0xf1   : > { %790 = vst.msk [vmem:[#allocation2 + $0xb1] sm:$0xff] %vm734_vm2, %v715_v12  ;;  %v714_v20 = vmax.f32 %v604_v13, 0.0  ;;  %v619_v21 = vadd.f32 %v6834_v17, %v8668_v2  ;;  %7150 = vrot.lane.b32.xlu0 %v7149_v15, %s8254_s29  ;;  %7145 = vrot.lane.b32.xlu1 %v7144_v16, %s8254_s29  ;;  %v1771_v5 = vld [vmem:[%s12136_s3 + $0x108] sm:$0xff]  ;;  %v1770_v18 = vld [vmem:[%s12136_s3 + $0x100] sm:$0xff] }
  0xf2   : > { %v613_v23 = vpop.f32.mrf.mxu0  ;;  %v913_v25 = vld [vmem:[#allocation2 + $0x78] sm:$0xff]  ;;  %v914_v26 = vld [vmem:[#allocation2 + $0x80] sm:$0xff]  ;;  %2167 = vmatpush1.msra.mxu0 %v1771_v5 }
  0xf3   : > { %789 = vst.msk [vmem:[#allocation2 + $0xa9] sm:$0xff] %vm734_vm2, %v714_v20  ;;  %v717_v27 = vmax.f32 %v619_v21, 0.0  ;;  %v614_v28 = vadd.f32 %v8668_v2, %v613_v23  ;;  %v7159_v29 = vpack.i.bf16 %v8776_v24, %v913_v25  ;;  %v8786_v33 = vld [vmem:[#allocation2 + $0x79] sm:$0xff]  ;;  %v7164_v38 = vpack.i.bf16 %v8788_v34, %v914_v26  ;;  %2168 = vmatprep.subr.mxu0 %v12144_v36 }
  0xf4   : > { %v6837_v32 = vpop.f32.mrf.mxu0  ;;  %v8815_v56 = vld [vmem:[#allocation2 + $0x99] sm:$0xff]  ;;  %2169 = vmatpush1.msra.mxu0 %v1770_v18 }
  0xf5   : > { %792 = vst.msk [vmem:[#allocation2 + $0xc9] sm:$0xff] %vm734_vm2, %v717_v27  ;;  %v716_v35 = vmax.f32 %v614_v28, 0.0  ;;  %v629_v37 = vadd.f32 %v6837_v32, %v8668_v2  ;;  %7160 = vrot.lane.b32.xlu0 %v7159_v29, %s8254_s29  ;;  %7155 = vrot.lane.b32.xlu1 %v7154_v30, %s8254_s29 }
  0xf6   : > { %v623_v41 = vpop.f32.mrf.mxu0  ;;  %v915_v42 = vld [vmem:[#allocation2 + $0x90] sm:$0xff]  ;;  %v916_v43 = vld [vmem:[#allocation2 + $0x98] sm:$0xff]  ;;  %2170 = vmatprep.subr.mxu0 %v12144_v36 }
  0xf7   : > { %791 = vst.msk [vmem:[#allocation2 + $0xc1] sm:$0xff] %vm734_vm2, %v716_v35  ;;  %v719_v44 = vmax.f32 %v629_v37, 0.0  ;;  %v624_v45 = vadd.f32 %v8668_v2, %v623_v41  ;;  %v7169_v46 = vpack.i.bf16 %v8786_v33, %v915_v42  ;;  %v8803_v48 = vld [vmem:[#allocation2 + $0x91] sm:$0xff]  ;;  %v7174_v53 = vpack.i.bf16 %v8805_v49, %v916_v43  ;;  %2171 = vmatpush2.msra.mxu0 %v1801_v31 }
  0xf8   : > { %v6840_v47 = vpop.f32.mrf.mxu0  ;;  %v8835_v8 = vld [vmem:[#allocation2 + $0xb1] sm:$0xff]  ;;  %2172 = vmatprep.subr.mxu0 %v12144_v36 }
  0xf9   : > { %794 = vst.msk [vmem:[#allocation2 + $0xe1] sm:$0xff] %vm734_vm2, %v719_v44  ;;  %v718_v51 = vmax.f32 %v624_v45, 0.0  ;;  %v639_v52 = vadd.f32 %v6840_v47, %v8668_v2  ;;  %7170 = vrot.lane.b32.xlu0 %v7169_v46, %s8254_s29  ;;  %7165 = vrot.lane.b32.xlu1 %v7164_v38, %s8254_s29  ;;  %v1800_v41 = vld [vmem:[%s12136_s3 + $0x1f0] sm:$0xff] }
  0xfa   : > { %v633_v54 = vpop.f32.mrf.mxu0  ;;  %v917_v55 = vld [vmem:[#allocation2 + $0xa8] sm:$0xff]  ;;  %v918_v57 = vld [vmem:[#allocation2 + $0xb0] sm:$0xff]  ;;  %2173 = vmatpush2.msra.mxu0 %v1800_v41 }
  0xfb   : > { %793 = vst.msk [vmem:[#allocation2 + $0xd9] sm:$0xff] %vm734_vm2, %v718_v51  ;;  %v721_v59 = vmax.f32 %v639_v52, 0.0  ;;  %v634_v60 = vadd.f32 %v8668_v2, %v633_v54  ;;  %v7179_v61 = vpack.i.bf16 %v8803_v48, %v917_v55  ;;  %v8824_v0 = vld [vmem:[#allocation2 + $0xa9] sm:$0xff]  ;;  %v7184_v4 = vpack.i.bf16 %v8815_v56, %v918_v57  ;;  %2174 = vmatprep.subr.mxu0 %v12144_v36 }
  0xfc   : > { %v6843_v63 = vpop.f32.mrf.mxu0  ;;  %v8851_v26 = vld [vmem:[#allocation2 + $0xc9] sm:$0xff] }
  0xfd   : > { %796 = vst.msk [vmem:[#allocation2 + $0xf9] sm:$0xff] %vm734_vm2, %v721_v59  ;;  %v720_v1 = vmax.f32 %v634_v60, 0.0  ;;  %v649_v3 = vadd.f32 %v6843_v63, %v8668_v2  ;;  %7180 = vrot.lane.b32.xlu0 %v7179_v61, %s8254_s29  ;;  %7175 = vrot.lane.b32.xlu1 %v7174_v53, %s8254_s29  ;;  %v1799_v53 = vld [vmem:[%s12136_s3 + $0x1e8] sm:$0xff] }
  0xfe   : > { %v643_v6 = vpop.f32.mrf.mxu0  ;;  %v919_v7 = vld [vmem:[#allocation2 + $0xc0] sm:$0xff]  ;;  %v920_v10 = vld [vmem:[#allocation2 + $0xc8] sm:$0xff]  ;;  %2175 = vmatpush2.msra.mxu0 %v1799_v53 }
  0xff   : > { %795 = vst.msk [vmem:[#allocation2 + $0xf1] sm:$0xff] %vm734_vm2, %v720_v1  ;;  %v723_v12 = vmax.f32 %v649_v3, 0.0  ;;  %v644_v13 = vadd.f32 %v8668_v2, %v643_v6  ;;  %v7189_v15 = vpack.i.bf16 %v8824_v0, %v919_v7  ;;  %v8841_v17 = vld [vmem:[#allocation2 + $0xc1] sm:$0xff]  ;;  %v7194_v21 = vpack.i.bf16 %v8835_v8, %v920_v10  ;;  %2176 = vmatprep.subr.mxu0 %v12144_v36 }
 0x100   : > { %v6846_v16 = vpop.f32.mrf.mxu0  ;;  %v8871_v44 = vld [vmem:[#allocation2 + $0xe1] sm:$0xff] }
 0x101   : > { %798 = vst.msk [vmem:[#allocation2 + $0x111] sm:$0xff] %vm734_vm2, %v723_v12  ;;  %v722_v19 = vmax.f32 %v644_v13, 0.0  ;;  %v659_v20 = vadd.f32 %v6846_v16, %v8668_v2  ;;  %7190 = vrot.lane.b32.xlu0 %v7189_v15, %s8254_s29  ;;  %7185 = vrot.lane.b32.xlu1 %v7184_v4, %s8254_s29  ;;  %v1798_v4 = vld [vmem:[%s12136_s3 + $0x1e0] sm:$0xff]  ;;  %v1797_v13 = vld [vmem:[%s12136_s3 + $0x1d8] sm:$0xff] }
 0x102   : > { %v653_v23 = vpop.f32.mrf.mxu0  ;;  %v921_v25 = vld [vmem:[#allocation2 + $0xd8] sm:$0xff]  ;;  %v922_v27 = vld [vmem:[#allocation2 + $0xe0] sm:$0xff]  ;;  %2177 = vmatpush2.msra.mxu0 %v1798_v4  ;;  %v1792_v4 = vld [vmem:[%s12136_s3 + $0x1b0] sm:$0xff] }
 0x103   : > { %797 = vst.msk [vmem:[#allocation2 + $0x109] sm:$0xff] %vm734_vm2, %v722_v19  ;;  %v725_v28 = vmax.f32 %v659_v20, 0.0  ;;  %v654_v29 = vadd.f32 %v8668_v2, %v653_v23  ;;  %v7199_v30 = vpack.i.bf16 %v8841_v17, %v921_v25  ;;  %v8860_v35 = vld [vmem:[#allocation2 + $0xd9] sm:$0xff]  ;;  %v7204_v39 = vpack.i.bf16 %v8851_v26, %v922_v27  ;;  %2178 = vmatprep.subr.mxu0 %v12144_v36 }
 0x104   : > { %v6849_v32 = vpop.f32.mrf.mxu0  ;;  %v8887_v61 = vld [vmem:[#allocation2 + $0xf9] sm:$0xff]  ;;  %2179 = vmatpush2.msra.mxu0 %v1797_v13 }
 0x105   : > { %800 = vst.msk [vmem:[#allocation2 + $0x129] sm:$0xff] %vm734_vm2, %v725_v28  ;;  %v724_v37 = vmax.f32 %v654_v29, 0.0  ;;  %v669_v38 = vadd.f32 %v6849_v32, %v8668_v2  ;;  %7200 = vrot.lane.b32.xlu0 %v7199_v30, %s8254_s29  ;;  %7195 = vrot.lane.b32.xlu1 %v7194_v21, %s8254_s29  ;;  %v1796_v28 = vld [vmem:[%s12136_s3 + $0x1d0] sm:$0xff] }
 0x106   : > { %v663_v42 = vpop.f32.mrf.mxu0  ;;  %v923_v43 = vld [vmem:[#allocation2 + $0xf0] sm:$0xff]  ;;  %v924_v45 = vld [vmem:[#allocation2 + $0xf8] sm:$0xff]  ;;  %2180 = vmatprep.subr.mxu0 %v12144_v36 }
 0x107   : > { %799 = vst.msk [vmem:[#allocation2 + $0x121] sm:$0xff] %vm734_vm2, %v724_v37  ;;  %v727_v46 = vmax.f32 %v669_v38, 0.0  ;;  %v664_v47 = vadd.f32 %v8668_v2, %v663_v42  ;;  %v7209_v50 = vpack.i.bf16 %v8860_v35, %v923_v43  ;;  %v8877_v52 = vld [vmem:[#allocation2 + $0xf1] sm:$0xff]  ;;  %v7214_v57 = vpack.i.bf16 %v8871_v44, %v924_v45  ;;  %2181 = vmatpush2.msra.mxu0 %v1796_v28  ;;  %v1795_v45 = vld [vmem:[%s12136_s3 + $0x1c8] sm:$0xff] }
 0x108   : > { %v6852_v51 = vpop.f32.mrf.mxu0  ;;  %v8907_v18 = vld [vmem:[#allocation2 + $0x111] sm:$0xff]  ;;  %2182 = vmatprep.subr.mxu0 %v12144_v36 }
 0x109   : > { %802 = vst.msk [vmem:[#allocation2 + $0x141] sm:$0xff] %vm734_vm2, %v727_v46  ;;  %v726_v54 = vmax.f32 %v664_v47, 0.0  ;;  %v679_v55 = vadd.f32 %v6852_v51, %v8668_v2  ;;  %7210 = vrot.lane.b32.xlu0 %v7209_v50, %s8254_s29  ;;  %7205 = vrot.lane.b32.xlu1 %v7204_v39, %s8254_s29  ;;  %v1794_v50 = vld [vmem:[%s12136_s3 + $0x1c0] sm:$0xff]  ;;  %v1788_v28 = vld [vmem:[%s12136_s3 + $0x190] sm:$0xff] }
 0x10a   : > { %v673_v59 = vpop.f32.mrf.mxu0  ;;  %v925_v60 = vld [vmem:[#allocation2 + $0x108] sm:$0xff]  ;;  %v926_v62 = vld [vmem:[#allocation2 + $0x110] sm:$0xff]  ;;  %2183 = vmatpush2.msra.mxu0 %v1795_v45  ;;  %v9033_v45 = vld [vmem:[#allocation2 + $0x7a] sm:$0xff] }
 0x10b   : > { %801 = vst.msk [vmem:[#allocation2 + $0x139] sm:$0xff] %vm734_vm2, %v726_v54  ;;  %v729_v63 = vmax.f32 %v679_v55, 0.0  ;;  %v674_v1 = vadd.f32 %v8668_v2, %v673_v59  ;;  %v7219_v3 = vpack.i.bf16 %v8877_v52, %v925_v60  ;;  %v8896_v6 = vld [vmem:[#allocation2 + $0x109] sm:$0xff]  ;;  %v7224_v12 = vpack.i.bf16 %v8887_v61, %v926_v62  ;;  %2184 = vmatprep.subr.mxu0 %v12144_v36  ;;  %v1793_v59 = vld [vmem:[%s12136_s3 + $0x1b8] sm:$0xff] }
 0x10c   : > { %v6855_v5 = vpop.f32.mrf.mxu0  ;;  %v8923_v38 = vld [vmem:[#allocation2 + $0x129] sm:$0xff]  ;;  %2185 = vmatpush2.msra.mxu0 %v1794_v50 }
 0x10d   : > { %804 = vst.msk [vmem:[#allocation2 + $0x159] sm:$0xff] %vm734_vm2, %v729_v63  ;;  %v728_v7 = vmax.f32 %v674_v1, 0.0  ;;  %v689_v10 = vadd.f32 %v6855_v5, %v8668_v2  ;;  %7220 = vrot.lane.b32.xlu0 %v7219_v3, %s8254_s29  ;;  %7215 = vrot.lane.b32.xlu1 %v7214_v57, %s8254_s29 }
 0x10e   : > { %v683_v15 = vpop.f32.mrf.mxu0  ;;  %v927_v16 = vld [vmem:[#allocation2 + $0x120] sm:$0xff]  ;;  %v928_v19 = vld [vmem:[#allocation2 + $0x128] sm:$0xff]  ;;  %2186 = vmatprep.subr.mxu0 %v12144_v36 }
 0x10f   : > { %803 = vst.msk [vmem:[#allocation2 + $0x151] sm:$0xff] %vm734_vm2, %v728_v7  ;;  %v731_v20 = vmax.f32 %v689_v10, 0.0  ;;  %v684_v21 = vadd.f32 %v8668_v2, %v683_v15  ;;  %v7229_v23 = vpack.i.bf16 %v8896_v6, %v927_v16  ;;  %v8913_v27 = vld [vmem:[#allocation2 + $0x121] sm:$0xff]  ;;  %v7234_v31 = vpack.i.bf16 %v8907_v18, %v928_v19  ;;  %2187 = vmatpush2.msra.mxu0 %v1793_v59 }
 0x110   : > { %v6858_v25 = vpop.f32.mrf.mxu0  ;;  %v8942_v53 = vld [vmem:[#allocation2 + $0x141] sm:$0xff]  ;;  %2188 = vmatprep.subr.mxu0 %v12144_v36 }
 0x111   : > { %806 = vst.msk [vmem:[#allocation2 + $0x171] sm:$0xff] %vm734_vm2, %v731_v20  ;;  %v730_v29 = vmax.f32 %v684_v21, 0.0  ;;  %v699_v30 = vadd.f32 %v6858_v25, %v8668_v2  ;;  %7230 = vrot.lane.b32.xlu0 %v7229_v23, %s8254_s29  ;;  %7225 = vrot.lane.b32.xlu1 %v7224_v12, %s8254_s29  ;;  %v1791_v10 = vld [vmem:[%s12136_s3 + $0x1a8] sm:$0xff]  ;;  %v1790_v19 = vld [vmem:[%s12136_s3 + $0x1a0] sm:$0xff] }
 0x112   : > { %v693_v32 = vpop.f32.mrf.mxu0  ;;  %v929_v37 = vld [vmem:[#allocation2 + $0x138] sm:$0xff]  ;;  %v930_v39 = vld [vmem:[#allocation2 + $0x140] sm:$0xff]  ;;  %2189 = vmatpush2.msra.mxu0 %v1792_v4 }
 0x113   : > { %805 = vst.msk [vmem:[#allocation2 + $0x169] sm:$0xff] %vm734_vm2, %v730_v29  ;;  %v733_v41 = vmax.f32 %v699_v30, 0.0  ;;  %v694_v42 = vadd.f32 %v8668_v2, %v693_v32  ;;  %v7239_v43 = vpack.i.bf16 %v8913_v27, %v929_v37  ;;  %v8932_v46 = vld [vmem:[#allocation2 + $0x139] sm:$0xff]  ;;  %v7244_v2 = vpack.i.bf16 %v8923_v38, %v930_v39  ;;  %2190 = vmatprep.subr.mxu0 %v12144_v36  ;;  %v8997_v30 = vld [vmem:[#allocation2 + $0x22] sm:$0xff]  ;;  %v9004_v32 = vld [vmem:[#allocation2 + $0x4a] sm:$0xff] }
 0x114   : > { %v8955_v63 = vld [vmem:[#allocation2 + $0x159] sm:$0xff]  ;;  %2191 = vmatpush2.msra.mxu0 %v1791_v10  ;;  %v1787_v39 = vld [vmem:[%s12136_s3 + $0x188] sm:$0xff] }
 0x115   : > { %808 = vst.msk [vmem:[#allocation2 + $0x189] sm:$0xff] %vm734_vm2, %v733_v41  ;;  %v732_v47 = vmax.f32 %v694_v42, 0.0  ;;  %7240 = vrot.lane.b32.xlu0 %v7239_v43, %s8254_s29  ;;  %7235 = vrot.lane.b32.xlu1 %v7234_v31, %s8254_s29  ;;  %v8981_v21 = vld [vmem:[#allocation2 + $0x1a] sm:$0xff]  ;;  %v8995_v29 = vld [vmem:[#allocation2 + $0x32] sm:$0xff]  ;;  %v7284_v31 = vpack.i.bf16 %v8997_v30, %v8760_v11  ;;  %v9021_v42 = vld [vmem:[#allocation2 + $0x62] sm:$0xff] }
 0x116   : > { %v931_v51 = vld [vmem:[#allocation2 + $0x150] sm:$0xff]  ;;  %v932_v54 = vld [vmem:[#allocation2 + $0x158] sm:$0xff]  ;;  %2192 = vmatprep.subr.mxu0 %v12144_v36  ;;  %v7279_v23 = vpack.i.bf16 %v8981_v21, %v8741_v58  ;;  %v7289_v58 = vpack.i.bf16 %v8995_v29, %v8758_v9  ;;  %v7299_v9 = vpack.i.bf16 %v9004_v32, %v8776_v24  ;;  %v1786_v41 = vld [vmem:[%s12136_s3 + $0x180] sm:$0xff]  ;;  %v7309_v24 = vpack.i.bf16 %v9021_v42, %v8786_v33 }
 0x117   : > { %807 = vst.msk [vmem:[#allocation2 + $0x181] sm:$0xff] %vm734_vm2, %v732_v47  ;;  %v7249_v55 = vpack.i.bf16 %v8932_v46, %v931_v51  ;;  %v8947_v57 = vld [vmem:[#allocation2 + $0x151] sm:$0xff]  ;;  %v7254_v60 = vpack.i.bf16 %v8942_v53, %v932_v54  ;;  %2193 = vmatpush2.msra.mxu0 %v1790_v19  ;;  %v9006_v37 = vld [vmem:[#allocation2 + $0x3a] sm:$0xff]  ;;  %v9045_v51 = vld [vmem:[#allocation2 + $0x82] sm:$0xff] }
 0x118   : > { %v8971_v13 = vld [vmem:[#allocation2 + $0x171] sm:$0xff]  ;;  %2194 = vmatprep.subr.mxu0 %v12144_v36  ;;  %v7294_v11 = vpack.i.bf16 %v9006_v37, %v8774_v22  ;;  %v7324_v54 = vpack.i.bf16 %v9045_v51, %v8815_v56  ;;  %v993_v19 = vld [vmem:[#allocation2 + $0x13a] sm:$0xff] }
 0x119   : > { %7250 = vrot.lane.b32.xlu0 %v7249_v55, %s8254_s29  ;;  %7245 = vrot.lane.b32.xlu1 %v7244_v2, %s8254_s29  ;;  %v1789_v25 = vld [vmem:[%s12136_s3 + $0x198] sm:$0xff]  ;;  %v9035_v47 = vld [vmem:[#allocation2 + $0x6a] sm:$0xff]  ;;  %v7319_v2 = vpack.i.bf16 %v9033_v45, %v8803_v48 }
 0x11a   : > { %v933_v62 = vld [vmem:[#allocation2 + $0x168] sm:$0xff]  ;;  %v934_v1 = vld [vmem:[#allocation2 + $0x170] sm:$0xff]  ;;  %2195 = vmatpush2.msra.mxu0 %v1789_v25  ;;  %v7314_v50 = vpack.i.bf16 %v9035_v47, %v8805_v49  ;;  %v9055_v48 = vld [vmem:[#allocation2 + $0x9a] sm:$0xff] }
 0x11b   : > { %v7259_v3 = vpack.i.bf16 %v8947_v57, %v933_v62  ;;  %v8962_v5 = vld [vmem:[#allocation2 + $0x169] sm:$0xff]  ;;  %v7264_v7 = vpack.i.bf16 %v8955_v63, %v934_v1  ;;  %2196 = vmatprep.subr.mxu0 %v12144_v36  ;;  %v9023_v43 = vld [vmem:[#allocation2 + $0x52] sm:$0xff]  ;;  %v7334_v59 = vpack.i.bf16 %v9055_v48, %v8835_v8  ;;  %v9073_v1 = vld [vmem:[#allocation2 + $0xda] sm:$0xff] }
 0x11c   : > { %2197 = vmatpush2.msra.mxu0 %v1788_v28  ;;  %v7304_v22 = vpack.i.bf16 %v9023_v43, %v8788_v34  ;;  %v9043_v33 = vld [vmem:[#allocation2 + $0x92] sm:$0xff]  ;;  %v9053_v55 = vld [vmem:[#allocation2 + $0xaa] sm:$0xff]  ;;  %v7359_v8 = vpack.i.bf16 %v9073_v1, %v8877_v52  ;;  %v9095_v52 = vld [vmem:[#allocation2 + $0xfa] sm:$0xff] }
 0x11d   : > { %7260 = vrot.lane.b32.xlu0 %v7259_v3, %s8254_s29  ;;  %7255 = vrot.lane.b32.xlu1 %v7254_v60, %s8254_s29  ;;  %v7329_v34 = vpack.i.bf16 %v9043_v33, %v8824_v0  ;;  %v7339_v49 = vpack.i.bf16 %v9053_v55, %v8841_v17  ;;  %v9063_v60 = vld [vmem:[#allocation2 + $0xc2] sm:$0xff]  ;;  %v9065_v0 = vld [vmem:[#allocation2 + $0xb2] sm:$0xff]  ;;  %v9075_v17 = vld [vmem:[#allocation2 + $0xca] sm:$0xff] }
 0x11e   : > { %v935_v12 = vld [vmem:[#allocation2 + $0x180] sm:$0xff]  ;;  %v936_v15 = vld [vmem:[#allocation2 + $0x188] sm:$0xff]  ;;  %2198 = vmatprep.subr.mxu0 %v12144_v36  ;;  %v7349_v56 = vpack.i.bf16 %v9063_v60, %v8860_v35  ;;  %v7344_v62 = vpack.i.bf16 %v9065_v0, %v8851_v26  ;;  %v7354_v3 = vpack.i.bf16 %v9075_v17, %v8871_v44  ;;  %v9083_v4 = vld [vmem:[#allocation2 + $0xf2] sm:$0xff] }
 0x11f   : > { %v7269_v16 = vpack.i.bf16 %v8962_v5, %v935_v12  ;;  %v7274_v20 = vpack.i.bf16 %v8971_v13, %v936_v15  ;;  %2199 = vmatpush2.msra.mxu0 %v1787_v39  ;;  %v9085_v35 = vld [vmem:[#allocation2 + $0xe2] sm:$0xff]  ;;  %v7369_v26 = vpack.i.bf16 %v9083_v4, %v8896_v6  ;;  %v9093_v10 = vld [vmem:[#allocation2 + $0x10a] sm:$0xff]  ;;  %v7374_v12 = vpack.i.bf16 %v9095_v52, %v8907_v18  ;;  %v9105_v6 = vld [vmem:[#allocation2 + $0x112] sm:$0xff] }
 0x120   : > { %2200 = vmatprep.subr.mxu0 %v12144_v36  ;;  %v7379_v44 = vpack.i.bf16 %v9093_v10, %v8913_v27  ;;  %v9103_v15 = vld [vmem:[#allocation2 + $0x122] sm:$0xff]  ;;  %v7399_v18 = vpack.i.bf16 %v993_v19, %v8947_v57 }
 0x121   : > { %7270 = vrot.lane.b32.xlu0 %v7269_v16, %s8254_s29  ;;  %7265 = vrot.lane.b32.xlu1 %v7264_v7, %s8254_s29  ;;  %v7364_v7 = vpack.i.bf16 %v9085_v35, %v8887_v61  ;;  %v7389_v61 = vpack.i.bf16 %v9103_v15, %v8932_v46  ;;  %v7384_v16 = vpack.i.bf16 %v9105_v6, %v8923_v38  ;;  %v994_v25 = vld [vmem:[#allocation2 + $0x142] sm:$0xff] }
 0x122   : > { %2201 = vmatpush2.msra.mxu0 %v1786_v41  ;;  %v7404_v38 = vpack.i.bf16 %v994_v25, %v8955_v63  ;;  %v1062_v41 = vld [vmem:[#allocation2 + $0x181] sm:$0xff]  ;;  %v874_v63 = vld [vmem:[#allocation2 + $0xa] sm:$0xff]  ;;  %v811_v25 = vld [vmem:[#allocation2 + $0x18] sm:$0xff] }
 0x123   : > { %3796 = vmatprep.subr.mxu0 %v12144_v36 }
 0x125   : > { %7280 = vrot.lane.b32.xlu0 %v7279_v23, %s8254_s29  ;;  %7275 = vrot.lane.b32.xlu1 %v7274_v20, %s8254_s29  ;;  %v992_v20 = vld [vmem:[#allocation2 + $0x12a] sm:$0xff]  ;;  %v995_v23 = vld [vmem:[#allocation2 + $0x152] sm:$0xff] }
 0x126   : > { %v7394_v27 = vpack.i.bf16 %v992_v20, %v8942_v53  ;;  %v7409_v28 = vpack.i.bf16 %v995_v23, %v8962_v5  ;;  %v996_v53 = vld [vmem:[#allocation2 + $0x15a] sm:$0xff]  ;;  %v1807_v23 = vld [vmem:[%s12136_s3 + $0x228] sm:$0xff] }
 0x129   : > { %7290 = vrot.lane.b32.xlu0 %v7289_v58, %s8254_s29  ;;  %7285 = vrot.lane.b32.xlu1 %v7284_v31, %s8254_s29  ;;  %v873_v58 = vld [vmem:[#allocation2 + $0x2] sm:$0xff] }
 0x12a   : > { %v809_v31 = vld [vmem:[#allocation2] sm:$0xff] }
 0x12d   : > { %7300 = vrot.lane.b32.xlu0 %v7299_v9, %s8254_s29  ;;  %7295 = vrot.lane.b32.xlu1 %v7294_v11, %s8254_s29  ;;  %v997_v11 = vld [vmem:[#allocation2 + $0x16a] sm:$0xff] }
 0x131   : > { %7310 = vrot.lane.b32.xlu0 %v7309_v24, %s8254_s29  ;;  %7305 = vrot.lane.b32.xlu1 %v7304_v22, %s8254_s29 }
 0x135   : > { %7320 = vrot.lane.b32.xlu0 %v7319_v2, %s8254_s29  ;;  %7315 = vrot.lane.b32.xlu1 %v7314_v50, %s8254_s29  ;;  %v7419_v2 = vpack.i.bf16 %v997_v11, %v1062_v41  ;;  %v810_v50 = vld [vmem:[#allocation2 + $0x8] sm:$0xff] }
 0x139   : > { %7330 = vrot.lane.b32.xlu0 %v7329_v34, %s8254_s29  ;;  %7325 = vrot.lane.b32.xlu1 %v7324_v54, %s8254_s29 }
 0x13d   : > { %7340 = vrot.lane.b32.xlu0 %v7339_v49, %s8254_s29  ;;  %7335 = vrot.lane.b32.xlu1 %v7334_v59, %s8254_s29  ;;  %v7414_v59 = vpack.i.bf16 %v996_v53, %v8971_v13 }
 0x141   : > { %7350 = vrot.lane.b32.xlu0 %v7349_v56, %s8254_s29  ;;  %7345 = vrot.lane.b32.xlu1 %v7344_v62, %s8254_s29  ;;  %v999_v56 = vld [vmem:[#allocation2 + $0x182] sm:$0xff]  ;;  %v1064_v62 = vld [vmem:[#allocation2 + $0x199] sm:$0xff] }
 0x145   : > { %7360 = vrot.lane.b32.xlu0 %v7359_v8, %s8254_s29  ;;  %7355 = vrot.lane.b32.xlu1 %v7354_v3, %s8254_s29  ;;  %v1808_v8 = vld [vmem:[%s12136_s3 + $0x230] sm:$0xff] }
 0x146   : > { %v998_v3 = vld [vmem:[#allocation2 + $0x172] sm:$0xff] }
 0x149   : > { %7370 = vrot.lane.b32.xlu0 %v7369_v26, %s8254_s29  ;;  %7365 = vrot.lane.b32.xlu1 %v7364_v7, %s8254_s29  ;;  %v1063_v26 = vld [vmem:[#allocation2 + $0x189] sm:$0xff] }
 0x14a   : > { %v7424_v20 = vpack.i.bf16 %v998_v3, %v1063_v26 }
 0x14d   : > { %7380 = vrot.lane.b32.xlu0 %v7379_v44, %s8254_s29  ;;  %7375 = vrot.lane.b32.xlu1 %v7374_v12, %s8254_s29 }
 0x151   : > { %7390 = vrot.lane.b32.xlu0 %v7389_v61, %s8254_s29  ;;  %7385 = vrot.lane.b32.xlu1 %v7384_v16, %s8254_s29  ;;  %v7429_v16 = vpack.i.bf16 %v999_v56, %v1064_v62  ;;  %v9174_v56 = vld [vmem:[#allocation2 + $0x38] sm:$0xff] }
 0x155   : > { %7400 = vrot.lane.b32.xlu0 %v7399_v18, %s8254_s29  ;;  %7395 = vrot.lane.b32.xlu1 %v7394_v27, %s8254_s29  ;;  %v1000_v18 = vld [vmem:[#allocation2 + $0x18a] sm:$0xff]  ;;  %v1065_v27 = vld [vmem:[#allocation2 + $0x1a1] sm:$0xff] }
 0x157   : > { %v7121_v46 = vpop.permute.xlu0 %7120 }
 0x158   : > { %v7123_v39 = vunpack.i.h.bf16 %v7121_v46  ;;  %v7122_v9 = vunpack.i.l.bf16 %v7121_v46 }
 0x159   : > { %7410 = vrot.lane.b32.xlu0 %v7409_v28, %s8254_s29  ;;  %7405 = vrot.lane.b32.xlu1 %v7404_v38, %s8254_s29 }
 0x15a   : > { %v1642_v57 = vsel %vm734_vm2, %v873_v58, %v7122_v9  ;;  %v1610_v24 = vsel %vm734_vm2, %v809_v31, %v7123_v39  ;;  %v1806_v9 = vld [vmem:[%s12136_s3 + $0x220] sm:$0xff] }
 0x15b   : > { %v7126_v22 = vpop.permute.xlu0 %7125  ;;  %1977 = vmatprep.mubr.f32.mxu1 %v1642_v57  ;;  %v7131_v5 = vpop.permute.xlu1 %7130 }
 0x15c   : > { %v7128_v34 = vunpack.i.h.bf16 %v7126_v22  ;;  %v7127_v54 = vunpack.i.l.bf16 %v7126_v22  ;;  %v7132_v49 = vunpack.i.l.bf16 %v7131_v5  ;;  %1978 = vmatmul.mubr.f32.vlgmr.msra.gmra.mxu1 %v1610_v24  ;;  %v7133_v12 = vunpack.i.h.bf16 %v7131_v5  ;;  %v1804_v5 = vld [vmem:[%s12136_s3 + $0x210] sm:$0xff] }
 0x15d   : > { %6860 = vmatpush3.msra.mxu1 %v8689_v14  ;;  %7420 = vrot.lane.b32.xlu0 %v7419_v2, %s8254_s29  ;;  %v9160_v2 = vld [vmem:[#allocation2 + $0x30] sm:$0xff] }
 0x15e   : > { %7415 = vrot.lane.b32.xlu1 %v7414_v59, %s8254_s29  ;;  %v1643_v7 = vsel %vm734_vm2, %v874_v63, %v7127_v54  ;;  %v1611_v44 = vsel %vm734_vm2, %v810_v50, %v7128_v34  ;;  %6861 = vmatprep.subr.mxu1 %v1808_v8  ;;  %v1644_v14 = vsel %vm734_vm2, %v8981_v21, %v7132_v49  ;;  %v1802_v59 = vld [vmem:[%s12136_s3 + $0x200] sm:$0xff] }
 0x15f   : > { %v7141_v13 = vpop.permute.xlu0 %7140  ;;  %1982 = vmatprep.mubr.f32.mxu1 %v1643_v7  ;;  %v7136_v61 = vpop.permute.xlu1 %7135  ;;  %v1612_v58 = vsel %vm734_vm2, %v811_v25, %v7133_v12  ;;  %6862 = vmatpush3.msra.mxu1 %v1808_v8  ;;  %v7434_v21 = vpack.i.bf16 %v1000_v18, %v1065_v27 }
 0x160   : > { %v7137_v19 = vunpack.i.l.bf16 %v7136_v61  ;;  %1983 = vmatmul.mubr.f32.gmra.mxu1 %v1611_v44  ;;  %v7138_v46 = vunpack.i.h.bf16 %v7136_v61  ;;  %v7142_v31 = vunpack.i.l.bf16 %v7141_v13  ;;  %6863 = vmatprep.subr.mxu1 %v1807_v23  ;;  %v7143_v11 = vunpack.i.h.bf16 %v7141_v13  ;;  %v9182_v44 = vld [vmem:[#allocation2 + $0x48] sm:$0xff] }
 0x161   : > { %7430 = vrot.lane.b32.xlu0 %v7429_v16, %s8254_s29  ;;  %1987 = vmatprep.mubr.f32.mxu1 %v1644_v14 }
 0x162   : > { %7425 = vrot.lane.b32.xlu1 %v7424_v20, %s8254_s29  ;;  %v1645_v39 = vsel %vm734_vm2, %v8997_v30, %v7137_v19  ;;  %6864 = vmatpush3.msra.mxu1 %v1807_v23  ;;  %v1613_v57 = vsel %vm734_vm2, %v8718_v40, %v7138_v46  ;;  %v1805_v30 = vld [vmem:[%s12136_s3 + $0x218] sm:$0xff]  ;;  %v1646_v22 = vsel %vm734_vm2, %v8995_v29, %v7142_v31  ;;  %v1803_v29 = vld [vmem:[%s12136_s3 + $0x208] sm:$0xff]  ;;  %v9194_v20 = vld [vmem:[#allocation2 + $0x50] sm:$0xff] }
 0x163   : > { %v7151_v28 = vpop.permute.xlu0 %7150  ;;  %v7146_v38 = vpop.permute.xlu1 %7145  ;;  %6865 = vmatprep.subr.mxu1 %v1806_v9  ;;  %v1614_v34 = vsel %vm734_vm2, %v9160_v2, %v7143_v11 }
 0x164   : > { %1988 = vmatmul.mubr.f32.gmra.mxu1 %v1612_v58  ;;  %v7147_v24 = vunpack.i.l.bf16 %v7146_v38  ;;  %v7148_v40 = vunpack.i.h.bf16 %v7146_v38  ;;  %v7152_v54 = vunpack.i.l.bf16 %v7151_v28  ;;  %v7153_v62 = vunpack.i.h.bf16 %v7151_v28  ;;  %v9205_v28 = vld [vmem:[#allocation2 + $0x60] sm:$0xff] }
 0x165   : > { %1992 = vmatprep.mubr.f32.mxu1 %v1645_v39  ;;  %6866 = vmatpush3.msra.mxu1 %v1806_v9  ;;  %v9216_v9 = vld [vmem:[#allocation2 + $0x68] sm:$0xff] }
 0x166   : > { %7435 = vrot.lane.b32.xlu1 %v7434_v21, %s8254_s29  ;;  %6867 = vmatprep.subr.mxu1 %v1805_v30  ;;  %v1647_v49 = vsel %vm734_vm2, %v9006_v37, %v7147_v24  ;;  %v1615_v26 = vsel %vm734_vm2, %v9174_v56, %v7148_v40  ;;  %v1648_v37 = vsel %vm734_vm2, %v9004_v32, %v7152_v54  ;;  %v9227_v24 = vld [vmem:[#allocation2 + $0x78] sm:$0xff] }
 0x167   : > { %v9148_v41 = vpop.permute.xlu0 %7160  ;;  %v7156_v53 = vpop.permute.xlu1 %7155  ;;  %6868 = vmatpush3.msra.mxu1 %v1805_v30  ;;  %v1616_v16 = vsel %vm734_vm2, %v9182_v44, %v7153_v62 }
 0x168   : > { %1993 = vmatmul.mubr.f32.gmra.mxu1 %v1613_v57  ;;  %6869 = vmatprep.subr.mxu1 %v1804_v5  ;;  %v7157_v7 = vunpack.i.l.bf16 %v7156_v53  ;;  %v7158_v12 = vunpack.i.h.bf16 %v7156_v53  ;;  %v7162_v19 = vunpack.i.l.bf16 %v9148_v41  ;;  %v7163_v14 = vunpack.i.h.bf16 %v9148_v41 }
 0x169   : > { %1997 = vmatprep.mubr.f32.mxu1 %v1646_v22  ;;  %6870 = vmatpush3.msra.mxu1 %v1804_v5 }
 0x16a   : > { %6871 = vmatprep.subr.mxu1 %v1803_v29  ;;  %v1649_v32 = vsel %vm734_vm2, %v9023_v43, %v7157_v7  ;;  %v1617_v23 = vsel %vm734_vm2, %v9194_v20, %v7158_v12  ;;  %v1650_v46 = vsel %vm734_vm2, %v9021_v42, %v7162_v19  ;;  %v1618_v31 = vsel %vm734_vm2, %v9205_v28, %v7163_v14 }
 0x16b   : > { %v9162_v63 = vpop.permute.xlu0 %7170  ;;  %v7166_v50 = vpop.permute.xlu1 %7165  ;;  %6872 = vmatpush3.msra.mxu1 %v1803_v29 }
 0x16c   : > { %1998 = vmatmul.mubr.f32.gmra.mxu1 %v1614_v34  ;;  %6873 = vmatprep.subr.mxu1 %v1802_v59  ;;  %v7167_v25 = vunpack.i.l.bf16 %v7166_v50  ;;  %v7168_v43 = vunpack.i.h.bf16 %v7166_v50  ;;  %v7172_v21 = vunpack.i.l.bf16 %v9162_v63  ;;  %v7173_v42 = vunpack.i.h.bf16 %v9162_v63  ;;  %v9238_v34 = vld [vmem:[#allocation2 + $0x80] sm:$0xff] }
 0x16d   : > { %2002 = vmatprep.mubr.f32.mxu1 %v1647_v49  ;;  %6874 = vmatpush3.msra.mxu1 %v1802_v59 }
 0x16e   : > { %7043 = vmatprep.subr.mxu1 %v12144_v36  ;;  %v1651_v39 = vsel %vm734_vm2, %v9035_v47, %v7167_v25  ;;  %v1619_v53 = vsel %vm734_vm2, %v9216_v9, %v7168_v43  ;;  %v1652_v30 = vsel %vm734_vm2, %v9033_v45, %v7172_v21  ;;  %v1620_v40 = vsel %vm734_vm2, %v9227_v24, %v7173_v42 }
 0x16f   : > { %v9176_v8 = vpop.permute.xlu0 %7180  ;;  %v7176_v3 = vpop.permute.xlu1 %7175 }
 0x170   : > { %2003 = vmatmul.mubr.f32.gmra.mxu1 %v1615_v26  ;;  %v7177_v57 = vunpack.i.l.bf16 %v7176_v3  ;;  %v7178_v47 = vunpack.i.h.bf16 %v7176_v3  ;;  %v7182_v63 = vunpack.i.l.bf16 %v9176_v8  ;;  %v7183_v45 = vunpack.i.h.bf16 %v9176_v8 }
 0x171   : > { %2007 = vmatprep.mubr.f32.mxu1 %v1648_v37 }
 0x172   : > { %v1653_v50 = vsel %vm734_vm2, %v9045_v51, %v7177_v57  ;;  %v1621_v49 = vsel %vm734_vm2, %v9238_v34, %v7178_v47  ;;  %v1654_v62 = vsel %vm734_vm2, %v9043_v33, %v7182_v63  ;;  %v9250_v51 = vld [vmem:[#allocation2 + $0x90] sm:$0xff]  ;;  %v9262_v33 = vld [vmem:[#allocation2 + $0x98] sm:$0xff] }
 0x173   : > { %v9185_v13 = vpop.permute.xlu0 %7190  ;;  %v9187_v61 = vpop.permute.xlu1 %7185  ;;  %v1622_v7 = vsel %vm734_vm2, %v9250_v51, %v7183_v45 }
 0x174   : > { %2008 = vmatmul.mubr.f32.gmra.mxu1 %v1616_v16  ;;  %v7187_v59 = vunpack.i.l.bf16 %v9187_v61  ;;  %v7188_v3 = vunpack.i.h.bf16 %v9187_v61  ;;  %v7192_v37 = vunpack.i.l.bf16 %v9185_v13  ;;  %v7193_v16 = vunpack.i.h.bf16 %v9185_v13 }
 0x175   : > { %2012 = vmatprep.mubr.f32.mxu1 %v1649_v32 }
 0x176   : > { %v1655_v12 = vsel %vm734_vm2, %v9055_v48, %v7187_v59  ;;  %v1623_v32 = vsel %vm734_vm2, %v9262_v33, %v7188_v3  ;;  %v9274_v48 = vld [vmem:[#allocation2 + $0xa8] sm:$0xff] }
 0x177   : > { %v9197_v18 = vpop.permute.xlu0 %7200  ;;  %v9199_v27 = vpop.permute.xlu1 %7195  ;;  %v1624_v43 = vsel %vm734_vm2, %v9274_v48, %v7193_v16 }
 0x178   : > { %2013 = vmatmul.mubr.f32.gmra.mxu1 %v1617_v23  ;;  %v7197_v14 = vunpack.i.l.bf16 %v9199_v27  ;;  %v1656_v23 = vsel %vm734_vm2, %v9053_v55, %v7192_v37  ;;  %v7198_v25 = vunpack.i.h.bf16 %v9199_v27  ;;  %v9286_v55 = vld [vmem:[#allocation2 + $0xb0] sm:$0xff] }
 0x179   : > { %2017 = vmatprep.mubr.f32.mxu1 %v1650_v46 }
 0x17a   : > { %v1657_v21 = vsel %vm734_vm2, %v9065_v0, %v7197_v14  ;;  %v937_v0 = vld [vmem:[#allocation2 + $0x19] sm:$0xff] }
 0x17b   : > { %v9207_v38 = vpop.permute.xlu0 %7210  ;;  %v9209_v58 = vpop.permute.xlu1 %7205 }
 0x17c   : > { %2018 = vmatmul.mubr.f32.gmra.mxu1 %v1618_v31  ;;  %v7202_v31 = vunpack.i.l.bf16 %v9197_v18  ;;  %v7207_v57 = vunpack.i.l.bf16 %v9209_v58  ;;  %v7212_v45 = vunpack.i.l.bf16 %v9207_v38  ;;  %v7213_v14 = vunpack.i.h.bf16 %v9207_v38  ;;  %v9320_v38 = vld [vmem:[#allocation2 + $0xd8] sm:$0xff] }
 0x17d   : > { %2022 = vmatprep.mubr.f32.mxu1 %v1651_v39  ;;  %v7203_v39 = vunpack.i.h.bf16 %v9197_v18  ;;  %v9298_v18 = vld [vmem:[#allocation2 + $0xc0] sm:$0xff] }
 0x17f   : > { %v9219_v11 = vpop.permute.xlu0 %7220  ;;  %v9221_v41 = vpop.permute.xlu1 %7215  ;;  %v1626_v3 = vsel %vm734_vm2, %v9298_v18, %v7203_v39 }
 0x180   : > { %2023 = vmatmul.mubr.f32.gmra.mxu1 %v1619_v53  ;;  %v1625_v53 = vsel %vm734_vm2, %v9286_v55, %v7198_v25 }
 0x181   : > { %2027 = vmatprep.mubr.f32.mxu1 %v1652_v30 }
 0x183   : > { %v9229_v22 = vpop.permute.xlu0 %7230  ;;  %v9231_v5 = vpop.permute.xlu1 %7225 }
 0x184   : > { %2028 = vmatmul.mubr.f32.gmra.mxu1 %v1620_v40  ;;  %v1658_v40 = vsel %vm734_vm2, %v9063_v60, %v7202_v31  ;;  %v7217_v31 = vunpack.i.l.bf16 %v9221_v41 }
 0x185   : > { %2032 = vmatprep.mubr.f32.mxu1 %v1653_v50 }
 0x187   : > { %v9241_v29 = vpop.permute.xlu0 %7240  ;;  %v9243_v54 = vpop.permute.xlu1 %7235 }
 0x188   : > { %2033 = vmatmul.mubr.f32.gmra.mxu1 %v1621_v49  ;;  %v7208_v49 = vunpack.i.h.bf16 %v9209_v58  ;;  %v9309_v58 = vld [vmem:[#allocation2 + $0xc8] sm:$0xff] }
 0x189   : > { %2037 = vmatprep.mubr.f32.mxu1 %v1654_v62 }
 0x18b   : > { %v9253_v26 = vpop.permute.xlu0 %7250  ;;  %v9255_v8 = vpop.permute.xlu1 %7245 }
 0x18c   : > { %2038 = vmatmul.mubr.f32.gmra.mxu1 %v1622_v7 }
 0x18d   : > { %2042 = vmatprep.mubr.f32.mxu1 %v1655_v12  ;;  %v938_v12 = vld [vmem:[#allocation2 + $0x21] sm:$0xff] }
 0x18f   : > { %v9265_v19 = vpop.permute.xlu0 %7260  ;;  %v9267_v61 = vpop.permute.xlu1 %7255 }
 0x190   : > { %2043 = vmatmul.mubr.f32.gmra.mxu1 %v1623_v32 }
 0x191   : > { %2047 = vmatprep.mubr.f32.mxu1 %v1656_v23 }
 0x193   : > { %v9277_v46 = vpop.permute.xlu0 %7270  ;;  %v9279_v13 = vpop.permute.xlu1 %7265 }
 0x194   : > { %2048 = vmatmul.mubr.f32.gmra.mxu1 %v1624_v43  ;;  %v1627_v43 = vsel %vm734_vm2, %v9309_v58, %v7208_v49 }
 0x195   : > { %2052 = vmatprep.mubr.f32.mxu1 %v1657_v21 }
 0x197   : > { %v7281_v42 = vpop.permute.xlu0 %7280  ;;  %v9289_v27 = vpop.permute.xlu1 %7275 }
 0x198   : > { %v7283_v30 = vunpack.i.h.bf16 %v7281_v42  ;;  %v7282_v47 = vunpack.i.l.bf16 %v7281_v42  ;;  %2053 = vmatmul.mubr.f32.gmra.mxu1 %v1625_v53  ;;  %v939_v42 = vld [vmem:[#allocation2 + $0x31] sm:$0xff]  ;;  %v7218_v53 = vunpack.i.h.bf16 %v9221_v41  ;;  %v9331_v41 = vld [vmem:[#allocation2 + $0xe0] sm:$0xff] }
 0x199   : > { %2057 = vmatprep.mubr.f32.mxu1 %v1658_v40  ;;  %v7222_v40 = vunpack.i.l.bf16 %v9219_v11 }
 0x19a   : > { %v1706_v63 = vsel %vm734_vm2, %v9160_v2, %v7282_v47  ;;  %v1674_v50 = vsel %vm734_vm2, %v937_v0, %v7283_v30  ;;  %v1659_v2 = vsel %vm734_vm2, %v9075_v17, %v7207_v57  ;;  %v1628_v30 = vsel %vm734_vm2, %v9320_v38, %v7213_v14 }
 0x19b   : > { %v7291_v59 = vpop.permute.xlu0 %7290  ;;  %2202 = vmatprep.mubr.f32.mxu0 %v1706_v63  ;;  %v7286_v62 = vpop.permute.xlu1 %7285  ;;  %v7232_v14 = vunpack.i.l.bf16 %v9229_v22 }
 0x19c   : > { %v7292_v60 = vunpack.i.l.bf16 %v7291_v59  ;;  %v7288_v7 = vunpack.i.h.bf16 %v7286_v62  ;;  %v7287_v37 = vunpack.i.l.bf16 %v7286_v62  ;;  %2058 = vmatmul.mubr.f32.gmra.mxu1 %v1626_v3  ;;  %2203 = vmatmul.mubr.f32.vlgmr.msra.gmra.mxu0 %v1674_v50  ;;  %v7293_v23 = vunpack.i.h.bf16 %v7291_v59  ;;  %v940_v50 = vld [vmem:[#allocation2 + $0x39] sm:$0xff] }
 0x19d   : > { %2062 = vmatprep.mubr.f32.mxu1 %v1659_v2  ;;  %v1629_v59 = vsel %vm734_vm2, %v9331_v41, %v7218_v53  ;;  %v7227_v3 = vunpack.i.l.bf16 %v9231_v5  ;;  %v7228_v2 = vunpack.i.h.bf16 %v9231_v5  ;;  %v9353_v5 = vld [vmem:[#allocation2 + $0xf8] sm:$0xff] }
 0x19e   : > { %v1707_v16 = vsel %vm734_vm2, %v9174_v56, %v7287_v37  ;;  %v1675_v32 = vsel %vm734_vm2, %v938_v12, %v7288_v7  ;;  %v1660_v56 = vsel %vm734_vm2, %v9073_v1, %v7212_v45  ;;  %v1708_v21 = vsel %vm734_vm2, %v9182_v44, %v7292_v60  ;;  %v941_v37 = vld [vmem:[#allocation2 + $0x49] sm:$0xff] }
 0x19f   : > { %v7296_v25 = vpop.permute.xlu1 %7295  ;;  %2207 = vmatprep.mubr.f32.mxu0 %v1707_v16  ;;  %v7301_v39 = vpop.permute.xlu0 %7300  ;;  %v1676_v47 = vsel %vm734_vm2, %v939_v42, %v7293_v23  ;;  %v1661_v44 = vsel %vm734_vm2, %v9085_v35, %v7217_v31  ;;  %v7223_v45 = vunpack.i.h.bf16 %v9219_v11  ;;  %v9342_v11 = vld [vmem:[#allocation2 + $0xf0] sm:$0xff]  ;;  %v7233_v31 = vunpack.i.h.bf16 %v9229_v22  ;;  %v9364_v22 = vld [vmem:[#allocation2 + $0x108] sm:$0xff] }
 0x1a0   : > { %v7297_v17 = vunpack.i.l.bf16 %v7296_v25  ;;  %2063 = vmatmul.mubr.f32.gmra.mxu1 %v1627_v43  ;;  %2208 = vmatmul.mubr.f32.gmra.mxu0 %v1675_v32  ;;  %v7298_v57 = vunpack.i.h.bf16 %v7296_v25  ;;  %v7302_v1 = vunpack.i.l.bf16 %v7301_v39  ;;  %v7303_v49 = vunpack.i.h.bf16 %v7301_v39  ;;  %v942_v43 = vld [vmem:[#allocation2 + $0x51] sm:$0xff] }
 0x1a1   : > { %2067 = vmatprep.mubr.f32.mxu1 %v1660_v56  ;;  %2212 = vmatprep.mubr.f32.mxu0 %v1708_v21  ;;  %v1630_v16 = vsel %vm734_vm2, %v9342_v11, %v7223_v45  ;;  %v1631_v56 = vsel %vm734_vm2, %v9353_v5, %v7228_v2  ;;  %v7237_v39 = vunpack.i.l.bf16 %v9243_v54  ;;  %v7243_v45 = vunpack.i.h.bf16 %v9241_v29 }
 0x1a2   : > { %v1709_v0 = vsel %vm734_vm2, %v9194_v20, %v7297_v17  ;;  %v1677_v62 = vsel %vm734_vm2, %v940_v50, %v7298_v57  ;;  %v1662_v20 = vsel %vm734_vm2, %v9083_v4, %v7222_v40  ;;  %v1710_v60 = vsel %vm734_vm2, %v9205_v28, %v7302_v1  ;;  %v943_v57 = vld [vmem:[#allocation2 + $0x61] sm:$0xff]  ;;  %v944_v50 = vld [vmem:[#allocation2 + $0x69] sm:$0xff] }
 0x1a3   : > { %v7306_v63 = vpop.permute.xlu1 %7305  ;;  %v7311_v7 = vpop.permute.xlu0 %7310  ;;  %v1678_v32 = vsel %vm734_vm2, %v941_v37, %v7303_v49  ;;  %v1663_v28 = vsel %vm734_vm2, %v9095_v52, %v7227_v3  ;;  %v1632_v40 = vsel %vm734_vm2, %v9364_v22, %v7233_v31  ;;  %v7247_v3 = vunpack.i.l.bf16 %v9255_v8 }
 0x1a4   : > { %2068 = vmatmul.mubr.f32.gmra.mxu1 %v1628_v30  ;;  %2213 = vmatmul.mubr.f32.gmra.mxu0 %v1676_v47  ;;  %v7307_v35 = vunpack.i.l.bf16 %v7306_v63  ;;  %v7308_v12 = vunpack.i.h.bf16 %v7306_v63  ;;  %v7312_v4 = vunpack.i.l.bf16 %v7311_v7  ;;  %v7313_v17 = vunpack.i.h.bf16 %v7311_v7 }
 0x1a5   : > { %2072 = vmatprep.mubr.f32.mxu1 %v1661_v44  ;;  %2217 = vmatprep.mubr.f32.mxu0 %v1709_v0  ;;  %v7238_v30 = vunpack.i.h.bf16 %v9243_v54  ;;  %v7242_v44 = vunpack.i.l.bf16 %v9241_v29  ;;  %v9375_v54 = vld [vmem:[#allocation2 + $0x110] sm:$0xff]  ;;  %v9386_v29 = vld [vmem:[#allocation2 + $0x120] sm:$0xff]  ;;  %v7248_v7 = vunpack.i.h.bf16 %v9255_v8 }
 0x1a6   : > { %v1711_v23 = vsel %vm734_vm2, %v9216_v9, %v7307_v35  ;;  %v1679_v21 = vsel %vm734_vm2, %v942_v43, %v7308_v12  ;;  %v1664_v9 = vsel %vm734_vm2, %v9093_v10, %v7232_v14  ;;  %v1712_v42 = vsel %vm734_vm2, %v9227_v24, %v7312_v4  ;;  %v9399_v4 = vld [vmem:[#allocation2 + $0x128] sm:$0xff] }
 0x1a7   : > { %v7316_v25 = vpop.permute.xlu1 %7315  ;;  %v7321_v53 = vpop.permute.xlu0 %7320  ;;  %v1680_v1 = vsel %vm734_vm2, %v943_v57, %v7313_v17  ;;  %v1665_v24 = vsel %vm734_vm2, %v9105_v6, %v7237_v39  ;;  %v1634_v2 = vsel %vm734_vm2, %v9386_v29, %v7243_v45  ;;  %v1635_v43 = vsel %vm734_vm2, %v9399_v4, %v7248_v7  ;;  %v9405_v17 = vld [vmem:[#allocation2 + $0x13a] sm:$0xff] }
 0x1a8   : > { %2073 = vmatmul.mubr.f32.gmra.mxu1 %v1629_v59  ;;  %2218 = vmatmul.mubr.f32.gmra.mxu0 %v1677_v62  ;;  %v7317_v52 = vunpack.i.l.bf16 %v7316_v25  ;;  %v7318_v47 = vunpack.i.h.bf16 %v7316_v25  ;;  %v7322_v10 = vunpack.i.l.bf16 %v7321_v53  ;;  %v7323_v49 = vunpack.i.h.bf16 %v7321_v53 }
 0x1a9   : > { %2077 = vmatprep.mubr.f32.mxu1 %v1662_v20  ;;  %2222 = vmatprep.mubr.f32.mxu0 %v1710_v60  ;;  %v1633_v59 = vsel %vm734_vm2, %v9375_v54, %v7238_v30  ;;  %v945_v60 = vld [vmem:[#allocation2 + $0x79] sm:$0xff] }
 0x1aa   : > { %v1713_v0 = vsel %vm734_vm2, %v9238_v34, %v7317_v52  ;;  %v1681_v62 = vsel %vm734_vm2, %v944_v50, %v7318_v47  ;;  %v1666_v34 = vsel %vm734_vm2, %v9103_v15, %v7242_v44  ;;  %v1714_v35 = vsel %vm734_vm2, %v9250_v51, %v7322_v10  ;;  %v9412_v52 = vld [vmem:[#allocation2 + $0x138] sm:$0xff]  ;;  %v9418_v47 = vld [vmem:[#allocation2 + $0x142] sm:$0xff] }
 0x1ab   : > { %v7326_v63 = vpop.permute.xlu1 %7325  ;;  %v7331_v20 = vpop.permute.xlu0 %7330  ;;  %v1682_v12 = vsel %vm734_vm2, %v945_v60, %v7323_v49  ;;  %v7252_v15 = vunpack.i.l.bf16 %v9253_v26  ;;  %v9425_v10 = vld [vmem:[#allocation2 + $0x140] sm:$0xff]  ;;  %v9431_v49 = vld [vmem:[#allocation2 + $0x152] sm:$0xff] }
 0x1ac   : > { %2078 = vmatmul.mubr.f32.gmra.mxu1 %v1630_v16  ;;  %2223 = vmatmul.mubr.f32.gmra.mxu0 %v1678_v32  ;;  %v7327_v6 = vunpack.i.l.bf16 %v7326_v63  ;;  %v7328_v37 = vunpack.i.h.bf16 %v7326_v63  ;;  %v9392_v16 = vld [vmem:[#allocation2 + $0x12a] sm:$0xff]  ;;  %v7332_v32 = vunpack.i.l.bf16 %v7331_v20  ;;  %v7333_v25 = vunpack.i.h.bf16 %v7331_v20 }
 0x1ad   : > { %2082 = vmatprep.mubr.f32.mxu1 %v1663_v28  ;;  %2227 = vmatprep.mubr.f32.mxu0 %v1711_v23  ;;  %v1667_v51 = vsel %vm734_vm2, %v9392_v16, %v7247_v3  ;;  %v946_v28 = vld [vmem:[#allocation2 + $0x81] sm:$0xff]  ;;  %v7253_v23 = vunpack.i.h.bf16 %v9253_v26 }
 0x1ae   : > { %v1715_v14 = vsel %vm734_vm2, %v9262_v33, %v7327_v6  ;;  %v1683_v31 = vsel %vm734_vm2, %v946_v28, %v7328_v37  ;;  %v1668_v33 = vsel %vm734_vm2, %v9405_v17, %v7252_v15  ;;  %v1716_v39 = vsel %vm734_vm2, %v9274_v48, %v7332_v32  ;;  %v9438_v6 = vld [vmem:[#allocation2 + $0x150] sm:$0xff]  ;;  %v9444_v37 = vld [vmem:[#allocation2 + $0x15a] sm:$0xff] }
 0x1af   : > { %v7336_v8 = vpop.permute.xlu1 %7335  ;;  %v7341_v26 = vpop.permute.xlu0 %7340  ;;  %v1636_v57 = vsel %vm734_vm2, %v9412_v52, %v7253_v23  ;;  %v9451_v32 = vld [vmem:[#allocation2 + $0x158] sm:$0xff] }
 0x1b0   : > { %2083 = vmatmul.mubr.f32.gmra.mxu1 %v1631_v56  ;;  %2228 = vmatmul.mubr.f32.gmra.mxu0 %v1679_v21  ;;  %v7257_v56 = vunpack.i.l.bf16 %v9267_v61  ;;  %v7337_v21 = vunpack.i.l.bf16 %v7336_v8  ;;  %v7338_v53 = vunpack.i.h.bf16 %v7336_v8  ;;  %v7343_v63 = vunpack.i.h.bf16 %v7341_v26 }
 0x1b1   : > { %2087 = vmatprep.mubr.f32.mxu1 %v1664_v9  ;;  %2232 = vmatprep.mubr.f32.mxu0 %v1712_v42  ;;  %v947_v9 = vld [vmem:[#allocation2 + $0x91] sm:$0xff]  ;;  %v7258_v42 = vunpack.i.h.bf16 %v9267_v61 }
 0x1b2   : > { %v1684_v30 = vsel %vm734_vm2, %v947_v9, %v7333_v25  ;;  %v1669_v48 = vsel %vm734_vm2, %v9418_v47, %v7257_v56  ;;  %v1717_v44 = vsel %vm734_vm2, %v9286_v55, %v7337_v21  ;;  %v9457_v25 = vld [vmem:[#allocation2 + $0x16a] sm:$0xff] }
 0x1b3   : > { %v7346_v61 = vpop.permute.xlu1 %7345  ;;  %v1637_v50 = vsel %vm734_vm2, %v9425_v10, %v7258_v42  ;;  %v9464_v21 = vld [vmem:[#allocation2 + $0x168] sm:$0xff] }
 0x1b4   : > { %2088 = vmatmul.mubr.f32.gmra.mxu1 %v1632_v40  ;;  %2233 = vmatmul.mubr.f32.gmra.mxu0 %v1680_v1  ;;  %v7262_v40 = vunpack.i.l.bf16 %v9265_v19  ;;  %v7342_v1 = vunpack.i.l.bf16 %v7341_v26  ;;  %v7348_v20 = vunpack.i.h.bf16 %v7346_v61 }
 0x1b5   : > { %2092 = vmatprep.mubr.f32.mxu1 %v1665_v24  ;;  %2237 = vmatprep.mubr.f32.mxu0 %v1713_v0  ;;  %v948_v24 = vld [vmem:[#allocation2 + $0x99] sm:$0xff]  ;;  %v7263_v0 = vunpack.i.h.bf16 %v9265_v19  ;;  %v7351_v19 = vpop.permute.xlu0 %7350 }
 0x1b6   : > { %v1685_v45 = vsel %vm734_vm2, %v948_v24, %v7338_v53  ;;  %v1670_v55 = vsel %vm734_vm2, %v9431_v49, %v7262_v40  ;;  %v1718_v3 = vsel %vm734_vm2, %v9298_v18, %v7342_v1  ;;  %v7353_v8 = vunpack.i.h.bf16 %v7351_v19  ;;  %v9470_v53 = vld [vmem:[#allocation2 + $0x172] sm:$0xff]  ;;  %v952_v1 = vld [vmem:[#allocation2 + $0xc9] sm:$0xff] }
 0x1b7   : > { %v1638_v60 = vsel %vm734_vm2, %v9438_v6, %v7263_v0 }
 0x1b8   : > { %2093 = vmatmul.mubr.f32.gmra.mxu1 %v1633_v59  ;;  %2238 = vmatmul.mubr.f32.gmra.mxu0 %v1681_v62  ;;  %v7267_v59 = vunpack.i.l.bf16 %v9279_v13  ;;  %v7347_v62 = vunpack.i.l.bf16 %v7346_v61 }
 0x1b9   : > { %2097 = vmatprep.mubr.f32.mxu1 %v1666_v34  ;;  %2242 = vmatprep.mubr.f32.mxu0 %v1714_v35  ;;  %v949_v34 = vld [vmem:[#allocation2 + $0xa9] sm:$0xff]  ;;  %v7268_v35 = vunpack.i.h.bf16 %v9279_v13  ;;  %v7356_v13 = vpop.permute.xlu1 %7355 }
 0x1ba   : > { %v1686_v7 = vsel %vm734_vm2, %v949_v34, %v7343_v63  ;;  %v1671_v18 = vsel %vm734_vm2, %v9444_v37, %v7267_v59  ;;  %v1719_v15 = vsel %vm734_vm2, %v9309_v58, %v7347_v62  ;;  %v7358_v26 = vunpack.i.h.bf16 %v7356_v13  ;;  %v1066_v63 = vld [vmem:[#allocation2 + $0x32] sm:$0xff]  ;;  %v1067_v62 = vld [vmem:[#allocation2 + $0x3a] sm:$0xff] }
 0x1bb   : > { %v1639_v28 = vsel %vm734_vm2, %v9451_v32, %v7268_v35 }
 0x1bc   : > { %2098 = vmatmul.mubr.f32.gmra.mxu1 %v1634_v2  ;;  %2243 = vmatmul.mubr.f32.gmra.mxu0 %v1682_v12  ;;  %v7272_v2 = vunpack.i.l.bf16 %v9277_v46  ;;  %v7352_v12 = vunpack.i.l.bf16 %v7351_v19  ;;  %v1689_v61 = vsel %vm734_vm2, %v952_v1, %v7358_v26  ;;  %v1068_v19 = vld [vmem:[#allocation2 + $0x4a] sm:$0xff] }
 0x1bd   : > { %2102 = vmatprep.mubr.f32.mxu1 %v1667_v51  ;;  %2247 = vmatprep.mubr.f32.mxu0 %v1715_v14  ;;  %v950_v51 = vld [vmem:[#allocation2 + $0xb1] sm:$0xff]  ;;  %v7273_v14 = vunpack.i.h.bf16 %v9277_v46  ;;  %v7361_v46 = vpop.permute.xlu0 %7360  ;;  %v7366_v40 = vpop.permute.xlu1 %7365 }
 0x1be   : > { %v1687_v23 = vsel %vm734_vm2, %v950_v51, %v7348_v20  ;;  %v1672_v58 = vsel %vm734_vm2, %v9457_v25, %v7272_v2  ;;  %v1720_v56 = vsel %vm734_vm2, %v9320_v38, %v7352_v12  ;;  %v7367_v24 = vunpack.i.l.bf16 %v7366_v40  ;;  %v1070_v12 = vld [vmem:[#allocation2 + $0x62] sm:$0xff]  ;;  %v1071_v51 = vld [vmem:[#allocation2 + $0x6a] sm:$0xff] }
 0x1bf   : > { %v1640_v9 = vsel %vm734_vm2, %v9464_v21, %v7273_v14 }
 0x1c0   : > { %2103 = vmatmul.mubr.f32.gmra.mxu1 %v1635_v43  ;;  %2248 = vmatmul.mubr.f32.gmra.mxu0 %v1683_v31  ;;  %v7277_v43 = vunpack.i.l.bf16 %v9289_v27  ;;  %v7357_v31 = vunpack.i.l.bf16 %v7356_v13 }
 0x1c1   : > { %2107 = vmatprep.mubr.f32.mxu1 %v1668_v33  ;;  %2252 = vmatprep.mubr.f32.mxu0 %v1716_v39  ;;  %v951_v33 = vld [vmem:[#allocation2 + $0xc1] sm:$0xff]  ;;  %v7278_v39 = vunpack.i.h.bf16 %v9289_v27  ;;  %v9476_v27 = vld [vmem:[#allocation2 + $0x170] sm:$0xff]  ;;  %v7376_v34 = vpop.permute.xlu1 %7375 }
 0x1c2   : > { %v1688_v42 = vsel %vm734_vm2, %v951_v33, %v7353_v8  ;;  %v1673_v38 = vsel %vm734_vm2, %v9470_v53, %v7277_v43  ;;  %v1074_v33 = vld [vmem:[#allocation2 + $0x92] sm:$0xff] }
 0x1c4   : > { %2108 = vmatmul.mubr.f32.gmra.mxu1 %v1636_v57  ;;  %2253 = vmatmul.mubr.f32.gmra.mxu0 %v1684_v30  ;;  %v7362_v57 = vunpack.i.l.bf16 %v7361_v46  ;;  %v1721_v30 = vsel %vm734_vm2, %v9331_v41, %v7357_v31  ;;  %v7371_v41 = vpop.permute.xlu0 %7370 }
 0x1c5   : > { %2112 = vmatprep.mubr.f32.mxu1 %v1669_v48  ;;  %2257 = vmatprep.mubr.f32.mxu0 %v1717_v44  ;;  %v7363_v48 = vunpack.i.h.bf16 %v7361_v46  ;;  %v1641_v44 = vsel %vm734_vm2, %v9476_v27, %v7278_v39  ;;  %v7373_v35 = vunpack.i.h.bf16 %v7371_v41 }
 0x1c6   : > { %v1722_v0 = vsel %vm734_vm2, %v9342_v11, %v7362_v57  ;;  %v954_v11 = vld [vmem:[#allocation2 + $0xe1] sm:$0xff] }
 0x1c8   : > { %2113 = vmatmul.mubr.f32.gmra.mxu1 %v1637_v50  ;;  %2258 = vmatmul.mubr.f32.gmra.mxu0 %v1685_v45  ;;  %v953_v50 = vld [vmem:[#allocation2 + $0xd9] sm:$0xff]  ;;  %v7368_v45 = vunpack.i.h.bf16 %v7366_v40 }
 0x1c9   : > { %2117 = vmatprep.mubr.f32.mxu1 %v1670_v55  ;;  %2262 = vmatprep.mubr.f32.mxu0 %v1718_v3  ;;  %v1690_v59 = vsel %vm734_vm2, %v953_v50, %v7363_v48  ;;  %v7372_v55 = vunpack.i.l.bf16 %v7371_v41  ;;  %v1723_v3 = vsel %vm734_vm2, %v9353_v5, %v7367_v24  ;;  %v955_v5 = vld [vmem:[#allocation2 + $0xf1] sm:$0xff] }
 0x1ca   : > { %v1691_v20 = vsel %vm734_vm2, %v954_v11, %v7368_v45  ;;  %v1692_v13 = vsel %vm734_vm2, %v955_v5, %v7373_v35  ;;  %v1079_v45 = vld [vmem:[#allocation2 + $0xca] sm:$0xff]  ;;  %v1081_v11 = vld [vmem:[#allocation2 + $0xe2] sm:$0xff] }
 0x1cb   : > { %v1724_v2 = vsel %vm734_vm2, %v9364_v22, %v7372_v55  ;;  %v956_v22 = vld [vmem:[#allocation2 + $0xf9] sm:$0xff] }
 0x1cc   : > { %2118 = vmatmul.mubr.f32.gmra.mxu1 %v1638_v60  ;;  %2263 = vmatmul.mubr.f32.gmra.mxu0 %v1686_v7  ;;  %v1069_v60 = vld [vmem:[#allocation2 + $0x52] sm:$0xff]  ;;  %v7377_v7 = vunpack.i.l.bf16 %v7376_v34  ;;  %v1080_v55 = vld [vmem:[#allocation2 + $0xda] sm:$0xff] }
 0x1cd   : > { %2122 = vmatprep.mubr.f32.mxu1 %v1671_v18  ;;  %2267 = vmatprep.mubr.f32.mxu0 %v1719_v15  ;;  %v7381_v18 = vpop.permute.xlu0 %7380  ;;  %v7378_v15 = vunpack.i.h.bf16 %v7376_v34 }
 0x1ce   : > { %v7382_v14 = vunpack.i.l.bf16 %v7381_v18  ;;  %v1725_v8 = vsel %vm734_vm2, %v9375_v54, %v7377_v7  ;;  %v7383_v43 = vunpack.i.h.bf16 %v7381_v18  ;;  %v957_v54 = vld [vmem:[#allocation2 + $0x109] sm:$0xff]  ;;  %v1083_v18 = vld [vmem:[#allocation2 + $0xfa] sm:$0xff] }
 0x1cf   : > { %v1693_v31 = vsel %vm734_vm2, %v956_v22, %v7378_v15 }
 0x1d0   : > { %2123 = vmatmul.mubr.f32.gmra.mxu1 %v1639_v28  ;;  %2268 = vmatmul.mubr.f32.gmra.mxu0 %v1687_v23  ;;  %v1072_v28 = vld [vmem:[#allocation2 + $0x7a] sm:$0xff]  ;;  %v7386_v23 = vpop.permute.xlu1 %7385  ;;  %v1726_v46 = vsel %vm734_vm2, %v9386_v29, %v7382_v14  ;;  %v958_v29 = vld [vmem:[#allocation2 + $0x111] sm:$0xff] }
 0x1d1   : > { %2127 = vmatprep.mubr.f32.mxu1 %v1672_v58  ;;  %2272 = vmatprep.mubr.f32.mxu0 %v1720_v56  ;;  %v1073_v58 = vld [vmem:[#allocation2 + $0x82] sm:$0xff]  ;;  %v7387_v56 = vunpack.i.l.bf16 %v7386_v23  ;;  %v7391_v39 = vpop.permute.xlu0 %7390  ;;  %v7388_v26 = vunpack.i.h.bf16 %v7386_v23 }
 0x1d2   : > { %v7392_v57 = vunpack.i.l.bf16 %v7391_v39  ;;  %v7393_v1 = vunpack.i.h.bf16 %v7391_v39 }
 0x1d3   : > { %v1695_v48 = vsel %vm734_vm2, %v958_v29, %v7388_v26 }
 0x1d4   : > { %2128 = vmatmul.mubr.f32.gmra.mxu1 %v1640_v9  ;;  %2273 = vmatmul.mubr.f32.gmra.mxu0 %v1688_v42  ;;  %v1694_v9 = vsel %vm734_vm2, %v957_v54, %v7383_v43  ;;  %v1075_v42 = vld [vmem:[#allocation2 + $0x9a] sm:$0xff]  ;;  %v7396_v40 = vpop.permute.xlu1 %7395  ;;  %v1728_v24 = vsel %vm734_vm2, %v9412_v52, %v7392_v57  ;;  %v960_v52 = vld [vmem:[#allocation2 + $0x129] sm:$0xff] }
 0x1d5   : > { %2132 = vmatprep.mubr.f32.mxu1 %v1673_v38  ;;  %2277 = vmatprep.mubr.f32.mxu0 %v1721_v30  ;;  %v1727_v38 = vsel %vm734_vm2, %v9399_v4, %v7387_v56  ;;  %v1076_v30 = vld [vmem:[#allocation2 + $0xaa] sm:$0xff]  ;;  %v959_v4 = vld [vmem:[#allocation2 + $0x121] sm:$0xff]  ;;  %v7398_v41 = vunpack.i.h.bf16 %v7396_v40 }
 0x1d6   : > { %v1696_v50 = vsel %vm734_vm2, %v959_v4, %v7393_v1  ;;  %v1086_v43 = vld [vmem:[#allocation2 + $0x122] sm:$0xff]  ;;  %v1032_v1 = vld [vmem:[#allocation2 + $0x198] sm:$0xff] }
 0x1d7   : > { %v1697_v34 = vsel %vm734_vm2, %v960_v52, %v7398_v41  ;;  %v1096_v4 = vld [vmem:[#allocation2 + $0x19a] sm:$0xff] }
 0x1d8   : > { %2133 = vmatmul.mubr.f32.gmra.mxu1 %v1641_v44  ;;  %2278 = vmatmul.mubr.f32.gmra.mxu0 %v1689_v61  ;;  %v1077_v44 = vld [vmem:[#allocation2 + $0xb2] sm:$0xff]  ;;  %v7397_v61 = vunpack.i.l.bf16 %v7396_v40 }
 0x1d9   : > { %2282 = vmatprep.mubr.f32.mxu0 %v1722_v0  ;;  %6875 = vmatprep.mubr.msk.f32.mxu1 %vm734_vm2, %v1066_v63  ;;  %v1078_v0 = vld [vmem:[#allocation2 + $0xc2] sm:$0xff]  ;;  %v7401_v63 = vpop.permute.xlu0 %7400 }
 0x1dc   : > { %2283 = vmatmul.mubr.f32.gmra.mxu0 %v1690_v59  ;;  %6876 = vmatmul.mubr.msk.f32.vlgmr.msra.gmra.mxu1 %vm734_vm2, %v1067_v62  ;;  %v7402_v59 = vunpack.i.l.bf16 %v7401_v63  ;;  %v1729_v62 = vsel %vm734_vm2, %v9425_v10, %v7397_v61  ;;  %v961_v10 = vld [vmem:[#allocation2 + $0x139] sm:$0xff] }
 0x1dd   : > { %2287 = vmatprep.mubr.f32.mxu0 %v1723_v3  ;;  %6878 = vmatprep.mubr.msk.f32.mxu1 %vm734_vm2, %v1068_v19  ;;  %v7406_v3 = vpop.permute.xlu1 %7405  ;;  %v7403_v19 = vunpack.i.h.bf16 %v7401_v63  ;;  %v7411_v7 = vpop.permute.xlu0 %7410  ;;  %v967_v63 = vld [vmem:[#allocation2 + $0x181] sm:$0xff] }
 0x1de   : > { %v7407_v35 = vunpack.i.l.bf16 %v7406_v3  ;;  %v7412_v5 = vunpack.i.l.bf16 %v7411_v7  ;;  %v7413_v14 = vunpack.i.h.bf16 %v7411_v7 }
 0x1e0   : > { %2288 = vmatmul.mubr.f32.gmra.mxu0 %v1691_v20  ;;  %6879 = vmatmul.mubr.msk.f32.gmra.mxu1 %vm734_vm2, %v1069_v60  ;;  %v1730_v20 = vsel %vm734_vm2, %v9438_v6, %v7402_v59  ;;  %v1082_v60 = vld [vmem:[#allocation2 + $0xf2] sm:$0xff]  ;;  %v1731_v15 = vsel %vm734_vm2, %v9451_v32, %v7407_v35  ;;  %v962_v6 = vld [vmem:[#allocation2 + $0x141] sm:$0xff]  ;;  %v1732_v22 = vsel %vm734_vm2, %v9464_v21, %v7412_v5  ;;  %v968_v59 = vld [vmem:[#allocation2 + $0x189] sm:$0xff] }
 0x1e1   : > { %2292 = vmatprep.mubr.f32.mxu0 %v1724_v2  ;;  %6881 = vmatprep.mubr.msk.f32.mxu1 %vm734_vm2, %v1070_v12  ;;  %v7408_v2 = vunpack.i.h.bf16 %v7406_v3  ;;  %v1698_v12 = vsel %vm734_vm2, %v961_v10, %v7403_v19  ;;  %v963_v32 = vld [vmem:[#allocation2 + $0x151] sm:$0xff]  ;;  %v964_v21 = vld [vmem:[#allocation2 + $0x159] sm:$0xff] }
 0x1e2   : > { %v1700_v56 = vsel %vm734_vm2, %v963_v32, %v7413_v14  ;;  %v3635_v10 = vld [vmem:[%s12138_s5 + $0x70] sm:$0xff]  ;;  %v3632_v14 = vld [vmem:[%s12138_s5 + $0x58] sm:$0xff] }
 0x1e4   : > { %2293 = vmatmul.mubr.f32.gmra.mxu0 %v1692_v13  ;;  %6882 = vmatmul.mubr.msk.f32.gmra.mxu1 %vm734_vm2, %v1071_v51  ;;  %v1084_v13 = vld [vmem:[#allocation2 + $0x10a] sm:$0xff]  ;;  %v7416_v51 = vpop.permute.xlu1 %7415 }
 0x1e5   : > { %2297 = vmatprep.mubr.f32.mxu0 %v1725_v8  ;;  %6884 = vmatprep.mubr.msk.f32.mxu1 %vm734_vm2, %v1072_v28  ;;  %v1699_v8 = vsel %vm734_vm2, %v962_v6, %v7408_v2  ;;  %v1085_v28 = vld [vmem:[#allocation2 + $0x112] sm:$0xff]  ;;  %v7417_v23 = vunpack.i.l.bf16 %v7416_v51 }
 0x1e8   : > { %2298 = vmatmul.mubr.f32.gmra.mxu0 %v1693_v31  ;;  %6885 = vmatmul.mubr.msk.f32.gmra.mxu1 %vm734_vm2, %v1073_v58  ;;  %v7421_v31 = vpop.permute.xlu0 %7420  ;;  %v7418_v58 = vunpack.i.h.bf16 %v7416_v51  ;;  %v7426_v39 = vpop.permute.xlu1 %7425 }
 0x1e9   : > { %2302 = vmatprep.mubr.f32.mxu0 %v1726_v46  ;;  %6887 = vmatprep.mubr.msk.f32.mxu1 %vm734_vm2, %v1074_v33  ;;  %v7422_v46 = vunpack.i.l.bf16 %v7421_v31  ;;  %v1733_v33 = vsel %vm734_vm2, %v9476_v27, %v7417_v23  ;;  %v7423_v54 = vunpack.i.h.bf16 %v7421_v31  ;;  %v965_v27 = vld [vmem:[#allocation2 + $0x169] sm:$0xff] }
 0x1ea   : > { %v1701_v26 = vsel %vm734_vm2, %v964_v21, %v7418_v58  ;;  %v3631_v23 = vld [vmem:[%s12138_s5 + $0x50] sm:$0xff]  ;;  %v3630_v31 = vld [vmem:[%s12138_s5 + $0x48] sm:$0xff] }
 0x1ec   : > { %2303 = vmatmul.mubr.f32.gmra.mxu0 %v1694_v9  ;;  %6888 = vmatmul.mubr.msk.f32.gmra.mxu1 %vm734_vm2, %v1075_v42  ;;  %v1030_v9 = vld [vmem:[#allocation2 + $0x180] sm:$0xff]  ;;  %v7427_v42 = vunpack.i.l.bf16 %v7426_v39  ;;  %v7431_v57 = vpop.permute.xlu0 %7430 }
 0x1ed   : > { %2307 = vmatprep.mubr.f32.mxu0 %v1727_v38  ;;  %6890 = vmatprep.mubr.msk.f32.mxu1 %vm734_vm2, %v1076_v30  ;;  %v7428_v38 = vunpack.i.h.bf16 %v7426_v39  ;;  %v1031_v30 = vld [vmem:[#allocation2 + $0x188] sm:$0xff]  ;;  %v7432_v40 = vunpack.i.l.bf16 %v7431_v57  ;;  %v3628_v39 = vld [vmem:[%s12138_s5 + $0x38] sm:$0xff] }
 0x1ee   : > { %v1735_v29 = vsel %vm734_vm2, %v1031_v30, %v7427_v42  ;;  %v9645_v30 = vld [vmem:[%s12137_s4] ss:$0 sm:$0xff] }
 0x1f0   : > { %2308 = vmatmul.mubr.f32.gmra.mxu0 %v1695_v48  ;;  %6891 = vmatmul.mubr.msk.f32.gmra.mxu1 %vm734_vm2, %v1077_v44  ;;  %v966_v48 = vld [vmem:[#allocation2 + $0x171] sm:$0xff] }
 0x1f1   : > { %2312 = vmatprep.mubr.f32.mxu0 %v1728_v24  ;;  %6893 = vmatprep.mubr.msk.f32.mxu1 %vm734_vm2, %v1078_v0  ;;  %v1703_v44 = vsel %vm734_vm2, %v966_v48, %v7428_v38  ;;  %v1736_v24 = vsel %vm734_vm2, %v1032_v1, %v7432_v40  ;;  %v1033_v0 = vld [vmem:[#allocation2 + $0x1a0] sm:$0xff] }
 0x1f2   : > { %v3625_v38 = vld [vmem:[%s12138_s5 + $0x20] sm:$0xff] }
 0x1f4   : > { %2313 = vmatmul.mubr.f32.gmra.mxu0 %v1696_v50  ;;  %6894 = vmatmul.mubr.msk.f32.gmra.mxu1 %vm734_vm2, %v1079_v45  ;;  %v1095_v50 = vld [vmem:[#allocation2 + $0x18a] sm:$0xff] }
 0x1f5   : > { %2317 = vmatprep.mubr.f32.mxu0 %v1729_v62  ;;  %6896 = vmatprep.mubr.msk.f32.mxu1 %vm734_vm2, %v1080_v55 }
 0x1f8   : > { %2318 = vmatmul.mubr.f32.gmra.mxu0 %v1697_v34  ;;  %6897 = vmatmul.mubr.msk.f32.gmra.mxu1 %vm734_vm2, %v1081_v11 }
 0x1f9   : > { %2322 = vmatprep.mubr.f32.mxu0 %v1730_v20  ;;  %6899 = vmatprep.mubr.msk.f32.mxu1 %vm734_vm2, %v1082_v60  ;;  %v3636_v20 = vld [vmem:[%s12138_s5 + $0x78] sm:$0xff] }
 0x1fa   : > { %3797 = vmatpush1.msra.mxu0 %v3636_v20  ;;  %v3650_v20 = vld [vmem:[%s12138_s5 + $0xe8] sm:$0xff] }
 0x1fb   : > { %3798 = vmatprep.subr.mxu0 %v12144_v36 }
 0x1fc   : > { %2323 = vmatmul.mubr.f32.gmra.mxu0 %v1698_v12  ;;  %6900 = vmatmul.mubr.msk.f32.gmra.mxu1 %vm734_vm2, %v1083_v18  ;;  %v3634_v18 = vld [vmem:[%s12138_s5 + $0x68] sm:$0xff] }
 0x1fd   : > { %2327 = vmatprep.mubr.f32.mxu0 %v1731_v15  ;;  %6902 = vmatprep.mubr.msk.f32.mxu1 %vm734_vm2, %v1084_v13  ;;  %v3633_v13 = vld [vmem:[%s12138_s5 + $0x60] sm:$0xff] }
 0x1fe   : > { %3799 = vmatpush1.msra.mxu0 %v3635_v10 }
 0x1ff   : > { %3800 = vmatprep.subr.mxu0 %v12144_v36 }
 0x200   : > { %2328 = vmatmul.mubr.f32.gmra.mxu0 %v1699_v8  ;;  %6903 = vmatmul.mubr.msk.f32.gmra.mxu1 %vm734_vm2, %v1085_v28 }
 0x201   : > { %2332 = vmatprep.mubr.f32.mxu0 %v1732_v22  ;;  %6905 = vmatprep.mubr.msk.f32.mxu1 %vm734_vm2, %v1086_v43 }
 0x202   : > { %3801 = vmatpush1.msra.mxu0 %v3634_v18 }
 0x203   : > { %3802 = vmatprep.subr.mxu0 %v12144_v36 }
 0x204   : > { %2333 = vmatmul.mubr.f32.gmra.mxu0 %v1700_v56  ;;  %6906 = vmatmul.mubr.msk.f32.gmra.mxu1 %vm734_vm2, %v9392_v16  ;;  %v1734_v16 = vsel %vm734_vm2, %v1030_v9, %v7422_v46  ;;  %v3629_v56 = vld [vmem:[%s12138_s5 + $0x40] sm:$0xff] }
 0x205   : > { %2337 = vmatprep.mubr.f32.mxu0 %v1733_v33  ;;  %6908 = vmatprep.mubr.msk.f32.mxu1 %vm734_vm2, %v9405_v17  ;;  %v1702_v17 = vsel %vm734_vm2, %v965_v27, %v7423_v54 }
 0x206   : > { %3803 = vmatpush1.msra.mxu0 %v3633_v13 }
 0x207   : > { %3804 = vmatprep.subr.mxu0 %v12144_v36 }
 0x208   : > { %2338 = vmatmul.mubr.f32.gmra.mxu0 %v1701_v26  ;;  %6909 = vmatmul.mubr.msk.f32.gmra.mxu1 %vm734_vm2, %v9418_v47  ;;  %v7436_v47 = vpop.permute.xlu1 %7435  ;;  %v3627_v26 = vld [vmem:[%s12138_s5 + $0x30] sm:$0xff] }
 0x209   : > { %2342 = vmatprep.mubr.f32.mxu0 %v1734_v16  ;;  %6911 = vmatprep.mubr.msk.f32.mxu1 %vm734_vm2, %v9431_v49  ;;  %v7433_v49 = vunpack.i.h.bf16 %v7431_v57  ;;  %v7437_v61 = vunpack.i.l.bf16 %v7436_v47  ;;  %v3626_v16 = vld [vmem:[%s12138_s5 + $0x28] sm:$0xff] }
 0x20a   : > { %3805 = vmatpush1.msra.mxu0 %v3632_v14 }
 0x20b   : > { %v1704_v41 = vsel %vm734_vm2, %v967_v63, %v7433_v49  ;;  %v1737_v45 = vsel %vm734_vm2, %v1033_v0, %v7437_v61  ;;  %3806 = vmatprep.subr.mxu0 %v12144_v36  ;;  %v3622_v0 = vld [vmem:[%s12138_s5 + $0x8] sm:$0xff] }
 0x20c   : > { %2343 = vmatmul.mubr.f32.gmra.mxu0 %v1702_v17  ;;  %6912 = vmatmul.mubr.msk.f32.gmra.mxu1 %vm734_vm2, %v9444_v37  ;;  %v1094_v37 = vld [vmem:[#allocation2 + $0x182] sm:$0xff] }
 0x20d   : > { %2347 = vmatprep.mubr.f32.mxu0 %v1735_v29  ;;  %6914 = vmatprep.mubr.msk.f32.mxu1 %vm734_vm2, %v9457_v25  ;;  %v7438_v25 = vunpack.i.h.bf16 %v7436_v47  ;;  %v3624_v29 = vld [vmem:[%s12138_s5 + $0x18] sm:$0xff] }
 0x20e   : > { %3807 = vmatpush1.msra.mxu0 %v3631_v23  ;;  %v3648_v23 = vld [vmem:[%s12138_s5 + $0xd8] sm:$0xff] }
 0x20f   : > { %v1705_v62 = vsel %vm734_vm2, %v968_v59, %v7438_v25  ;;  %3808 = vmatprep.subr.mxu0 %v12144_v36  ;;  %v3621_v25 = vld [vmem:[%s12138_s5] sm:$0xff] }
 0x210   : > { %2348 = vmatmul.mubr.f32.gmra.mxu0 %v1703_v44  ;;  %6915 = vmatmul.mubr.msk.f32.gmra.mxu1 %vm734_vm2, %v9470_v53  ;;  %v1097_v53 = vld [vmem:[#allocation2 + $0x1a2] sm:$0xff] }
 0x211   : > { %2352 = vmatprep.mubr.f32.mxu0 %v1736_v24  ;;  %6917 = vmatprep.mubr.msk.f32.mxu1 %vm734_vm2, %v1094_v37  ;;  %v3623_v37 = vld [vmem:[%s12138_s5 + $0x10] sm:$0xff] }
 0x212   : > { %3809 = vmatpush1.msra.mxu0 %v3630_v31 }
 0x213   : > { %3810 = vmatprep.subr.mxu0 %v12144_v36 }
 0x214   : > { %2353 = vmatmul.mubr.f32.gmra.mxu0 %v1704_v41  ;;  %6918 = vmatmul.mubr.msk.f32.gmra.mxu1 %vm734_vm2, %v1095_v50 }
 0x215   : > { %2357 = vmatprep.mubr.f32.mxu0 %v1737_v45  ;;  %6920 = vmatprep.mubr.msk.f32.mxu1 %vm734_vm2, %v1096_v4  ;;  %v3652_v45 = vld [vmem:[%s12138_s5 + $0xf8] sm:$0xff] }
 0x216   : > { %3811 = vmatpush1.msra.mxu0 %v3629_v56 }
 0x217   : > { %3812 = vmatprep.subr.mxu0 %v12144_v36 }
 0x218   : > { %2358 = vmatmul.mubr.f32.gmra.mxu0 %v1705_v62  ;;  %6921 = vmatmul.mubr.msk.f32.gmra.mxu1 %vm734_vm2, %v1097_v53  ;;  %v3651_v62 = vld [vmem:[%s12138_s5 + $0xf0] sm:$0xff] }
 0x219   : > { %3813 = vmatpush1.msra.mxu0 %v3628_v39 }
 0x21a   : > { %3814 = vmatprep.subr.mxu0 %v12144_v36 }
 0x21b   : > { %3815 = vmatpush1.msra.mxu0 %v3627_v26 }
 0x21c   : > { %v9564_v55 = vpop.f32.mrf.mxu1  ;;  %3816 = vmatprep.subr.mxu0 %v12144_v36 }
 0x21d   : > { %3817 = vmatpush1.msra.mxu0 %v3626_v16  ;;  %v1980_v1 = vadd.f32 %v9645_v30, %v9564_v55  ;;  %v3646_v16 = vld [vmem:[%s12138_s5 + $0xc8] sm:$0xff] }
 0x21e   : > { %v1981_v3 = vpop.f32.mrf.mxu1  ;;  %3818 = vmatprep.subr.mxu0 %v12144_v36 }
 0x21f   : > { %3819 = vmatpush1.msra.mxu0 %v3625_v38 }
 0x220   : > { %v9566_v52 = vpop.f32.mrf.mxu1  ;;  %3820 = vmatprep.subr.mxu0 %v12144_v36 }
 0x221   : > { %3821 = vmatpush1.msra.mxu0 %v3624_v29 }
 0x222   : > { %v1986_v19 = vpop.f32.mrf.mxu1  ;;  %3822 = vmatprep.subr.mxu0 %v12144_v36 }
 0x223   : > { %3823 = vmatpush1.msra.mxu0 %v3623_v37  ;;  %v3644_v37 = vld [vmem:[%s12138_s5 + $0xb8] sm:$0xff] }
 0x224   : > { %v9568_v34 = vpop.f32.mrf.mxu1  ;;  %3824 = vmatprep.subr.mxu0 %v12144_v36 }
 0x225   : > { %3825 = vmatpush1.msra.mxu0 %v3622_v0 }
 0x226   : > { %v1991_v11 = vpop.f32.mrf.mxu1  ;;  %3826 = vmatprep.subr.mxu0 %v12144_v36 }
 0x227   : > { %3827 = vmatpush1.msra.mxu0 %v3621_v25 }
 0x228   : > { %v9570_v35 = vpop.f32.mrf.mxu1  ;;  %3828 = vmatprep.subr.mxu0 %v12144_v36 }
 0x229   : > { %3829 = vmatpush2.msra.mxu0 %v3652_v45  ;;  %v3643_v45 = vld [vmem:[%s12138_s5 + $0xb0] sm:$0xff] }
 0x22a   : > { %v1996_v60 = vpop.f32.mrf.mxu1  ;;  %3830 = vmatprep.subr.mxu0 %v12144_v36 }
 0x22b   : > { %3831 = vmatpush2.msra.mxu0 %v3651_v62 }
 0x22c   : > { %v9576_v7 = vpop.f32.mrf.mxu1  ;;  %3832 = vmatprep.subr.mxu0 %v12144_v36 }
 0x22d   : > { %3833 = vmatpush2.msra.mxu0 %v3650_v20 }
 0x22e   : > { %v2001_v2 = vpop.f32.mrf.mxu1  ;;  %3834 = vmatprep.subr.mxu0 %v12144_v36 }
 0x230   : > { %v9582_v12 = vpop.f32.mrf.mxu1 }
 0x232   : > { %v2006_v5 = vpop.f32.mrf.mxu1 }
 0x233   : > { %v3649_v5 = vld [vmem:[%s12138_s5 + $0xe0] sm:$0xff] }
 0x234   : > { %v9588_v15 = vpop.f32.mrf.mxu1  ;;  %3835 = vmatpush2.msra.mxu0 %v3649_v5 }
 0x235   : > { %3836 = vmatprep.subr.mxu0 %v12144_v36 }
 0x236   : > { %v2011_v51 = vpop.f32.mrf.mxu1  ;;  %3837 = vmatpush2.msra.mxu0 %v3648_v23  ;;  %v3641_v23 = vld [vmem:[%s12138_s5 + $0xa0] sm:$0xff] }
 0x237   : > { %3838 = vmatprep.subr.mxu0 %v12144_v36 }
 0x238   : > { %v9594_v6 = vpop.f32.mrf.mxu1 }
 0x23a   : > { %v2016_v8 = vpop.f32.mrf.mxu1 }
 0x23c   : > { %v9600_v28 = vpop.f32.mrf.mxu1 }
 0x23e   : > { %v2021_v22 = vpop.f32.mrf.mxu1 }
 0x240   : > { %v9606_v43 = vpop.f32.mrf.mxu1 }
 0x242   : > { %v2026_v32 = vpop.f32.mrf.mxu1 }
 0x244   : > { %v9612_v58 = vpop.f32.mrf.mxu1 }
 0x246   : > { %v2031_v46 = vpop.f32.mrf.mxu1 }
 0x247   : > { %v3647_v46 = vld [vmem:[%s12138_s5 + $0xd0] sm:$0xff] }
 0x248   : > { %v9618_v33 = vpop.f32.mrf.mxu1  ;;  %3839 = vmatpush2.msra.mxu0 %v3647_v46 }
 0x249   : > { %3840 = vmatprep.subr.mxu0 %v12144_v36 }
 0x24a   : > { %v2036_v21 = vpop.f32.mrf.mxu1  ;;  %3841 = vmatpush2.msra.mxu0 %v3646_v16 }
 0x24b   : > { %3842 = vmatprep.subr.mxu0 %v12144_v36 }
 0x24c   : > { %v9624_v54 = vpop.f32.mrf.mxu1 }
 0x24e   : > { %v2041_v9 = vpop.f32.mrf.mxu1 }
 0x250   : > { %v9630_v42 = vpop.f32.mrf.mxu1 }
 0x252   : > { %v2046_v57 = vpop.f32.mrf.mxu1 }
 0x254   : > { %v9636_v27 = vpop.f32.mrf.mxu1 }
 0x256   : > { %v2051_v17 = vpop.f32.mrf.mxu1 }
 0x258   : > { %v9647_v40 = vpop.f32.mrf.mxu1 }
 0x25a   : > { %v2056_v47 = vpop.f32.mrf.mxu1 }
 0x25b   : > { %v3645_v47 = vld [vmem:[%s12138_s5 + $0xc0] sm:$0xff] }
 0x25c   : > { %v9655_v48 = vpop.f32.mrf.mxu1  ;;  %v2204_v49 = vpop.f32.mrf.mxu0  ;;  %3843 = vmatpush2.msra.mxu0 %v3645_v47 }
 0x25d   : > { %v9657_v44 = vadd.f32 %v2204_v49, %v1980_v1  ;;  %3844 = vmatprep.subr.mxu0 %v12144_v36 }
 0x25e   : > { %v2061_v61 = vpop.f32.mrf.mxu1  ;;  %v2206_v24 = vpop.f32.mrf.mxu0  ;;  %3845 = vmatpush2.msra.mxu0 %v3644_v37 }
 0x25f   : > { %3846 = vmatprep.subr.mxu0 %v12144_v36 }
 0x260   : > { %v9665_v63 = vpop.f32.mrf.mxu1  ;;  %v9667_v4 = vpop.f32.mrf.mxu0  ;;  %3847 = vmatpush2.msra.mxu0 %v3643_v45  ;;  %v1985_v45 = vadd.f32 %v9645_v30, %v9566_v52 }
 0x261   : > { %3848 = vmatprep.subr.mxu0 %v12144_v36 }
 0x262   : > { %v2066_v41 = vpop.f32.mrf.mxu1  ;;  %v2211_v50 = vpop.f32.mrf.mxu0 }
 0x264   : > { %v9677_v53 = vpop.f32.mrf.mxu1  ;;  %v9679_v59 = vpop.f32.mrf.mxu0 }
 0x266   : > { %v2071_v55 = vpop.f32.mrf.mxu1  ;;  %v2216_v3 = vpop.f32.mrf.mxu0 }
 0x268   : > { %v9686_v19 = vpop.f32.mrf.mxu1  ;;  %v9688_v11 = vpop.f32.mrf.mxu0 }
 0x26a   : > { %v2076_v60 = vpop.f32.mrf.mxu1  ;;  %v2221_v10 = vpop.f32.mrf.mxu0 }
 0x26b   : > { %v3642_v60 = vld [vmem:[%s12138_s5 + $0xa8] sm:$0xff] }
 0x26c   : > { %v9695_v2 = vpop.f32.mrf.mxu1  ;;  %v9697_v18 = vpop.f32.mrf.mxu0  ;;  %3849 = vmatpush2.msra.mxu0 %v3642_v60 }
 0x26d   : > { %3850 = vmatprep.subr.mxu0 %v12144_v36 }
 0x26e   : > { %v2081_v13 = vpop.f32.mrf.mxu1  ;;  %v2226_v51 = vpop.f32.mrf.mxu0  ;;  %3851 = vmatpush2.msra.mxu0 %v3641_v23 }
 0x26f   : > { %3852 = vmatprep.subr.mxu0 %v12144_v36 }
 0x270   : > { %v9703_v14 = vpop.f32.mrf.mxu1  ;;  %v9705_v8 = vpop.f32.mrf.mxu0 }
 0x272   : > { %v2086_v22 = vpop.f32.mrf.mxu1  ;;  %v2231_v31 = vpop.f32.mrf.mxu0 }
 0x274   : > { %v9711_v32 = vpop.f32.mrf.mxu1  ;;  %v9713_v56 = vpop.f32.mrf.mxu0 }
 0x276   : > { %v2091_v39 = vpop.f32.mrf.mxu1  ;;  %v2236_v21 = vpop.f32.mrf.mxu0 }
 0x277   : > { %v3640_v21 = vld [vmem:[%s12138_s5 + $0x98] sm:$0xff] }
 0x278   : > { %v9719_v26 = vpop.f32.mrf.mxu1  ;;  %v9721_v9 = vpop.f32.mrf.mxu0  ;;  %3853 = vmatpush2.msra.mxu0 %v3640_v21 }
 0x279   : > { %3854 = vmatprep.subr.mxu0 %v12144_v36 }
 0x27a   : > { %v2096_v57 = vpop.f32.mrf.mxu1  ;;  %v2241_v38 = vpop.f32.mrf.mxu0 }
 0x27c   : > { %v9727_v17 = vpop.f32.mrf.mxu1  ;;  %v9729_v29 = vpop.f32.mrf.mxu0 }
 0x27e   : > { %v2101_v1 = vpop.f32.mrf.mxu1  ;;  %v2246_v49 = vpop.f32.mrf.mxu0 }
 0x27f   : > { %v3639_v1 = vld [vmem:[%s12138_s5 + $0x90] sm:$0xff] }
 0x280   : > { %v9735_v61 = vpop.f32.mrf.mxu1  ;;  %v9737_v24 = vpop.f32.mrf.mxu0  ;;  %3855 = vmatpush2.msra.mxu0 %v3639_v1 }
 0x281   : > { %3856 = vmatprep.subr.mxu0 %v12144_v36 }
 0x282   : > { %v2106_v0 = vpop.f32.mrf.mxu1  ;;  %v2251_v25 = vpop.f32.mrf.mxu0 }
 0x284   : > { %v9743_v41 = vpop.f32.mrf.mxu1  ;;  %v9745_v50 = vpop.f32.mrf.mxu0 }
 0x286   : > { %v2111_v62 = vpop.f32.mrf.mxu1  ;;  %v2256_v55 = vpop.f32.mrf.mxu0 }
 0x287   : > { %v3638_v62 = vld [vmem:[%s12138_s5 + $0x88] sm:$0xff] }
 0x288   : > { %v9751_v3 = vpop.f32.mrf.mxu1  ;;  %v9753_v20 = vpop.f32.mrf.mxu0  ;;  %3857 = vmatpush2.msra.mxu0 %v3638_v62 }
 0x289   : > { %3858 = vmatprep.subr.mxu0 %v12144_v36 }
 0x28a   : > { %v2116_v10 = vpop.f32.mrf.mxu1  ;;  %v2261_v5 = vpop.f32.mrf.mxu0 }
 0x28b   : > { %v2210_v10 = vadd.f32 %v9667_v4, %v1985_v45  ;;  %v3637_v45 = vld [vmem:[%s12138_s5 + $0x80] sm:$0xff] }
 0x28c   : > { %v9759_v13 = vpop.f32.mrf.mxu1  ;;  %v9761_v51 = vpop.f32.mrf.mxu0  ;;  %3859 = vmatpush2.msra.mxu0 %v3637_v45 }
 0x28d   : > { %4021 = vmatprep.subr.mxu0 %v12144_v36 }
 0x28e   : > { %v2121_v22 = vpop.f32.mrf.mxu1  ;;  %v2266_v31 = vpop.f32.mrf.mxu0 }
 0x28f   : > { %v1995_v22 = vadd.f32 %v9645_v30, %v9570_v35  ;;  %v2005_v35 = vadd.f32 %v9645_v30, %v9582_v12 }
 0x290   : > { %v9767_v46 = vpop.f32.mrf.mxu1  ;;  %v9769_v39 = vpop.f32.mrf.mxu0 }
 0x292   : > { %v2126_v16 = vpop.f32.mrf.mxu1  ;;  %v2271_v57 = vpop.f32.mrf.mxu0 }
 0x293   : > { %v1990_v16 = vadd.f32 %v9645_v30, %v9568_v34  ;;  %v2220_v57 = vadd.f32 %v9688_v11, %v1995_v22 }
 0x294   : > { %v9775_v38 = vpop.f32.mrf.mxu1  ;;  %v9777_v47 = vpop.f32.mrf.mxu0 }
 0x295   : > { %v2215_v62 = vadd.f32 %v9679_v59, %v1990_v16 }
 0x296   : > { %v2131_v49 = vpop.f32.mrf.mxu1  ;;  %v2276_v37 = vpop.f32.mrf.mxu0 }
 0x298   : > { %v9783_v0 = vpop.f32.mrf.mxu1  ;;  %v9785_v25 = vpop.f32.mrf.mxu0 }
 0x29a   : > { %v2136_v55 = vpop.f32.mrf.mxu1  ;;  %v2281_v60 = vpop.f32.mrf.mxu0 }
 0x29c   : > { %v9794_v5 = vpop.f32.mrf.mxu0  ;;  %v6877_v23 = vpop.f32.mrf.mxu1 }
 0x29d   : > { %v2435_v31 = vadd.f32 %v6877_v23, %v2210_v10  ;;  %v2230_v10 = vadd.f32 %v9705_v8, %v2005_v35 }
 0x29e   : > { %v2286_v21 = vpop.f32.mrf.mxu0  ;;  %v2429_v52 = vpop.f32.mrf.mxu1 }
 0x29f   : > { %v2589_v1 = vmax.f32 %v2435_v31, 0.0  ;;  %v2430_v49 = vadd.f32 %v2429_v52, %v9657_v44  ;;  %v2000_v44 = vadd.f32 %v9645_v30, %v9576_v7  ;;  %v3668_v31 = vld [vmem:[%s12138_s5 + $0x178] sm:$0xff]  ;;  %v2015_v21 = vadd.f32 %v9645_v30, %v9594_v6 }
 0x2a0   : > { %v9802_v4 = vpop.f32.mrf.mxu0  ;;  %v6880_v37 = vpop.f32.mrf.mxu1  ;;  %7075 = vmatpush1.msra.mxu1 %v3668_v31 }
 0x2a1   : > { %2661 = vst.msk [vmem:[#allocation3 + $0x21] sm:$0xff] %vm734_vm2, %v2589_v1  ;;  %v2588_v34 = vmax.f32 %v2430_v49, 0.0  ;;  %v2445_v55 = vadd.f32 %v6880_v37, %v2220_v57  ;;  %v2225_v52 = vadd.f32 %v9697_v18, %v2000_v44  ;;  %7044 = vmatprep.subr.mxu1 %v12144_v36  ;;  %v2010_v1 = vadd.f32 %v9645_v30, %v9588_v15 }
 0x2a2   : > { %v2291_v11 = vpop.f32.mrf.mxu0  ;;  %v2439_v60 = vpop.f32.mrf.mxu1  ;;  %v2240_v49 = vadd.f32 %v9721_v9, %v2015_v21  ;;  %v2025_v18 = vadd.f32 %v9645_v30, %v9606_v43  ;;  %v3667_v9 = vld [vmem:[%s12138_s5 + $0x170] sm:$0xff] }
 0x2a3   : > { %2660 = vst.msk [vmem:[#allocation3 + $0x19] sm:$0xff] %vm734_vm2, %v2588_v34  ;;  %v2591_v23 = vmax.f32 %v2445_v55, 0.0  ;;  %v2440_v12 = vadd.f32 %v2439_v60, %v2215_v62  ;;  %v2725_v62 = vld [vmem:[#allocation3 + $0x9] sm:$0xff]  ;;  %v2724_v34 = vld [vmem:[#allocation3 + $0x1] sm:$0xff]  ;;  %v2235_v55 = vadd.f32 %v9713_v56, %v2010_v1  ;;  %v2020_v60 = vadd.f32 %v9645_v30, %v9600_v28  ;;  %7076 = vmatpush1.msra.mxu1 %v3667_v9 }
 0x2a4   : > { %v9816_v22 = vpop.f32.mrf.mxu0  ;;  %v6883_v59 = vpop.f32.mrf.mxu1  ;;  %v2250_v43 = vadd.f32 %v9737_v24, %v2025_v18  ;;  %7045 = vmatprep.subr.mxu1 %v12144_v36  ;;  %v3666_v24 = vld [vmem:[%s12138_s5 + $0x168] sm:$0xff]  ;;  %v9867_v9 = vld [vmem:[%s12138_s5 + $0x160] sm:$0xff] }
 0x2a5   : > { %2663 = vst.msk [vmem:[#allocation3 + $0x39] sm:$0xff] %vm734_vm2, %v2591_v23  ;;  %v2590_v7 = vmax.f32 %v2440_v12, 0.0  ;;  %v2455_v8 = vadd.f32 %v6883_v59, %v2230_v10  ;;  %7077 = vmatpush1.msra.mxu1 %v3666_v24 }
 0x2a6   : > { %v2296_v16 = vpop.f32.mrf.mxu0  ;;  %v2449_v57 = vpop.f32.mrf.mxu1  ;;  %7046 = vmatprep.subr.mxu1 %v12144_v36 }
 0x2a7   : > { %2662 = vst.msk [vmem:[#allocation3 + $0x31] sm:$0xff] %vm734_vm2, %v2590_v7  ;;  %v2593_v37 = vmax.f32 %v2455_v8, 0.0  ;;  %v2450_v6 = vadd.f32 %v2449_v57, %v2225_v52  ;;  %v2035_v52 = vadd.f32 %v9645_v30, %v9618_v33  ;;  %v2245_v8 = vadd.f32 %v9729_v29, %v2020_v60  ;;  %7078 = vmatpush1.msra.mxu1 %v9867_v9 }
 0x2a8   : > { %v9832_v45 = vpop.f32.mrf.mxu0  ;;  %v6886_v35 = vpop.f32.mrf.mxu1  ;;  %v2727_v1 = vld [vmem:[#allocation3 + $0x21] sm:$0xff]  ;;  %v2030_v33 = vadd.f32 %v9645_v30, %v9612_v58  ;;  %7047 = vmatprep.subr.mxu1 %v12144_v36 }
 0x2a9   : > { %2665 = vst.msk [vmem:[#allocation3 + $0x51] sm:$0xff] %vm734_vm2, %v2593_v37  ;;  %v2592_v11 = vmax.f32 %v2450_v6, 0.0  ;;  %v2465_v15 = vadd.f32 %v6886_v35, %v2240_v49  ;;  %v2260_v49 = vadd.f32 %v9753_v20, %v2035_v52 }
 0x2aa   : > { %v2301_v44 = vpop.f32.mrf.mxu0  ;;  %v2459_v10 = vpop.f32.mrf.mxu1  ;;  %v2789_v23 = vld [vmem:[#allocation3 + $0x20] sm:$0xff]  ;;  %v2788_v12 = vld [vmem:[#allocation3 + $0x18] sm:$0xff]  ;;  %v2255_v60 = vadd.f32 %v9745_v50, %v2030_v33 }
 0x2ab   : > { %2664 = vst.msk [vmem:[#allocation3 + $0x49] sm:$0xff] %vm734_vm2, %v2592_v11  ;;  %v2595_v56 = vmax.f32 %v2465_v15, 0.0  ;;  %v2460_v59 = vadd.f32 %v2459_v10, %v2235_v55  ;;  %v7444_v31 = vpack.i.bf16 %v2725_v62, %v2789_v23  ;;  %v7439_v21 = vpack.i.bf16 %v2724_v34, %v2788_v12  ;;  %v2726_v35 = vld [vmem:[#allocation3 + $0x19] sm:$0xff] }
 0x2ac   : > { %v9846_v7 = vpop.f32.mrf.mxu0  ;;  %v6889_v28 = vpop.f32.mrf.mxu1  ;;  %v2045_v15 = vadd.f32 %v9645_v30, %v9630_v42  ;;  %v9873_v10 = vld [vmem:[#allocation3 + $0x39] sm:$0xff]  ;;  %v2040_v42 = vadd.f32 %v9645_v30, %v9624_v54  ;;  %v2055_v54 = vadd.f32 %v9645_v30, %v9647_v40  ;;  %v2050_v40 = vadd.f32 %v9645_v30, %v9636_v27 }
 0x2ad   : > { %2667 = vst.msk [vmem:[#allocation3 + $0x69] sm:$0xff] %vm734_vm2, %v2595_v56  ;;  %v2594_v16 = vmax.f32 %v2460_v59, 0.0  ;;  %v2475_v57 = vadd.f32 %v6889_v28, %v2250_v43  ;;  %7445 = vrot.lane.b32.xlu1 %v7444_v31, %s8254_s29  ;;  %7440 = vrot.lane.b32.xlu0 %v7439_v21, %s8254_s29  ;;  %v2065_v27 = vadd.f32 %v9645_v30, %v9665_v63 }
 0x2ae   : > { %v2306_v37 = vpop.f32.mrf.mxu0  ;;  %v2469_v6 = vpop.f32.mrf.mxu1  ;;  %v2791_v18 = vld [vmem:[#allocation3 + $0x38] sm:$0xff]  ;;  %v2790_v62 = vld [vmem:[#allocation3 + $0x30] sm:$0xff]  ;;  %v2270_v23 = vadd.f32 %v9769_v39, %v2045_v15  ;;  %v2060_v63 = vadd.f32 %v9645_v30, %v9655_v48  ;;  %v2075_v48 = vadd.f32 %v9645_v30, %v9686_v19 }
 0x2af   : > { %2666 = vst.msk [vmem:[#allocation3 + $0x61] sm:$0xff] %vm734_vm2, %v2594_v16  ;;  %v2597_v29 = vmax.f32 %v2475_v57, 0.0  ;;  %v2470_v34 = vadd.f32 %v2469_v6, %v2245_v8  ;;  %v7454_v55 = vpack.i.bf16 %v2727_v1, %v2791_v18  ;;  %v7449_v11 = vpack.i.bf16 %v2726_v35, %v2790_v62  ;;  %v9878_v31 = vld [vmem:[#allocation3 + $0x31] sm:$0xff]  ;;  %v9892_v16 = vld [vmem:[%s12138_s5 + $0x158] sm:$0xff] }
 0x2b0   : > { %v9862_v58 = vpop.f32.mrf.mxu0  ;;  %v6892_v20 = vpop.f32.mrf.mxu1  ;;  %v2265_v57 = vadd.f32 %v9761_v51, %v2040_v42  ;;  %v2280_v37 = vadd.f32 %v9785_v25, %v2055_v54  ;;  %7079 = vmatpush1.msra.mxu1 %v9892_v16  ;;  %v9953_v19 = vld [vmem:[%s12138_s5 + $0x140] sm:$0xff] }
 0x2b1   : > { %2669 = vst.msk [vmem:[#allocation3 + $0x81] sm:$0xff] %vm734_vm2, %v2597_v29  ;;  %v2596_v43 = vmax.f32 %v2470_v34, 0.0  ;;  %v2485_v44 = vadd.f32 %v6892_v20, %v2260_v49  ;;  %7455 = vrot.lane.b32.xlu1 %v7454_v55, %s8254_s29  ;;  %7450 = vrot.lane.b32.xlu0 %v7449_v11, %s8254_s29  ;;  %v9898_v49 = vld [vmem:[#allocation3 + $0x51] sm:$0xff]  ;;  %v9917_v20 = vld [vmem:[%s12138_s5 + $0x150] sm:$0xff] }
 0x2b2   : > { %v2311_v12 = vpop.f32.mrf.mxu0  ;;  %v2479_v56 = vpop.f32.mrf.mxu1  ;;  %v2793_v59 = vld [vmem:[#allocation3 + $0x50] sm:$0xff]  ;;  %v2792_v50 = vld [vmem:[#allocation3 + $0x48] sm:$0xff]  ;;  %7048 = vmatprep.subr.mxu1 %v12144_v36 }
 0x2b3   : > { %2668 = vst.msk [vmem:[#allocation3 + $0x79] sm:$0xff] %vm734_vm2, %v2596_v43  ;;  %v2599_v21 = vmax.f32 %v2485_v44, 0.0  ;;  %v2480_v52 = vadd.f32 %v2479_v56, %v2255_v60  ;;  %v7464_v28 = vpack.i.bf16 %v9873_v10, %v2793_v59  ;;  %v7459_v24 = vpack.i.bf16 %v9878_v31, %v2792_v50  ;;  %v9903_v62 = vld [vmem:[#allocation3 + $0x49] sm:$0xff]  ;;  %7080 = vmatpush1.msra.mxu1 %v9917_v20 }
 0x2b4   : > { %v9887_v39 = vpop.f32.mrf.mxu0  ;;  %v6895_v8 = vpop.f32.mrf.mxu1  ;;  %v2275_v60 = vadd.f32 %v9777_v47, %v2050_v40  ;;  %v9923_v42 = vld [vmem:[#allocation3 + $0x69] sm:$0xff]  ;;  %7049 = vmatprep.subr.mxu1 %v12144_v36 }
 0x2b5   : > { %2671 = vst.msk [vmem:[#allocation3 + $0x99] sm:$0xff] %vm734_vm2, %v2599_v21  ;;  %v2598_v1 = vmax.f32 %v2480_v52, 0.0  ;;  %v2495_v33 = vadd.f32 %v6895_v8, %v2270_v23  ;;  %7465 = vrot.lane.b32.xlu1 %v7464_v28, %s8254_s29  ;;  %7460 = vrot.lane.b32.xlu0 %v7459_v24, %s8254_s29  ;;  %v2290_v23 = vadd.f32 %v9802_v4, %v2065_v27  ;;  %v9942_v8 = vld [vmem:[%s12138_s5 + $0x148] sm:$0xff] }
 0x2b6   : > { %v2316_v6 = vpop.f32.mrf.mxu0  ;;  %v2489_v18 = vpop.f32.mrf.mxu1  ;;  %v2795_v35 = vld [vmem:[#allocation3 + $0x68] sm:$0xff]  ;;  %v2794_v51 = vld [vmem:[#allocation3 + $0x60] sm:$0xff]  ;;  %7081 = vmatpush1.msra.mxu1 %v9942_v8 }
 0x2b7   : > { %2670 = vst.msk [vmem:[#allocation3 + $0x91] sm:$0xff] %vm734_vm2, %v2598_v1  ;;  %v2601_v29 = vmax.f32 %v2495_v33, 0.0  ;;  %v2490_v34 = vadd.f32 %v2489_v18, %v2265_v57  ;;  %v7474_v55 = vpack.i.bf16 %v9898_v49, %v2795_v35  ;;  %v7469_v11 = vpack.i.bf16 %v9903_v62, %v2794_v51  ;;  %v9928_v50 = vld [vmem:[#allocation3 + $0x61] sm:$0xff]  ;;  %7050 = vmatprep.subr.mxu1 %v12144_v36 }
 0x2b8   : > { %v9912_v25 = vpop.f32.mrf.mxu0  ;;  %v6898_v15 = vpop.f32.mrf.mxu1  ;;  %v2285_v57 = vadd.f32 %v9794_v5, %v2060_v63  ;;  %v9948_v40 = vld [vmem:[#allocation3 + $0x81] sm:$0xff]  ;;  %v2300_v5 = vadd.f32 %v9832_v45, %v2075_v48  ;;  %7082 = vmatpush1.msra.mxu1 %v9953_v19 }
 0x2b9   : > { %2673 = vst.msk [vmem:[#allocation3 + $0xb1] sm:$0xff] %vm734_vm2, %v2601_v29  ;;  %v2600_v43 = vmax.f32 %v2490_v34, 0.0  ;;  %v2505_v44 = vadd.f32 %v6898_v15, %v2280_v37  ;;  %7475 = vrot.lane.b32.xlu1 %v7474_v55, %s8254_s29  ;;  %7470 = vrot.lane.b32.xlu0 %v7469_v11, %s8254_s29  ;;  %v2070_v37 = vadd.f32 %v9645_v30, %v9677_v53 }
 0x2ba   : > { %v2321_v12 = vpop.f32.mrf.mxu0  ;;  %v2499_v56 = vpop.f32.mrf.mxu1  ;;  %v2797_v59 = vld [vmem:[#allocation3 + $0x80] sm:$0xff]  ;;  %v2796_v47 = vld [vmem:[#allocation3 + $0x78] sm:$0xff]  ;;  %v2085_v53 = vadd.f32 %v9645_v30, %v9703_v14  ;;  %v9979_v14 = vld [vmem:[%s12138_s5 + $0x138] sm:$0xff]  ;;  %7051 = vmatprep.subr.mxu1 %v12144_v36 }
 0x2bb   : > { %2672 = vst.msk [vmem:[#allocation3 + $0xa9] sm:$0xff] %vm734_vm2, %v2600_v43  ;;  %v2603_v21 = vmax.f32 %v2505_v44, 0.0  ;;  %v2500_v52 = vadd.f32 %v2499_v56, %v2275_v60  ;;  %v7484_v28 = vpack.i.bf16 %v9923_v42, %v2797_v59  ;;  %v7479_v24 = vpack.i.bf16 %v9928_v50, %v2796_v47  ;;  %v9958_v51 = vld [vmem:[#allocation3 + $0x79] sm:$0xff]  ;;  %7083 = vmatpush1.msra.mxu1 %v9979_v14 }
 0x2bc   : > { %v9937_v4 = vpop.f32.mrf.mxu0  ;;  %v6901_v54 = vpop.f32.mrf.mxu1  ;;  %v2295_v60 = vadd.f32 %v9816_v22, %v2070_v37  ;;  %v9974_v63 = vld [vmem:[#allocation3 + $0x99] sm:$0xff]  ;;  %v2310_v22 = vadd.f32 %v9862_v58, %v2085_v53  ;;  %v2095_v58 = vadd.f32 %v9645_v30, %v9719_v26  ;;  %7052 = vmatprep.subr.mxu1 %v12144_v36 }
 0x2bd   : > { %2675 = vst.msk [vmem:[#allocation3 + $0xc9] sm:$0xff] %vm734_vm2, %v2603_v21  ;;  %v2602_v1 = vmax.f32 %v2500_v52, 0.0  ;;  %v2515_v33 = vadd.f32 %v6901_v54, %v2290_v23  ;;  %7485 = vrot.lane.b32.xlu1 %v7484_v28, %s8254_s29  ;;  %7480 = vrot.lane.b32.xlu0 %v7479_v24, %s8254_s29  ;;  %v2080_v23 = vadd.f32 %v9645_v30, %v9695_v2  ;;  %v9994_v2 = vld [vmem:[%s12138_s5 + $0x130] sm:$0xff]  ;;  %v10010_v26 = vld [vmem:[%s12138_s5 + $0x128] sm:$0xff] }
 0x2be   : > { %v2326_v6 = vpop.f32.mrf.mxu0  ;;  %v2509_v18 = vpop.f32.mrf.mxu1  ;;  %v2799_v35 = vld [vmem:[#allocation3 + $0x98] sm:$0xff]  ;;  %v2798_v29 = vld [vmem:[#allocation3 + $0x90] sm:$0xff]  ;;  %7084 = vmatpush1.msra.mxu1 %v9994_v2 }
 0x2bf   : > { %2674 = vst.msk [vmem:[#allocation3 + $0xc1] sm:$0xff] %vm734_vm2, %v2602_v1  ;;  %v2605_v34 = vmax.f32 %v2515_v33, 0.0  ;;  %v2510_v55 = vadd.f32 %v2509_v18, %v2285_v57  ;;  %v7494_v11 = vpack.i.bf16 %v9948_v40, %v2799_v35  ;;  %v7489_v27 = vpack.i.bf16 %v9958_v51, %v2798_v29  ;;  %v9984_v47 = vld [vmem:[#allocation3 + $0x91] sm:$0xff]  ;;  %7053 = vmatprep.subr.mxu1 %v12144_v36 }
 0x2c0   : > { %v9967_v45 = vpop.f32.mrf.mxu0  ;;  %v6904_v15 = vpop.f32.mrf.mxu1  ;;  %v2305_v1 = vadd.f32 %v9846_v7, %v2080_v23  ;;  %v2090_v6 = vadd.f32 %v9645_v30, %v9711_v32  ;;  %v2320_v7 = vadd.f32 %v9912_v25, %v2095_v58  ;;  %v2105_v32 = vadd.f32 %v9645_v30, %v9735_v61  ;;  %7085 = vmatpush1.msra.mxu1 %v10010_v26 }
 0x2c1   : > { %2677 = vst.msk [vmem:[#allocation3 + $0xe1] sm:$0xff] %vm734_vm2, %v2605_v34  ;;  %v2604_v43 = vmax.f32 %v2510_v55, 0.0  ;;  %v2525_v44 = vadd.f32 %v6904_v15, %v2300_v5  ;;  %7495 = vrot.lane.b32.xlu1 %v7494_v11, %s8254_s29  ;;  %7490 = vrot.lane.b32.xlu0 %v7489_v27, %s8254_s29  ;;  %v10005_v5 = vld [vmem:[#allocation3 + $0xb1] sm:$0xff] }
 0x2c2   : > { %v2331_v12 = vpop.f32.mrf.mxu0  ;;  %v2519_v56 = vpop.f32.mrf.mxu1  ;;  %v2801_v59 = vld [vmem:[#allocation3 + $0xb0] sm:$0xff]  ;;  %v2800_v21 = vld [vmem:[#allocation3 + $0xa8] sm:$0xff]  ;;  %7054 = vmatprep.subr.mxu1 %v12144_v36 }
 0x2c3   : > { %2676 = vst.msk [vmem:[#allocation3 + $0xd9] sm:$0xff] %vm734_vm2, %v2604_v43  ;;  %v2607_v52 = vmax.f32 %v2525_v44, 0.0  ;;  %v2520_v28 = vadd.f32 %v2519_v56, %v2295_v60  ;;  %v7504_v24 = vpack.i.bf16 %v9974_v63, %v2801_v59  ;;  %v7499_v48 = vpack.i.bf16 %v9984_v47, %v2800_v21  ;;  %v10015_v34 = vld [vmem:[#allocation3 + $0xa9] sm:$0xff] }
 0x2c4   : > { %v9998_v54 = vpop.f32.mrf.mxu0  ;;  %v6907_v57 = vpop.f32.mrf.mxu1  ;;  %v10028_v43 = vld [vmem:[%s12138_s5 + $0x120] sm:$0xff]  ;;  %v2315_v44 = vadd.f32 %v9887_v39, %v2090_v6  ;;  %v2100_v12 = vadd.f32 %v9645_v30, %v9727_v17  ;;  %v2330_v56 = vadd.f32 %v9967_v45, %v2105_v32  ;;  %v10049_v17 = vld [vmem:[%s12138_s5 + $0x118] sm:$0xff]  ;;  %v2115_v45 = vadd.f32 %v9645_v30, %v9751_v3  ;;  %v10063_v3 = vld [vmem:[%s12138_s5 + $0x110] sm:$0xff] }
 0x2c5   : > { %2679 = vst.msk [vmem:[#allocation3 + $0xf9] sm:$0xff] %vm734_vm2, %v2607_v52  ;;  %v2606_v33 = vmax.f32 %v2520_v28, 0.0  ;;  %v2535_v37 = vadd.f32 %v6907_v57, %v2310_v22  ;;  %7505 = vrot.lane.b32.xlu1 %v7504_v24, %s8254_s29  ;;  %7500 = vrot.lane.b32.xlu0 %v7499_v48, %s8254_s29  ;;  %v10034_v61 = vld [vmem:[#allocation3 + $0xc9] sm:$0xff] }
 0x2c6   : > { %v2336_v18 = vpop.f32.mrf.mxu0  ;;  %v2529_v35 = vpop.f32.mrf.mxu1  ;;  %v2803_v29 = vld [vmem:[#allocation3 + $0xc8] sm:$0xff]  ;;  %v2802_v55 = vld [vmem:[#allocation3 + $0xc0] sm:$0xff]  ;;  %7086 = vmatpush1.msra.mxu1 %v10028_v43 }
 0x2c7   : > { %2678 = vst.msk [vmem:[#allocation3 + $0xf1] sm:$0xff] %vm734_vm2, %v2606_v33  ;;  %v2609_v11 = vmax.f32 %v2535_v37, 0.0  ;;  %v2530_v27 = vadd.f32 %v2529_v35, %v2305_v1  ;;  %v7514_v53 = vpack.i.bf16 %v10005_v5, %v2803_v29  ;;  %v7509_v15 = vpack.i.bf16 %v10015_v34, %v2802_v55  ;;  %v10039_v28 = vld [vmem:[#allocation3 + $0xc1] sm:$0xff]  ;;  %7055 = vmatprep.subr.mxu1 %v12144_v36 }
 0x2c8   : > { %v2339_v25 = vpop.f32.mrf.mxu0  ;;  %v6910_v60 = vpop.f32.mrf.mxu1  ;;  %v2325_v37 = vadd.f32 %v9937_v4, %v2100_v12  ;;  %v10058_v18 = vld [vmem:[#allocation3 + $0xe1] sm:$0xff]  ;;  %v2110_v35 = vadd.f32 %v9645_v30, %v9743_v41  ;;  %7087 = vmatpush1.msra.mxu1 %v10049_v17  ;;  %v2125_v41 = vadd.f32 %v9645_v30, %v9767_v46 }
 0x2c9   : > { %2681 = vst.msk [vmem:[#allocation3 + $0x111] sm:$0xff] %vm734_vm2, %v2609_v11  ;;  %v2608_v23 = vmax.f32 %v2530_v27, 0.0  ;;  %v2545_v22 = vadd.f32 %v6910_v60, %v2320_v7  ;;  %7515 = vrot.lane.b32.xlu1 %v7514_v53, %s8254_s29  ;;  %7510 = vrot.lane.b32.xlu0 %v7509_v15, %s8254_s29  ;;  %v2340_v29 = vadd.f32 %v2339_v25, %v2115_v45 }
 0x2ca   : > { %v2341_v59 = vpop.f32.mrf.mxu0  ;;  %v2539_v21 = vpop.f32.mrf.mxu1  ;;  %v2805_v52 = vld [vmem:[#allocation3 + $0xe0] sm:$0xff]  ;;  %v2804_v39 = vld [vmem:[#allocation3 + $0xd8] sm:$0xff]  ;;  %7056 = vmatprep.subr.mxu1 %v12144_v36  ;;  %v2335_v12 = vadd.f32 %v9998_v54, %v2110_v35 }
 0x2cb   : > { %2680 = vst.msk [vmem:[#allocation3 + $0x109] sm:$0xff] %vm734_vm2, %v2608_v23  ;;  %v2611_v24 = vmax.f32 %v2545_v22, 0.0  ;;  %v2540_v48 = vadd.f32 %v2539_v21, %v2315_v44  ;;  %v7524_v58 = vpack.i.bf16 %v10034_v61, %v2805_v52  ;;  %v7519_v57 = vpack.i.bf16 %v10039_v28, %v2804_v39  ;;  %v10067_v27 = vld [vmem:[#allocation3 + $0xd9] sm:$0xff]  ;;  %7088 = vmatpush1.msra.mxu1 %v10063_v3 }
 0x2cc   : > { %v2344_v1 = vpop.f32.mrf.mxu0  ;;  %v6913_v33 = vpop.f32.mrf.mxu1  ;;  %v10080_v22 = vld [vmem:[%s12138_s5 + $0x108] sm:$0xff]  ;;  %v2120_v21 = vadd.f32 %v9645_v30, %v9759_v13  ;;  %7057 = vmatprep.subr.mxu1 %v12144_v36  ;;  %v10100_v13 = vld [vmem:[%s12138_s5 + $0x100] sm:$0xff] }
 0x2cd   : > { %2683 = vst.msk [vmem:[#allocation3 + $0x129] sm:$0xff] %vm734_vm2, %v2611_v24  ;;  %v2610_v6 = vmax.f32 %v2540_v48, 0.0  ;;  %v2555_v7 = vadd.f32 %v6913_v33, %v2330_v56  ;;  %7525 = vrot.lane.b32.xlu1 %v7524_v58, %s8254_s29  ;;  %7520 = vrot.lane.b32.xlu0 %v7519_v57, %s8254_s29  ;;  %v10086_v46 = vld [vmem:[#allocation3 + $0xf9] sm:$0xff] }
 0x2ce   : > { %v2346_v4 = vpop.f32.mrf.mxu0  ;;  %v2549_v55 = vpop.f32.mrf.mxu1  ;;  %v2807_v11 = vld [vmem:[#allocation3 + $0xf8] sm:$0xff]  ;;  %v2806_v53 = vld [vmem:[#allocation3 + $0xf0] sm:$0xff]  ;;  %7089 = vmatpush1.msra.mxu1 %v10080_v22  ;;  %v2345_v35 = vadd.f32 %v2344_v1, %v2120_v21  ;;  %v2135_v1 = vadd.f32 %v9645_v30, %v9783_v0  ;;  %v10128_v0 = vld [vmem:[%s12138_s5 + $0x1f0] sm:$0xff] }
 0x2cf   : > { %2682 = vst.msk [vmem:[#allocation3 + $0x121] sm:$0xff] %vm734_vm2, %v2610_v6  ;;  %v2613_v15 = vmax.f32 %v2555_v7, 0.0  ;;  %v2550_v32 = vadd.f32 %v2549_v55, %v2325_v37  ;;  %v7534_v60 = vpack.i.bf16 %v10058_v18, %v2807_v11  ;;  %v7529_v44 = vpack.i.bf16 %v10067_v27, %v2806_v53  ;;  %v10090_v58 = vld [vmem:[#allocation3 + $0xf1] sm:$0xff]  ;;  %7058 = vmatprep.subr.mxu1 %v12144_v36  ;;  %v10111_v11 = vld [vmem:[%s12138_s5 + $0x1f8] sm:$0xff] }
 0x2d0   : > { %v2349_v25 = vpop.f32.mrf.mxu0  ;;  %v6916_v23 = vpop.f32.mrf.mxu1  ;;  %v10106_v55 = vld [vmem:[#allocation3 + $0x111] sm:$0xff]  ;;  %v2130_v53 = vadd.f32 %v9645_v30, %v9775_v38  ;;  %7090 = vmatpush1.msra.mxu1 %v10100_v13 }
 0x2d1   : > { %2685 = vst.msk [vmem:[#allocation3 + $0x141] sm:$0xff] %vm734_vm2, %v2613_v15  ;;  %v2612_v56 = vmax.f32 %v2550_v32, 0.0  ;;  %v2565_v59 = vadd.f32 %v6916_v23, %v2340_v29  ;;  %7535 = vrot.lane.b32.xlu1 %v7534_v60, %s8254_s29  ;;  %7530 = vrot.lane.b32.xlu0 %v7529_v44, %s8254_s29  ;;  %v2350_v52 = vadd.f32 %v2349_v25, %v2125_v41 }
 0x2d2   : > { %v2351_v39 = vpop.f32.mrf.mxu0  ;;  %v2559_v24 = vpop.f32.mrf.mxu1  ;;  %v2809_v48 = vld [vmem:[#allocation3 + $0x110] sm:$0xff]  ;;  %v2808_v54 = vld [vmem:[#allocation3 + $0x108] sm:$0xff]  ;;  %7059 = vmatprep.subr.mxu1 %v12144_v36 }
 0x2d3   : > { %2684 = vst.msk [vmem:[#allocation3 + $0x139] sm:$0xff] %vm734_vm2, %v2612_v56  ;;  %v2615_v57 = vmax.f32 %v2565_v59, 0.0  ;;  %v2560_v45 = vadd.f32 %v2559_v24, %v2335_v12  ;;  %v7544_v33 = vpack.i.bf16 %v10086_v46, %v2809_v48  ;;  %v7539_v37 = vpack.i.bf16 %v10090_v58, %v2808_v54  ;;  %v10117_v44 = vld [vmem:[#allocation3 + $0x109] sm:$0xff]  ;;  %7091 = vmatpush2.msra.mxu1 %v10111_v11 }
 0x2d4   : > { %v2354_v6 = vpop.f32.mrf.mxu0  ;;  %v6919_v7 = vpop.f32.mrf.mxu1  ;;  %v10133_v39 = vld [vmem:[#allocation3 + $0x129] sm:$0xff]  ;;  %7060 = vmatprep.subr.mxu1 %v12144_v36 }
 0x2d5   : > { %2687 = vst.msk [vmem:[#allocation3 + $0x159] sm:$0xff] %vm734_vm2, %v2615_v57  ;;  %v2614_v29 = vmax.f32 %v2560_v45, 0.0  ;;  %v2575_v4 = vadd.f32 %v6919_v7, %v2350_v52  ;;  %7545 = vrot.lane.b32.xlu1 %v7544_v33, %s8254_s29  ;;  %7540 = vrot.lane.b32.xlu0 %v7539_v37, %s8254_s29  ;;  %v2355_v59 = vadd.f32 %v2354_v6, %v2130_v53 }
 0x2d6   : > { %v2356_v15 = vpop.f32.mrf.mxu0  ;;  %v2569_v32 = vpop.f32.mrf.mxu1  ;;  %v2811_v60 = vld [vmem:[#allocation3 + $0x128] sm:$0xff]  ;;  %v2810_v41 = vld [vmem:[#allocation3 + $0x120] sm:$0xff]  ;;  %7092 = vmatpush2.msra.mxu1 %v10128_v0 }
 0x2d7   : > { %2686 = vst.msk [vmem:[#allocation3 + $0x151] sm:$0xff] %vm734_vm2, %v2614_v29  ;;  %v2617_v25 = vmax.f32 %v2575_v4, 0.0  ;;  %v2570_v23 = vadd.f32 %v2569_v32, %v2345_v35  ;;  %v7554_v12 = vpack.i.bf16 %v10106_v55, %v2811_v60  ;;  %v7549_v56 = vpack.i.bf16 %v10117_v44, %v2810_v41  ;;  %v10135_v57 = vld [vmem:[#allocation3 + $0x121] sm:$0xff]  ;;  %v10145_v35 = vld [vmem:[%s12138_s5 + $0x1e8] sm:$0xff]  ;;  %7061 = vmatprep.subr.mxu1 %v12144_v36 }
 0x2d8   : > { %v2359_v38 = vpop.f32.mrf.mxu0  ;;  %v6922_v30 = vpop.f32.mrf.mxu1  ;;  %v10150_v53 = vld [vmem:[#allocation3 + $0x141] sm:$0xff]  ;;  %7093 = vmatpush2.msra.mxu1 %v10145_v35 }
 0x2d9   : > { %2689 = vst.msk [vmem:[#allocation3 + $0x171] sm:$0xff] %vm734_vm2, %v2617_v25  ;;  %v2616_v21 = vmax.f32 %v2570_v23, 0.0  ;;  %v2360_v52 = vadd.f32 %v2359_v38, %v2135_v1  ;;  %7555 = vrot.lane.b32.xlu1 %v7554_v12, %s8254_s29  ;;  %7550 = vrot.lane.b32.xlu0 %v7549_v56, %s8254_s29  ;;  %v10155_v1 = vld [vmem:[%s12138_s5 + $0x1e0] sm:$0xff]  ;;  %v10169_v23 = vld [vmem:[%s12138_s5 + $0x1d8] sm:$0xff] }
 0x2da   : > { %v2361_v24 = vpop.f32.mrf.mxu0  ;;  %v2579_v48 = vpop.f32.mrf.mxu1  ;;  %v2813_v54 = vld [vmem:[#allocation3 + $0x140] sm:$0xff]  ;;  %v2812_v45 = vld [vmem:[#allocation3 + $0x138] sm:$0xff]  ;;  %7062 = vmatprep.subr.mxu1 %v12144_v36 }
 0x2db   : > { %2688 = vst.msk [vmem:[#allocation3 + $0x169] sm:$0xff] %vm734_vm2, %v2616_v21  ;;  %v2585_v33 = vadd.f32 %v6922_v30, %v2360_v52  ;;  %v2580_v37 = vadd.f32 %v2579_v48, %v2355_v59  ;;  %v7564_v6 = vpack.i.bf16 %v10133_v39, %v2813_v54  ;;  %v7559_v7 = vpack.i.bf16 %v10135_v57, %v2812_v45  ;;  %v10157_v32 = vld [vmem:[#allocation3 + $0x139] sm:$0xff] }
 0x2dc   : > { %7094 = vmatpush2.msra.mxu1 %v10155_v1  ;;  %v10173_v12 = vld [vmem:[#allocation3 + $0x159] sm:$0xff] }
 0x2dd   : > { %v2619_v29 = vmax.f32 %v2585_v33, 0.0  ;;  %v2618_v4 = vmax.f32 %v2580_v37, 0.0  ;;  %7565 = vrot.lane.b32.xlu1 %v7564_v6, %s8254_s29  ;;  %7560 = vrot.lane.b32.xlu0 %v7559_v7, %s8254_s29  ;;  %v10184_v52 = vld [vmem:[%s12138_s5 + $0x1d0] sm:$0xff]  ;;  %v10194_v48 = vld [vmem:[%s12138_s5 + $0x1c8] sm:$0xff] }
 0x2de   : > { %v2815_v15 = vld [vmem:[#allocation3 + $0x158] sm:$0xff]  ;;  %v2814_v60 = vld [vmem:[#allocation3 + $0x150] sm:$0xff]  ;;  %7063 = vmatprep.subr.mxu1 %v12144_v36 }
 0x2df   : > { %2691 = vst.msk [vmem:[#allocation3 + $0x189] sm:$0xff] %vm734_vm2, %v2619_v29  ;;  %2690 = vst.msk [vmem:[#allocation3 + $0x181] sm:$0xff] %vm734_vm2, %v2618_v4  ;;  %v7574_v41 = vpack.i.bf16 %v10150_v53, %v2815_v15  ;;  %v7569_v25 = vpack.i.bf16 %v10157_v32, %v2814_v60  ;;  %v10175_v38 = vld [vmem:[#allocation3 + $0x151] sm:$0xff]  ;;  %7095 = vmatpush2.msra.mxu1 %v10169_v23  ;;  %v10210_v29 = vld [vmem:[#allocation3 + $0x22] sm:$0xff] }
 0x2e0   : > { %7064 = vmatprep.subr.mxu1 %v12144_v36  ;;  %v10189_v24 = vld [vmem:[#allocation3 + $0x171] sm:$0xff]  ;;  %v10212_v4 = vld [vmem:[#allocation3 + $0x1a] sm:$0xff]  ;;  %v7604_v15 = vpack.i.bf16 %v10210_v29, %v9873_v10 }
 0x2e1   : > { %7575 = vrot.lane.b32.xlu1 %v7574_v41, %s8254_s29  ;;  %7570 = vrot.lane.b32.xlu0 %v7569_v25, %s8254_s29  ;;  %v10206_v7 = vld [vmem:[%s12138_s5 + $0x1c0] sm:$0xff]  ;;  %v7599_v60 = vpack.i.bf16 %v10212_v4, %v9878_v31  ;;  %v10223_v41 = vld [vmem:[%s12138_s5 + $0x1b8] sm:$0xff]  ;;  %v10233_v25 = vld [vmem:[#allocation3 + $0x3a] sm:$0xff] }
 0x2e2   : > { %v2817_v56 = vld [vmem:[#allocation3 + $0x170] sm:$0xff]  ;;  %v2816_v30 = vld [vmem:[#allocation3 + $0x168] sm:$0xff]  ;;  %7096 = vmatpush2.msra.mxu1 %v10184_v52  ;;  %v10231_v10 = vld [vmem:[%s12138_s5 + $0x1b0] sm:$0xff] }
 0x2e3   : > { %v7584_v59 = vpack.i.bf16 %v10173_v12, %v2817_v56  ;;  %v7579_v21 = vpack.i.bf16 %v10175_v38, %v2816_v30  ;;  %v10196_v45 = vld [vmem:[#allocation3 + $0x169] sm:$0xff]  ;;  %7065 = vmatprep.subr.mxu1 %v12144_v36  ;;  %v10235_v31 = vld [vmem:[#allocation3 + $0x32] sm:$0xff]  ;;  %v7614_v56 = vpack.i.bf16 %v10233_v25, %v9898_v49 }
 0x2e4   : > { %7097 = vmatpush2.msra.mxu1 %v10194_v48  ;;  %v7609_v30 = vpack.i.bf16 %v10235_v31, %v9903_v62 }
 0x2e5   : > { %7585 = vrot.lane.b32.xlu1 %v7584_v59, %s8254_s29  ;;  %7580 = vrot.lane.b32.xlu0 %v7579_v21, %s8254_s29  ;;  %v10247_v59 = vld [vmem:[%s12138_s5 + $0x1a8] sm:$0xff] }
 0x2e6   : > { %v2819_v54 = vld [vmem:[#allocation3 + $0x188] sm:$0xff]  ;;  %v2818_v33 = vld [vmem:[#allocation3 + $0x180] sm:$0xff]  ;;  %7066 = vmatprep.subr.mxu1 %v12144_v36  ;;  %v10251_v21 = vld [vmem:[#allocation3 + $0x52] sm:$0xff] }
 0x2e7   : > { %v7594_v37 = vpack.i.bf16 %v10189_v24, %v2819_v54  ;;  %v7589_v6 = vpack.i.bf16 %v10196_v45, %v2818_v33  ;;  %7098 = vmatpush2.msra.mxu1 %v10206_v7  ;;  %v10253_v54 = vld [vmem:[#allocation3 + $0x4a] sm:$0xff]  ;;  %v7624_v49 = vpack.i.bf16 %v10251_v21, %v9923_v42 }
 0x2e8   : > { %7067 = vmatprep.subr.mxu1 %v12144_v36  ;;  %v7619_v62 = vpack.i.bf16 %v10253_v54, %v9928_v50  ;;  %v10264_v33 = vld [vmem:[%s12138_s5 + $0x1a0] sm:$0xff]  ;;  %v10272_v42 = vld [vmem:[%s12138_s5 + $0x198] sm:$0xff] }
 0x2e9   : > { %7595 = vrot.lane.b32.xlu1 %v7594_v37, %s8254_s29  ;;  %7590 = vrot.lane.b32.xlu0 %v7589_v6, %s8254_s29  ;;  %v10274_v37 = vld [vmem:[#allocation3 + $0x6a] sm:$0xff]  ;;  %v10276_v50 = vld [vmem:[#allocation3 + $0x62] sm:$0xff] }
 0x2ea   : > { %7099 = vmatpush2.msra.mxu1 %v10223_v41  ;;  %v7634_v6 = vpack.i.bf16 %v10274_v37, %v9948_v40 }
 0x2eb   : > { %7068 = vmatprep.subr.mxu1 %v12144_v36 }
 0x2ec   : > { %7100 = vmatpush2.msra.mxu1 %v10231_v10 }
 0x2ed   : > { %7605 = vrot.lane.b32.xlu1 %v7604_v15, %s8254_s29  ;;  %7600 = vrot.lane.b32.xlu0 %v7599_v60, %s8254_s29  ;;  %v7629_v15 = vpack.i.bf16 %v10276_v50, %v9958_v51  ;;  %v10288_v60 = vld [vmem:[%s12138_s5 + $0x190] sm:$0xff] }
 0x2ee   : > { %7069 = vmatprep.subr.mxu1 %v12144_v36 }
 0x2ef   : > { %7101 = vmatpush2.msra.mxu1 %v10247_v59 }
 0x2f0   : > { %7070 = vmatprep.subr.mxu1 %v12144_v36 }
 0x2f1   : > { %7615 = vrot.lane.b32.xlu1 %v7614_v56, %s8254_s29  ;;  %7610 = vrot.lane.b32.xlu0 %v7609_v30, %s8254_s29  ;;  %v10292_v56 = vld [vmem:[#allocation3 + $0x82] sm:$0xff]  ;;  %v10294_v30 = vld [vmem:[#allocation3 + $0x7a] sm:$0xff] }
 0x2f2   : > { %7102 = vmatpush2.msra.mxu1 %v10264_v33  ;;  %v7644_v40 = vpack.i.bf16 %v10292_v56, %v9974_v63  ;;  %v7639_v51 = vpack.i.bf16 %v10294_v30, %v9984_v47  ;;  %v10313_v63 = vld [vmem:[%s12138_s5 + $0x180] sm:$0xff] }
 0x2f3   : > { %7071 = vmatprep.subr.mxu1 %v12144_v36  ;;  %12156 = vst [vmem:[#allocation6_spill] sm:$0xff] %v10313_v63  ;;  %v10317_v47 = vld [vmem:[#allocation3 + $0x92] sm:$0xff] }
 0x2f4   : > { %7103 = vmatpush2.msra.mxu1 %v10272_v42 }
 0x2f5   : > { %7625 = vrot.lane.b32.xlu1 %v7624_v49, %s8254_s29  ;;  %7620 = vrot.lane.b32.xlu0 %v7619_v62, %s8254_s29  ;;  %v10305_v49 = vld [vmem:[%s12138_s5 + $0x188] sm:$0xff] }
 0x2f6   : > { %7072 = vmatprep.subr.mxu1 %v12144_v36  ;;  %12155 = vst [vmem:[#allocation5_spill] sm:$0xff] %v10305_v49  ;;  %v10315_v62 = vld [vmem:[#allocation3 + $0x9a] sm:$0xff] }
 0x2f7   : > { %7104 = vmatpush2.msra.mxu1 %v10288_v60 }
 0x2f8   : > { %7073 = vmatprep.subr.mxu1 %v12144_v36 }
 0x2f9   : > { %7635 = vrot.lane.b32.xlu1 %v7634_v6, %s8254_s29  ;;  %7630 = vrot.lane.b32.xlu0 %v7629_v15, %s8254_s29  ;;  %v7654_v6 = vpack.i.bf16 %v10315_v62, %v10005_v5  ;;  %v7649_v15 = vpack.i.bf16 %v10317_v47, %v10015_v34 }
 0x2fa   : > { %7105 = vmatpush2.msra.mxu1 %v10305_v49 }
 0x2fb   : > { %7074 = vmatprep.subr.mxu1 %v12144_v36 }
 0x2fc   : > { %7106 = vmatpush2.msra.mxu1 %v10313_v63  ;;  %v10339_v63 = vld [vmem:[#allocation3 + $0xca] sm:$0xff] }
 0x2fd   : > { %7645 = vrot.lane.b32.xlu1 %v7644_v40, %s8254_s29  ;;  %7640 = vrot.lane.b32.xlu0 %v7639_v51, %s8254_s29  ;;  %v10328_v40 = vld [vmem:[#allocation3 + $0xb2] sm:$0xff]  ;;  %v10330_v51 = vld [vmem:[#allocation3 + $0xaa] sm:$0xff]  ;;  %12157 = vst [vmem:[#allocation7_spill] sm:$0xff] %v10339_v63 }
 0x2fe   : > { %5967 = vmatprep.subr.mxu1 %v12144_v36  ;;  %v7664_v5 = vpack.i.bf16 %v10328_v40, %v10034_v61  ;;  %v7659_v34 = vpack.i.bf16 %v10330_v51, %v10039_v28  ;;  %v10349_v61 = vld [vmem:[#allocation3 + $0xe2] sm:$0xff]  ;;  %v10351_v28 = vld [vmem:[#allocation3 + $0xda] sm:$0xff] }
 0x2ff   : > { %12158 = vst [vmem:[#allocation8_spill] sm:$0xff] %v10349_v61  ;;  %12159 = vst [vmem:[#allocation9_spill] sm:$0xff] %v10351_v28 }
 0x301   : > { %7655 = vrot.lane.b32.xlu1 %v7654_v6, %s8254_s29  ;;  %7650 = vrot.lane.b32.xlu0 %v7649_v15, %s8254_s29  ;;  %v10341_v6 = vld [vmem:[#allocation3 + $0xc2] sm:$0xff]  ;;  %v7674_v15 = vpack.i.bf16 %v10339_v63, %v10058_v18  ;;  %v10359_v18 = vld [vmem:[#allocation3 + $0xfa] sm:$0xff] }
 0x302   : > { %v7669_v36 = vpack.i.bf16 %v10341_v6, %v10067_v27  ;;  %12160 = vst [vmem:[#allocation10_spill] sm:$0xff] %v10359_v18  ;;  %v10361_v27 = vld [vmem:[#allocation3 + $0xf2] sm:$0xff]  ;;  %v2948_v63 = vld [vmem:[#allocation3 + $0x1a1] sm:$0xff] }
 0x303   : > { %12161 = vst [vmem:[#allocation11_spill] sm:$0xff] %v10361_v27 }
 0x305   : > { %7665 = vrot.lane.b32.xlu1 %v7664_v5, %s8254_s29  ;;  %7660 = vrot.lane.b32.xlu0 %v7659_v34, %s8254_s29  ;;  %v7684_v5 = vpack.i.bf16 %v10349_v61, %v10086_v46  ;;  %v7679_v34 = vpack.i.bf16 %v10351_v28, %v10090_v58  ;;  %v10369_v46 = vld [vmem:[#allocation3 + $0x112] sm:$0xff]  ;;  %v10371_v58 = vld [vmem:[#allocation3 + $0x10a] sm:$0xff] }
 0x306   : > { %12162 = vst [vmem:[#allocation12_spill] sm:$0xff] %v10369_v46  ;;  %12163 = vst [vmem:[#allocation13_spill] sm:$0xff] %v10371_v58 }
 0x309   : > { %7675 = vrot.lane.b32.xlu1 %v7674_v15, %s8254_s29  ;;  %7670 = vrot.lane.b32.xlu0 %v7669_v36, %s8254_s29  ;;  %v7694_v36 = vpack.i.bf16 %v10359_v18, %v10106_v55  ;;  %v7689_v15 = vpack.i.bf16 %v10361_v27, %v10117_v44  ;;  %v2875_v55 = vld [vmem:[#allocation3 + $0x12a] sm:$0xff]  ;;  %v10379_v44 = vld [vmem:[#allocation3 + $0x122] sm:$0xff] }
 0x30a   : > { %12164 = vst [vmem:[#allocation14_spill] sm:$0xff] %v10379_v44 }
 0x30d   : > { %7685 = vrot.lane.b32.xlu1 %v7684_v5, %s8254_s29  ;;  %7680 = vrot.lane.b32.xlu0 %v7679_v34, %s8254_s29  ;;  %v7704_v5 = vpack.i.bf16 %v10369_v46, %v10133_v39  ;;  %v7699_v34 = vpack.i.bf16 %v10371_v58, %v10135_v57  ;;  %v2877_v39 = vld [vmem:[#allocation3 + $0x142] sm:$0xff]  ;;  %v2876_v46 = vld [vmem:[#allocation3 + $0x13a] sm:$0xff]  ;;  %v2878_v58 = vld [vmem:[#allocation3 + $0x152] sm:$0xff] }
 0x30e   : > { %v7724_v57 = vpack.i.bf16 %v2877_v39, %v10173_v12  ;;  %v2757_v12 = vld [vmem:[#allocation3 + $0xa] sm:$0xff] }
 0x311   : > { %7695 = vrot.lane.b32.xlu1 %v7694_v36, %s8254_s29  ;;  %7690 = vrot.lane.b32.xlu0 %v7689_v15, %s8254_s29  ;;  %v7714_v36 = vpack.i.bf16 %v2875_v55, %v10150_v53  ;;  %v7709_v15 = vpack.i.bf16 %v10379_v44, %v10157_v32  ;;  %v2756_v44 = vld [vmem:[#allocation3 + $0x2] sm:$0xff] }
 0x315   : > { %7705 = vrot.lane.b32.xlu1 %v7704_v5, %s8254_s29  ;;  %7700 = vrot.lane.b32.xlu0 %v7699_v34, %s8254_s29  ;;  %v7719_v5 = vpack.i.bf16 %v2876_v46, %v10175_v38  ;;  %v2879_v34 = vld [vmem:[#allocation3 + $0x15a] sm:$0xff]  ;;  %v2946_v38 = vld [vmem:[#allocation3 + $0x189] sm:$0xff] }
 0x316   : > { %v7734_v32 = vpack.i.bf16 %v2879_v34, %v10189_v24  ;;  %v2945_v46 = vld [vmem:[#allocation3 + $0x181] sm:$0xff]  ;;  %v2880_v34 = vld [vmem:[#allocation3 + $0x16a] sm:$0xff] }
 0x317   : > { %v7739_v49 = vpack.i.bf16 %v2880_v34, %v2945_v46 }
 0x319   : > { %7715 = vrot.lane.b32.xlu1 %v7714_v36, %s8254_s29  ;;  %7710 = vrot.lane.b32.xlu0 %v7709_v15, %s8254_s29  ;;  %v7729_v36 = vpack.i.bf16 %v2878_v58, %v10196_v45  ;;  %v2692_v15 = vld [vmem:[#allocation3] sm:$0xff]  ;;  %v2881_v58 = vld [vmem:[#allocation3 + $0x172] sm:$0xff] }
 0x31d   : > { %7725 = vrot.lane.b32.xlu1 %v7724_v57, %s8254_s29  ;;  %7720 = vrot.lane.b32.xlu0 %v7719_v5, %s8254_s29 }
 0x31f   : > { %v7446_v53 = vpop.permute.xlu1 %7445  ;;  %v7441_v55 = vpop.permute.xlu0 %7440 }
 0x320   : > { %v7447_v18 = vunpack.i.l.bf16 %v7446_v53  ;;  %v7443_v27 = vunpack.i.h.bf16 %v7441_v55  ;;  %v7442_v61 = vunpack.i.l.bf16 %v7441_v55  ;;  %v7448_v5 = vunpack.i.h.bf16 %v7446_v53  ;;  %v2947_v53 = vld [vmem:[#allocation3 + $0x199] sm:$0xff] }
 0x321   : > { %7735 = vrot.lane.b32.xlu1 %v7734_v32, %s8254_s29  ;;  %7730 = vrot.lane.b32.xlu0 %v7729_v36, %s8254_s29  ;;  %v7744_v32 = vpack.i.bf16 %v2881_v58, %v2946_v38  ;;  %v2693_v36 = vld [vmem:[#allocation3 + $0x8] sm:$0xff] }
 0x322   : > { %v3525_v39 = vsel %vm734_vm2, %v2756_v44, %v7442_v61  ;;  %v3493_v57 = vsel %vm734_vm2, %v2692_v15, %v7443_v27  ;;  %v3526_v55 = vsel %vm734_vm2, %v2757_v12, %v7447_v18  ;;  %v8239_v61 = vld [vmem:[%s12138_s5 + $0x178] sm:$0xff]  ;;  %v3494_v38 = vsel %vm734_vm2, %v2693_v36, %v7448_v5  ;;  %v8242_v36 = vld [vmem:[%s12138_s5 + $0x168] sm:$0xff] }
 0x323   : > { %3860 = vmatprep.mubr.f32.mxu0 %v3525_v39  ;;  %v7456_v24 = vpop.permute.xlu1 %7455  ;;  %v7451_v45 = vpop.permute.xlu0 %7450  ;;  %v2883_v27 = vld [vmem:[#allocation3 + $0x18a] sm:$0xff]  ;;  %v2882_v44 = vld [vmem:[#allocation3 + $0x182] sm:$0xff]  ;;  %v12165_v39 = vmov 0.0  }
 0x324   : > { %v7452_v28 = vunpack.i.l.bf16 %v7451_v45  ;;  %3861 = vmatmul.mubr.f32.vlgmr.msra.gmra.mxu0 %v3493_v57  ;;  %v7453_v15 = vunpack.i.h.bf16 %v7451_v45  ;;  %v7457_v46 = vunpack.i.l.bf16 %v7456_v24  ;;  %v7754_v57 = vpack.i.bf16 %v2883_v27, %v2948_v63  ;;  %v8241_v45 = vld [vmem:[#allocation3 + $0x18] sm:$0xff]  ;;  %4504 = vst.msk [vmem:[#allocation4] sm:$0xff] %vm4503_vm5, %v12165_v39  ;;  %4505 = vst.msk [vmem:[#allocation4 + $0x8] sm:$0xff] %vm4503_vm5, %v12165_v39 }
 0x325   : > { %4022 = vmatpush1.msra.mxu0 %v8239_v61  ;;  %3865 = vmatprep.mubr.f32.mxu0 %v3526_v55  ;;  %v7749_v34 = vpack.i.bf16 %v2882_v44, %v2947_v53  ;;  %v8240_v55 = vld [vmem:[%s12138_s5 + $0x170] sm:$0xff]  ;;  %4509 = vst.msk [vmem:[#allocation4 + $0x198] sm:$0xff] %vm4503_vm5, %v12165_v39  ;;  %4510 = vst.msk [vmem:[#allocation4 + $0x1a0] sm:$0xff] %vm4503_vm5, %v12165_v39 }
 0x326   : > { %7745 = vrot.lane.b32.xlu1 %v7744_v32, %s8254_s29  ;;  %7740 = vrot.lane.b32.xlu0 %v7739_v49, %s8254_s29  ;;  %v3527_v58 = vsel %vm734_vm2, %v10212_v4, %v7452_v28  ;;  %v7458_v49 = vunpack.i.h.bf16 %v7456_v24  ;;  %v3495_v4 = vsel %vm734_vm2, %v8241_v45, %v7453_v15  ;;  %v3528_v32 = vsel %vm734_vm2, %v10210_v29, %v7457_v46  ;;  %v2695_v24 = vld [vmem:[#allocation3 + $0x20] sm:$0xff] }
 0x327   : > { %4023 = vmatprep.subr.mxu0 %v12165_v39  ;;  %v7466_v18 = vpop.permute.xlu1 %7465  ;;  %v7461_v12 = vpop.permute.xlu0 %7460  ;;  %4507 = vst.msk [vmem:[#allocation4 + $0x10] sm:$0x3] %vm4506_vm6, %v12165_v39  ;;  %4511 = vst.msk [vmem:[#allocation4 + $0x1a8] sm:$0x3] %vm4506_vm6, %v12165_v39 }
 0x328   : > { %3866 = vmatmul.mubr.f32.gmra.mxu0 %v3494_v38  ;;  %v7462_v28 = vunpack.i.l.bf16 %v7461_v12  ;;  %v7463_v61 = vunpack.i.h.bf16 %v7461_v12  ;;  %v3496_v53 = vsel %vm734_vm2, %v2695_v24, %v7458_v49  ;;  %v7467_v15 = vunpack.i.l.bf16 %v7466_v18  ;;  %v2696_v38 = vld [vmem:[#allocation3 + $0x30] sm:$0xff]  ;;  %4530 = vst.msk [vmem:[#allocation4 + $0x29] sm:$0x1] %vm4513_vm7, %v12165_v39  ;;  %4514 = vst.msk [vmem:[#allocation4 + $0x18] sm:$0x1] %vm4513_vm7, %v12165_v39 }
 0x329   : > { %4024 = vmatpush1.msra.mxu0 %v8240_v55  ;;  %3870 = vmatprep.mubr.f32.mxu0 %v3527_v58  ;;  %v7468_v12 = vunpack.i.h.bf16 %v7466_v18  ;;  %4515 = vst.msk [vmem:[#allocation4 + $0x30] sm:$0x1] %vm4513_vm7, %v12165_v39  ;;  %4516 = vst.msk [vmem:[#allocation4 + $0x48] sm:$0x1] %vm4513_vm7, %v12165_v39 }
 0x32a   : > { %7755 = vrot.lane.b32.xlu1 %v7754_v57, %s8254_s29  ;;  %7750 = vrot.lane.b32.xlu0 %v7749_v34, %s8254_s29  ;;  %v3529_v29 = vsel %vm734_vm2, %v10235_v31, %v7462_v28  ;;  %v3530_v31 = vsel %vm734_vm2, %v10233_v25, %v7467_v15  ;;  %4517 = vst.msk [vmem:[#allocation4 + $0x60] sm:$0x1] %vm4513_vm7, %v12165_v39  ;;  %4518 = vst.msk [vmem:[#allocation4 + $0x78] sm:$0x1] %vm4513_vm7, %v12165_v39 }
 0x32b   : > { %4025 = vmatprep.subr.mxu0 %v12165_v39  ;;  %v10412_v5 = vpop.permute.xlu1 %7475  ;;  %v7471_v63 = vpop.permute.xlu0 %7470  ;;  %4519 = vst.msk [vmem:[#allocation4 + $0x90] sm:$0x1] %vm4513_vm7, %v12165_v39  ;;  %4520 = vst.msk [vmem:[#allocation4 + $0xa8] sm:$0x1] %vm4513_vm7, %v12165_v39 }
 0x32c   : > { %3871 = vmatmul.mubr.f32.gmra.mxu0 %v3495_v4  ;;  %v7472_v58 = vunpack.i.l.bf16 %v7471_v63  ;;  %v7473_v18 = vunpack.i.h.bf16 %v7471_v63  ;;  %v7477_v49 = vunpack.i.l.bf16 %v10412_v5  ;;  %v7478_v63 = vunpack.i.h.bf16 %v10412_v5  ;;  %4521 = vst.msk [vmem:[#allocation4 + $0xc0] sm:$0x1] %vm4513_vm7, %v12165_v39  ;;  %4522 = vst.msk [vmem:[#allocation4 + $0xd8] sm:$0x1] %vm4513_vm7, %v12165_v39 }
 0x32d   : > { %4026 = vmatpush1.msra.mxu0 %v8242_v36  ;;  %3875 = vmatprep.mubr.f32.mxu0 %v3528_v32  ;;  %4523 = vst.msk [vmem:[#allocation4 + $0xf0] sm:$0x1] %vm4513_vm7, %v12165_v39  ;;  %4524 = vst.msk [vmem:[#allocation4 + $0x108] sm:$0x1] %vm4513_vm7, %v12165_v39 }
 0x32e   : > { %4027 = vmatprep.subr.mxu0 %v12165_v39  ;;  %v3531_v25 = vsel %vm734_vm2, %v10253_v54, %v7472_v58  ;;  %v3532_v28 = vsel %vm734_vm2, %v10251_v21, %v7477_v49  ;;  %4525 = vst.msk [vmem:[#allocation4 + $0x120] sm:$0x1] %vm4513_vm7, %v12165_v39  ;;  %4526 = vst.msk [vmem:[#allocation4 + $0x138] sm:$0x1] %vm4513_vm7, %v12165_v39 }
 0x32f   : > { %v10421_v27 = vpop.permute.xlu1 %7485  ;;  %v10423_v44 = vpop.permute.xlu0 %7480  ;;  %4028 = vmatpush1.msra.mxu0 %v9867_v9  ;;  %v3497_v9 = vsel %vm734_vm2, %v2696_v38, %v7463_v61  ;;  %4527 = vst.msk [vmem:[#allocation4 + $0x150] sm:$0x1] %vm4513_vm7, %v12165_v39  ;;  %4528 = vst.msk [vmem:[#allocation4 + $0x168] sm:$0x1] %vm4513_vm7, %v12165_v39 }
 0x330   : > { %3876 = vmatmul.mubr.f32.gmra.mxu0 %v3496_v53  ;;  %4029 = vmatprep.subr.mxu0 %v12165_v39  ;;  %v7482_v54 = vunpack.i.l.bf16 %v10423_v44  ;;  %v7483_v5 = vunpack.i.h.bf16 %v10423_v44  ;;  %v7487_v21 = vunpack.i.l.bf16 %v10421_v27  ;;  %v7488_v61 = vunpack.i.h.bf16 %v10421_v27  ;;  %4529 = vst.msk [vmem:[#allocation4 + $0x180] sm:$0x1] %vm4513_vm7, %v12165_v39  ;;  %4531 = vst.msk [vmem:[#allocation4 + $0x41] sm:$0x1] %vm4513_vm7, %v12165_v39 }
 0x331   : > { %3880 = vmatprep.mubr.f32.mxu0 %v3529_v29  ;;  %4030 = vmatpush1.msra.mxu0 %v9892_v16  ;;  %v2697_v16 = vld [vmem:[#allocation3 + $0x38] sm:$0xff]  ;;  %4532 = vst.msk [vmem:[#allocation4 + $0x59] sm:$0x1] %vm4513_vm7, %v12165_v39  ;;  %4533 = vst.msk [vmem:[#allocation4 + $0x71] sm:$0x1] %vm4513_vm7, %v12165_v39 }
 0x332   : > { %4031 = vmatprep.subr.mxu0 %v12165_v39  ;;  %v3533_v24 = vsel %vm734_vm2, %v10276_v50, %v7482_v54  ;;  %v3534_v15 = vsel %vm734_vm2, %v10274_v37, %v7487_v21  ;;  %4534 = vst.msk [vmem:[#allocation4 + $0x89] sm:$0x1] %vm4513_vm7, %v12165_v39  ;;  %4535 = vst.msk [vmem:[#allocation4 + $0xa1] sm:$0x1] %vm4513_vm7, %v12165_v39 }
 0x333   : > { %v10432_v46 = vpop.permute.xlu1 %7495  ;;  %v10434_v57 = vpop.permute.xlu0 %7490  ;;  %4032 = vmatpush1.msra.mxu0 %v9917_v20  ;;  %v3498_v20 = vsel %vm734_vm2, %v2697_v16, %v7468_v12  ;;  %4536 = vst.msk [vmem:[#allocation4 + $0xb9] sm:$0x1] %vm4513_vm7, %v12165_v39  ;;  %4537 = vst.msk [vmem:[#allocation4 + $0xd1] sm:$0x1] %vm4513_vm7, %v12165_v39 }
 0x334   : > { %3881 = vmatmul.mubr.f32.gmra.mxu0 %v3497_v9  ;;  %4033 = vmatprep.subr.mxu0 %v12165_v39  ;;  %v7492_v50 = vunpack.i.l.bf16 %v10434_v57  ;;  %v7493_v27 = vunpack.i.h.bf16 %v10434_v57  ;;  %v7497_v37 = vunpack.i.l.bf16 %v10432_v46  ;;  %v7498_v57 = vunpack.i.h.bf16 %v10432_v46  ;;  %4538 = vst.msk [vmem:[#allocation4 + $0xe9] sm:$0x1] %vm4513_vm7, %v12165_v39  ;;  %4539 = vst.msk [vmem:[#allocation4 + $0x101] sm:$0x1] %vm4513_vm7, %v12165_v39 }
 0x335   : > { %3885 = vmatprep.mubr.f32.mxu0 %v3530_v31  ;;  %4034 = vmatpush1.msra.mxu0 %v9942_v8  ;;  %v2698_v8 = vld [vmem:[#allocation3 + $0x48] sm:$0xff]  ;;  %4540 = vst.msk [vmem:[#allocation4 + $0x119] sm:$0x1] %vm4513_vm7, %v12165_v39  ;;  %4541 = vst.msk [vmem:[#allocation4 + $0x131] sm:$0x1] %vm4513_vm7, %v12165_v39 }
 0x336   : > { %4035 = vmatprep.subr.mxu0 %v12165_v39  ;;  %v3535_v12 = vsel %vm734_vm2, %v10294_v30, %v7492_v50  ;;  %v3536_v31 = vsel %vm734_vm2, %v10292_v56, %v7497_v37  ;;  %v12167_v50 = vld [vmem:[#allocation5_spill] sm:$0xff]  ;;  %v12168_v37 = vld [vmem:[#allocation6_spill] sm:$0xff]  ;;  %4542 = vst.msk [vmem:[#allocation4 + $0x149] sm:$0x1] %vm4513_vm7, %v12165_v39  ;;  %4543 = vst.msk [vmem:[#allocation4 + $0x161] sm:$0x1] %vm4513_vm7, %v12165_v39 }
 0x337   : > { %v10443_v34 = vpop.permute.xlu1 %7505  ;;  %v10445_v55 = vpop.permute.xlu0 %7500  ;;  %4036 = vmatpush1.msra.mxu0 %v9953_v19  ;;  %v3499_v19 = vsel %vm734_vm2, %v2698_v8, %v7473_v18  ;;  %4544 = vst.msk [vmem:[#allocation4 + $0x179] sm:$0x1] %vm4513_vm7, %v12165_v39  ;;  %4545 = vst.msk [vmem:[#allocation4 + $0x191] sm:$0x1] %vm4513_vm7, %v12165_v39 }
 0x338   : > { %3886 = vmatmul.mubr.f32.gmra.mxu0 %v3498_v20  ;;  %4037 = vmatprep.subr.mxu0 %v12165_v39  ;;  %v7502_v30 = vunpack.i.l.bf16 %v10445_v55  ;;  %v7503_v46 = vunpack.i.h.bf16 %v10445_v55  ;;  %v7507_v56 = vunpack.i.l.bf16 %v10443_v34  ;;  %v10535_v55 = vld [vmem:[#allocation3 + $0x90] sm:$0xff]  ;;  %v7508_v20 = vunpack.i.h.bf16 %v10443_v34  ;;  %v10551_v34 = vld [vmem:[#allocation3 + $0x98] sm:$0xff] }
 0x339   : > { %3890 = vmatprep.mubr.f32.mxu0 %v3531_v25  ;;  %4038 = vmatpush1.msra.mxu0 %v9979_v14  ;;  %v2699_v14 = vld [vmem:[#allocation3 + $0x50] sm:$0xff] }
 0x33a   : > { %4039 = vmatprep.subr.mxu0 %v12165_v39  ;;  %v3505_v25 = vsel %vm734_vm2, %v10535_v55, %v7503_v46 }
 0x33b   : > { %v10456_v45 = vpop.permute.xlu1 %7515  ;;  %v10458_v4 = vpop.permute.xlu0 %7510  ;;  %4040 = vmatpush1.msra.mxu0 %v9994_v2  ;;  %v3500_v2 = vsel %vm734_vm2, %v2699_v14, %v7478_v63 }
 0x33c   : > { %3891 = vmatmul.mubr.f32.gmra.mxu0 %v3499_v19  ;;  %4041 = vmatprep.subr.mxu0 %v12165_v39  ;;  %v7513_v8 = vunpack.i.h.bf16 %v10458_v4  ;;  %v3506_v19 = vsel %vm734_vm2, %v10551_v34, %v7508_v20  ;;  %v7518_v54 = vunpack.i.h.bf16 %v10456_v45  ;;  %v12170_v20 = vld [vmem:[#allocation8_spill] sm:$0xff] }
 0x33d   : > { %3895 = vmatprep.mubr.f32.mxu0 %v3532_v28  ;;  %4042 = vmatpush1.msra.mxu0 %v10010_v26  ;;  %v2700_v26 = vld [vmem:[#allocation3 + $0x60] sm:$0xff] }
 0x33e   : > { %4043 = vmatprep.subr.mxu0 %v12165_v39 }
 0x33f   : > { %v10469_v32 = vpop.permute.xlu1 %7525  ;;  %v10471_v36 = vpop.permute.xlu0 %7520  ;;  %4044 = vmatpush1.msra.mxu0 %v10028_v43  ;;  %v3501_v43 = vsel %vm734_vm2, %v2700_v26, %v7483_v5 }
 0x340   : > { %3896 = vmatmul.mubr.f32.gmra.mxu0 %v3500_v2  ;;  %4045 = vmatprep.subr.mxu0 %v12165_v39  ;;  %v7523_v5 = vunpack.i.h.bf16 %v10471_v36 }
 0x341   : > { %3900 = vmatprep.mubr.f32.mxu0 %v3533_v24  ;;  %4046 = vmatpush1.msra.mxu0 %v10049_v17  ;;  %v2701_v17 = vld [vmem:[#allocation3 + $0x68] sm:$0xff]  ;;  %v7528_v24 = vunpack.i.h.bf16 %v10469_v32 }
 0x342   : > { %4047 = vmatprep.subr.mxu0 %v12165_v39 }
 0x343   : > { %v10482_v44 = vpop.permute.xlu1 %7535  ;;  %v10484_v53 = vpop.permute.xlu0 %7530  ;;  %4048 = vmatpush1.msra.mxu0 %v10063_v3  ;;  %v3502_v3 = vsel %vm734_vm2, %v2701_v17, %v7488_v61 }
 0x344   : > { %3901 = vmatmul.mubr.f32.gmra.mxu0 %v3501_v43  ;;  %4049 = vmatprep.subr.mxu0 %v12165_v39  ;;  %v12166_v43 = vld [vmem:[#allocation7_spill] sm:$0xff] }
 0x345   : > { %3905 = vmatprep.mubr.f32.mxu0 %v3534_v15  ;;  %4050 = vmatpush1.msra.mxu0 %v10080_v22  ;;  %v2702_v22 = vld [vmem:[#allocation3 + $0x78] sm:$0xff]  ;;  %v10620_v15 = vld [vmem:[#allocation3 + $0xc8] sm:$0xff] }
 0x346   : > { %4051 = vmatprep.subr.mxu0 %v12165_v39 }
 0x347   : > { %v10495_v29 = vpop.permute.xlu1 %7545  ;;  %v10497_v38 = vpop.permute.xlu0 %7540  ;;  %4052 = vmatpush1.msra.mxu0 %v10100_v13  ;;  %v3503_v13 = vsel %vm734_vm2, %v2702_v22, %v7493_v27  ;;  %v12169_v22 = vld [vmem:[#allocation9_spill] sm:$0xff] }
 0x348   : > { %3906 = vmatmul.mubr.f32.gmra.mxu0 %v3502_v3  ;;  %4053 = vmatprep.subr.mxu0 %v12165_v39  ;;  %v3510_v3 = vsel %vm734_vm2, %v10620_v15, %v7528_v24 }
 0x349   : > { %3910 = vmatprep.mubr.f32.mxu0 %v3535_v12  ;;  %4054 = vmatpush2.msra.mxu0 %v10111_v11  ;;  %v10519_v11 = vld [vmem:[#allocation3 + $0x80] sm:$0xff]  ;;  %v7537_v12 = vunpack.i.l.bf16 %v10482_v44 }
 0x34a   : > { %4055 = vmatprep.subr.mxu0 %v12165_v39  ;;  %v3504_v18 = vsel %vm734_vm2, %v10519_v11, %v7498_v57 }
 0x34b   : > { %v10508_v9 = vpop.permute.xlu1 %7555  ;;  %v10510_v58 = vpop.permute.xlu0 %7550  ;;  %4056 = vmatpush2.msra.mxu0 %v10128_v0 }
 0x34c   : > { %3911 = vmatmul.mubr.f32.gmra.mxu0 %v3503_v13  ;;  %4057 = vmatprep.subr.mxu0 %v12165_v39  ;;  %v10635_v13 = vld [vmem:[#allocation3 + $0xd8] sm:$0xff] }
 0x34d   : > { %3915 = vmatprep.mubr.f32.mxu0 %v3536_v31  ;;  %4058 = vmatpush2.msra.mxu0 %v10145_v35  ;;  %v3537_v35 = vsel %vm734_vm2, %v10317_v47, %v7502_v30  ;;  %v7512_v47 = vunpack.i.l.bf16 %v10458_v4  ;;  %v10567_v4 = vld [vmem:[#allocation3 + $0xa8] sm:$0xff] }
 0x34e   : > { %4059 = vmatprep.subr.mxu0 %v12165_v39  ;;  %v3507_v14 = vsel %vm734_vm2, %v10567_v4, %v7513_v8 }
 0x34f   : > { %v10523_v16 = vpop.permute.xlu1 %7565  ;;  %v10525_v0 = vpop.permute.xlu0 %7560  ;;  %4060 = vmatpush2.msra.mxu0 %v10155_v1 }
 0x350   : > { %3916 = vmatmul.mubr.f32.gmra.mxu0 %v3504_v18  ;;  %4061 = vmatprep.subr.mxu0 %v12165_v39  ;;  %v7542_v18 = vunpack.i.l.bf16 %v10497_v38 }
 0x351   : > { %3920 = vmatprep.mubr.f32.mxu0 %v3537_v35  ;;  %4062 = vmatpush2.msra.mxu0 %v10169_v23  ;;  %v3538_v23 = vsel %vm734_vm2, %v10315_v62, %v7507_v56  ;;  %v7517_v62 = vunpack.i.l.bf16 %v10456_v45  ;;  %v10583_v45 = vld [vmem:[#allocation3 + $0xb0] sm:$0xff] }
 0x352   : > { %4063 = vmatprep.subr.mxu0 %v12165_v39  ;;  %v3508_v21 = vsel %vm734_vm2, %v10583_v45, %v7518_v54 }
 0x353   : > { %v10539_v49 = vpop.permute.xlu1 %7575  ;;  %v10541_v1 = vpop.permute.xlu0 %7570  ;;  %4064 = vmatpush2.msra.mxu0 %v10184_v52 }
 0x354   : > { %3921 = vmatmul.mubr.f32.gmra.mxu0 %v3505_v25  ;;  %4065 = vmatprep.subr.mxu0 %v12165_v39  ;;  %v3544_v25 = vsel %vm734_vm2, %v12170_v20, %v7537_v12 }
 0x355   : > { %3925 = vmatprep.mubr.f32.mxu0 %v3538_v23  ;;  %4066 = vmatpush2.msra.mxu0 %v10194_v48  ;;  %v3539_v48 = vsel %vm734_vm2, %v10330_v51, %v7512_v47  ;;  %v7522_v51 = vunpack.i.l.bf16 %v10471_v36  ;;  %v10599_v36 = vld [vmem:[#allocation3 + $0xc0] sm:$0xff]  ;;  %v2827_v47 = vld [vmem:[#allocation3 + $0x69] sm:$0xff] }
 0x356   : > { %4067 = vmatprep.subr.mxu0 %v12165_v39  ;;  %v3509_v61 = vsel %vm734_vm2, %v10599_v36, %v7523_v5 }
 0x357   : > { %v10555_v63 = vpop.permute.xlu1 %7585  ;;  %v10557_v52 = vpop.permute.xlu0 %7580  ;;  %4068 = vmatpush2.msra.mxu0 %v10206_v7 }
 0x358   : > { %3926 = vmatmul.mubr.f32.gmra.mxu0 %v3506_v19  ;;  %4069 = vmatprep.subr.mxu0 %v12165_v39  ;;  %v7547_v19 = vunpack.i.l.bf16 %v10495_v29 }
 0x359   : > { %3930 = vmatprep.mubr.f32.mxu0 %v3539_v48  ;;  %4070 = vmatpush2.msra.mxu0 %v10223_v41  ;;  %v3540_v41 = vsel %vm734_vm2, %v10328_v40, %v7517_v62  ;;  %v7527_v40 = vunpack.i.l.bf16 %v10469_v32  ;;  %v10618_v32 = vld [vmem:[%s12138_s5 + $0x238] sm:$0xff]  ;;  %v7543_v62 = vunpack.i.h.bf16 %v10497_v38  ;;  %v10658_v38 = vld [vmem:[#allocation3 + $0xf0] sm:$0xff] }
 0x35a   : > { %4071 = vmatprep.subr.mxu0 %v12165_v39 }
 0x35b   : > { %v10571_v28 = vpop.permute.xlu1 %7595  ;;  %v10573_v7 = vpop.permute.xlu0 %7590  ;;  %4072 = vmatpush2.msra.mxu0 %v10231_v10 }
 0x35c   : > { %3931 = vmatmul.mubr.f32.gmra.mxu0 %v3507_v14  ;;  %4073 = vmatprep.subr.mxu0 %v12165_v39 }
 0x35d   : > { %3935 = vmatprep.mubr.f32.mxu0 %v3540_v41  ;;  %4074 = vmatpush2.msra.mxu0 %v10247_v59  ;;  %v3541_v59 = vsel %vm734_vm2, %v10341_v6, %v7522_v51  ;;  %v7532_v6 = vunpack.i.l.bf16 %v10484_v53 }
 0x35e   : > { %4075 = vmatprep.subr.mxu0 %v12165_v39 }
 0x35f   : > { %v10587_v2 = vpop.permute.xlu1 %7605  ;;  %v10589_v10 = vpop.permute.xlu0 %7600  ;;  %4076 = vmatpush2.msra.mxu0 %v10264_v33  ;;  %v3543_v57 = vsel %vm734_vm2, %v12169_v22, %v7532_v6  ;;  %v2829_v22 = vld [vmem:[#allocation3 + $0x81] sm:$0xff] }
 0x360   : > { %3936 = vmatmul.mubr.f32.gmra.mxu0 %v3508_v21  ;;  %4077 = vmatprep.subr.mxu0 %v12165_v39 }
 0x361   : > { %3940 = vmatprep.mubr.f32.mxu0 %v3541_v59  ;;  %4078 = vmatpush2.msra.mxu0 %v10272_v42  ;;  %v3542_v42 = vsel %vm734_vm2, %v12166_v43, %v7527_v40  ;;  %v2828_v40 = vld [vmem:[#allocation3 + $0x79] sm:$0xff] }
 0x362   : > { %4079 = vmatprep.subr.mxu0 %v12165_v39 }
 0x363   : > { %v10603_v26 = vpop.permute.xlu1 %7615  ;;  %v10605_v33 = vpop.permute.xlu0 %7610  ;;  %4080 = vmatpush2.msra.mxu0 %v10288_v60  ;;  %v7533_v60 = vunpack.i.h.bf16 %v10484_v53  ;;  %v7538_v53 = vunpack.i.h.bf16 %v10482_v44  ;;  %v10647_v44 = vld [vmem:[#allocation3 + $0xe0] sm:$0xff] }
 0x364   : > { %3941 = vmatmul.mubr.f32.gmra.mxu0 %v3509_v61  ;;  %4081 = vmatprep.subr.mxu0 %v12165_v39  ;;  %v7548_v61 = vunpack.i.h.bf16 %v10495_v29  ;;  %v10669_v29 = vld [vmem:[#allocation3 + $0xf8] sm:$0xff] }
 0x365   : > { %3945 = vmatprep.mubr.f32.mxu0 %v3542_v42  ;;  %4082 = vmatpush2.msra.mxu0 %v12167_v50  ;;  %v3511_v46 = vsel %vm734_vm2, %v10635_v13, %v7533_v60  ;;  %v3512_v14 = vsel %vm734_vm2, %v10647_v44, %v7538_v53  ;;  %v3513_v42 = vsel %vm734_vm2, %v10658_v38, %v7543_v62  ;;  %v7552_v50 = vunpack.i.l.bf16 %v10510_v58 }
 0x366   : > { %4083 = vmatprep.subr.mxu0 %v12165_v39 }
 0x367   : > { %v10624_v17 = vpop.permute.xlu1 %7625  ;;  %v10626_v27 = vpop.permute.xlu0 %7620  ;;  %4084 = vmatpush2.msra.mxu0 %v12168_v37 }
 0x368   : > { %3946 = vmatmul.mubr.f32.gmra.mxu0 %v3510_v3  ;;  %6923 = vmatprep.subr.mxu0 %v10618_v32  ;;  %v12172_v3 = vld [vmem:[#allocation10_spill] sm:$0xff] }
 0x369   : > { %3950 = vmatprep.mubr.f32.mxu0 %v3543_v57  ;;  %v7553_v57 = vunpack.i.h.bf16 %v10510_v58  ;;  %v10680_v58 = vld [vmem:[#allocation3 + $0x108] sm:$0xff] }
 0x36b   : > { %v7636_v30 = vpop.permute.xlu1 %7635  ;;  %v10638_v31 = vpop.permute.xlu0 %7630 }
 0x36c   : > { %v7638_v56 = vunpack.i.h.bf16 %v7636_v30  ;;  %v7637_v35 = vunpack.i.l.bf16 %v7636_v30  ;;  %3951 = vmatmul.mubr.f32.gmra.mxu0 %v3511_v46  ;;  %v3514_v30 = vsel %vm734_vm2, %v10669_v29, %v7548_v61 }
 0x36d   : > { %3955 = vmatprep.mubr.f32.mxu0 %v3544_v25 }
 0x36e   : > { %v3596_v23 = vsel %vm734_vm2, %v10519_v11, %v7637_v35  ;;  %v3564_v8 = vsel %vm734_vm2, %v2827_v47, %v7638_v56  ;;  %v12171_v11 = vld [vmem:[#allocation11_spill] sm:$0xff] }
 0x36f   : > { %v7646_v48 = vpop.permute.xlu1 %7645  ;;  %4120 = vmatprep.mubr.f32.mxu1 %v3596_v23  ;;  %v7641_v54 = vpop.permute.xlu0 %7640  ;;  %v3545_v21 = vsel %vm734_vm2, %v12171_v11, %v7542_v18  ;;  %v7557_v18 = vunpack.i.l.bf16 %v10508_v9  ;;  %v2830_v47 = vld [vmem:[#allocation3 + $0x91] sm:$0xff]  ;;  %v7558_v23 = vunpack.i.h.bf16 %v10508_v9  ;;  %v7563_v11 = vunpack.i.h.bf16 %v10525_v0 }
 0x370   : > { %v7647_v51 = vunpack.i.l.bf16 %v7646_v48  ;;  %v7643_v41 = vunpack.i.h.bf16 %v7641_v54  ;;  %v7642_v5 = vunpack.i.l.bf16 %v7641_v54  ;;  %3956 = vmatmul.mubr.f32.gmra.mxu0 %v3512_v14  ;;  %4121 = vmatmul.mubr.f32.vlgmr.msra.gmra.mxu1 %v3564_v8  ;;  %v7648_v6 = vunpack.i.h.bf16 %v7646_v48  ;;  %v10691_v9 = vld [vmem:[#allocation3 + $0x110] sm:$0xff] }
 0x371   : > { %3960 = vmatprep.mubr.f32.mxu0 %v3545_v21  ;;  %v7562_v48 = vunpack.i.l.bf16 %v10525_v0  ;;  %v10702_v0 = vld [vmem:[#allocation3 + $0x120] sm:$0xff] }
 0x372   : > { %v3597_v59 = vsel %vm734_vm2, %v10535_v55, %v7642_v5  ;;  %v3565_v24 = vsel %vm734_vm2, %v2828_v40, %v7643_v41  ;;  %v3546_v55 = vsel %vm734_vm2, %v12172_v3, %v7547_v19  ;;  %v3598_v37 = vsel %vm734_vm2, %v10551_v34, %v7647_v51  ;;  %v12173_v34 = vld [vmem:[#allocation13_spill] sm:$0xff] }
 0x373   : > { %v7651_v43 = vpop.permute.xlu0 %7650  ;;  %4125 = vmatprep.mubr.f32.mxu1 %v3597_v59  ;;  %v7656_v12 = vpop.permute.xlu1 %7655  ;;  %v3566_v46 = vsel %vm734_vm2, %v2829_v22, %v7648_v6  ;;  %v3547_v35 = vsel %vm734_vm2, %v12173_v34, %v7552_v50  ;;  %v3515_v19 = vsel %vm734_vm2, %v10680_v58, %v7553_v57  ;;  %v2831_v5 = vld [vmem:[#allocation3 + $0x99] sm:$0xff]  ;;  %v3516_v40 = vsel %vm734_vm2, %v10691_v9, %v7558_v23  ;;  %v2832_v50 = vld [vmem:[#allocation3 + $0xa9] sm:$0xff] }
 0x374   : > { %v7652_v60 = vunpack.i.l.bf16 %v7651_v43  ;;  %3961 = vmatmul.mubr.f32.gmra.mxu0 %v3513_v42  ;;  %4126 = vmatmul.mubr.f32.gmra.mxu1 %v3565_v24  ;;  %v7653_v53 = vunpack.i.h.bf16 %v7651_v43  ;;  %v7657_v56 = vunpack.i.l.bf16 %v7656_v12  ;;  %v7658_v8 = vunpack.i.h.bf16 %v7656_v12  ;;  %v10708_v12 = vld [vmem:[#allocation3 + $0x12a] sm:$0xff] }
 0x375   : > { %3965 = vmatprep.mubr.f32.mxu0 %v3546_v55  ;;  %4130 = vmatprep.mubr.f32.mxu1 %v3598_v37  ;;  %v7567_v24 = vunpack.i.l.bf16 %v10523_v16  ;;  %v3517_v55 = vsel %vm734_vm2, %v10702_v0, %v7563_v11  ;;  %v7572_v22 = vunpack.i.l.bf16 %v10541_v1  ;;  %v10741_v11 = vld [vmem:[#allocation3 + $0x140] sm:$0xff] }
 0x376   : > { %v3599_v20 = vsel %vm734_vm2, %v10567_v4, %v7652_v60  ;;  %v3567_v62 = vsel %vm734_vm2, %v2830_v47, %v7653_v53  ;;  %v12174_v4 = vld [vmem:[#allocation12_spill] sm:$0xff]  ;;  %v3600_v51 = vsel %vm734_vm2, %v10583_v45, %v7657_v56  ;;  %v3568_v59 = vsel %vm734_vm2, %v2831_v5, %v7658_v8  ;;  %v12175_v45 = vld [vmem:[#allocation14_spill] sm:$0xff] }
 0x377   : > { %v7661_v25 = vpop.permute.xlu0 %7660  ;;  %v3548_v14 = vsel %vm734_vm2, %v12174_v4, %v7557_v18  ;;  %v7666_v41 = vpop.permute.xlu1 %7665  ;;  %v3549_v6 = vsel %vm734_vm2, %v12175_v45, %v7562_v48  ;;  %v7568_v60 = vunpack.i.h.bf16 %v10523_v16  ;;  %v7573_v18 = vunpack.i.h.bf16 %v10541_v1  ;;  %v10728_v8 = vld [vmem:[#allocation3 + $0x138] sm:$0xff] }
 0x378   : > { %3966 = vmatmul.mubr.f32.gmra.mxu0 %v3514_v30  ;;  %4131 = vmatmul.mubr.f32.gmra.mxu1 %v3566_v46  ;;  %v7662_v54 = vunpack.i.l.bf16 %v7661_v25  ;;  %v7663_v21 = vunpack.i.h.bf16 %v7661_v25  ;;  %v7667_v61 = vunpack.i.l.bf16 %v7666_v41  ;;  %v7668_v3 = vunpack.i.h.bf16 %v7666_v41  ;;  %v10715_v30 = vld [vmem:[#allocation3 + $0x128] sm:$0xff]  ;;  %v2833_v46 = vld [vmem:[#allocation3 + $0xb1] sm:$0xff] }
 0x379   : > { %3970 = vmatprep.mubr.f32.mxu0 %v3547_v35  ;;  %4135 = vmatprep.mubr.f32.mxu1 %v3599_v20  ;;  %v3518_v34 = vsel %vm734_vm2, %v10715_v30, %v7568_v60  ;;  %v10721_v20 = vld [vmem:[#allocation3 + $0x13a] sm:$0xff]  ;;  %v7577_v25 = vunpack.i.l.bf16 %v10539_v49  ;;  %v10747_v45 = vld [vmem:[#allocation3 + $0x152] sm:$0xff] }
 0x37a   : > { %v3601_v43 = vsel %vm734_vm2, %v10599_v36, %v7662_v54  ;;  %v3569_v37 = vsel %vm734_vm2, %v2832_v50, %v7663_v21  ;;  %v3550_v36 = vsel %vm734_vm2, %v10708_v12, %v7567_v24  ;;  %v3602_v53 = vsel %vm734_vm2, %v10620_v15, %v7667_v61  ;;  %v2835_v21 = vld [vmem:[#allocation3 + $0xc9] sm:$0xff]  ;;  %v2836_v60 = vld [vmem:[#allocation3 + $0xd9] sm:$0xff] }
 0x37b   : > { %v7671_v42 = vpop.permute.xlu0 %7670  ;;  %v7676_v16 = vpop.permute.xlu1 %7675  ;;  %v3570_v35 = vsel %vm734_vm2, %v2833_v46, %v7668_v3  ;;  %v3551_v15 = vsel %vm734_vm2, %v10721_v20, %v7572_v22  ;;  %v3519_v54 = vsel %vm734_vm2, %v10728_v8, %v7573_v18  ;;  %v10754_v50 = vld [vmem:[#allocation3 + $0x150] sm:$0xff]  ;;  %v7588_v3 = vunpack.i.h.bf16 %v10555_v63  ;;  %v10767_v46 = vld [vmem:[#allocation3 + $0x158] sm:$0xff]  ;;  %v2837_v18 = vld [vmem:[#allocation3 + $0xe1] sm:$0xff] }
 0x37c   : > { %3971 = vmatmul.mubr.f32.gmra.mxu0 %v3515_v19  ;;  %4136 = vmatmul.mubr.f32.gmra.mxu1 %v3567_v62  ;;  %v7672_v57 = vunpack.i.l.bf16 %v7671_v42  ;;  %v7673_v56 = vunpack.i.h.bf16 %v7671_v42  ;;  %v7677_v47 = vunpack.i.l.bf16 %v7676_v16  ;;  %v2834_v19 = vld [vmem:[#allocation3 + $0xc1] sm:$0xff]  ;;  %v7578_v62 = vunpack.i.h.bf16 %v10539_v49 }
 0x37d   : > { %3975 = vmatprep.mubr.f32.mxu0 %v3548_v14  ;;  %4140 = vmatprep.mubr.f32.mxu1 %v3600_v51  ;;  %v7678_v48 = vunpack.i.h.bf16 %v7676_v16  ;;  %v10734_v14 = vld [vmem:[#allocation3 + $0x142] sm:$0xff]  ;;  %v7582_v51 = vunpack.i.l.bf16 %v10557_v52 }
 0x37e   : > { %v3603_v23 = vsel %vm734_vm2, %v10635_v13, %v7672_v57  ;;  %v3571_v4 = vsel %vm734_vm2, %v2834_v19, %v7673_v56  ;;  %v3552_v13 = vsel %vm734_vm2, %v10734_v14, %v7577_v25  ;;  %v3604_v5 = vsel %vm734_vm2, %v10647_v44, %v7677_v47  ;;  %v10760_v57 = vld [vmem:[#allocation3 + $0x15a] sm:$0xff]  ;;  %v10773_v47 = vld [vmem:[#allocation3 + $0x16a] sm:$0xff] }
 0x37f   : > { %v7681_v1 = vpop.permute.xlu0 %7680  ;;  %v7686_v49 = vpop.permute.xlu1 %7685  ;;  %v3520_v24 = vsel %vm734_vm2, %v10741_v11, %v7578_v62  ;;  %v3572_v61 = vsel %vm734_vm2, %v2835_v21, %v7678_v48  ;;  %v3553_v44 = vsel %vm734_vm2, %v10747_v45, %v7582_v51  ;;  %v7593_v56 = vunpack.i.h.bf16 %v10573_v7  ;;  %v10780_v19 = vld [vmem:[#allocation3 + $0x168] sm:$0xff]  ;;  %v2838_v62 = vld [vmem:[#allocation3 + $0xf1] sm:$0xff] }
 0x380   : > { %3976 = vmatmul.mubr.f32.gmra.mxu0 %v3516_v40  ;;  %4141 = vmatmul.mubr.f32.gmra.mxu1 %v3568_v59  ;;  %v7682_v41 = vunpack.i.l.bf16 %v7681_v1  ;;  %v7583_v40 = vunpack.i.h.bf16 %v10557_v52  ;;  %v7683_v59 = vunpack.i.h.bf16 %v7681_v1  ;;  %v7598_v48 = vunpack.i.h.bf16 %v10571_v28  ;;  %v10793_v21 = vld [vmem:[#allocation3 + $0x170] sm:$0xff] }
 0x381   : > { %3980 = vmatprep.mubr.f32.mxu0 %v3549_v6  ;;  %4145 = vmatprep.mubr.f32.mxu1 %v3601_v43  ;;  %v7587_v6 = vunpack.i.l.bf16 %v10555_v63  ;;  %v7687_v43 = vunpack.i.l.bf16 %v7686_v49 }
 0x382   : > { %v3605_v42 = vsel %vm734_vm2, %v10658_v38, %v7682_v41  ;;  %v3573_v22 = vsel %vm734_vm2, %v2836_v60, %v7683_v59  ;;  %v10786_v41 = vld [vmem:[#allocation3 + $0x172] sm:$0xff]  ;;  %v7603_v59 = vunpack.i.h.bf16 %v10589_v10 }
 0x383   : > { %v7691_v52 = vpop.permute.xlu0 %7690  ;;  %v3554_v38 = vsel %vm734_vm2, %v10760_v57, %v7587_v6  ;;  %v3606_v16 = vsel %vm734_vm2, %v10669_v29, %v7687_v43  ;;  %v7696_v63 = vpop.permute.xlu1 %7695  ;;  %v2885_v43 = vld [vmem:[#allocation3 + $0x30] sm:$0xff] }
 0x384   : > { %3981 = vmatmul.mubr.f32.gmra.mxu0 %v3517_v55  ;;  %4146 = vmatmul.mubr.f32.gmra.mxu1 %v3569_v37  ;;  %v7688_v55 = vunpack.i.h.bf16 %v7686_v49  ;;  %v3521_v37 = vsel %vm734_vm2, %v10754_v50, %v7583_v40  ;;  %v2839_v40 = vld [vmem:[#allocation3 + $0xf9] sm:$0xff] }
 0x385   : > { %3985 = vmatprep.mubr.f32.mxu0 %v3550_v36  ;;  %4150 = vmatprep.mubr.f32.mxu1 %v3602_v53  ;;  %v7592_v36 = vunpack.i.l.bf16 %v10573_v7  ;;  %v7692_v53 = vunpack.i.l.bf16 %v7691_v52 }
 0x386   : > { %v3574_v25 = vsel %vm734_vm2, %v2837_v18, %v7688_v55  ;;  %v7608_v55 = vunpack.i.h.bf16 %v10587_v2 }
 0x387   : > { %v3555_v29 = vsel %vm734_vm2, %v10773_v47, %v7592_v36  ;;  %v3607_v1 = vsel %vm734_vm2, %v10680_v58, %v7692_v53  ;;  %v7701_v7 = vpop.permute.xlu0 %7700  ;;  %v2886_v53 = vld [vmem:[#allocation3 + $0x38] sm:$0xff] }
 0x388   : > { %3986 = vmatmul.mubr.f32.gmra.mxu0 %v3518_v34  ;;  %4151 = vmatmul.mubr.f32.gmra.mxu1 %v3570_v35  ;;  %v7693_v34 = vunpack.i.h.bf16 %v7691_v52  ;;  %v3522_v35 = vsel %vm734_vm2, %v10767_v46, %v7588_v3  ;;  %v2840_v3 = vld [vmem:[#allocation3 + $0x109] sm:$0xff] }
 0x389   : > { %3990 = vmatprep.mubr.f32.mxu0 %v3551_v15  ;;  %4155 = vmatprep.mubr.f32.mxu1 %v3603_v23  ;;  %v7597_v15 = vunpack.i.l.bf16 %v10571_v28  ;;  %v7697_v23 = vunpack.i.l.bf16 %v7696_v63  ;;  %v7706_v28 = vpop.permute.xlu1 %7705 }
 0x38a   : > { %v3575_v51 = vsel %vm734_vm2, %v2838_v62, %v7693_v34  ;;  %v7707_v52 = vunpack.i.l.bf16 %v7706_v28  ;;  %v2841_v34 = vld [vmem:[#allocation3 + $0x111] sm:$0xff] }
 0x38b   : > { %v3556_v58 = vsel %vm734_vm2, %v10786_v41, %v7597_v15  ;;  %v3608_v49 = vsel %vm734_vm2, %v10691_v9, %v7697_v23  ;;  %v7711_v60 = vpop.permute.xlu0 %7710 }
 0x38c   : > { %3991 = vmatmul.mubr.f32.gmra.mxu0 %v3519_v54  ;;  %4156 = vmatmul.mubr.f32.gmra.mxu1 %v3571_v4  ;;  %v7698_v54 = vunpack.i.h.bf16 %v7696_v63  ;;  %v3523_v4 = vsel %vm734_vm2, %v10780_v19, %v7593_v56  ;;  %v2821_v56 = vld [vmem:[#allocation3 + $0x21] sm:$0xff] }
 0x38d   : > { %3995 = vmatprep.mubr.f32.mxu0 %v3552_v13  ;;  %4160 = vmatprep.mubr.f32.mxu1 %v3604_v5  ;;  %v7602_v13 = vunpack.i.l.bf16 %v10589_v10  ;;  %v7702_v5 = vunpack.i.l.bf16 %v7701_v7  ;;  %v2820_v10 = vld [vmem:[#allocation3 + $0x19] sm:$0xff]  ;;  %v7716_v18 = vpop.permute.xlu1 %7715  ;;  %v3558_v15 = vsel %vm734_vm2, %v2821_v56, %v7608_v55  ;;  %v2824_v55 = vld [vmem:[#allocation3 + $0x49] sm:$0xff]  ;;  %v2825_v56 = vld [vmem:[#allocation3 + $0x51] sm:$0xff] }
 0x38e   : > { %v3576_v6 = vsel %vm734_vm2, %v2839_v40, %v7698_v54  ;;  %v2842_v54 = vld [vmem:[#allocation3 + $0x121] sm:$0xff] }
 0x38f   : > { %v3589_v9 = vsel %vm734_vm2, %v2885_v43, %v7602_v13  ;;  %v7721_v62 = vpop.permute.xlu0 %7720 }
 0x390   : > { %3996 = vmatmul.mubr.f32.gmra.mxu0 %v3520_v24  ;;  %4161 = vmatmul.mubr.f32.gmra.mxu1 %v3572_v61  ;;  %v7703_v24 = vunpack.i.h.bf16 %v7701_v7  ;;  %v3524_v61 = vsel %vm734_vm2, %v10793_v21, %v7598_v48  ;;  %v2822_v48 = vld [vmem:[#allocation3 + $0x31] sm:$0xff]  ;;  %v7723_v43 = vunpack.i.h.bf16 %v7721_v62 }
 0x391   : > { %4000 = vmatprep.mubr.f32.mxu0 %v3553_v44  ;;  %4165 = vmatprep.mubr.f32.mxu1 %v3605_v42  ;;  %v7607_v44 = vunpack.i.l.bf16 %v10587_v2  ;;  %v3609_v42 = vsel %vm734_vm2, %v10702_v0, %v7702_v5  ;;  %v7612_v0 = vunpack.i.l.bf16 %v10605_v33  ;;  %v3610_v2 = vsel %vm734_vm2, %v10715_v30, %v7707_v52  ;;  %v3688_v52 = vld [vmem:[%s12138_s5 + $0x218] sm:$0xff] }
 0x392   : > { %v3577_v36 = vsel %vm734_vm2, %v2840_v3, %v7703_v24  ;;  %v7717_v30 = vunpack.i.l.bf16 %v7716_v18  ;;  %v2823_v24 = vld [vmem:[#allocation3 + $0x39] sm:$0xff] }
 0x393   : > { %v3590_v63 = vsel %vm734_vm2, %v2886_v53, %v7607_v44  ;;  %v7731_v3 = vpop.permute.xlu0 %7730 }
 0x394   : > { %4001 = vmatmul.mubr.f32.gmra.mxu0 %v3521_v37  ;;  %4166 = vmatmul.mubr.f32.gmra.mxu1 %v3573_v22  ;;  %v3557_v37 = vsel %vm734_vm2, %v2820_v10, %v7603_v59  ;;  %v7708_v22 = vunpack.i.h.bf16 %v7706_v28  ;;  %v7722_v28 = vunpack.i.l.bf16 %v7721_v62  ;;  %v7726_v59 = vpop.permute.xlu1 %7725  ;;  %v2846_v62 = vld [vmem:[#allocation3 + $0x151] sm:$0xff] }
 0x395   : > { %4005 = vmatprep.mubr.f32.mxu0 %v3554_v38  ;;  %4170 = vmatprep.mubr.f32.mxu1 %v3606_v16  ;;  %v3691_v38 = vld [vmem:[%s12138_s5 + $0x230] sm:$0xff]  ;;  %v7712_v16 = vunpack.i.l.bf16 %v7711_v60 }
 0x396   : > { %v3578_v23 = vsel %vm734_vm2, %v2841_v34, %v7708_v22  ;;  %v7628_v22 = vunpack.i.h.bf16 %v10624_v17  ;;  %v2845_v34 = vld [vmem:[#allocation3 + $0x141] sm:$0xff] }
 0x398   : > { %4006 = vmatmul.mubr.f32.gmra.mxu0 %v3522_v35  ;;  %4171 = vmatmul.mubr.f32.gmra.mxu1 %v3574_v25  ;;  %v7613_v35 = vunpack.i.h.bf16 %v10605_v33  ;;  %v7713_v25 = vunpack.i.h.bf16 %v7711_v60  ;;  %v3611_v33 = vsel %vm734_vm2, %v10728_v8, %v7712_v16  ;;  %v7622_v8 = vunpack.i.l.bf16 %v10626_v27  ;;  %v3687_v16 = vld [vmem:[%s12138_s5 + $0x210] sm:$0xff] }
 0x399   : > { %4010 = vmatprep.mubr.f32.mxu0 %v3555_v29  ;;  %4175 = vmatprep.mubr.f32.mxu1 %v3607_v1  ;;  %v2887_v29 = vld [vmem:[#allocation3 + $0x48] sm:$0xff]  ;;  %v7617_v1 = vunpack.i.l.bf16 %v10603_v26  ;;  %v7727_v60 = vunpack.i.l.bf16 %v7726_v59 }
 0x39a   : > { %v3591_v7 = vsel %vm734_vm2, %v2887_v29, %v7612_v0  ;;  %v3559_v13 = vsel %vm734_vm2, %v2822_v48, %v7613_v35  ;;  %v3579_v5 = vsel %vm734_vm2, %v2842_v54, %v7713_v25  ;;  %v2890_v0 = vld [vmem:[#allocation3 + $0x68] sm:$0xff]  ;;  %v3686_v35 = vld [vmem:[%s12138_s5 + $0x208] sm:$0xff]  ;;  %v7633_v25 = vunpack.i.h.bf16 %v10638_v31 }
 0x39c   : > { %4011 = vmatmul.mubr.f32.gmra.mxu0 %v3523_v4  ;;  %4176 = vmatmul.mubr.f32.gmra.mxu1 %v3575_v51  ;;  %v7618_v4 = vunpack.i.h.bf16 %v10603_v26  ;;  %v7718_v51 = vunpack.i.h.bf16 %v7716_v18  ;;  %v3612_v26 = vsel %vm734_vm2, %v10741_v11, %v7717_v30  ;;  %v7627_v11 = vunpack.i.l.bf16 %v10624_v17  ;;  %v7736_v18 = vpop.permute.xlu1 %7735  ;;  %v3685_v30 = vld [vmem:[%s12138_s5 + $0x200] sm:$0xff] }
 0x39d   : > { %4015 = vmatprep.mubr.f32.mxu0 %v3556_v58  ;;  %4180 = vmatprep.mubr.f32.mxu1 %v3608_v49  ;;  %v2888_v58 = vld [vmem:[#allocation3 + $0x50] sm:$0xff]  ;;  %v3614_v17 = vsel %vm734_vm2, %v10767_v46, %v7727_v60  ;;  %v2891_v46 = vld [vmem:[#allocation3 + $0x78] sm:$0xff]  ;;  %v7738_v48 = vunpack.i.h.bf16 %v7736_v18 }
 0x39e   : > { %v3689_v49 = vld [vmem:[%s12138_s5 + $0x220] sm:$0xff]  ;;  %v3592_v40 = vsel %vm734_vm2, %v2888_v58, %v7617_v1  ;;  %v3560_v44 = vsel %vm734_vm2, %v2823_v24, %v7618_v4  ;;  %v2847_v58 = vld [vmem:[#allocation3 + $0x159] sm:$0xff] }
 0x39f   : > { %v2951_v24 = vld [vmem:[#allocation3 + $0x4a] sm:$0xff] }
 0x3a0   : > { %4016 = vmatmul.mubr.f32.gmra.mxu0 %v3524_v61  ;;  %4181 = vmatmul.mubr.f32.gmra.mxu1 %v3576_v6  ;;  %v2843_v61 = vld [vmem:[#allocation3 + $0x129] sm:$0xff]  ;;  %v7623_v6 = vunpack.i.h.bf16 %v10626_v27  ;;  %v3613_v27 = vsel %vm734_vm2, %v10754_v50, %v7722_v28  ;;  %v7632_v50 = vunpack.i.l.bf16 %v10638_v31  ;;  %v2950_v28 = vld [vmem:[#allocation3 + $0x3a] sm:$0xff] }
 0x3a1   : > { %4085 = vmatprep.mubr.f32.mxu0 %v3589_v9  ;;  %4185 = vmatprep.mubr.f32.mxu1 %v3609_v42  ;;  %v3580_v9 = vsel %vm734_vm2, %v2843_v61, %v7718_v51  ;;  %v2889_v42 = vld [vmem:[#allocation3 + $0x60] sm:$0xff]  ;;  %v2848_v61 = vld [vmem:[#allocation3 + $0x169] sm:$0xff] }
 0x3a2   : > { %v3593_v10 = vsel %vm734_vm2, %v2889_v42, %v7622_v8  ;;  %v3561_v53 = vsel %vm734_vm2, %v2824_v55, %v7623_v6  ;;  %v3595_v1 = vsel %vm734_vm2, %v2891_v46, %v7632_v50  ;;  %v3584_v8 = vsel %vm734_vm2, %v2847_v58, %v7738_v48  ;;  %v2964_v46 = vld [vmem:[#allocation3 + $0xe2] sm:$0xff] }
 0x3a4   : > { %4086 = vmatmul.mubr.f32.vlgmr.msra.gmra.mxu0 %v3557_v37  ;;  %4186 = vmatmul.mubr.f32.gmra.mxu1 %v3577_v36  ;;  %v2844_v37 = vld [vmem:[#allocation3 + $0x139] sm:$0xff]  ;;  %v7728_v36 = vunpack.i.h.bf16 %v7726_v59 }
 0x3a5   : > { %6924 = vmatpush3.msra.mxu0 %v10618_v32  ;;  %4090 = vmatprep.mubr.f32.mxu0 %v3590_v63  ;;  %v3690_v32 = vld [vmem:[%s12138_s5 + $0x228] sm:$0xff]  ;;  %v3594_v63 = vsel %vm734_vm2, %v2890_v0, %v7627_v11  ;;  %v2953_v11 = vld [vmem:[#allocation3 + $0x62] sm:$0xff] }
 0x3a6   : > { %4190 = vmatprep.mubr.f32.mxu1 %v3610_v2  ;;  %6925 = vmatprep.subr.mxu0 %v3691_v38  ;;  %v7732_v2 = vunpack.i.l.bf16 %v7731_v3  ;;  %v3582_v29 = vsel %vm734_vm2, %v2845_v34, %v7728_v36  ;;  %v2850_v0 = vld [vmem:[#allocation3 + $0x181] sm:$0xff] }
 0x3a7   : > { %6926 = vmatpush3.msra.mxu0 %v3691_v38  ;;  %v3581_v38 = vsel %vm734_vm2, %v2844_v37, %v7723_v43  ;;  %v2954_v37 = vld [vmem:[#allocation3 + $0x6a] sm:$0xff]  ;;  %v2958_v34 = vld [vmem:[#allocation3 + $0x9a] sm:$0xff] }
 0x3a8   : > { %4091 = vmatmul.mubr.f32.gmra.mxu0 %v3558_v15  ;;  %4191 = vmatmul.mubr.f32.gmra.mxu1 %v3578_v23  ;;  %v7733_v15 = vunpack.i.h.bf16 %v7731_v3  ;;  %v3562_v23 = vsel %vm734_vm2, %v2825_v56, %v7628_v22  ;;  %v3615_v31 = vsel %vm734_vm2, %v10780_v19, %v7732_v2  ;;  %v2949_v19 = vld [vmem:[#allocation3 + $0x32] sm:$0xff]  ;;  %v2851_v2 = vld [vmem:[#allocation3 + $0x189] sm:$0xff] }
 0x3a9   : > { %4095 = vmatprep.mubr.f32.mxu0 %v3591_v7  ;;  %4195 = vmatprep.mubr.f32.mxu1 %v3611_v33  ;;  %v7741_v7 = vpop.permute.xlu0 %7740  ;;  %v2826_v33 = vld [vmem:[#allocation3 + $0x61] sm:$0xff] }
 0x3aa   : > { %6927 = vmatprep.subr.mxu0 %v3690_v32  ;;  %v3563_v54 = vsel %vm734_vm2, %v2826_v33, %v7633_v25  ;;  %v3583_v4 = vsel %vm734_vm2, %v2846_v62, %v7733_v15  ;;  %v7742_v51 = vunpack.i.l.bf16 %v7741_v7  ;;  %v2960_v25 = vld [vmem:[#allocation3 + $0xb2] sm:$0xff]  ;;  %v2961_v15 = vld [vmem:[#allocation3 + $0xc2] sm:$0xff] }
 0x3ab   : > { %6928 = vmatpush3.msra.mxu0 %v3690_v32  ;;  %v7737_v32 = vunpack.i.l.bf16 %v7736_v18  ;;  %v2957_v18 = vld [vmem:[#allocation3 + $0x92] sm:$0xff]  ;;  %v2969_v33 = vld [vmem:[#allocation3 + $0x122] sm:$0xff] }
 0x3ac   : > { %4096 = vmatmul.mubr.f32.gmra.mxu0 %v3559_v13  ;;  %4196 = vmatmul.mubr.f32.gmra.mxu1 %v3579_v5  ;;  %v7746_v5 = vpop.permute.xlu1 %7745 }
 0x3ad   : > { %4100 = vmatprep.mubr.f32.mxu0 %v3592_v40  ;;  %4200 = vmatprep.mubr.f32.mxu1 %v3612_v26  ;;  %v3616_v13 = vsel %vm734_vm2, %v10793_v21, %v7737_v32  ;;  %v2913_v40 = vld [vmem:[#allocation3 + $0x180] sm:$0xff]  ;;  %v7747_v26 = vunpack.i.l.bf16 %v7746_v5  ;;  %v7751_v21 = vpop.permute.xlu0 %7750  ;;  %v7748_v6 = vunpack.i.h.bf16 %v7746_v5  ;;  %v2965_v32 = vld [vmem:[#allocation3 + $0xf2] sm:$0xff] }
 0x3ae   : > { %6929 = vmatprep.subr.mxu0 %v3689_v49  ;;  %v3617_v59 = vsel %vm734_vm2, %v2913_v40, %v7742_v51  ;;  %v7752_v42 = vunpack.i.l.bf16 %v7751_v21  ;;  %v7753_v3 = vunpack.i.h.bf16 %v7751_v21  ;;  %v2977_v5 = vld [vmem:[#allocation3 + $0x182] sm:$0xff] }
 0x3af   : > { %6930 = vmatpush3.msra.mxu0 %v3689_v49  ;;  %v7743_v49 = vunpack.i.h.bf16 %v7741_v7  ;;  %v2968_v7 = vld [vmem:[#allocation3 + $0x112] sm:$0xff] }
 0x3b0   : > { %4101 = vmatmul.mubr.f32.gmra.mxu0 %v3560_v44  ;;  %4201 = vmatmul.mubr.f32.gmra.mxu1 %v3580_v9  ;;  %v2952_v44 = vld [vmem:[#allocation3 + $0x52] sm:$0xff]  ;;  %v2914_v9 = vld [vmem:[#allocation3 + $0x188] sm:$0xff]  ;;  %v7756_v60 = vpop.permute.xlu1 %7755  ;;  %v3587_v50 = vsel %vm734_vm2, %v2850_v0, %v7753_v3 }
 0x3b1   : > { %4105 = vmatprep.mubr.f32.mxu0 %v3593_v10  ;;  %4205 = vmatprep.mubr.f32.mxu1 %v3613_v27  ;;  %v3585_v43 = vsel %vm734_vm2, %v2848_v61, %v7743_v49  ;;  %v2915_v10 = vld [vmem:[#allocation3 + $0x198] sm:$0xff]  ;;  %v7757_v22 = vunpack.i.l.bf16 %v7756_v60 }
 0x3b2   : > { %6931 = vmatprep.subr.mxu0 %v3688_v52  ;;  %v2849_v27 = vld [vmem:[#allocation3 + $0x171] sm:$0xff]  ;;  %v3619_v36 = vsel %vm734_vm2, %v2915_v10, %v7752_v42 }
 0x3b3   : > { %6932 = vmatpush3.msra.mxu0 %v3688_v52  ;;  %v3618_v52 = vsel %vm734_vm2, %v2914_v9, %v7747_v26  ;;  %v3586_v55 = vsel %vm734_vm2, %v2849_v27, %v7748_v6  ;;  %v5862_v9 = vld [vmem:[%s12140_s7 + $0x110] sm:$0xff] }
 0x3b4   : > { %4106 = vmatmul.mubr.f32.gmra.mxu0 %v3561_v53  ;;  %4206 = vmatmul.mubr.f32.gmra.mxu1 %v3581_v38  ;;  %v2955_v53 = vld [vmem:[#allocation3 + $0x7a] sm:$0xff] }
 0x3b5   : > { %4110 = vmatprep.mubr.f32.mxu0 %v3594_v63  ;;  %4210 = vmatprep.mubr.f32.mxu1 %v3614_v17  ;;  %v2916_v38 = vld [vmem:[#allocation3 + $0x1a0] sm:$0xff] }
 0x3b6   : > { %6933 = vmatprep.subr.mxu0 %v3687_v16  ;;  %v2956_v63 = vld [vmem:[#allocation3 + $0x82] sm:$0xff]  ;;  %v3620_v17 = vsel %vm734_vm2, %v2916_v38, %v7757_v22 }
 0x3b7   : > { %6934 = vmatpush3.msra.mxu0 %v3687_v16  ;;  %v7758_v16 = vunpack.i.h.bf16 %v7756_v60  ;;  %v5860_v60 = vld [vmem:[%s12140_s7 + $0x100] sm:$0xff] }
 0x3b8   : > { %4111 = vmatmul.mubr.f32.gmra.mxu0 %v3562_v23  ;;  %4211 = vmatmul.mubr.f32.gmra.mxu1 %v3582_v29  ;;  %v2962_v23 = vld [vmem:[#allocation3 + $0xca] sm:$0xff]  ;;  %v2963_v29 = vld [vmem:[#allocation3 + $0xda] sm:$0xff] }
 0x3b9   : > { %6935 = vmatprep.subr.mxu0 %v3686_v35  ;;  %4115 = vmatprep.mubr.f32.mxu0 %v3595_v1  ;;  %v3588_v56 = vsel %vm734_vm2, %v2851_v2, %v7758_v16  ;;  %v2966_v1 = vld [vmem:[#allocation3 + $0xfa] sm:$0xff] }
 0x3ba   : > { %4215 = vmatprep.mubr.f32.mxu1 %v3615_v31  ;;  %6936 = vmatpush3.msra.mxu0 %v3686_v35  ;;  %v2959_v35 = vld [vmem:[#allocation3 + $0xaa] sm:$0xff] }
 0x3bb   : > { %6937 = vmatprep.subr.mxu0 %v3685_v30 }
 0x3bc   : > { %4116 = vmatmul.mubr.f32.gmra.mxu0 %v3563_v54  ;;  %4216 = vmatmul.mubr.f32.gmra.mxu1 %v3583_v4 }
 0x3bd   : > { %4220 = vmatprep.mubr.f32.mxu1 %v3616_v13  ;;  %6938 = vmatpush3.msra.mxu0 %v3685_v30  ;;  %v2967_v30 = vld [vmem:[#allocation3 + $0x10a] sm:$0xff] }
 0x3be   : > { %6939 = vmatprep.mubr.msk.f32.mxu0 %vm734_vm2, %v2949_v19  ;;  %v2978_v19 = vld [vmem:[#allocation3 + $0x18a] sm:$0xff] }
 0x3c0   : > { %4221 = vmatmul.mubr.f32.gmra.mxu1 %v3584_v8  ;;  %6940 = vmatmul.mubr.msk.f32.vlgmr.msra.gmra.mxu0 %vm734_vm2, %v2950_v28 }
 0x3c1   : > { %4225 = vmatprep.mubr.f32.mxu1 %v3617_v59  ;;  %6942 = vmatprep.mubr.msk.f32.mxu0 %vm734_vm2, %v2951_v24 }
 0x3c4   : > { %4226 = vmatmul.mubr.f32.gmra.mxu1 %v3585_v43  ;;  %6943 = vmatmul.mubr.msk.f32.gmra.mxu0 %vm734_vm2, %v2952_v44  ;;  %v5863_v43 = vld [vmem:[%s12140_s7 + $0x118] sm:$0xff] }
 0x3c5   : > { %4230 = vmatprep.mubr.f32.mxu1 %v3618_v52  ;;  %6945 = vmatprep.mubr.msk.f32.mxu0 %vm734_vm2, %v2953_v11  ;;  %v5861_v52 = vld [vmem:[%s12140_s7 + $0x108] sm:$0xff] }
 0x3c6   : > { %6987 = vmatprep.subr.mxu0 %v5863_v43 }
 0x3c7   : > { %6988 = vmatpush3.msra.mxu0 %v5863_v43 }
 0x3c8   : > { %4231 = vmatmul.mubr.f32.gmra.mxu1 %v3586_v55  ;;  %6946 = vmatmul.mubr.msk.f32.gmra.mxu0 %vm734_vm2, %v2954_v37 }
 0x3c9   : > { %4235 = vmatprep.mubr.f32.mxu1 %v3619_v36  ;;  %6948 = vmatprep.mubr.msk.f32.mxu0 %vm734_vm2, %v2955_v53 }
 0x3ca   : > { %6989 = vmatprep.subr.mxu0 %v5862_v9 }
 0x3cb   : > { %6990 = vmatpush3.msra.mxu0 %v5862_v9 }
 0x3cc   : > { %4236 = vmatmul.mubr.f32.gmra.mxu1 %v3587_v50  ;;  %6949 = vmatmul.mubr.msk.f32.gmra.mxu0 %vm734_vm2, %v2956_v63  ;;  %v11037_v50 = vld [vmem:[%s12139_s6] ss:$0 sm:$0xff] }
 0x3cd   : > { %4240 = vmatprep.mubr.f32.mxu1 %v3620_v17  ;;  %6951 = vmatprep.mubr.msk.f32.mxu0 %vm734_vm2, %v2957_v18 }
 0x3ce   : > { %6991 = vmatprep.subr.mxu0 %v5861_v52 }
 0x3cf   : > { %6992 = vmatpush3.msra.mxu0 %v5861_v52 }
 0x3d0   : > { %4241 = vmatmul.mubr.f32.gmra.mxu1 %v3588_v56  ;;  %6952 = vmatmul.mubr.msk.f32.gmra.mxu0 %vm734_vm2, %v2958_v34 }
 0x3d1   : > { %6954 = vmatprep.mubr.msk.f32.mxu0 %vm734_vm2, %v2959_v35  ;;  %6993 = vmatprep.subr.mxu0 %v5860_v60 }
 0x3d2   : > { %6994 = vmatpush3.msra.mxu0 %v5860_v60 }
 0x3d4   : > { %6955 = vmatmul.mubr.msk.f32.gmra.mxu0 %vm734_vm2, %v2960_v25 }
 0x3d5   : > { %6957 = vmatprep.mubr.msk.f32.mxu0 %vm734_vm2, %v2961_v15 }
 0x3d8   : > { %6958 = vmatmul.mubr.msk.f32.gmra.mxu0 %vm734_vm2, %v2962_v23 }
 0x3d9   : > { %6960 = vmatprep.mubr.msk.f32.mxu0 %vm734_vm2, %v2963_v29 }
 0x3dc   : > { %6961 = vmatmul.mubr.msk.f32.gmra.mxu0 %vm734_vm2, %v2964_v46 }
 0x3dd   : > { %6963 = vmatprep.mubr.msk.f32.mxu0 %vm734_vm2, %v2965_v32 }
 0x3e0   : > { %6964 = vmatmul.mubr.msk.f32.gmra.mxu0 %vm734_vm2, %v2966_v1 }
 0x3e1   : > { %6966 = vmatprep.mubr.msk.f32.mxu0 %vm734_vm2, %v2967_v30 }
 0x3e4   : > { %v10898_v31 = vpop.f32.mrf.mxu0  ;;  %6967 = vmatmul.mubr.msk.f32.gmra.mxu0 %vm734_vm2, %v2968_v7 }
 0x3e5   : > { %6969 = vmatprep.mubr.msk.f32.mxu0 %vm734_vm2, %v2969_v33 }
 0x3e6   : > { %v3864_v62 = vpop.f32.mrf.mxu0 }
 0x3e8   : > { %v10902_v48 = vpop.f32.mrf.mxu0  ;;  %6970 = vmatmul.mubr.msk.f32.gmra.mxu0 %vm734_vm2, %v10708_v12 }
 0x3e9   : > { %6972 = vmatprep.mubr.msk.f32.mxu0 %vm734_vm2, %v10721_v20 }
 0x3ea   : > { %v3869_v54 = vpop.f32.mrf.mxu0 }
 0x3ec   : > { %v10908_v4 = vpop.f32.mrf.mxu0  ;;  %6973 = vmatmul.mubr.msk.f32.gmra.mxu0 %vm734_vm2, %v10734_v14 }
 0x3ed   : > { %6975 = vmatprep.mubr.msk.f32.mxu0 %vm734_vm2, %v10747_v45  ;;  %v2979_v45 = vld [vmem:[#allocation3 + $0x19a] sm:$0xff] }
 0x3ee   : > { %v3874_v51 = vpop.f32.mrf.mxu0 }
 0x3f0   : > { %v10914_v13 = vpop.f32.mrf.mxu0  ;;  %6976 = vmatmul.mubr.msk.f32.gmra.mxu0 %vm734_vm2, %v10760_v57  ;;  %v2980_v57 = vld [vmem:[#allocation3 + $0x1a2] sm:$0xff] }
 0x3f1   : > { %6978 = vmatprep.mubr.msk.f32.mxu0 %vm734_vm2, %v10773_v47 }
 0x3f2   : > { %v3879_v12 = vpop.f32.mrf.mxu0 }
 0x3f4   : > { %v10920_v20 = vpop.f32.mrf.mxu0  ;;  %6979 = vmatmul.mubr.msk.f32.gmra.mxu0 %vm734_vm2, %v10786_v41 }
 0x3f5   : > { %6981 = vmatprep.mubr.msk.f32.mxu0 %vm734_vm2, %v2977_v5 }
 0x3f6   : > { %v3884_v14 = vpop.f32.mrf.mxu0 }
 0x3f8   : > { %v10925_v58 = vpop.f32.mrf.mxu0  ;;  %6982 = vmatmul.mubr.msk.f32.gmra.mxu0 %vm734_vm2, %v2978_v19 }
 0x3f9   : > { %6984 = vmatprep.mubr.msk.f32.mxu0 %vm734_vm2, %v2979_v45 }
 0x3fa   : > { %v3889_v47 = vpop.f32.mrf.mxu0 }
 0x3fc   : > { %v10929_v49 = vpop.f32.mrf.mxu0  ;;  %6985 = vmatmul.mubr.msk.f32.gmra.mxu0 %vm734_vm2, %v2980_v57 }
 0x3fe   : > { %v3894_v8 = vpop.f32.mrf.mxu0 }
 0x400   : > { %v10932_v41 = vpop.f32.mrf.mxu0 }
 0x401   : > { %v3898_v17 = vadd.f32 %v11037_v50, %v10932_v41 }
 0x402   : > { %v3899_v28 = vpop.f32.mrf.mxu0 }
 0x404   : > { %v10934_v40 = vpop.f32.mrf.mxu0 }
 0x405   : > { %v3903_v25 = vadd.f32 %v11037_v50, %v10934_v40 }
 0x406   : > { %v3904_v26 = vpop.f32.mrf.mxu0 }
 0x408   : > { %v10944_v59 = vpop.f32.mrf.mxu0 }
 0x409   : > { %v3908_v1 = vadd.f32 %v11037_v50, %v10944_v59 }
 0x40a   : > { %v3909_v24 = vpop.f32.mrf.mxu0 }
 0x40c   : > { %v10946_v21 = vpop.f32.mrf.mxu0 }
 0x40d   : > { %v3913_v51 = vadd.f32 %v11037_v50, %v10946_v21 }
 0x40e   : > { %v3914_v61 = vpop.f32.mrf.mxu0 }
 0x410   : > { %v10948_v6 = vpop.f32.mrf.mxu0 }
 0x411   : > { %v3918_v57 = vadd.f32 %v11037_v50, %v10948_v6 }
 0x412   : > { %v3919_v44 = vpop.f32.mrf.mxu0 }
 0x414   : > { %v10956_v42 = vpop.f32.mrf.mxu0 }
 0x415   : > { %v3923_v26 = vadd.f32 %v11037_v50, %v10956_v42 }
 0x416   : > { %v3924_v11 = vpop.f32.mrf.mxu0 }
 0x418   : > { %v3927_v10 = vpop.f32.mrf.mxu0 }
 0x419   : > { %v3928_v44 = vadd.f32 %v11037_v50, %v3927_v10 }
 0x41a   : > { %v3929_v27 = vpop.f32.mrf.mxu0 }
 0x41c   : > { %v3932_v3 = vpop.f32.mrf.mxu0 }
 0x41d   : > { %v3933_v27 = vadd.f32 %v11037_v50, %v3932_v3  ;;  %v5843_v3 = vld [vmem:[%s12140_s7 + $0x78] sm:$0xff] }
 0x41e   : > { %v3934_v55 = vpop.f32.mrf.mxu0  ;;  %5968 = vmatpush1.msra.mxu1 %v5843_v3  ;;  %v5833_v3 = vld [vmem:[%s12140_s7 + $0x28] sm:$0xff] }
 0x41f   : > { %5969 = vmatprep.subr.mxu1 %v12165_v39 }
 0x420   : > { %v3937_v37 = vpop.f32.mrf.mxu0 }
 0x422   : > { %v3939_v22 = vpop.f32.mrf.mxu0 }
 0x424   : > { %v3942_v36 = vpop.f32.mrf.mxu0 }
 0x426   : > { %v3944_v53 = vpop.f32.mrf.mxu0 }
 0x428   : > { %v11030_v38 = vpop.f32.mrf.mxu0 }
 0x42a   : > { %v3949_v0 = vpop.f32.mrf.mxu0 }
 0x42c   : > { %v11032_v16 = vpop.f32.mrf.mxu0 }
 0x42e   : > { %v3954_v63 = vpop.f32.mrf.mxu0 }
 0x42f   : > { %v3938_v63 = vadd.f32 %v11037_v50, %v3937_v37  ;;  %v5842_v37 = vld [vmem:[%s12140_s7 + $0x70] sm:$0xff] }
 0x430   : > { %v11041_v18 = vpop.f32.mrf.mxu0  ;;  %v4122_v2 = vpop.f32.mrf.mxu1  ;;  %5970 = vmatpush1.msra.mxu1 %v5842_v37 }
 0x431   : > { %v11043_v56 = vadd.f32 %v4122_v2, %v3898_v17  ;;  %5971 = vmatprep.subr.mxu1 %v12165_v39 }
 0x432   : > { %v3959_v34 = vpop.f32.mrf.mxu0  ;;  %v4124_v35 = vpop.f32.mrf.mxu1 }
 0x434   : > { %v11047_v15 = vpop.f32.mrf.mxu0  ;;  %v4127_v23 = vpop.f32.mrf.mxu1 }
 0x435   : > { %v11049_v29 = vadd.f32 %v4127_v23, %v3903_v25  ;;  %v3943_v25 = vadd.f32 %v11037_v50, %v3942_v36  ;;  %v3948_v36 = vadd.f32 %v11037_v50, %v11030_v38 }
 0x436   : > { %v3964_v46 = vpop.f32.mrf.mxu0  ;;  %v4129_v32 = vpop.f32.mrf.mxu1 }
 0x438   : > { %v11053_v30 = vpop.f32.mrf.mxu0  ;;  %v4132_v7 = vpop.f32.mrf.mxu1 }
 0x439   : > { %v11055_v33 = vadd.f32 %v4132_v7, %v3908_v1 }
 0x43a   : > { %v3969_v62 = vpop.f32.mrf.mxu0  ;;  %v4134_v54 = vpop.f32.mrf.mxu1 }
 0x43b   : > { %v5841_v62 = vld [vmem:[%s12140_s7 + $0x68] sm:$0xff] }
 0x43c   : > { %v11059_v12 = vpop.f32.mrf.mxu0  ;;  %v4137_v5 = vpop.f32.mrf.mxu1  ;;  %5972 = vmatpush1.msra.mxu1 %v5841_v62 }
 0x43d   : > { %v11061_v14 = vadd.f32 %v4137_v5, %v3913_v51  ;;  %5973 = vmatprep.subr.mxu1 %v12165_v39  ;;  %v3973_v62 = vadd.f32 %v11037_v50, %v11059_v12 }
 0x43e   : > { %v3974_v45 = vpop.f32.mrf.mxu0  ;;  %v4139_v19 = vpop.f32.mrf.mxu1 }
 0x43f   : > { %v5840_v45 = vld [vmem:[%s12140_s7 + $0x60] sm:$0xff] }
 0x440   : > { %v11065_v47 = vpop.f32.mrf.mxu0  ;;  %v4142_v8 = vpop.f32.mrf.mxu1  ;;  %5974 = vmatpush1.msra.mxu1 %v5840_v45 }
 0x441   : > { %v11067_v41 = vadd.f32 %v4142_v8, %v3918_v57  ;;  %v3953_v57 = vadd.f32 %v11037_v50, %v11032_v16  ;;  %5975 = vmatprep.subr.mxu1 %v12165_v39  ;;  %v5839_v8 = vld [vmem:[%s12140_s7 + $0x58] sm:$0xff] }
 0x442   : > { %v3979_v28 = vpop.f32.mrf.mxu0  ;;  %v4144_v40 = vpop.f32.mrf.mxu1  ;;  %5976 = vmatpush1.msra.mxu1 %v5839_v8 }
 0x443   : > { %5977 = vmatprep.subr.mxu1 %v12165_v39 }
 0x444   : > { %v11071_v59 = vpop.f32.mrf.mxu0  ;;  %v4147_v24 = vpop.f32.mrf.mxu1 }
 0x445   : > { %v11073_v21 = vadd.f32 %v4147_v24, %v3923_v26  ;;  %v5838_v24 = vld [vmem:[%s12140_s7 + $0x50] sm:$0xff] }
 0x446   : > { %v3984_v61 = vpop.f32.mrf.mxu0  ;;  %v4149_v43 = vpop.f32.mrf.mxu1  ;;  %5978 = vmatpush1.msra.mxu1 %v5838_v24 }
 0x447   : > { %v3958_v43 = vadd.f32 %v11037_v50, %v11041_v18  ;;  %5979 = vmatprep.subr.mxu1 %v12165_v39 }
 0x448   : > { %v11076_v6 = vpop.f32.mrf.mxu0  ;;  %v4152_v9 = vpop.f32.mrf.mxu1 }
 0x449   : > { %v11078_v52 = vadd.f32 %v4152_v9, %v3928_v44  ;;  %v5837_v44 = vld [vmem:[%s12140_s7 + $0x48] sm:$0xff] }
 0x44a   : > { %v3989_v11 = vpop.f32.mrf.mxu0  ;;  %v4154_v60 = vpop.f32.mrf.mxu1  ;;  %5980 = vmatpush1.msra.mxu1 %v5837_v44 }
 0x44b   : > { %5981 = vmatprep.subr.mxu1 %v12165_v39 }
 0x44c   : > { %v11081_v55 = vpop.f32.mrf.mxu0  ;;  %v4157_v42 = vpop.f32.mrf.mxu1 }
 0x44d   : > { %v11083_v22 = vadd.f32 %v4157_v42, %v3933_v27  ;;  %v5836_v27 = vld [vmem:[%s12140_s7 + $0x40] sm:$0xff] }
 0x44e   : > { %v3994_v53 = vpop.f32.mrf.mxu0  ;;  %v4159_v0 = vpop.f32.mrf.mxu1  ;;  %5982 = vmatpush1.msra.mxu1 %v5836_v27 }
 0x44f   : > { %v3963_v53 = vadd.f32 %v11037_v50, %v11047_v15  ;;  %5983 = vmatprep.subr.mxu1 %v12165_v39  ;;  %v5835_v0 = vld [vmem:[%s12140_s7 + $0x38] sm:$0xff] }
 0x450   : > { %v11086_v17 = vpop.f32.mrf.mxu0  ;;  %v4162_v10 = vpop.f32.mrf.mxu1  ;;  %5984 = vmatpush1.msra.mxu1 %v5835_v0 }
 0x451   : > { %v11088_v2 = vadd.f32 %v4162_v10, %v3938_v63  ;;  %5985 = vmatprep.subr.mxu1 %v12165_v39 }
 0x452   : > { %v3999_v34 = vpop.f32.mrf.mxu0  ;;  %v4164_v35 = vpop.f32.mrf.mxu1 }
 0x453   : > { %v5834_v35 = vld [vmem:[%s12140_s7 + $0x30] sm:$0xff] }
 0x454   : > { %v11094_v23 = vpop.f32.mrf.mxu0  ;;  %v4167_v46 = vpop.f32.mrf.mxu1  ;;  %5986 = vmatpush1.msra.mxu1 %v5834_v35 }
 0x455   : > { %v11096_v32 = vadd.f32 %v4167_v46, %v3943_v25  ;;  %5987 = vmatprep.subr.mxu1 %v12165_v39 }
 0x456   : > { %v4004_v1 = vpop.f32.mrf.mxu0  ;;  %v4169_v7 = vpop.f32.mrf.mxu1  ;;  %5988 = vmatpush1.msra.mxu1 %v5833_v3 }
 0x457   : > { %5989 = vmatprep.subr.mxu1 %v12165_v39  ;;  %v5832_v1 = vld [vmem:[%s12140_s7 + $0x20] sm:$0xff] }
 0x458   : > { %v11108_v54 = vpop.f32.mrf.mxu0  ;;  %v4172_v51 = vpop.f32.mrf.mxu1  ;;  %5990 = vmatpush1.msra.mxu1 %v5832_v1 }
 0x459   : > { %v11110_v5 = vadd.f32 %v4172_v51, %v3948_v36  ;;  %5991 = vmatprep.subr.mxu1 %v12165_v39  ;;  %v5831_v51 = vld [vmem:[%s12140_s7 + $0x18] sm:$0xff] }
 0x45a   : > { %v4009_v19 = vpop.f32.mrf.mxu0  ;;  %v4174_v38 = vpop.f32.mrf.mxu1  ;;  %5992 = vmatpush1.msra.mxu1 %v5831_v51  ;;  %v3868_v51 = vadd.f32 %v11037_v50, %v10902_v48 }
 0x45b   : > { %5993 = vmatprep.subr.mxu1 %v12165_v39 }
 0x45c   : > { %v11122_v28 = vpop.f32.mrf.mxu0  ;;  %v4177_v40 = vpop.f32.mrf.mxu1 }
 0x45d   : > { %v11124_v26 = vadd.f32 %v4177_v40, %v3953_v57  ;;  %v5830_v57 = vld [vmem:[%s12140_s7 + $0x10] sm:$0xff]  ;;  %v5829_v40 = vld [vmem:[%s12140_s7 + $0x8] sm:$0xff] }
 0x45e   : > { %v4014_v61 = vpop.f32.mrf.mxu0  ;;  %v4179_v16 = vpop.f32.mrf.mxu1  ;;  %5994 = vmatpush1.msra.mxu1 %v5830_v57 }
 0x45f   : > { %5995 = vmatprep.subr.mxu1 %v12165_v39  ;;  %v5828_v16 = vld [vmem:[%s12140_s7] sm:$0xff] }
 0x460   : > { %v11136_v9 = vpop.f32.mrf.mxu0  ;;  %v4182_v11 = vpop.f32.mrf.mxu1  ;;  %5996 = vmatpush1.msra.mxu1 %v5829_v40 }
 0x461   : > { %v11138_v60 = vadd.f32 %v4182_v11, %v3958_v43  ;;  %5997 = vmatprep.subr.mxu1 %v12165_v39  ;;  %v5859_v11 = vld [vmem:[%s12140_s7 + $0xf8] sm:$0xff] }
 0x462   : > { %v4019_v42 = vpop.f32.mrf.mxu0  ;;  %v4184_v18 = vpop.f32.mrf.mxu1  ;;  %5998 = vmatpush1.msra.mxu1 %v5828_v16  ;;  %v5853_v16 = vld [vmem:[%s12140_s7 + $0xc8] sm:$0xff] }
 0x463   : > { %5999 = vmatprep.subr.mxu1 %v12165_v39  ;;  %v5858_v18 = vld [vmem:[%s12140_s7 + $0xf0] sm:$0xff] }
 0x464   : > { %v11150_v63 = vpop.f32.mrf.mxu0  ;;  %v4187_v10 = vpop.f32.mrf.mxu1  ;;  %6000 = vmatpush2.msra.mxu1 %v5859_v11 }
 0x465   : > { %v11152_v34 = vadd.f32 %v4187_v10, %v3963_v53  ;;  %6001 = vmatprep.subr.mxu1 %v12165_v39  ;;  %v5857_v10 = vld [vmem:[%s12140_s7 + $0xe8] sm:$0xff] }
 0x466   : > { %v4089_v25 = vpop.f32.mrf.mxu0  ;;  %v4189_v15 = vpop.f32.mrf.mxu1  ;;  %6002 = vmatpush2.msra.mxu1 %v5858_v18 }
 0x467   : > { %6003 = vmatprep.subr.mxu1 %v12165_v39  ;;  %v5856_v15 = vld [vmem:[%s12140_s7 + $0xe0] sm:$0xff] }
 0x468   : > { %v4092_v46 = vpop.f32.mrf.mxu0  ;;  %v11162_v37 = vpop.f32.mrf.mxu1  ;;  %6004 = vmatpush2.msra.mxu1 %v5857_v10 }
 0x469   : > { %6005 = vmatprep.subr.mxu1 %v12165_v39  ;;  %v4093_v40 = vadd.f32 %v4092_v46, %v3868_v51 }
 0x46a   : > { %v4094_v7 = vpop.f32.mrf.mxu0  ;;  %v4194_v36 = vpop.f32.mrf.mxu1  ;;  %6006 = vmatpush2.msra.mxu1 %v5856_v15 }
 0x46b   : > { %6007 = vmatprep.subr.mxu1 %v12165_v39  ;;  %v5855_v7 = vld [vmem:[%s12140_s7 + $0xd8] sm:$0xff] }
 0x46c   : > { %v11174_v45 = vpop.f32.mrf.mxu0  ;;  %v4197_v19 = vpop.f32.mrf.mxu1  ;;  %6008 = vmatpush2.msra.mxu1 %v5855_v7 }
 0x46d   : > { %v11176_v38 = vadd.f32 %v4197_v19, %v3973_v62  ;;  %6009 = vmatprep.subr.mxu1 %v12165_v39  ;;  %v5854_v19 = vld [vmem:[%s12140_s7 + $0xd0] sm:$0xff] }
 0x46e   : > { %v4099_v8 = vpop.f32.mrf.mxu0  ;;  %v4199_v12 = vpop.f32.mrf.mxu1  ;;  %6010 = vmatpush2.msra.mxu1 %v5854_v19 }
 0x46f   : > { %v3863_v12 = vadd.f32 %v11037_v50, %v10898_v31  ;;  %6011 = vmatprep.subr.mxu1 %v12165_v39 }
 0x470   : > { %v4102_v24 = vpop.f32.mrf.mxu0  ;;  %v11186_v61 = vpop.f32.mrf.mxu1  ;;  %6012 = vmatpush2.msra.mxu1 %v5853_v16 }
 0x471   : > { %v4088_v11 = vadd.f32 %v11150_v63, %v3863_v12  ;;  %6013 = vmatprep.subr.mxu1 %v12165_v39  ;;  %v3888_v63 = vadd.f32 %v11037_v50, %v10925_v58  ;;  %v3883_v58 = vadd.f32 %v11037_v50, %v10920_v20 }
 0x472   : > { %v4104_v43 = vpop.f32.mrf.mxu0  ;;  %v4204_v44 = vpop.f32.mrf.mxu1 }
 0x473   : > { %v3878_v44 = vadd.f32 %v11037_v50, %v10914_v13  ;;  %v5852_v13 = vld [vmem:[%s12140_s7 + $0xc0] sm:$0xff] }
 0x474   : > { %v11196_v27 = vpop.f32.mrf.mxu0  ;;  %v11198_v42 = vpop.f32.mrf.mxu1  ;;  %6014 = vmatpush2.msra.mxu1 %v5852_v13  ;;  %v4610_v13 = vld [vmem:[#allocation4 + $0x1] sm:$0xff] }
 0x475   : > { %6015 = vmatprep.subr.mxu1 %v12165_v39 }
 0x476   : > { %v4109_v53 = vpop.f32.mrf.mxu0  ;;  %v4209_v0 = vpop.f32.mrf.mxu1 }
 0x477   : > { %v3873_v53 = vadd.f32 %v11037_v50, %v10908_v4  ;;  %v4103_v0 = vadd.f32 %v4102_v24, %v3878_v44  ;;  %v5849_v44 = vld [vmem:[%s12140_s7 + $0xa8] sm:$0xff] }
 0x478   : > { %v4112_v35 = vpop.f32.mrf.mxu0  ;;  %v11208_v25 = vpop.f32.mrf.mxu1 }
 0x479   : > { %v4098_v7 = vadd.f32 %v11174_v45, %v3873_v53  ;;  %v4113_v45 = vadd.f32 %v4112_v35, %v3888_v63  ;;  %v3893_v53 = vadd.f32 %v11037_v50, %v10929_v49  ;;  %v5848_v63 = vld [vmem:[%s12140_s7 + $0xa0] sm:$0xff] }
 0x47a   : > { %v4114_v3 = vpop.f32.mrf.mxu0  ;;  %v4214_v1 = vpop.f32.mrf.mxu1 }
 0x47c   : > { %v11218_v36 = vpop.f32.mrf.mxu0  ;;  %v11220_v62 = vpop.f32.mrf.mxu1 }
 0x47e   : > { %v4119_v57 = vpop.f32.mrf.mxu0  ;;  %v4219_v8 = vpop.f32.mrf.mxu1 }
 0x47f   : > { %v5851_v57 = vld [vmem:[%s12140_s7 + $0xb8] sm:$0xff]  ;;  %v5850_v8 = vld [vmem:[%s12140_s7 + $0xb0] sm:$0xff] }
 0x480   : > { %v11234_v48 = vpop.f32.mrf.mxu1  ;;  %v6941_v43 = vpop.f32.mrf.mxu0  ;;  %6016 = vmatpush2.msra.mxu1 %v5851_v57 }
 0x481   : > { %v4318_v18 = vadd.f32 %v6941_v43, %v4093_v40  ;;  %6017 = vmatprep.subr.mxu1 %v12165_v39 }
 0x482   : > { %v4224_v31 = vpop.f32.mrf.mxu1  ;;  %v4312_v46 = vpop.f32.mrf.mxu0  ;;  %6018 = vmatpush2.msra.mxu1 %v5850_v8 }
 0x483   : > { %v4472_v10 = vmax.f32 %v4318_v18, 0.0  ;;  %v4313_v15 = vadd.f32 %v4312_v46, %v4088_v11  ;;  %v4108_v11 = vadd.f32 %v11196_v27, %v3883_v58  ;;  %v4611_v46 = vld [vmem:[#allocation4 + $0x9] sm:$0xff]  ;;  %6019 = vmatprep.subr.mxu1 %v12165_v39 }
 0x484   : > { %v11242_v3 = vpop.f32.mrf.mxu1  ;;  %v6944_v1 = vpop.f32.mrf.mxu0  ;;  %6020 = vmatpush2.msra.mxu1 %v5849_v44  ;;  %v5846_v44 = vld [vmem:[%s12140_s7 + $0x90] sm:$0xff] }
 0x485   : > { %4547 = vst.msk [vmem:[#allocation4 + $0x21] sm:$0xff] %vm4503_vm5, %v4472_v10  ;;  %v4471_v51 = vmax.f32 %v4313_v15, 0.0  ;;  %v4328_v19 = vadd.f32 %v6944_v1, %v4103_v0  ;;  %6021 = vmatprep.subr.mxu1 %v12165_v39 }
 0x486   : > { %v4229_v4 = vpop.f32.mrf.mxu1  ;;  %v4322_v24 = vpop.f32.mrf.mxu0  ;;  %6022 = vmatpush2.msra.mxu1 %v5848_v63  ;;  %v5845_v63 = vld [vmem:[%s12140_s7 + $0x88] sm:$0xff] }
 0x487   : > { %4546 = vst.msk [vmem:[#allocation4 + $0x19] sm:$0xff] %vm4503_vm5, %v4471_v51  ;;  %v4474_v12 = vmax.f32 %v4328_v19, 0.0  ;;  %v4323_v40 = vadd.f32 %v4322_v24, %v4098_v7  ;;  %v4118_v7 = vadd.f32 %v11218_v36, %v3893_v53  ;;  %v5847_v4 = vld [vmem:[%s12140_s7 + $0x98] sm:$0xff]  ;;  %6023 = vmatprep.subr.mxu1 %v12165_v39 }
 0x488   : > { %v11261_v16 = vpop.f32.mrf.mxu1  ;;  %v6947_v43 = vpop.f32.mrf.mxu0  ;;  %6024 = vmatpush2.msra.mxu1 %v5847_v4 }
 0x489   : > { %4549 = vst.msk [vmem:[#allocation4 + $0x39] sm:$0xff] %vm4503_vm5, %v4474_v12  ;;  %v4473_v20 = vmax.f32 %v4323_v40, 0.0  ;;  %v4338_v35 = vadd.f32 %v6947_v43, %v4113_v45  ;;  %6025 = vmatprep.subr.mxu1 %v12165_v39 }
 0x48a   : > { %v4234_v18 = vpop.f32.mrf.mxu1  ;;  %v4332_v31 = vpop.f32.mrf.mxu0  ;;  %6026 = vmatpush2.msra.mxu1 %v5846_v44 }
 0x48b   : > { %4548 = vst.msk [vmem:[#allocation4 + $0x31] sm:$0xff] %vm4503_vm5, %v4473_v20  ;;  %v4476_v0 = vmax.f32 %v4338_v35, 0.0  ;;  %v4333_v10 = vadd.f32 %v4332_v31, %v4108_v11  ;;  %6027 = vmatprep.subr.mxu1 %v12165_v39 }
 0x48c   : > { %v11273_v15 = vpop.f32.mrf.mxu1  ;;  %v6950_v27 = vpop.f32.mrf.mxu0  ;;  %v11275_v1 = vld [vmem:[#allocation4 + $0x22] sm:$0xff]  ;;  %6028 = vmatpush2.msra.mxu1 %v5845_v63 }
 0x48d   : > { %4551 = vst.msk [vmem:[#allocation4 + $0x51] sm:$0xff] %vm4503_vm5, %v4476_v0  ;;  %v4475_v49 = vmax.f32 %v4333_v10, 0.0  ;;  %v4348_v51 = vadd.f32 %v6950_v27, %v11043_v56  ;;  %v7759_v19 = vpack.i.bf16 %v4611_v46, %v11275_v1  ;;  %6029 = vmatprep.subr.mxu1 %v12165_v39 }
 0x48e   : > { %v4239_v24 = vpop.f32.mrf.mxu1  ;;  %v4342_v57 = vpop.f32.mrf.mxu0  ;;  %v11288_v8 = vld [vmem:[#allocation4 + $0x1a] sm:$0xff] }
 0x48f   : > { %4550 = vst.msk [vmem:[#allocation4 + $0x49] sm:$0xff] %vm4503_vm5, %v4475_v49  ;;  %v4478_v36 = vmax.f32 %v4348_v51, 0.0  ;;  %v4343_v58 = vadd.f32 %v4342_v57, %v4118_v7  ;;  %7760 = vrot.lane.b32.xlu1 %v7759_v19, %s8255_s28  ;;  %v7764_v56 = vpack.i.bf16 %v11288_v8, %v4610_v13  ;;  %v11296_v40 = vld [vmem:[#allocation4 + $0x20] sm:$0xff]  ;;  %v11309_v18 = vld [vmem:[#allocation4 + $0x18] sm:$0xff]  ;;  %v4643_v51 = vld [vmem:[#allocation4 + $0xa] sm:$0xff] }
 0x490   : > { %v11294_v45 = vpop.f32.mrf.mxu1  ;;  %v6953_v12 = vpop.f32.mrf.mxu0  ;;  %v11298_v43 = vld [vmem:[#allocation4 + $0x39] sm:$0xff] }
 0x491   : > { %4553 = vst.msk [vmem:[#allocation4 + $0x69] sm:$0xff] %vm4503_vm5, %v4478_v36  ;;  %v4477_v11 = vmax.f32 %v4343_v58, 0.0  ;;  %v4358_v20 = vadd.f32 %v6953_v12, %v11055_v33  ;;  %7765 = vrot.lane.b32.xlu0 %v7764_v56, %s8255_s28  ;;  %v7769_v35 = vpack.i.bf16 %v11296_v40, %v11298_v43  ;;  %v11313_v0 = vld [vmem:[#allocation4 + $0x3a] sm:$0xff]  ;;  %v4642_v56 = vld [vmem:[#allocation4 + $0x2] sm:$0xff] }
 0x492   : > { %v4244_v31 = vpop.f32.mrf.mxu1  ;;  %v4352_v46 = vpop.f32.mrf.mxu0  ;;  %v11311_v53 = vld [vmem:[#allocation4 + $0x32] sm:$0xff]  ;;  %v5844_v7 = vld [vmem:[%s12140_s7 + $0x80] sm:$0xff] }
 0x493   : > { %v11315_v10 = vld [vmem:[#allocation4 + $0x31] sm:$0xff]  ;;  %4552 = vst.msk [vmem:[#allocation4 + $0x61] sm:$0xff] %vm4503_vm5, %v4477_v11  ;;  %v4480_v33 = vmax.f32 %v4358_v20, 0.0  ;;  %v4353_v27 = vadd.f32 %v4352_v46, %v11049_v29  ;;  %6995 = vmatprep.mubr.msk.f32.mxu0 %vm4503_vm5, %v11311_v53  ;;  %7770 = vrot.lane.b32.xlu1 %v7769_v35, %s8256_s13  ;;  %v4613_v29 = vld [vmem:[#allocation4 + $0x21] sm:$0xff] }
 0x494   : > { %v7784_v13 = vpack.i.bf16 %v11309_v18, %v11315_v10  ;;  %v6956_v49 = vpop.f32.mrf.mxu0  ;;  %6996 = vmatmul.mubr.msk.f32.vlgmr.msra.gmra.mxu0 %vm4503_vm5, %v11313_v0  ;;  %v4772_v19 = vld [vmem:[#allocation4 + $0x38] sm:$0xff]  ;;  %v7774_v57 = vpack.i.bf16 %v4613_v29, %v11313_v0  ;;  %v4771_v12 = vld [vmem:[#allocation4 + $0x30] sm:$0xff]  ;;  %6030 = vmatpush2.msra.mxu1 %v5844_v7 }
 0x495   : > { %4555 = vst.msk [vmem:[#allocation4 + $0x81] sm:$0xff] %vm4503_vm5, %v4480_v33  ;;  %v4479_v4 = vmax.f32 %v4353_v27, 0.0  ;;  %v4368_v24 = vadd.f32 %v6956_v49, %v11067_v41  ;;  %v11345_v41 = vld [vmem:[#allocation4 + $0x52] sm:$0xff]  ;;  %v7789_v20 = vpack.i.bf16 %v4643_v51, %v4772_v19 }
 0x496   : > { %7785 = vrot.lane.b32.xlu0 %v7784_v13, %s8256_s13  ;;  %v4362_v36 = vpop.f32.mrf.mxu0  ;;  %v11338_v58 = vld [vmem:[#allocation4 + $0x4a] sm:$0xff]  ;;  %v11354_v27 = vld [vmem:[#allocation4 + $0x19] sm:$0xff] }
 0x497   : > { %4554 = vst.msk [vmem:[#allocation4 + $0x79] sm:$0xff] %vm4503_vm5, %v4479_v4  ;;  %v4482_v44 = vmax.f32 %v4368_v24, 0.0  ;;  %v4363_v11 = vadd.f32 %v4362_v36, %v11061_v14  ;;  %7775 = vrot.lane.b32.xlu1 %v7774_v57, %s8255_s28  ;;  %6998 = vmatprep.mubr.msk.f32.mxu0 %vm4503_vm5, %v11338_v58  ;;  %v7779_v14 = vpack.i.bf16 %v4642_v56, %v4771_v12  ;;  %v11356_v13 = vld [vmem:[#allocation4 + $0x51] sm:$0xff]  ;;  %v11369_v51 = vld [vmem:[#allocation4 + $0x49] sm:$0xff] }
 0x498   : > { %v6959_v39 = vpop.f32.mrf.mxu0  ;;  %6999 = vmatmul.mubr.msk.f32.gmra.mxu0 %vm4503_vm5, %v11345_v41  ;;  %v7794_v49 = vpack.i.bf16 %v11354_v27, %v11311_v53  ;;  %v7799_v24 = vpack.i.bf16 %v4772_v19, %v11356_v13  ;;  %v4774_v19 = vld [vmem:[#allocation4 + $0x50] sm:$0xff] }
 0x499   : > { %4557 = vst.msk [vmem:[#allocation4 + $0x99] sm:$0xff] %vm4503_vm5, %v4482_v44  ;;  %v4481_v35 = vmax.f32 %v4363_v11, 0.0  ;;  %v4378_v31 = vadd.f32 %v6959_v39, %v11078_v52  ;;  %v11363_v52 = vld [vmem:[#allocation4 + $0x6a] sm:$0xff] }
 0x49a   : > { %7790 = vrot.lane.b32.xlu0 %v7789_v20, %s8254_s29  ;;  %v4372_v46 = vpop.f32.mrf.mxu0  ;;  %v11352_v33 = vld [vmem:[#allocation4 + $0x62] sm:$0xff] }
 0x49b   : > { %4556 = vst.msk [vmem:[#allocation4 + $0x91] sm:$0xff] %vm4503_vm5, %v4481_v35  ;;  %v4484_v63 = vmax.f32 %v4378_v31, 0.0  ;;  %v4373_v7 = vadd.f32 %v4372_v46, %v11073_v21  ;;  %7780 = vrot.lane.b32.xlu1 %v7779_v14, %s8254_s29  ;;  %7001 = vmatprep.mubr.msk.f32.mxu0 %vm4503_vm5, %v11352_v33  ;;  %v4773_v46 = vld [vmem:[#allocation4 + $0x48] sm:$0xff] }
 0x49c   : > { %v6962_v29 = vpop.f32.mrf.mxu0  ;;  %7002 = vmatmul.mubr.msk.f32.gmra.mxu0 %vm4503_vm5, %v11363_v52  ;;  %v11382_v11 = vld [vmem:[#allocation4 + $0x82] sm:$0xff] }
 0x49d   : > { %4559 = vst.msk [vmem:[#allocation4 + $0xb1] sm:$0xff] %vm4503_vm5, %v4484_v63  ;;  %v4483_v4 = vmax.f32 %v4373_v7, 0.0  ;;  %v4388_v21 = vadd.f32 %v6962_v29, %v11088_v2  ;;  %v7814_v2 = vpack.i.bf16 %v4771_v12, %v11369_v51  ;;  %v7819_v7 = vpack.i.bf16 %v11275_v1, %v4774_v19  ;;  %v11412_v1 = vld [vmem:[#allocation4 + $0x69] sm:$0xff] }
 0x49e   : > { %7795 = vrot.lane.b32.xlu0 %v7794_v49, %s8255_s28  ;;  %v4382_v57 = vpop.f32.mrf.mxu0  ;;  %v11375_v36 = vld [vmem:[#allocation4 + $0x7a] sm:$0xff] }
 0x49f   : > { %4558 = vst.msk [vmem:[#allocation4 + $0xa9] sm:$0xff] %vm4503_vm5, %v4483_v4  ;;  %v4486_v56 = vmax.f32 %v4388_v21, 0.0  ;;  %v4383_v44 = vadd.f32 %v4382_v57, %v11083_v22  ;;  %7800 = vrot.lane.b32.xlu1 %v7799_v24, %s8256_s13  ;;  %7004 = vmatprep.mubr.msk.f32.mxu0 %vm4503_vm5, %v11375_v36  ;;  %v7804_v22 = vpack.i.bf16 %v11298_v43, %v11345_v41 }
 0x4a0   : > { %v6965_v20 = vpop.f32.mrf.mxu0  ;;  %7005 = vmatmul.mubr.msk.f32.gmra.mxu0 %vm4503_vm5, %v11382_v11  ;;  %v3968_v43 = vadd.f32 %v11037_v50, %v11053_v30  ;;  %v7809_v4 = vpack.i.bf16 %v11288_v8, %v4773_v46  ;;  %v7824_v8 = vpack.i.bf16 %v11315_v10, %v11338_v58 }
 0x4a1   : > { %4561 = vst.msk [vmem:[#allocation4 + $0xc9] sm:$0xff] %vm4503_vm5, %v4486_v56  ;;  %v4485_v39 = vmax.f32 %v4383_v44, 0.0  ;;  %v4398_v35 = vadd.f32 %v6965_v20, %v11110_v5  ;;  %v11399_v5 = vld [vmem:[#allocation4 + $0x9a] sm:$0xff] }
 0x4a2   : > { %7815 = vrot.lane.b32.xlu0 %v7814_v2, %s8256_s13  ;;  %v4392_v31 = vpop.f32.mrf.mxu0  ;;  %v11392_v14 = vld [vmem:[#allocation4 + $0x92] sm:$0xff]  ;;  %v4193_v57 = vadd.f32 %v11162_v37, %v3968_v43  ;;  %v11426_v37 = vld [vmem:[#allocation4 + $0x61] sm:$0xff]  ;;  %v3978_v2 = vadd.f32 %v11037_v50, %v11065_v47  ;;  %v7834_v43 = vpack.i.bf16 %v11356_v13, %v11363_v52 }
 0x4a3   : > { %4560 = vst.msk [vmem:[#allocation4 + $0xc1] sm:$0xff] %vm4503_vm5, %v4485_v39  ;;  %v4488_v12 = vmax.f32 %v4398_v35, 0.0  ;;  %v4393_v63 = vadd.f32 %v4392_v31, %v11096_v32  ;;  %7805 = vrot.lane.b32.xlu1 %v7804_v22, %s8255_s28  ;;  %7007 = vmatprep.mubr.msk.f32.mxu0 %vm4503_vm5, %v11392_v14  ;;  %v7829_v39 = vpack.i.bf16 %v4774_v19, %v11412_v1 }
 0x4a4   : > { %v6968_v49 = vpop.f32.mrf.mxu0  ;;  %7008 = vmatmul.mubr.msk.f32.gmra.mxu0 %vm4503_vm5, %v11399_v5  ;;  %v4203_v10 = vadd.f32 %v11186_v61, %v3978_v2  ;;  %v3988_v61 = vadd.f32 %v11037_v50, %v11076_v6 }
 0x4a5   : > { %4563 = vst.msk [vmem:[#allocation4 + $0xe1] sm:$0xff] %vm4503_vm5, %v4488_v12  ;;  %v4487_v29 = vmax.f32 %v4393_v63, 0.0  ;;  %v4408_v32 = vadd.f32 %v6968_v49, %v11138_v60  ;;  %v11420_v60 = vld [vmem:[#allocation4 + $0xb2] sm:$0xff]  ;;  %v7844_v63 = vpack.i.bf16 %v4773_v46, %v11426_v37  ;;  %v3983_v46 = vadd.f32 %v11037_v50, %v11071_v59 }
 0x4a6   : > { %7820 = vrot.lane.b32.xlu0 %v7819_v7, %s8254_s29  ;;  %v4402_v21 = vpop.f32.mrf.mxu0  ;;  %v11410_v24 = vld [vmem:[#allocation4 + $0xaa] sm:$0xff] }
 0x4a7   : > { %4562 = vst.msk [vmem:[#allocation4 + $0xd9] sm:$0xff] %vm4503_vm5, %v4487_v29  ;;  %v4490_v56 = vmax.f32 %v4408_v32, 0.0  ;;  %v4403_v30 = vadd.f32 %v4402_v21, %v11124_v26  ;;  %7010 = vmatprep.mubr.msk.f32.mxu0 %vm4503_vm5, %v11410_v24  ;;  %7810 = vrot.lane.b32.xlu1 %v7809_v4, %s8254_s29  ;;  %v4776_v7 = vld [vmem:[#allocation4 + $0x68] sm:$0xff]  ;;  %v4775_v4 = vld [vmem:[#allocation4 + $0x60] sm:$0xff]  ;;  %v4213_v21 = vadd.f32 %v11208_v25, %v3988_v61 }
 0x4a8   : > { %v6971_v44 = vpop.f32.mrf.mxu0  ;;  %7011 = vmatmul.mubr.msk.f32.gmra.mxu0 %vm4503_vm5, %v11420_v60  ;;  %v11441_v47 = vld [vmem:[#allocation4 + $0xca] sm:$0xff]  ;;  %v7849_v59 = vpack.i.bf16 %v11313_v0, %v4776_v7  ;;  %v4208_v25 = vadd.f32 %v11198_v42, %v3983_v46  ;;  %v3993_v0 = vadd.f32 %v11037_v50, %v11081_v55  ;;  %v7854_v55 = vpack.i.bf16 %v11369_v51, %v11352_v33 }
 0x4a9   : > { %4565 = vst.msk [vmem:[#allocation4 + $0xf9] sm:$0xff] %vm4503_vm5, %v4490_v56  ;;  %v4489_v26 = vmax.f32 %v4403_v30, 0.0  ;;  %v4418_v20 = vadd.f32 %v6971_v44, %v4193_v57  ;;  %v3998_v56 = vadd.f32 %v11037_v50, %v11086_v17  ;;  %v7839_v44 = vpack.i.bf16 %v11311_v53, %v4775_v4  ;;  %v11477_v17 = vld [vmem:[#allocation4 + $0x81] sm:$0xff] }
 0x4aa   : > { %7825 = vrot.lane.b32.xlu0 %v7824_v8, %s8255_s28  ;;  %v4412_v35 = vpop.f32.mrf.mxu0  ;;  %v11433_v22 = vld [vmem:[#allocation4 + $0xc2] sm:$0xff]  ;;  %v4003_v51 = vadd.f32 %v11037_v50, %v11094_v23  ;;  %v4018_v23 = vadd.f32 %v11037_v50, %v11136_v9 }
 0x4ab   : > { %4564 = vst.msk [vmem:[#allocation4 + $0xf1] sm:$0xff] %vm4503_vm5, %v4489_v26  ;;  %v4492_v31 = vmax.f32 %v4418_v20, 0.0  ;;  %v4413_v12 = vadd.f32 %v4412_v35, %v11152_v34  ;;  %7013 = vmatprep.mubr.msk.f32.mxu0 %vm4503_vm5, %v11433_v22  ;;  %7830 = vrot.lane.b32.xlu1 %v7829_v39, %s8256_s13  ;;  %v4223_v20 = vadd.f32 %v11234_v48, %v3998_v56  ;;  %v11492_v48 = vld [vmem:[#allocation4 + $0x79] sm:$0xff] }
 0x4ac   : > { %v6974_v19 = vpop.f32.mrf.mxu0  ;;  %7014 = vmatmul.mubr.msk.f32.gmra.mxu0 %vm4503_vm5, %v11441_v47  ;;  %v11462_v13 = vld [vmem:[#allocation4 + $0xe2] sm:$0xff]  ;;  %v4008_v35 = vadd.f32 %v11037_v50, %v11108_v54  ;;  %v4777_v56 = vld [vmem:[#allocation4 + $0x78] sm:$0xff] }
 0x4ad   : > { %4567 = vst.msk [vmem:[#allocation4 + $0x111] sm:$0xff] %vm4503_vm5, %v4492_v31  ;;  %v4491_v34 = vmax.f32 %v4413_v12, 0.0  ;;  %v4428_v49 = vadd.f32 %v6974_v19, %v4203_v10  ;;  %v4218_v31 = vadd.f32 %v11220_v62, %v3993_v0  ;;  %v7859_v19 = vpack.i.bf16 %v4776_v7, %v11477_v17 }
 0x4ae   : > { %7845 = vrot.lane.b32.xlu0 %v7844_v63, %s8256_s13  ;;  %v4422_v29 = vpop.f32.mrf.mxu0  ;;  %v11454_v32 = vld [vmem:[#allocation4 + $0xda] sm:$0xff]  ;;  %v7874_v7 = vpack.i.bf16 %v4775_v4, %v11492_v48  ;;  %v4013_v4 = vadd.f32 %v11037_v50, %v11122_v28 }
 0x4af   : > { %4566 = vst.msk [vmem:[#allocation4 + $0x109] sm:$0xff] %vm4503_vm5, %v4491_v34  ;;  %v4494_v6 = vmax.f32 %v4428_v49, 0.0  ;;  %v4423_v57 = vadd.f32 %v4422_v29, %v11176_v38  ;;  %7016 = vmatprep.mubr.msk.f32.mxu0 %vm4503_vm5, %v11454_v32  ;;  %7835 = vrot.lane.b32.xlu1 %v7834_v43, %s8255_s28  ;;  %v4233_v34 = vadd.f32 %v11261_v16, %v4008_v35  ;;  %v4778_v16 = vld [vmem:[#allocation4 + $0x80] sm:$0xff] }
 0x4b0   : > { %v6977_v30 = vpop.f32.mrf.mxu0  ;;  %7017 = vmatmul.mubr.msk.f32.gmra.mxu0 %vm4503_vm5, %v11462_v13  ;;  %v11484_v53 = vld [vmem:[#allocation4 + $0xfa] sm:$0xff]  ;;  %v4228_v29 = vadd.f32 %v11242_v3, %v4003_v51  ;;  %v4238_v28 = vadd.f32 %v11273_v15, %v4013_v4  ;;  %v4779_v51 = vld [vmem:[#allocation4 + $0x90] sm:$0xff] }
 0x4b1   : > { %4569 = vst.msk [vmem:[#allocation4 + $0x129] sm:$0xff] %vm4503_vm5, %v4494_v6  ;;  %v4493_v38 = vmax.f32 %v4423_v57, 0.0  ;;  %v4438_v8 = vadd.f32 %v6977_v30, %v4213_v21  ;;  %v7864_v57 = vpack.i.bf16 %v11412_v1, %v11382_v11  ;;  %v4243_v30 = vadd.f32 %v11294_v45, %v4018_v23 }
 0x4b2   : > { %7850 = vrot.lane.b32.xlu0 %v7849_v59, %s8254_s29  ;;  %v4432_v2 = vpop.f32.mrf.mxu0  ;;  %v11475_v26 = vld [vmem:[#allocation4 + $0xf2] sm:$0xff]  ;;  %v7879_v1 = vpack.i.bf16 %v11345_v41, %v4778_v16  ;;  %v7914_v23 = vpack.i.bf16 %v11492_v48, %v11392_v14 }
 0x4b3   : > { %4568 = vst.msk [vmem:[#allocation4 + $0x121] sm:$0xff] %vm4503_vm5, %v4493_v38  ;;  %v4496_v42 = vmax.f32 %v4438_v8, 0.0  ;;  %v4433_v39 = vadd.f32 %v4432_v2, %v4208_v25  ;;  %7019 = vmatprep.mubr.msk.f32.mxu0 %vm4503_vm5, %v11475_v26  ;;  %7840 = vrot.lane.b32.xlu1 %v7839_v44, %s8254_s29  ;;  %v7869_v44 = vpack.i.bf16 %v11338_v58, %v4777_v56  ;;  %v4811_v58 = vld [vmem:[#allocation4 + $0x91] sm:$0xff] }
 0x4b4   : > { %v6980_v10 = vpop.f32.mrf.mxu0  ;;  %7020 = vmatmul.mubr.msk.f32.gmra.mxu0 %vm4503_vm5, %v11484_v53  ;;  %v11507_v43 = vld [vmem:[#allocation4 + $0x112] sm:$0xff]  ;;  %v7944_v4 = vpack.i.bf16 %v4811_v58, %v11410_v24 }
 0x4b5   : > { %4571 = vst.msk [vmem:[#allocation4 + $0x141] sm:$0xff] %vm4503_vm5, %v4496_v42  ;;  %v4495_v12 = vmax.f32 %v4433_v39, 0.0  ;;  %v4448_v63 = vadd.f32 %v6980_v10, %v4223_v20  ;;  %v4812_v20 = vld [vmem:[#allocation4 + $0x99] sm:$0xff]  ;;  %v7884_v39 = vpack.i.bf16 %v11426_v37, %v11375_v36 }
 0x4b6   : > { %7855 = vrot.lane.b32.xlu0 %v7854_v55, %s8255_s28  ;;  %v4442_v54 = vpop.f32.mrf.mxu0  ;;  %v11500_v61 = vld [vmem:[#allocation4 + $0x10a] sm:$0xff]  ;;  %v7889_v35 = vpack.i.bf16 %v4778_v16, %v4812_v20 }
 0x4b7   : > { %4570 = vst.msk [vmem:[#allocation4 + $0x139] sm:$0xff] %vm4503_vm5, %v4495_v12  ;;  %v4498_v49 = vmax.f32 %v4448_v63, 0.0  ;;  %v4443_v62 = vadd.f32 %v4442_v54, %v4218_v31  ;;  %7022 = vmatprep.mubr.msk.f32.mxu0 %vm4503_vm5, %v11500_v61  ;;  %7860 = vrot.lane.b32.xlu1 %v7859_v19, %s8256_s13  ;;  %v7904_v31 = vpack.i.bf16 %v4777_v56, %v4811_v58  ;;  %v4780_v12 = vld [vmem:[#allocation4 + $0x98] sm:$0xff] }
 0x4b8   : > { %v6983_v46 = vpop.f32.mrf.mxu0  ;;  %7023 = vmatmul.mubr.msk.f32.gmra.mxu0 %vm4503_vm5, %v11507_v43  ;;  %v11528_v38 = vld [vmem:[#allocation4 + $0x12a] sm:$0xff]  ;;  %v7894_v63 = vpack.i.bf16 %v11477_v17, %v11399_v5 }
 0x4b9   : > { %4573 = vst.msk [vmem:[#allocation4 + $0x159] sm:$0xff] %vm4503_vm5, %v4498_v49  ;;  %v4497_v21 = vmax.f32 %v4443_v62, 0.0  ;;  %v4458_v6 = vadd.f32 %v6983_v46, %v4233_v34  ;;  %v7909_v34 = vpack.i.bf16 %v11363_v52, %v4780_v12  ;;  %v7899_v49 = vpack.i.bf16 %v11352_v33, %v4779_v51  ;;  %v4814_v62 = vld [vmem:[#allocation4 + $0xb1] sm:$0xff]  ;;  %v4813_v52 = vld [vmem:[#allocation4 + $0xa9] sm:$0xff] }
 0x4ba   : > { %7875 = vrot.lane.b32.xlu0 %v7874_v7, %s8256_s13  ;;  %v4452_v9 = vpop.f32.mrf.mxu0  ;;  %v11521_v59 = vld [vmem:[#allocation4 + $0x122] sm:$0xff]  ;;  %v7919_v46 = vpack.i.bf16 %v4780_v12, %v4814_v62  ;;  %v7934_v16 = vpack.i.bf16 %v4779_v51, %v4813_v52  ;;  %v4782_v33 = vld [vmem:[#allocation4 + $0xb0] sm:$0xff] }
 0x4bb   : > { %4572 = vst.msk [vmem:[#allocation4 + $0x151] sm:$0xff] %vm4503_vm5, %v4497_v21  ;;  %v4500_v3 = vmax.f32 %v4458_v6, 0.0  ;;  %v4453_v25 = vadd.f32 %v4452_v9, %v4228_v29  ;;  %7025 = vmatprep.mubr.msk.f32.mxu0 %vm4503_vm5, %v11521_v59  ;;  %7865 = vrot.lane.b32.xlu1 %v7864_v57, %s8255_s28  ;;  %v7924_v29 = vpack.i.bf16 %v4812_v20, %v11420_v60  ;;  %v4781_v21 = vld [vmem:[#allocation4 + $0xa8] sm:$0xff]  ;;  %v4785_v20 = vld [vmem:[#allocation4 + $0xd8] sm:$0xff]  ;;  %v4787_v12 = vld [vmem:[#allocation4 + $0xf0] sm:$0xff] }
 0x4bc   : > { %v6986_v50 = vpop.f32.mrf.mxu0  ;;  %7026 = vmatmul.mubr.msk.f32.gmra.mxu0 %vm4503_vm5, %v11528_v38  ;;  %v11543_v15 = vld [vmem:[#allocation4 + $0x142] sm:$0xff]  ;;  %v7939_v6 = vpack.i.bf16 %v11382_v11, %v4782_v33  ;;  %v7929_v48 = vpack.i.bf16 %v11375_v36, %v4781_v21  ;;  %v7954_v11 = vpack.i.bf16 %v4814_v62, %v11441_v47  ;;  %v4819_v58 = vld [vmem:[#allocation4 + $0xf1] sm:$0xff] }
 0x4bd   : > { %4575 = vst.msk [vmem:[#allocation4 + $0x171] sm:$0xff] %vm4503_vm5, %v4500_v3  ;;  %v4499_v45 = vmax.f32 %v4453_v25, 0.0  ;;  %v4468_v8 = vadd.f32 %v6986_v50, %v4243_v30  ;;  %v4816_v57 = vld [vmem:[#allocation4 + $0xc9] sm:$0xff]  ;;  %v4815_v9 = vld [vmem:[#allocation4 + $0xc1] sm:$0xff]  ;;  %v4822_v51 = vld [vmem:[#allocation4 + $0x111] sm:$0xff] }
 0x4be   : > { %7880 = vrot.lane.b32.xlu0 %v7879_v1, %s8254_s29  ;;  %v4462_v0 = vpop.f32.mrf.mxu0  ;;  %v11537_v2 = vld [vmem:[#allocation4 + $0x13a] sm:$0xff]  ;;  %v7949_v56 = vpack.i.bf16 %v4782_v33, %v4816_v57  ;;  %v7964_v30 = vpack.i.bf16 %v4781_v21, %v4815_v9  ;;  %v4784_v3 = vld [vmem:[#allocation4 + $0xc8] sm:$0xff] }
 0x4bf   : > { %4574 = vst.msk [vmem:[#allocation4 + $0x169] sm:$0xff] %vm4503_vm5, %v4499_v45  ;;  %v4502_v41 = vmax.f32 %v4468_v8, 0.0  ;;  %v4463_v42 = vadd.f32 %v4462_v0, %v4238_v28  ;;  %7028 = vmatprep.mubr.msk.f32.mxu0 %vm4503_vm5, %v11537_v2  ;;  %7870 = vrot.lane.b32.xlu1 %v7869_v44, %s8254_s29  ;;  %v4783_v25 = vld [vmem:[#allocation4 + $0xc0] sm:$0xff]  ;;  %v7969_v36 = vpack.i.bf16 %v11399_v5, %v4784_v3 }
 0x4c0   : > { %7029 = vmatmul.mubr.msk.f32.gmra.mxu0 %vm4503_vm5, %v11543_v15  ;;  %v11557_v37 = vld [vmem:[#allocation4 + $0x15a] sm:$0xff]  ;;  %v7959_v1 = vpack.i.bf16 %v11392_v14, %v4783_v25  ;;  %v7974_v28 = vpack.i.bf16 %v4813_v52, %v11433_v22  ;;  %v7984_v5 = vpack.i.bf16 %v4816_v57, %v11462_v13 }
 0x4c1   : > { %4577 = vst.msk [vmem:[#allocation4 + $0x189] sm:$0xff] %vm4503_vm5, %v4502_v41  ;;  %v4501_v55 = vmax.f32 %v4463_v42, 0.0  ;;  %v4818_v50 = vld [vmem:[#allocation4 + $0xe1] sm:$0xff]  ;;  %v4817_v45 = vld [vmem:[#allocation4 + $0xd9] sm:$0xff]  ;;  %v7989_v41 = vpack.i.bf16 %v11410_v24, %v4785_v20 }
 0x4c2   : > { %7885 = vrot.lane.b32.xlu0 %v7884_v39, %s8255_s28  ;;  %v11551_v10 = vld [vmem:[#allocation4 + $0x152] sm:$0xff]  ;;  %v7979_v8 = vpack.i.bf16 %v4784_v3, %v4818_v50  ;;  %v7994_v44 = vpack.i.bf16 %v4783_v25, %v4817_v45  ;;  %v4786_v0 = vld [vmem:[#allocation4 + $0xe0] sm:$0xff]  ;;  %v8004_v39 = vpack.i.bf16 %v4815_v9, %v11454_v32 }
 0x4c3   : > { %4576 = vst.msk [vmem:[#allocation4 + $0x181] sm:$0xff] %vm4503_vm5, %v4501_v55  ;;  %7031 = vmatprep.mubr.msk.f32.mxu0 %vm4503_vm5, %v11551_v10  ;;  %7890 = vrot.lane.b32.xlu1 %v7889_v35, %s8256_s13  ;;  %v7999_v14 = vpack.i.bf16 %v11420_v60, %v4786_v0  ;;  %v4820_v42 = vld [vmem:[#allocation4 + $0xf9] sm:$0xff]  ;;  %v8024_v35 = vpack.i.bf16 %v4785_v20, %v4819_v58 }
 0x4c4   : > { %7032 = vmatmul.mubr.msk.f32.gmra.mxu0 %vm4503_vm5, %v11557_v37  ;;  %v11569_v54 = vld [vmem:[#allocation4 + $0x172] sm:$0xff]  ;;  %v8009_v55 = vpack.i.bf16 %v4786_v0, %v4820_v42  ;;  %v8014_v60 = vpack.i.bf16 %v4818_v50, %v11484_v53  ;;  %v8074_v50 = vpack.i.bf16 %v4822_v51, %v11528_v38 }
 0x4c6   : > { %7905 = vrot.lane.b32.xlu0 %v7904_v31, %s8256_s13  ;;  %v11564_v19 = vld [vmem:[#allocation4 + $0x16a] sm:$0xff]  ;;  %v4788_v31 = vld [vmem:[#allocation4 + $0xf8] sm:$0xff] }
 0x4c7   : > { %7034 = vmatprep.mubr.msk.f32.mxu0 %vm4503_vm5, %v11564_v19  ;;  %7895 = vrot.lane.b32.xlu1 %v7894_v63, %s8255_s28  ;;  %v8029_v24 = vpack.i.bf16 %v11441_v47, %v4788_v31  ;;  %v8019_v63 = vpack.i.bf16 %v11433_v22, %v4787_v12  ;;  %v8044_v22 = vpack.i.bf16 %v4820_v42, %v11507_v43 }
 0x4c8   : > { %7035 = vmatmul.mubr.msk.f32.gmra.mxu0 %vm4503_vm5, %v11569_v54  ;;  %v4864_v7 = vld [vmem:[#allocation4 + $0x18a] sm:$0xff] }
 0x4ca   : > { %7910 = vrot.lane.b32.xlu0 %v7909_v34, %s8254_s29  ;;  %v4863_v17 = vld [vmem:[#allocation4 + $0x182] sm:$0xff]  ;;  %v8034_v34 = vpack.i.bf16 %v4817_v45, %v11475_v26 }
 0x4cb   : > { %7037 = vmatprep.mubr.msk.f32.mxu0 %vm4503_vm5, %v4863_v17  ;;  %7900 = vrot.lane.b32.xlu1 %v7899_v49, %s8254_s29  ;;  %v11621_v49 = vld [vmem:[#allocation4 + $0x109] sm:$0xff]  ;;  %v8039_v17 = vpack.i.bf16 %v4788_v31, %v4822_v51  ;;  %v4707_v45 = vld [vmem:[#allocation4 + $0x21] sm:$0xff] }
 0x4cc   : > { %7038 = vmatmul.mubr.msk.f32.gmra.mxu0 %vm4503_vm5, %v4864_v7  ;;  %v8054_v62 = vpack.i.bf16 %v4787_v12, %v11621_v49  ;;  %v4790_v7 = vld [vmem:[#allocation4 + $0x110] sm:$0xff] }
 0x4ce   : > { %7915 = vrot.lane.b32.xlu0 %v7914_v23, %s8255_s28  ;;  %v4789_v23 = vld [vmem:[#allocation4 + $0x108] sm:$0xff] }
 0x4cf   : > { %7920 = vrot.lane.b32.xlu1 %v7919_v46, %s8256_s13  ;;  %v8059_v46 = vpack.i.bf16 %v11462_v13, %v4790_v7  ;;  %v8049_v33 = vpack.i.bf16 %v11454_v32, %v4789_v23 }
 0x4d2   : > { %7935 = vrot.lane.b32.xlu0 %v7934_v16, %s8256_s13 }
 0x4d3   : > { %7925 = vrot.lane.b32.xlu1 %v7924_v29, %s8255_s28  ;;  %v11634_v29 = vld [vmem:[#allocation4 + $0x129] sm:$0xff] }
 0x4d4   : > { %v8069_v13 = vpack.i.bf16 %v4790_v7, %v11634_v29  ;;  %v8094_v7 = vpack.i.bf16 %v11621_v49, %v11521_v59 }
 0x4d6   : > { %7940 = vrot.lane.b32.xlu0 %v7939_v6, %s8254_s29  ;;  %v8064_v6 = vpack.i.bf16 %v4819_v58, %v11500_v61 }
 0x4d7   : > { %7930 = vrot.lane.b32.xlu1 %v7929_v48, %s8254_s29  ;;  %v11638_v48 = vld [vmem:[#allocation4 + $0x121] sm:$0xff] }
 0x4da   : > { %7945 = vrot.lane.b32.xlu0 %v7944_v4, %s8255_s28 }
 0x4db   : > { %7950 = vrot.lane.b32.xlu1 %v7949_v56, %s8256_s13  ;;  %v4792_v56 = vld [vmem:[#allocation4 + $0x128] sm:$0xff] }
 0x4de   : > { %7965 = vrot.lane.b32.xlu0 %v7964_v30, %s8256_s13  ;;  %v4578_v30 = vld [vmem:[#allocation4] sm:$0xff] }
 0x4df   : > { %7955 = vrot.lane.b32.xlu1 %v7954_v11, %s8255_s28  ;;  %v8084_v11 = vpack.i.bf16 %v4789_v23, %v11638_v48 }
 0x4e2   : > { %7970 = vrot.lane.b32.xlu0 %v7969_v36, %s8254_s29 }
 0x4e3   : > { %7960 = vrot.lane.b32.xlu1 %v7959_v1, %s8254_s29 }
 0x4e6   : > { %7975 = vrot.lane.b32.xlu0 %v7974_v28, %s8255_s28  ;;  %v8089_v28 = vpack.i.bf16 %v11484_v53, %v4792_v56 }
 0x4e7   : > { %7980 = vrot.lane.b32.xlu1 %v7979_v8, %s8256_s13 }
 0x4ea   : > { %7995 = vrot.lane.b32.xlu0 %v7994_v44, %s8256_s13 }
 0x4eb   : > { %7985 = vrot.lane.b32.xlu1 %v7984_v5, %s8255_s28  ;;  %v4791_v5 = vld [vmem:[#allocation4 + $0x120] sm:$0xff] }
 0x4ec   : > { %v8079_v51 = vpack.i.bf16 %v11475_v26, %v4791_v5  ;;  %v11673_v26 = vld [vmem:[#allocation4 + $0x139] sm:$0xff] }
 0x4ee   : > { %8000 = vrot.lane.b32.xlu0 %v7999_v14, %s8254_s29  ;;  %v4579_v14 = vld [vmem:[#allocation4 + $0x8] sm:$0xff] }
 0x4ef   : > { %7990 = vrot.lane.b32.xlu1 %v7989_v41, %s8254_s29 }
 0x4f2   : > { %8005 = vrot.lane.b32.xlu0 %v8004_v39, %s8255_s28 }
 0x4f3   : > { %8010 = vrot.lane.b32.xlu1 %v8009_v55, %s8256_s13 }
 0x4f6   : > { %8025 = vrot.lane.b32.xlu0 %v8024_v35, %s8256_s13 }
 0x4f7   : > { %8015 = vrot.lane.b32.xlu1 %v8014_v60, %s8255_s28 }
 0x4fa   : > { %8030 = vrot.lane.b32.xlu0 %v8029_v24, %s8254_s29 }
 0x4fb   : > { %8020 = vrot.lane.b32.xlu1 %v8019_v63, %s8254_s29 }
 0x4fe   : > { %8035 = vrot.lane.b32.xlu0 %v8034_v34, %s8255_s28  ;;  %v11665_v34 = vld [vmem:[#allocation4 + $0x141] sm:$0xff] }
 0x4ff   : > { %8040 = vrot.lane.b32.xlu1 %v8039_v17, %s8256_s13 }
 0x501   : > { %v7761_v47 = vpop.permute.xlu1 %7760 }
 0x502   : > { %8055 = vrot.lane.b32.xlu0 %v8054_v62, %s8256_s13  ;;  %v7762_v4 = vunpack.i.l.bf16 %v7761_v47  ;;  %v7763_v36 = vunpack.i.h.bf16 %v7761_v47 }
 0x503   : > { %v7766_v52 = vpop.permute.xlu0 %7765  ;;  %8045 = vrot.lane.b32.xlu1 %v8044_v22, %s8255_s28 }
 0x504   : > { %v7767_v9 = vunpack.i.l.bf16 %v7766_v52  ;;  %v7768_v32 = vunpack.i.h.bf16 %v7766_v52  ;;  %v5733_v20 = vsel %vm4503_vm5, %v4707_v45, %v7762_v4  ;;  %v8099_v52 = vpack.i.bf16 %v4792_v56, %v11665_v34 }
 0x505   : > { %v11630_v16 = vpop.permute.xlu1 %7770  ;;  %v8104_v56 = vpack.i.bf16 %v11634_v29, %v11543_v15 }
 0x506   : > { %8060 = vrot.lane.b32.xlu0 %v8059_v46, %s8254_s29  ;;  %v5635_v8 = vsel %vm4503_vm5, %v4578_v30, %v7767_v9  ;;  %v5732_v55 = vsel %vm4503_vm5, %v11354_v27, %v7768_v32  ;;  %v7772_v60 = vunpack.i.l.bf16 %v11630_v16  ;;  %v5636_v27 = vsel %vm4503_vm5, %v4579_v14, %v7763_v36 }
 0x507   : > { %8050 = vrot.lane.b32.xlu1 %v8049_v33, %s8254_s29  ;;  %v7773_v22 = vunpack.i.h.bf16 %v11630_v16  ;;  %v8114_v16 = vpack.i.bf16 %v4791_v5, %v11673_v26 }
 0x508   : > { %v7786_v21 = vpop.permute.xlu0 %7785 }
 0x509   : > { %v11640_v57 = vpop.permute.xlu1 %7775  ;;  %v7788_v41 = vunpack.i.h.bf16 %v7786_v21  ;;  %v7787_v42 = vunpack.i.l.bf16 %v7786_v21 }
 0x50a   : > { %8065 = vrot.lane.b32.xlu0 %v8064_v6, %s8255_s28  ;;  %v7777_v46 = vunpack.i.l.bf16 %v11640_v57  ;;  %v4794_v6 = vld [vmem:[#allocation4 + $0x140] sm:$0xff]  ;;  %v7778_v9 = vunpack.i.h.bf16 %v11640_v57 }
 0x50b   : > { %8070 = vrot.lane.b32.xlu1 %v8069_v13, %s8256_s13  ;;  %v8119_v32 = vpack.i.bf16 %v11507_v43, %v4794_v6 }
 0x50c   : > { %v7791_v3 = vpop.permute.xlu0 %7790 }
 0x50d   : > { %v7792_v25 = vunpack.i.l.bf16 %v7791_v3  ;;  %v7781_v1 = vpop.permute.xlu1 %7780  ;;  %v7793_v39 = vunpack.i.h.bf16 %v7791_v3  ;;  %v4709_v3 = vld [vmem:[#allocation4 + $0x39] sm:$0xff] }
 0x50e   : > { %8085 = vrot.lane.b32.xlu0 %v8084_v11, %s8256_s13  ;;  %v7783_v44 = vunpack.i.h.bf16 %v7781_v1  ;;  %v7782_v0 = vunpack.i.l.bf16 %v7781_v1  ;;  %v4708_v1 = vld [vmem:[#allocation4 + $0x31] sm:$0xff] }
 0x50f   : > { %8075 = vrot.lane.b32.xlu1 %v8074_v50, %s8255_s28  ;;  %v5765_v31 = vsel %vm734_vm2, %v5733_v20, %v7792_v25  ;;  %v5668_v47 = vsel %vm734_vm2, %v5636_v27, %v7793_v39  ;;  %v4793_v50 = vld [vmem:[#allocation4 + $0x138] sm:$0xff]  ;;  %v5638_v39 = vsel %vm4503_vm5, %v11296_v40, %v7778_v9 }
 0x510   : > { %v7796_v58 = vpop.permute.xlu0 %7795  ;;  %v5667_v53 = vsel %vm734_vm2, %v5635_v8, %v7783_v44  ;;  %v5764_v35 = vsel %vm734_vm2, %v5732_v55, %v7782_v0  ;;  %v5797_v62 = vsel %vm5699_vm8, %v5765_v31, %v7772_v60  ;;  %v5701_v21 = vsel %vm5699_vm8, %v5668_v47, %v7773_v22  ;;  %v4582_v22 = vld [vmem:[#allocation4 + $0x30] sm:$0xff] }
 0x511   : > { %v11658_v12 = vpop.permute.xlu1 %7800  ;;  %v5796_v24 = vsel %vm5699_vm8, %v5764_v35, %v7787_v42  ;;  %v5700_v63 = vsel %vm5699_vm8, %v5667_v53, %v7788_v41  ;;  %v7798_v33 = vunpack.i.h.bf16 %v7796_v58  ;;  %v7797_v49 = vunpack.i.l.bf16 %v7796_v58  ;;  %v11705_v58 = vld [vmem:[#allocation4 + $0x159] sm:$0xff] }
 0x512   : > { %8090 = vrot.lane.b32.xlu0 %v8089_v28, %s8254_s29  ;;  %6031 = vmatprep.mubr.f32.mxu1 %v5796_v24  ;;  %v5735_v28 = vsel %vm4503_vm5, %v4709_v3, %v7777_v46  ;;  %v7802_v5 = vunpack.i.l.bf16 %v11658_v12  ;;  %v8109_v42 = vpack.i.bf16 %v11500_v61, %v4793_v50  ;;  %v8124_v35 = vpack.i.bf16 %v11638_v48, %v11537_v2  ;;  %v11713_v61 = vld [vmem:[#allocation4 + $0x151] sm:$0xff] }
 0x513   : > { %6032 = vmatmul.mubr.f32.vlgmr.msra.gmra.mxu1 %v5700_v63  ;;  %8080 = vrot.lane.b32.xlu1 %v8079_v51, %s8254_s29  ;;  %v5637_v11 = vsel %vm4503_vm5, %v11309_v18, %v7798_v33  ;;  %v5734_v29 = vsel %vm4503_vm5, %v4708_v1, %v7797_v49  ;;  %v7803_v60 = vunpack.i.h.bf16 %v11658_v12  ;;  %v8129_v24 = vpack.i.bf16 %v4794_v6, %v11705_v58 }
 0x514   : > { %v7816_v17 = vpop.permute.xlu0 %7815  ;;  %6036 = vmatprep.mubr.f32.mxu1 %v5797_v62  ;;  %v8144_v12 = vpack.i.bf16 %v4793_v50, %v11713_v61  ;;  %v8134_v46 = vpack.i.bf16 %v11665_v34, %v11557_v37 }
 0x515   : > { %v11675_v23 = vpop.permute.xlu1 %7805  ;;  %v7818_v45 = vunpack.i.h.bf16 %v7816_v17  ;;  %v7817_v57 = vunpack.i.l.bf16 %v7816_v17  ;;  %v4796_v17 = vld [vmem:[#allocation4 + $0x158] sm:$0xff] }
 0x516   : > { %8095 = vrot.lane.b32.xlu0 %v8094_v7, %s8255_s28  ;;  %v7807_v63 = vunpack.i.l.bf16 %v11675_v23  ;;  %v7808_v47 = vunpack.i.h.bf16 %v11675_v23  ;;  %v8149_v33 = vpack.i.bf16 %v11528_v38, %v4796_v17 }
 0x517   : > { %6037 = vmatmul.mubr.f32.gmra.mxu1 %v5701_v21  ;;  %8100 = vrot.lane.b32.xlu1 %v8099_v52, %s8256_s13  ;;  %v4711_v21 = vld [vmem:[#allocation4 + $0x51] sm:$0xff] }
 0x518   : > { %v7821_v13 = vpop.permute.xlu0 %7820  ;;  %v5737_v9 = vsel %vm4503_vm5, %v4711_v21, %v7807_v63 }
 0x519   : > { %v7822_v4 = vunpack.i.l.bf16 %v7821_v13  ;;  %v7811_v30 = vpop.permute.xlu1 %7810  ;;  %v7823_v8 = vunpack.i.h.bf16 %v7821_v13 }
 0x51a   : > { %8115 = vrot.lane.b32.xlu0 %v8114_v16, %s8256_s13  ;;  %v7813_v25 = vunpack.i.h.bf16 %v7811_v30  ;;  %v7812_v36 = vunpack.i.l.bf16 %v7811_v30  ;;  %v4710_v16 = vld [vmem:[#allocation4 + $0x49] sm:$0xff] }
 0x51b   : > { %8105 = vrot.lane.b32.xlu1 %v8104_v56, %s8255_s28  ;;  %v5767_v18 = vsel %vm734_vm2, %v5735_v28, %v7822_v4  ;;  %v5670_v31 = vsel %vm734_vm2, %v5638_v39, %v7823_v8  ;;  %v11729_v4 = vld [vmem:[#allocation4 + $0x150] sm:$0xff]  ;;  %v11762_v39 = vld [vmem:[#allocation4 + $0x168] sm:$0xff] }
 0x51c   : > { %v7826_v44 = vpop.permute.xlu0 %7825  ;;  %v5766_v43 = vsel %vm734_vm2, %v5734_v29, %v7812_v36  ;;  %v5669_v0 = vsel %vm734_vm2, %v5637_v11, %v7813_v25  ;;  %v5799_v53 = vsel %vm5699_vm8, %v5767_v18, %v7802_v5  ;;  %v5703_v27 = vsel %vm5699_vm8, %v5670_v31, %v7803_v60  ;;  %v4583_v11 = vld [vmem:[#allocation4 + $0x38] sm:$0xff]  ;;  %v4584_v31 = vld [vmem:[#allocation4 + $0x48] sm:$0xff] }
 0x51d   : > { %v11697_v20 = vpop.permute.xlu1 %7830  ;;  %v5798_v14 = vsel %vm5699_vm8, %v5766_v43, %v7817_v57  ;;  %v5702_v41 = vsel %vm5699_vm8, %v5669_v0, %v7818_v45  ;;  %v7828_v51 = vunpack.i.h.bf16 %v7826_v44  ;;  %v7827_v48 = vunpack.i.l.bf16 %v7826_v44  ;;  %v11746_v57 = vld [vmem:[#allocation4 + $0x171] sm:$0xff] }
 0x51e   : > { %8120 = vrot.lane.b32.xlu0 %v8119_v32, %s8254_s29  ;;  %6041 = vmatprep.mubr.f32.mxu1 %v5798_v14  ;;  %v7832_v25 = vunpack.i.l.bf16 %v11697_v20  ;;  %v8139_v28 = vpack.i.bf16 %v11521_v59, %v11729_v4  ;;  %v5640_v45 = vsel %vm4503_vm5, %v4583_v11, %v7808_v47  ;;  %v8154_v29 = vpack.i.bf16 %v11673_v26, %v11551_v10  ;;  %v11754_v59 = vld [vmem:[#allocation4 + $0x169] sm:$0xff] }
 0x51f   : > { %6042 = vmatmul.mubr.f32.gmra.mxu1 %v5702_v41  ;;  %8110 = vrot.lane.b32.xlu1 %v8109_v42, %s8254_s29  ;;  %v5639_v6 = vsel %vm4503_vm5, %v4582_v22, %v7828_v51  ;;  %v5736_v37 = vsel %vm4503_vm5, %v4710_v16, %v7827_v48  ;;  %v7833_v0 = vunpack.i.h.bf16 %v11697_v20  ;;  %v8159_v5 = vpack.i.bf16 %v4796_v17, %v11746_v57  ;;  %v11764_v10 = vld [vmem:[#allocation4 + $0x170] sm:$0xff] }
 0x520   : > { %v7846_v55 = vpop.permute.xlu0 %7845  ;;  %6046 = vmatprep.mubr.f32.mxu1 %v5799_v53  ;;  %v8179_v63 = vpack.i.bf16 %v11543_v15, %v11764_v10  ;;  %v4713_v51 = vld [vmem:[#allocation4 + $0x69] sm:$0xff] }
 0x521   : > { %v11715_v40 = vpop.permute.xlu1 %7835  ;;  %v7848_v23 = vunpack.i.h.bf16 %v7846_v55  ;;  %v7847_v30 = vunpack.i.l.bf16 %v7846_v55  ;;  %v8174_v55 = vpack.i.bf16 %v11729_v4, %v11754_v59 }
 0x522   : > { %8125 = vrot.lane.b32.xlu0 %v8124_v35, %s8255_s28  ;;  %v7837_v14 = vunpack.i.l.bf16 %v11715_v40  ;;  %v7838_v35 = vunpack.i.h.bf16 %v11715_v40 }
 0x523   : > { %6047 = vmatmul.mubr.f32.gmra.mxu1 %v5703_v27  ;;  %8130 = vrot.lane.b32.xlu1 %v8129_v24, %s8256_s13  ;;  %v8164_v24 = vpack.i.bf16 %v11537_v2, %v11762_v39 }
 0x524   : > { %v7851_v62 = vpop.permute.xlu0 %7850 }
 0x525   : > { %v7852_v7 = vunpack.i.l.bf16 %v7851_v62  ;;  %v7841_v52 = vpop.permute.xlu1 %7840  ;;  %v7853_v56 = vunpack.i.h.bf16 %v7851_v62  ;;  %v4712_v62 = vld [vmem:[#allocation4 + $0x61] sm:$0xff] }
 0x526   : > { %8145 = vrot.lane.b32.xlu0 %v8144_v12, %s8256_s13  ;;  %v7843_v49 = vunpack.i.h.bf16 %v7841_v52  ;;  %v7842_v13 = vunpack.i.l.bf16 %v7841_v52  ;;  %v5739_v12 = vsel %vm4503_vm5, %v4713_v51, %v7837_v14  ;;  %v4801_v14 = vld [vmem:[#allocation4 + $0x198] sm:$0xff] }
 0x527   : > { %8135 = vrot.lane.b32.xlu1 %v8134_v46, %s8255_s28  ;;  %v5769_v3 = vsel %vm734_vm2, %v5737_v9, %v7852_v7  ;;  %v5672_v43 = vsel %vm734_vm2, %v5640_v45, %v7853_v56 }
 0x528   : > { %v7856_v32 = vpop.permute.xlu0 %7855  ;;  %v5768_v38 = vsel %vm734_vm2, %v5736_v37, %v7842_v13  ;;  %v5671_v34 = vsel %vm734_vm2, %v5639_v6, %v7843_v49  ;;  %v5801_v44 = vsel %vm5699_vm8, %v5769_v3, %v7832_v25  ;;  %v5705_v42 = vsel %vm5699_vm8, %v5672_v43, %v7833_v0 }
 0x529   : > { %v11738_v36 = vpop.permute.xlu1 %7860  ;;  %v5800_v1 = vsel %vm5699_vm8, %v5768_v38, %v7847_v30  ;;  %v5704_v50 = vsel %vm5699_vm8, %v5671_v34, %v7848_v23  ;;  %v7858_v41 = vunpack.i.h.bf16 %v7856_v32  ;;  %v7857_v26 = vunpack.i.l.bf16 %v7856_v32  ;;  %v11791_v23 = vld [vmem:[#allocation4 + $0x180] sm:$0xff] }
 0x52a   : > { %8150 = vrot.lane.b32.xlu0 %v8149_v33, %s8254_s29  ;;  %6051 = vmatprep.mubr.f32.mxu1 %v5800_v1  ;;  %v4585_v33 = vld [vmem:[#allocation4 + $0x50] sm:$0xff]  ;;  %v7862_v21 = vunpack.i.l.bf16 %v11738_v36  ;;  %v8169_v13 = vpack.i.bf16 %v11705_v58, %v11569_v54  ;;  %v8184_v32 = vpack.i.bf16 %v11713_v61, %v11564_v19  ;;  %v7863_v54 = vunpack.i.h.bf16 %v11738_v36  ;;  %v11799_v38 = vld [vmem:[#allocation4 + $0x181] sm:$0xff] }
 0x52b   : > { %6052 = vmatmul.mubr.f32.gmra.mxu1 %v5704_v50  ;;  %8140 = vrot.lane.b32.xlu1 %v8139_v28, %s8254_s29  ;;  %v5641_v27 = vsel %vm4503_vm5, %v4584_v31, %v7858_v41  ;;  %v5738_v52 = vsel %vm4503_vm5, %v4712_v62, %v7857_v26  ;;  %v5642_v9 = vsel %vm4503_vm5, %v4585_v33, %v7838_v35  ;;  %v4670_v58 = vld [vmem:[#allocation4 + $0x152] sm:$0xff]  ;;  %v11807_v19 = vld [vmem:[#allocation4 + $0x189] sm:$0xff]  ;;  %v4715_v41 = vld [vmem:[#allocation4 + $0x81] sm:$0xff] }
 0x52c   : > { %v7876_v8 = vpop.permute.xlu0 %7875  ;;  %6056 = vmatprep.mubr.f32.mxu1 %v5801_v44  ;;  %v8189_v3 = vpack.i.bf16 %v4670_v58, %v11791_v23  ;;  %v11809_v61 = vld [vmem:[#allocation4 + $0x188] sm:$0xff]  ;;  %v8209_v28 = vpack.i.bf16 %v11762_v39, %v11799_v38  ;;  %v8194_v0 = vpack.i.bf16 %v11764_v10, %v11807_v19  ;;  %v4673_v58 = vld [vmem:[#allocation4 + $0x172] sm:$0xff] }
 0x52d   : > { %v11756_v18 = vpop.permute.xlu1 %7865  ;;  %v7878_v7 = vunpack.i.h.bf16 %v7876_v8  ;;  %v7877_v40 = vunpack.i.l.bf16 %v7876_v8  ;;  %v4671_v8 = vld [vmem:[#allocation4 + $0x15a] sm:$0xff]  ;;  %v4587_v62 = vld [vmem:[#allocation4 + $0x68] sm:$0xff] }
 0x52e   : > { %8155 = vrot.lane.b32.xlu0 %v8154_v29, %s8255_s28  ;;  %v7867_v11 = vunpack.i.l.bf16 %v11756_v18  ;;  %v7868_v44 = vunpack.i.h.bf16 %v11756_v18  ;;  %v4586_v29 = vld [vmem:[#allocation4 + $0x60] sm:$0xff] }
 0x52f   : > { %6057 = vmatmul.mubr.f32.gmra.mxu1 %v5705_v42  ;;  %8160 = vrot.lane.b32.xlu1 %v8159_v5, %s8256_s13  ;;  %v8214_v5 = vpack.i.bf16 %v4671_v8, %v11809_v61  ;;  %v4865_v18 = vld [vmem:[#allocation4 + $0x19a] sm:$0xff] }
 0x530   : > { %v7881_v20 = vpop.permute.xlu0 %7880  ;;  %v5741_v35 = vsel %vm4503_vm5, %v4715_v41, %v7867_v11  ;;  %7040 = vmatprep.mubr.msk.f32.mxu0 %vm4503_vm5, %v4865_v18  ;;  %v4717_v8 = vld [vmem:[#allocation4 + $0x99] sm:$0xff] }
 0x531   : > { %v7882_v53 = vunpack.i.l.bf16 %v7881_v20  ;;  %v7871_v60 = vpop.permute.xlu1 %7870  ;;  %v7883_v47 = vunpack.i.h.bf16 %v7881_v20 }
 0x532   : > { %8175 = vrot.lane.b32.xlu0 %v8174_v55, %s8256_s13  ;;  %v7873_v17 = vunpack.i.h.bf16 %v7871_v60  ;;  %v7872_v48 = vunpack.i.l.bf16 %v7871_v60  ;;  %v4714_v55 = vld [vmem:[#allocation4 + $0x79] sm:$0xff] }
 0x533   : > { %8165 = vrot.lane.b32.xlu1 %v8164_v24, %s8254_s29  ;;  %v5771_v46 = vsel %vm734_vm2, %v5739_v12, %v7882_v53  ;;  %v5674_v37 = vsel %vm734_vm2, %v5642_v9, %v7883_v47  ;;  %v4672_v53 = vld [vmem:[#allocation4 + $0x16a] sm:$0xff] }
 0x534   : > { %v7886_v22 = vpop.permute.xlu0 %7885  ;;  %v5770_v2 = vsel %vm734_vm2, %v5738_v52, %v7872_v48  ;;  %v5673_v15 = vsel %vm734_vm2, %v5641_v27, %v7873_v17  ;;  %v5803_v56 = vsel %vm5699_vm8, %v5771_v46, %v7862_v21  ;;  %v5707_v1 = vsel %vm5699_vm8, %v5674_v37, %v7863_v54  ;;  %v4768_v48 = vld [vmem:[#allocation4 + $0x182] sm:$0xff] }
 0x535   : > { %v11783_v6 = vpop.permute.xlu1 %7890  ;;  %v5802_v49 = vsel %vm5699_vm8, %v5770_v2, %v7877_v40  ;;  %v5706_v16 = vsel %vm5699_vm8, %v5673_v15, %v7878_v7  ;;  %v7888_v25 = vunpack.i.h.bf16 %v7886_v22  ;;  %v7887_v36 = vunpack.i.l.bf16 %v7886_v22  ;;  %v4769_v2 = vld [vmem:[#allocation4 + $0x18a] sm:$0xff]  ;;  %v4866_v15 = vld [vmem:[#allocation4 + $0x1a2] sm:$0xff] }
 0x536   : > { %8180 = vrot.lane.b32.xlu0 %v8179_v63, %s8254_s29  ;;  %6061 = vmatprep.mubr.f32.mxu1 %v5802_v49  ;;  %v7892_v12 = vunpack.i.l.bf16 %v11783_v6  ;;  %v8199_v47 = vpack.i.bf16 %v4672_v53, %v4801_v14  ;;  %v5644_v52 = vsel %vm4503_vm5, %v4587_v62, %v7868_v44  ;;  %v8219_v21 = vpack.i.bf16 %v11754_v59, %v4768_v48  ;;  %v4834_v54 = vld [vmem:[#allocation4 + $0x1a1] sm:$0xff] }
 0x537   : > { %8170 = vrot.lane.b32.xlu1 %v8169_v13, %s8255_s28  ;;  %6062 = vmatmul.mubr.f32.gmra.mxu1 %v5706_v16  ;;  %v5643_v42 = vsel %vm4503_vm5, %v4586_v29, %v7888_v25  ;;  %v5740_v10 = vsel %vm4503_vm5, %v4714_v55, %v7887_v36  ;;  %v7893_v13 = vunpack.i.h.bf16 %v11783_v6  ;;  %v4833_v16 = vld [vmem:[#allocation4 + $0x199] sm:$0xff] }
 0x538   : > { %v7906_v30 = vpop.permute.xlu0 %7905  ;;  %6066 = vmatprep.mubr.f32.mxu1 %v5803_v56  ;;  %7041 = vmatmul.mubr.msk.f32.gmra.mxu0 %vm4503_vm5, %v4866_v15  ;;  %v8224_v25 = vpack.i.bf16 %v11791_v23, %v4833_v16  ;;  %v4589_v55 = vld [vmem:[#allocation4 + $0x80] sm:$0xff]  ;;  %v4719_v15 = vld [vmem:[#allocation4 + $0xb1] sm:$0xff] }
 0x539   : > { %v11801_v34 = vpop.permute.xlu1 %7895  ;;  %v7908_v31 = vunpack.i.h.bf16 %v7906_v30  ;;  %v7907_v60 = vunpack.i.l.bf16 %v7906_v30  ;;  %v8204_v30 = vpack.i.bf16 %v11746_v57, %v4769_v2 }
 0x53a   : > { %8185 = vrot.lane.b32.xlu0 %v8184_v32, %s8255_s28  ;;  %v7897_v56 = vunpack.i.l.bf16 %v11801_v34  ;;  %v7898_v36 = vunpack.i.h.bf16 %v11801_v34 }
 0x53b   : > { %8190 = vrot.lane.b32.xlu1 %v8189_v3, %s8254_s29  ;;  %6067 = vmatmul.mubr.f32.gmra.mxu1 %v5707_v1  ;;  %v4802_v3 = vld [vmem:[#allocation4 + $0x1a0] sm:$0xff] }
 0x53c   : > { %v7911_v50 = vpop.permute.xlu0 %7910 }
 0x53d   : > { %v7912_v45 = vunpack.i.l.bf16 %v7911_v50  ;;  %v7901_v43 = vpop.permute.xlu1 %7900  ;;  %v7913_v24 = vunpack.i.h.bf16 %v7911_v50  ;;  %v4588_v50 = vld [vmem:[#allocation4 + $0x78] sm:$0xff] }
 0x53e   : > { %8210 = vrot.lane.b32.xlu0 %v8209_v28, %s8256_s13  ;;  %v7903_v26 = vunpack.i.h.bf16 %v7901_v43  ;;  %v7902_v20 = vunpack.i.l.bf16 %v7901_v43  ;;  %v8234_v28 = vpack.i.bf16 %v11809_v61, %v4834_v54 }
 0x53f   : > { %8195 = vrot.lane.b32.xlu1 %v8194_v0, %s8256_s13  ;;  %v5773_v17 = vsel %vm734_vm2, %v5741_v35, %v7912_v45  ;;  %v5676_v49 = vsel %vm734_vm2, %v5644_v52, %v7913_v24  ;;  %v8229_v45 = vpack.i.bf16 %v4673_v58, %v4802_v3  ;;  %v4716_v0 = vld [vmem:[#allocation4 + $0x91] sm:$0xff] }
 0x540   : > { %v7916_v63 = vpop.permute.xlu0 %7915  ;;  %v5772_v51 = vsel %vm734_vm2, %v5740_v10, %v7902_v20  ;;  %v5675_v27 = vsel %vm734_vm2, %v5643_v42, %v7903_v26  ;;  %v5805_v33 = vsel %vm5699_vm8, %v5773_v17, %v7892_v12  ;;  %v5709_v37 = vsel %vm5699_vm8, %v5676_v49, %v7893_v13  ;;  %v4590_v52 = vld [vmem:[#allocation4 + $0x90] sm:$0xff]  ;;  %v4591_v58 = vld [vmem:[#allocation4 + $0x98] sm:$0xff] }
 0x541   : > { %v11828_v7 = vpop.permute.xlu1 %7920  ;;  %v5804_v40 = vsel %vm5699_vm8, %v5772_v51, %v7907_v60  ;;  %v5708_v22 = vsel %vm5699_vm8, %v5675_v27, %v7908_v31  ;;  %v7918_v32 = vunpack.i.h.bf16 %v7916_v63  ;;  %v7917_v11 = vunpack.i.l.bf16 %v7916_v63 }
 0x542   : > { %8215 = vrot.lane.b32.xlu0 %v8214_v5, %s8254_s29  ;;  %6071 = vmatprep.mubr.f32.mxu1 %v5804_v40  ;;  %v5743_v5 = vsel %vm4503_vm5, %v4717_v8, %v7897_v56  ;;  %v7922_v53 = vunpack.i.l.bf16 %v11828_v7  ;;  %v5646_v60 = vsel %vm4503_vm5, %v4589_v55, %v7898_v36  ;;  %v7923_v51 = vunpack.i.h.bf16 %v11828_v7 }
 0x543   : > { %8200 = vrot.lane.b32.xlu1 %v8199_v47, %s8254_s29  ;;  %6072 = vmatmul.mubr.f32.gmra.mxu1 %v5708_v22  ;;  %v5645_v44 = vsel %vm4503_vm5, %v4588_v50, %v7918_v32  ;;  %v5742_v42 = vsel %vm4503_vm5, %v4716_v0, %v7917_v11 }
 0x544   : > { %v7936_v46 = vpop.permute.xlu0 %7935  ;;  %6076 = vmatprep.mubr.f32.mxu1 %v5805_v33 }
 0x545   : > { %v11840_v9 = vpop.permute.xlu1 %7925  ;;  %v7938_v14 = vunpack.i.h.bf16 %v7936_v46  ;;  %v7937_v23 = vunpack.i.l.bf16 %v7936_v46 }
 0x546   : > { %8220 = vrot.lane.b32.xlu0 %v8219_v21, %s8255_s28  ;;  %v7927_v17 = vunpack.i.l.bf16 %v11840_v9  ;;  %v7928_v22 = vunpack.i.h.bf16 %v11840_v9  ;;  %v4718_v21 = vld [vmem:[#allocation4 + $0xa9] sm:$0xff] }
 0x547   : > { %8205 = vrot.lane.b32.xlu1 %v8204_v30, %s8255_s28  ;;  %6077 = vmatmul.mubr.f32.gmra.mxu1 %v5709_v37 }
 0x548   : > { %v7941_v6 = vpop.permute.xlu0 %7940  ;;  %v5745_v49 = vsel %vm4503_vm5, %v4719_v15, %v7927_v17 }
 0x549   : > { %v7942_v1 = vunpack.i.l.bf16 %v7941_v6  ;;  %v7931_v57 = vpop.permute.xlu1 %7930  ;;  %v7943_v41 = vunpack.i.h.bf16 %v7941_v6 }
 0x54a   : > { %8225 = vrot.lane.b32.xlu0 %v8224_v25, %s8256_s13  ;;  %v7933_v29 = vunpack.i.h.bf16 %v7931_v57  ;;  %v7932_v43 = vunpack.i.l.bf16 %v7931_v57 }
 0x54b   : > { %8235 = vrot.lane.b32.xlu1 %v8234_v28, %s8256_s13  ;;  %v5775_v20 = vsel %vm734_vm2, %v5743_v5, %v7942_v1  ;;  %v5678_v10 = vsel %vm734_vm2, %v5646_v60, %v7943_v41  ;;  %v5648_v1 = vsel %vm4503_vm5, %v4591_v58, %v7928_v22 }
 0x54c   : > { %v7946_v34 = vpop.permute.xlu0 %7945  ;;  %v5774_v26 = vsel %vm734_vm2, %v5742_v42, %v7932_v43  ;;  %v5677_v61 = vsel %vm734_vm2, %v5645_v44, %v7933_v29  ;;  %v5807_v63 = vsel %vm5699_vm8, %v5775_v20, %v7922_v53  ;;  %v5711_v62 = vsel %vm5699_vm8, %v5678_v10, %v7923_v51  ;;  %v4720_v20 = vld [vmem:[#allocation4 + $0xc1] sm:$0xff]  ;;  %v4593_v51 = vld [vmem:[#allocation4 + $0xb0] sm:$0xff] }
 0x54d   : > { %v7951_v35 = vpop.permute.xlu1 %7950  ;;  %v5806_v18 = vsel %vm5699_vm8, %v5774_v26, %v7937_v23  ;;  %v5710_v31 = vsel %vm5699_vm8, %v5677_v61, %v7938_v14  ;;  %v7948_v48 = vunpack.i.h.bf16 %v7946_v34  ;;  %v7947_v12 = vunpack.i.l.bf16 %v7946_v34  ;;  %v4592_v23 = vld [vmem:[#allocation4 + $0xa8] sm:$0xff] }
 0x54e   : > { %8230 = vrot.lane.b32.xlu0 %v8229_v45, %s8254_s29  ;;  %6081 = vmatprep.mubr.f32.mxu1 %v5806_v18  ;;  %v7952_v3 = vunpack.i.l.bf16 %v7951_v35  ;;  %v7953_v28 = vunpack.i.h.bf16 %v7951_v35  ;;  %v4721_v34 = vld [vmem:[#allocation4 + $0xc9] sm:$0xff] }
 0x54f   : > { %6082 = vmatmul.mubr.f32.gmra.mxu1 %v5710_v31  ;;  %v5647_v46 = vsel %vm4503_vm5, %v4590_v52, %v7948_v48  ;;  %v5744_v32 = vsel %vm4503_vm5, %v4718_v21, %v7947_v12 }
 0x550   : > { %v7966_v24 = vpop.permute.xlu0 %7965  ;;  %6086 = vmatprep.mubr.f32.mxu1 %v5807_v63 }
 0x551   : > { %v11866_v27 = vpop.permute.xlu1 %7955  ;;  %v7968_v13 = vunpack.i.h.bf16 %v7966_v24  ;;  %v7967_v16 = vunpack.i.l.bf16 %v7966_v24 }
 0x552   : > { %v7957_v8 = vunpack.i.l.bf16 %v11866_v27  ;;  %v7958_v14 = vunpack.i.h.bf16 %v11866_v27 }
 0x553   : > { %6087 = vmatmul.mubr.f32.gmra.mxu1 %v5711_v62 }
 0x554   : > { %v7971_v40 = vpop.permute.xlu0 %7970  ;;  %v5747_v55 = vsel %vm4503_vm5, %v4721_v34, %v7957_v8  ;;  %v5650_v12 = vsel %vm4503_vm5, %v4593_v51, %v7958_v14 }
 0x555   : > { %v7972_v47 = vunpack.i.l.bf16 %v7971_v40  ;;  %v7961_v2 = vpop.permute.xlu1 %7960  ;;  %v7973_v30 = vunpack.i.h.bf16 %v7971_v40 }
 0x556   : > { %v7963_v7 = vunpack.i.h.bf16 %v7961_v2  ;;  %v7962_v33 = vunpack.i.l.bf16 %v7961_v2 }
 0x557   : > { %v5777_v54 = vsel %vm734_vm2, %v5745_v49, %v7972_v47  ;;  %v5680_v57 = vsel %vm734_vm2, %v5648_v1, %v7973_v30 }
 0x558   : > { %v7976_v56 = vpop.permute.xlu0 %7975  ;;  %v5776_v37 = vsel %vm734_vm2, %v5744_v32, %v7962_v33  ;;  %v5679_v9 = vsel %vm734_vm2, %v5647_v46, %v7963_v7  ;;  %v5809_v50 = vsel %vm5699_vm8, %v5777_v54, %v7952_v3  ;;  %v5713_v29 = vsel %vm5699_vm8, %v5680_v57, %v7953_v28  ;;  %v4722_v54 = vld [vmem:[#allocation4 + $0xd9] sm:$0xff]  ;;  %v4595_v28 = vld [vmem:[#allocation4 + $0xc8] sm:$0xff] }
 0x559   : > { %v7981_v11 = vpop.permute.xlu1 %7980  ;;  %v5808_v6 = vsel %vm5699_vm8, %v5776_v37, %v7967_v16  ;;  %v5712_v25 = vsel %vm5699_vm8, %v5679_v9, %v7968_v13  ;;  %v7978_v44 = vunpack.i.h.bf16 %v7976_v56  ;;  %v7977_v43 = vunpack.i.l.bf16 %v7976_v56  ;;  %v4594_v16 = vld [vmem:[#allocation4 + $0xc0] sm:$0xff] }
 0x55a   : > { %6091 = vmatprep.mubr.f32.mxu1 %v5808_v6  ;;  %v7982_v27 = vunpack.i.l.bf16 %v7981_v11  ;;  %v7983_v52 = vunpack.i.h.bf16 %v7981_v11  ;;  %v4723_v56 = vld [vmem:[#allocation4 + $0xe1] sm:$0xff] }
 0x55b   : > { %6092 = vmatmul.mubr.f32.gmra.mxu1 %v5712_v25  ;;  %v5649_v42 = vsel %vm4503_vm5, %v4592_v23, %v7978_v44  ;;  %v5746_v60 = vsel %vm4503_vm5, %v4720_v20, %v7977_v43 }
 0x55c   : > { %v7996_v36 = vpop.permute.xlu0 %7995  ;;  %6096 = vmatprep.mubr.f32.mxu1 %v5809_v50 }
 0x55d   : > { %v11882_v45 = vpop.permute.xlu1 %7985  ;;  %v7998_v53 = vunpack.i.h.bf16 %v7996_v36  ;;  %v7997_v35 = vunpack.i.l.bf16 %v7996_v36 }
 0x55e   : > { %v7987_v15 = vunpack.i.l.bf16 %v11882_v45  ;;  %v7988_v13 = vunpack.i.h.bf16 %v11882_v45 }
 0x55f   : > { %6097 = vmatmul.mubr.f32.gmra.mxu1 %v5713_v29 }
 0x560   : > { %v8001_v0 = vpop.permute.xlu0 %8000  ;;  %v5749_v58 = vsel %vm4503_vm5, %v4723_v56, %v7987_v15  ;;  %v5652_v43 = vsel %vm4503_vm5, %v4595_v28, %v7988_v13 }
 0x561   : > { %v8002_v5 = vunpack.i.l.bf16 %v8001_v0  ;;  %v7991_v41 = vpop.permute.xlu1 %7990  ;;  %v8003_v18 = vunpack.i.h.bf16 %v8001_v0 }
 0x562   : > { %v7993_v26 = vunpack.i.h.bf16 %v7991_v41  ;;  %v7992_v61 = vunpack.i.l.bf16 %v7991_v41 }
 0x563   : > { %v5779_v10 = vsel %vm734_vm2, %v5747_v55, %v8002_v5  ;;  %v5682_v22 = vsel %vm734_vm2, %v5650_v12, %v8003_v18 }
 0x564   : > { %v8006_v31 = vpop.permute.xlu0 %8005  ;;  %v5778_v24 = vsel %vm734_vm2, %v5746_v60, %v7992_v61  ;;  %v5681_v63 = vsel %vm734_vm2, %v5649_v42, %v7993_v26  ;;  %v5811_v47 = vsel %vm5699_vm8, %v5779_v10, %v7982_v27  ;;  %v5715_v7 = vsel %vm5699_vm8, %v5682_v22, %v7983_v52  ;;  %v4724_v10 = vld [vmem:[#allocation4 + $0xf1] sm:$0xff]  ;;  %v4597_v52 = vld [vmem:[#allocation4 + $0xe0] sm:$0xff] }
 0x565   : > { %v8011_v17 = vpop.permute.xlu1 %8010  ;;  %v5810_v48 = vsel %vm5699_vm8, %v5778_v24, %v7997_v35  ;;  %v5714_v62 = vsel %vm5699_vm8, %v5681_v63, %v7998_v53  ;;  %v8008_v46 = vunpack.i.h.bf16 %v8006_v31  ;;  %v8007_v33 = vunpack.i.l.bf16 %v8006_v31  ;;  %v4596_v35 = vld [vmem:[#allocation4 + $0xd8] sm:$0xff] }
 0x566   : > { %6101 = vmatprep.mubr.f32.mxu1 %v5810_v48  ;;  %v8012_v45 = vunpack.i.l.bf16 %v8011_v17  ;;  %v8013_v23 = vunpack.i.h.bf16 %v8011_v17  ;;  %v4725_v31 = vld [vmem:[#allocation4 + $0xf9] sm:$0xff] }
 0x567   : > { %6102 = vmatmul.mubr.f32.gmra.mxu1 %v5714_v62  ;;  %v5651_v32 = vsel %vm4503_vm5, %v4594_v16, %v8008_v46  ;;  %v5748_v1 = vsel %vm4503_vm5, %v4722_v54, %v8007_v33 }
 0x568   : > { %v8026_v40 = vpop.permute.xlu0 %8025  ;;  %6106 = vmatprep.mubr.f32.mxu1 %v5811_v47 }
 0x569   : > { %v11898_v2 = vpop.permute.xlu1 %8015  ;;  %v8028_v3 = vunpack.i.h.bf16 %v8026_v40  ;;  %v8027_v11 = vunpack.i.l.bf16 %v8026_v40 }
 0x56a   : > { %v8017_v34 = vunpack.i.l.bf16 %v11898_v2  ;;  %v8018_v53 = vunpack.i.h.bf16 %v11898_v2 }
 0x56b   : > { %6107 = vmatmul.mubr.f32.gmra.mxu1 %v5715_v7 }
 0x56c   : > { %v8031_v21 = vpop.permute.xlu0 %8030  ;;  %v5751_v51 = vsel %vm4503_vm5, %v4725_v31, %v8017_v34  ;;  %v5654_v33 = vsel %vm4503_vm5, %v4597_v52, %v8018_v53 }
 0x56d   : > { %v8032_v49 = vunpack.i.l.bf16 %v8031_v21  ;;  %v8021_v30 = vpop.permute.xlu1 %8020  ;;  %v8033_v6 = vunpack.i.h.bf16 %v8031_v21 }
 0x56e   : > { %v8023_v37 = vunpack.i.h.bf16 %v8021_v30  ;;  %v8022_v9 = vunpack.i.l.bf16 %v8021_v30 }
 0x56f   : > { %v5781_v57 = vsel %vm734_vm2, %v5749_v58, %v8032_v49  ;;  %v5684_v14 = vsel %vm734_vm2, %v5652_v43, %v8033_v6 }
 0x570   : > { %v8036_v25 = vpop.permute.xlu0 %8035  ;;  %v5780_v36 = vsel %vm734_vm2, %v5748_v1, %v8022_v9  ;;  %v5683_v50 = vsel %vm734_vm2, %v5651_v32, %v8023_v37  ;;  %v5813_v5 = vsel %vm5699_vm8, %v5781_v57, %v8012_v45  ;;  %v5717_v26 = vsel %vm5699_vm8, %v5684_v14, %v8013_v23  ;;  %v4726_v57 = vld [vmem:[#allocation4 + $0x109] sm:$0xff]  ;;  %v4599_v23 = vld [vmem:[#allocation4 + $0xf8] sm:$0xff] }
 0x571   : > { %v8041_v8 = vpop.permute.xlu1 %8040  ;;  %v5812_v44 = vsel %vm5699_vm8, %v5780_v36, %v8027_v11  ;;  %v5716_v29 = vsel %vm5699_vm8, %v5683_v50, %v8028_v3  ;;  %v8038_v42 = vunpack.i.h.bf16 %v8036_v25  ;;  %v8037_v61 = vunpack.i.l.bf16 %v8036_v25  ;;  %v4598_v11 = vld [vmem:[#allocation4 + $0xf0] sm:$0xff] }
 0x572   : > { %6111 = vmatprep.mubr.f32.mxu1 %v5812_v44  ;;  %v8042_v2 = vunpack.i.l.bf16 %v8041_v8  ;;  %v8043_v16 = vunpack.i.h.bf16 %v8041_v8  ;;  %v4727_v25 = vld [vmem:[#allocation4 + $0x111] sm:$0xff] }
 0x573   : > { %6112 = vmatmul.mubr.f32.gmra.mxu1 %v5716_v29  ;;  %v5653_v60 = vsel %vm4503_vm5, %v4596_v35, %v8038_v42  ;;  %v5750_v12 = vsel %vm4503_vm5, %v4724_v10, %v8037_v61 }
 0x574   : > { %v8056_v0 = vpop.permute.xlu0 %8055  ;;  %6116 = vmatprep.mubr.f32.mxu1 %v5813_v5 }
 0x575   : > { %v11914_v41 = vpop.permute.xlu1 %8045  ;;  %v8058_v27 = vunpack.i.h.bf16 %v8056_v0  ;;  %v8057_v17 = vunpack.i.l.bf16 %v8056_v0 }
 0x576   : > { %v8047_v56 = vunpack.i.l.bf16 %v11914_v41  ;;  %v8048_v3 = vunpack.i.h.bf16 %v11914_v41 }
 0x577   : > { %6117 = vmatmul.mubr.f32.gmra.mxu1 %v5717_v26 }
 0x578   : > { %v8061_v20 = vpop.permute.xlu0 %8060  ;;  %v5753_v28 = vsel %vm4503_vm5, %v4727_v25, %v8047_v56  ;;  %v5656_v61 = vsel %vm4503_vm5, %v4599_v23, %v8048_v3 }
 0x579   : > { %v8062_v55 = vunpack.i.l.bf16 %v8061_v20  ;;  %v8051_v18 = vpop.permute.xlu1 %8050  ;;  %v8063_v48 = vunpack.i.h.bf16 %v8061_v20 }
 0x57a   : > { %v8053_v24 = vunpack.i.h.bf16 %v8051_v18  ;;  %v8052_v63 = vunpack.i.l.bf16 %v8051_v18 }
 0x57b   : > { %v5783_v22 = vsel %vm734_vm2, %v5751_v51, %v8062_v55  ;;  %v5686_v13 = vsel %vm734_vm2, %v5654_v33, %v8063_v48 }
 0x57c   : > { %v8066_v62 = vpop.permute.xlu0 %8065  ;;  %v5782_v40 = vsel %vm734_vm2, %v5750_v12, %v8052_v63  ;;  %v5685_v47 = vsel %vm734_vm2, %v5653_v60, %v8053_v24  ;;  %v5815_v49 = vsel %vm5699_vm8, %v5783_v22, %v8042_v2  ;;  %v5719_v37 = vsel %vm5699_vm8, %v5686_v13, %v8043_v16  ;;  %v4728_v22 = vld [vmem:[#allocation4 + $0x121] sm:$0xff]  ;;  %v4601_v16 = vld [vmem:[#allocation4 + $0x110] sm:$0xff] }
 0x57d   : > { %v8071_v15 = vpop.permute.xlu1 %8070  ;;  %v5814_v46 = vsel %vm5699_vm8, %v5782_v40, %v8057_v17  ;;  %v5718_v7 = vsel %vm5699_vm8, %v5685_v47, %v8058_v27  ;;  %v8068_v32 = vunpack.i.h.bf16 %v8066_v62  ;;  %v8067_v9 = vunpack.i.l.bf16 %v8066_v62  ;;  %v4600_v17 = vld [vmem:[#allocation4 + $0x108] sm:$0xff] }
 0x57e   : > { %6121 = vmatprep.mubr.f32.mxu1 %v5814_v46  ;;  %v8072_v41 = vunpack.i.l.bf16 %v8071_v15  ;;  %v8073_v35 = vunpack.i.h.bf16 %v8071_v15  ;;  %v4729_v62 = vld [vmem:[#allocation4 + $0x129] sm:$0xff] }
 0x57f   : > { %6122 = vmatmul.mubr.f32.gmra.mxu1 %v5718_v7  ;;  %v5655_v1 = vsel %vm4503_vm5, %v4598_v11, %v8068_v32  ;;  %v5752_v43 = vsel %vm4503_vm5, %v4726_v57, %v8067_v9 }
 0x580   : > { %v8086_v21 = vpop.permute.xlu0 %8085  ;;  %6126 = vmatprep.mubr.f32.mxu1 %v5815_v49 }
 0x581   : > { %v11930_v30 = vpop.permute.xlu1 %8075  ;;  %v8088_v45 = vunpack.i.h.bf16 %v8086_v21  ;;  %v8087_v8 = vunpack.i.l.bf16 %v8086_v21 }
 0x582   : > { %v8077_v31 = vunpack.i.l.bf16 %v11930_v30  ;;  %v8078_v27 = vunpack.i.h.bf16 %v11930_v30 }
 0x583   : > { %6127 = vmatmul.mubr.f32.gmra.mxu1 %v5719_v37 }
 0x584   : > { %v8091_v54 = vpop.permute.xlu0 %8090  ;;  %v5755_v52 = vsel %vm4503_vm5, %v4729_v62, %v8077_v31  ;;  %v5658_v9 = vsel %vm4503_vm5, %v4601_v16, %v8078_v27 }
 0x585   : > { %v8092_v58 = vunpack.i.l.bf16 %v8091_v54  ;;  %v8081_v6 = vpop.permute.xlu1 %8080  ;;  %v8093_v44 = vunpack.i.h.bf16 %v8091_v54 }
 0x586   : > { %v8083_v36 = vunpack.i.h.bf16 %v8081_v6  ;;  %v8082_v50 = vunpack.i.l.bf16 %v8081_v6 }
 0x587   : > { %v5785_v14 = vsel %vm734_vm2, %v5753_v28, %v8092_v58  ;;  %v5688_v53 = vsel %vm734_vm2, %v5656_v61, %v8093_v44 }
 0x588   : > { %v8096_v29 = vpop.permute.xlu0 %8095  ;;  %v5784_v0 = vsel %vm734_vm2, %v5752_v43, %v8082_v50  ;;  %v5687_v5 = vsel %vm734_vm2, %v5655_v1, %v8083_v36  ;;  %v5817_v55 = vsel %vm5699_vm8, %v5785_v14, %v8072_v41  ;;  %v5721_v24 = vsel %vm5699_vm8, %v5688_v53, %v8073_v35  ;;  %v4730_v14 = vld [vmem:[#allocation4 + $0x139] sm:$0xff]  ;;  %v4603_v35 = vld [vmem:[#allocation4 + $0x128] sm:$0xff] }
 0x589   : > { %v8101_v34 = vpop.permute.xlu1 %8100  ;;  %v5816_v42 = vsel %vm5699_vm8, %v5784_v0, %v8087_v8  ;;  %v5720_v26 = vsel %vm5699_vm8, %v5687_v5, %v8088_v45  ;;  %v8098_v60 = vunpack.i.h.bf16 %v8096_v29  ;;  %v8097_v63 = vunpack.i.l.bf16 %v8096_v29  ;;  %v4602_v8 = vld [vmem:[#allocation4 + $0x120] sm:$0xff] }
 0x58a   : > { %6131 = vmatprep.mubr.f32.mxu1 %v5816_v42  ;;  %v8102_v30 = vunpack.i.l.bf16 %v8101_v34  ;;  %v8103_v11 = vunpack.i.h.bf16 %v8101_v34  ;;  %v4731_v29 = vld [vmem:[#allocation4 + $0x141] sm:$0xff] }
 0x58b   : > { %6132 = vmatmul.mubr.f32.gmra.mxu1 %v5720_v26  ;;  %v5657_v12 = vsel %vm4503_vm5, %v4600_v17, %v8098_v60  ;;  %v5754_v33 = vsel %vm4503_vm5, %v4728_v22, %v8097_v63 }
 0x58c   : > { %v8116_v20 = vpop.permute.xlu0 %8115  ;;  %6136 = vmatprep.mubr.f32.mxu1 %v5817_v55 }
 0x58d   : > { %v11946_v18 = vpop.permute.xlu1 %8105  ;;  %v8118_v2 = vunpack.i.h.bf16 %v8116_v20  ;;  %v8117_v15 = vunpack.i.l.bf16 %v8116_v20 }
 0x58e   : > { %v8107_v25 = vunpack.i.l.bf16 %v11946_v18  ;;  %v8108_v45 = vunpack.i.h.bf16 %v11946_v18 }
 0x58f   : > { %6137 = vmatmul.mubr.f32.gmra.mxu1 %v5721_v24 }
 0x590   : > { %v8121_v10 = vpop.permute.xlu0 %8120  ;;  %v5757_v23 = vsel %vm4503_vm5, %v4731_v29, %v8107_v25  ;;  %v5660_v63 = vsel %vm4503_vm5, %v4603_v35, %v8108_v45 }
 0x591   : > { %v8122_v51 = vunpack.i.l.bf16 %v8121_v10  ;;  %v8111_v48 = vpop.permute.xlu1 %8110  ;;  %v8123_v46 = vunpack.i.h.bf16 %v8121_v10 }
 0x592   : > { %v8113_v40 = vunpack.i.h.bf16 %v8111_v48  ;;  %v8112_v47 = vunpack.i.l.bf16 %v8111_v48 }
 0x593   : > { %v5787_v13 = vsel %vm734_vm2, %v5755_v52, %v8122_v51  ;;  %v5690_v3 = vsel %vm734_vm2, %v5658_v9, %v8123_v46 }
 0x594   : > { %v8126_v7 = vpop.permute.xlu0 %8125  ;;  %v5786_v21 = vsel %vm734_vm2, %v5754_v33, %v8112_v47  ;;  %v5689_v49 = vsel %vm734_vm2, %v5657_v12, %v8113_v40  ;;  %v5819_v58 = vsel %vm5699_vm8, %v5787_v13, %v8102_v30  ;;  %v5723_v36 = vsel %vm5699_vm8, %v5690_v3, %v8103_v11  ;;  %v4605_v40 = vld [vmem:[#allocation4 + $0x140] sm:$0xff]  ;;  %v4732_v33 = vld [vmem:[#allocation4 + $0x151] sm:$0xff] }
 0x595   : > { %v8131_v56 = vpop.permute.xlu1 %8130  ;;  %v5818_v32 = vsel %vm5699_vm8, %v5786_v21, %v8117_v15  ;;  %v5722_v37 = vsel %vm5699_vm8, %v5689_v49, %v8118_v2  ;;  %v8128_v1 = vunpack.i.h.bf16 %v8126_v7  ;;  %v8127_v50 = vunpack.i.l.bf16 %v8126_v7  ;;  %v4604_v2 = vld [vmem:[#allocation4 + $0x138] sm:$0xff] }
 0x596   : > { %6141 = vmatprep.mubr.f32.mxu1 %v5818_v32  ;;  %v8132_v18 = vunpack.i.l.bf16 %v8131_v56  ;;  %v8133_v12 = vunpack.i.h.bf16 %v8131_v56 }
 0x597   : > { %6142 = vmatmul.mubr.f32.gmra.mxu1 %v5722_v37  ;;  %v5659_v43 = vsel %vm4503_vm5, %v4602_v8, %v8128_v1  ;;  %v5756_v61 = vsel %vm4503_vm5, %v4730_v14, %v8127_v50 }
 0x598   : > { %v8146_v54 = vpop.permute.xlu0 %8145  ;;  %6146 = vmatprep.mubr.f32.mxu1 %v5819_v58 }
 0x599   : > { %v11962_v6 = vpop.permute.xlu1 %8135  ;;  %v8148_v41 = vunpack.i.h.bf16 %v8146_v54  ;;  %v8147_v34 = vunpack.i.l.bf16 %v8146_v54  ;;  %v4733_v54 = vld [vmem:[#allocation4 + $0x159] sm:$0xff] }
 0x59a   : > { %v8138_v10 = vunpack.i.h.bf16 %v11962_v6  ;;  %v8137_v47 = vunpack.i.l.bf16 %v11962_v6 }
 0x59b   : > { %6147 = vmatmul.mubr.f32.gmra.mxu1 %v5723_v36 }
 0x59c   : > { %v8151_v57 = vpop.permute.xlu0 %8150  ;;  %v5662_v52 = vsel %vm4503_vm5, %v4605_v40, %v8138_v10  ;;  %v5759_v25 = vsel %vm4503_vm5, %v4733_v54, %v8137_v47 }
 0x59d   : > { %v8152_v28 = vunpack.i.l.bf16 %v8151_v57  ;;  %v8141_v44 = vpop.permute.xlu1 %8140  ;;  %v8153_v42 = vunpack.i.h.bf16 %v8151_v57 }
 0x59e   : > { %v8143_v0 = vunpack.i.h.bf16 %v8141_v44  ;;  %v8142_v5 = vunpack.i.l.bf16 %v8141_v44 }
 0x59f   : > { %v5789_v53 = vsel %vm734_vm2, %v5757_v23, %v8152_v28  ;;  %v5692_v62 = vsel %vm734_vm2, %v5660_v63, %v8153_v42 }
 0x5a0   : > { %v8156_v26 = vpop.permute.xlu0 %8155  ;;  %v5788_v20 = vsel %vm734_vm2, %v5756_v61, %v8142_v5  ;;  %v5691_v55 = vsel %vm734_vm2, %v5659_v43, %v8143_v0  ;;  %v5821_v48 = vsel %vm5699_vm8, %v5789_v53, %v8132_v18  ;;  %v5725_v7 = vsel %vm5699_vm8, %v5692_v62, %v8133_v12 }
 0x5a1   : > { %v8161_v31 = vpop.permute.xlu1 %8160  ;;  %v5820_v60 = vsel %vm5699_vm8, %v5788_v20, %v8147_v34  ;;  %v5724_v24 = vsel %vm5699_vm8, %v5691_v55, %v8148_v41  ;;  %v8158_v51 = vunpack.i.h.bf16 %v8156_v26  ;;  %v8157_v27 = vunpack.i.l.bf16 %v8156_v26 }
 0x5a2   : > { %6151 = vmatprep.mubr.f32.mxu1 %v5820_v60  ;;  %v8162_v58 = vunpack.i.l.bf16 %v8161_v31  ;;  %v8163_v50 = vunpack.i.h.bf16 %v8161_v31  ;;  %v8243_v60 = vld [vmem:[#allocation4 + $0x158] sm:$0xff] }
 0x5a3   : > { %6152 = vmatmul.mubr.f32.gmra.mxu1 %v5724_v24  ;;  %v5661_v21 = vsel %vm4503_vm5, %v4604_v2, %v8158_v51  ;;  %v5758_v30 = vsel %vm4503_vm5, %v4732_v33, %v8157_v27 }
 0x5a4   : > { %v8176_v17 = vpop.permute.xlu0 %8175  ;;  %6156 = vmatprep.mubr.f32.mxu1 %v5821_v48 }
 0x5a5   : > { %v8166_v22 = vpop.permute.xlu1 %8165  ;;  %v8178_v49 = vunpack.i.h.bf16 %v8176_v17  ;;  %v8177_v13 = vunpack.i.l.bf16 %v8176_v17 }
 0x5a6   : > { %v8168_v15 = vunpack.i.h.bf16 %v8166_v22  ;;  %v8167_v46 = vunpack.i.l.bf16 %v8166_v22 }
 0x5a7   : > { %6157 = vmatmul.mubr.f32.gmra.mxu1 %v5725_v7 }
 0x5a8   : > { %v8181_v16 = vpop.permute.xlu0 %8180  ;;  %v5790_v37 = vsel %vm734_vm2, %v5758_v30, %v8167_v46  ;;  %v5693_v9 = vsel %vm734_vm2, %v5661_v21, %v8168_v15 }
 0x5a9   : > { %v8183_v56 = vunpack.i.h.bf16 %v8181_v16  ;;  %v8182_v32 = vunpack.i.l.bf16 %v8181_v16  ;;  %v8171_v3 = vpop.permute.xlu1 %8170  ;;  %v5822_v11 = vsel %vm5699_vm8, %v5790_v37, %v8177_v13  ;;  %v5726_v6 = vsel %vm5699_vm8, %v5693_v9, %v8178_v49 }
 0x5aa   : > { %6161 = vmatprep.mubr.f32.mxu1 %v5822_v11  ;;  %v8173_v61 = vunpack.i.h.bf16 %v8171_v3  ;;  %v8172_v20 = vunpack.i.l.bf16 %v8171_v3 }
 0x5ab   : > { %v5791_v1 = vsel %vm734_vm2, %v5759_v25, %v8182_v32  ;;  %v5694_v36 = vsel %vm734_vm2, %v5662_v52, %v8183_v56  ;;  %6162 = vmatmul.mubr.f32.gmra.mxu1 %v5726_v6 }
 0x5ac   : > { %v8186_v57 = vpop.permute.xlu0 %8185  ;;  %v5823_v28 = vsel %vm5699_vm8, %v5791_v1, %v8162_v58  ;;  %v5727_v29 = vsel %vm5699_vm8, %v5694_v36, %v8163_v50  ;;  %v5664_v24 = vsel %vm4503_vm5, %v8243_v60, %v8173_v61  ;;  %v8244_v58 = vld [vmem:[#allocation4 + $0x170] sm:$0xff] }
 0x5ad   : > { %v8188_v45 = vunpack.i.h.bf16 %v8186_v57  ;;  %v8187_v8 = vunpack.i.l.bf16 %v8186_v57  ;;  %6166 = vmatprep.mubr.f32.mxu1 %v5823_v28  ;;  %v8191_v44 = vpop.permute.xlu1 %8190  ;;  %v6997_v28 = vpop.f32.mrf.mxu0 }
 0x5ae   : > { %v8193_v0 = vunpack.i.h.bf16 %v8191_v44  ;;  %v8192_v5 = vunpack.i.l.bf16 %v8191_v44 }
 0x5af   : > { %v5663_v43 = vsel %vm4503_vm5, %v11729_v4, %v8188_v45  ;;  %v5760_v14 = vsel %vm4503_vm5, %v11754_v59, %v8187_v8  ;;  %6167 = vmatmul.mubr.f32.gmra.mxu1 %v5727_v29  ;;  %v4735_v59 = vld [vmem:[#allocation4 + $0x171] sm:$0xff]  ;;  %v12025_v45 = vld [vmem:[%s12141_s8] ss:$0 sm:$0xff] }
 0x5b0   : > { %v8211_v23 = vpop.permute.xlu0 %8210  ;;  %v5792_v42 = vsel %vm734_vm2, %v5760_v14, %v8192_v5  ;;  %v5695_v26 = vsel %vm734_vm2, %v5663_v43, %v8193_v0  ;;  %v5761_v27 = vsel %vm4503_vm5, %v4735_v59, %v8172_v20 }
 0x5b1   : > { %v8213_v41 = vunpack.i.h.bf16 %v8211_v23  ;;  %v8212_v34 = vunpack.i.l.bf16 %v8211_v23  ;;  %v8196_v55 = vpop.permute.xlu1 %8195 }
 0x5b2   : > { %v8198_v63 = vunpack.i.h.bf16 %v8196_v55  ;;  %v8197_v10 = vunpack.i.l.bf16 %v8196_v55 }
 0x5b3   : > { %v5824_v53 = vsel %vm5699_vm8, %v5792_v42, %v8212_v34  ;;  %v5728_v4 = vsel %vm5699_vm8, %v5695_v26, %v8213_v41 }
 0x5b4   : > { %v8216_v35 = vpop.permute.xlu0 %8215  ;;  %6171 = vmatprep.mubr.f32.mxu1 %v5824_v53 }
 0x5b5   : > { %v8218_v18 = vunpack.i.h.bf16 %v8216_v35  ;;  %v8217_v31 = vunpack.i.l.bf16 %v8216_v35  ;;  %6172 = vmatmul.mubr.f32.gmra.mxu1 %v5728_v4  ;;  %v8201_v51 = vpop.permute.xlu1 %8200 }
 0x5b6   : > { %v8203_v46 = vunpack.i.h.bf16 %v8201_v51  ;;  %v8202_v7 = vunpack.i.l.bf16 %v8201_v51 }
 0x5b7   : > { %v5793_v17 = vsel %vm734_vm2, %v5761_v27, %v8217_v31  ;;  %v5696_v48 = vsel %vm734_vm2, %v5664_v24, %v8218_v18 }
 0x5b8   : > { %v8221_v62 = vpop.permute.xlu0 %8220  ;;  %v5825_v12 = vsel %vm5699_vm8, %v5793_v17, %v8197_v10  ;;  %v5729_v40 = vsel %vm5699_vm8, %v5696_v48, %v8198_v63 }
 0x5b9   : > { %v8223_v47 = vunpack.i.h.bf16 %v8221_v62  ;;  %v8222_v22 = vunpack.i.l.bf16 %v8221_v62  ;;  %6176 = vmatprep.mubr.f32.mxu1 %v5825_v12  ;;  %v8206_v52 = vpop.permute.xlu1 %8205 }
 0x5ba   : > { %6177 = vmatmul.mubr.f32.gmra.mxu1 %v5729_v40  ;;  %v8208_v13 = vunpack.i.h.bf16 %v8206_v52  ;;  %v8207_v16 = vunpack.i.l.bf16 %v8206_v52 }
 0x5bb   : > { %v5665_v2 = vsel %vm4503_vm5, %v11762_v39, %v8223_v47  ;;  %v5762_v15 = vsel %vm4503_vm5, %v11799_v38, %v8222_v22 }
 0x5bc   : > { %v8226_v33 = vpop.permute.xlu0 %8225  ;;  %v5794_v30 = vsel %vm734_vm2, %v5762_v15, %v8202_v7  ;;  %v5697_v56 = vsel %vm734_vm2, %v5665_v2, %v8203_v46  ;;  %v5666_v3 = vsel %vm4503_vm5, %v8244_v58, %v8208_v13  ;;  %v5763_v25 = vsel %vm4503_vm5, %v11807_v19, %v8207_v16  ;;  %v6258_v19 = vpop.f32.mrf.mxu0 }
 0x5bd   : > { %v8228_v21 = vunpack.i.h.bf16 %v8226_v33  ;;  %v8227_v49 = vunpack.i.l.bf16 %v8226_v33  ;;  %v8236_v32 = vpop.permute.xlu1 %8235 }
 0x5be   : > { %v8238_v11 = vunpack.i.h.bf16 %v8236_v32  ;;  %v8237_v6 = vunpack.i.l.bf16 %v8236_v32  ;;  %v7000_v41 = vpop.f32.mrf.mxu0 }
 0x5bf   : > { %v5826_v37 = vsel %vm5699_vm8, %v5794_v30, %v8227_v49  ;;  %v5730_v9 = vsel %vm5699_vm8, %v5697_v56, %v8228_v21 }
 0x5c0   : > { %v8231_v39 = vpop.permute.xlu0 %8230  ;;  %6181 = vmatprep.mubr.f32.mxu1 %v5826_v37  ;;  %v6268_v26 = vpop.f32.mrf.mxu0 }
 0x5c1   : > { %v8233_v54 = vunpack.i.h.bf16 %v8231_v39  ;;  %v8232_v38 = vunpack.i.l.bf16 %v8231_v39  ;;  %6182 = vmatmul.mubr.f32.gmra.mxu1 %v5730_v9 }
 0x5c2   : > { %v7003_v18 = vpop.f32.mrf.mxu0 }
 0x5c3   : > { %v5698_v1 = vsel %vm734_vm2, %v5666_v3, %v8233_v54  ;;  %v5795_v36 = vsel %vm734_vm2, %v5763_v25, %v8232_v38 }
 0x5c4   : > { %v5827_v50 = vsel %vm5699_vm8, %v5795_v36, %v8237_v6  ;;  %v5731_v57 = vsel %vm5699_vm8, %v5698_v1, %v8238_v11  ;;  %v6278_v60 = vpop.f32.mrf.mxu0 }
 0x5c5   : > { %6186 = vmatprep.mubr.f32.mxu1 %v5827_v50 }
 0x5c6   : > { %6187 = vmatmul.mubr.f32.gmra.mxu1 %v5731_v57  ;;  %v7006_v48 = vpop.f32.mrf.mxu0 }
 0x5c8   : > { %v6288_v40 = vpop.f32.mrf.mxu0 }
 0x5ca   : > { %v7009_v7 = vpop.f32.mrf.mxu0 }
 0x5cc   : > { %v6298_v49 = vpop.f32.mrf.mxu0 }
 0x5ce   : > { %v7012_v9 = vpop.f32.mrf.mxu0 }
 0x5d0   : > { %v6308_v38 = vpop.f32.mrf.mxu0 }
 0x5d2   : > { %v7015_v36 = vpop.f32.mrf.mxu0 }
 0x5d3   : > { %v6033_v8 = vpop.f32.mrf.mxu1 }
 0x5d4   : > { %v6034_v44 = vadd.f32 %v12025_v45, %v6033_v8 }
 0x5d5   : > { %v6035_v29 = vpop.f32.mrf.mxu1 }
 0x5d6   : > { %v6259_v43 = vadd.f32 %v6258_v19, %v6034_v44 }
 0x5d7   : > { %v6038_v0 = vpop.f32.mrf.mxu1 }
 0x5d8   : > { %6418 = vst.msk [vmem:[%s12033_s22] sm:$0xff] %vm6417_vm9, %v6259_v43  ;;  %v6039_v5 = vadd.f32 %v12025_v45, %v6038_v0 }
 0x5d9   : > { %v6040_v14 = vpop.f32.mrf.mxu1 }
 0x5da   : > { %v6264_v23 = vadd.f32 %v6997_v28, %v6039_v5  ;;  %v6318_v28 = vpop.f32.mrf.mxu0 }
 0x5dc   : > { %6419 = vst.msk [vmem:[%s12033_s22 + $0x8] sm:$0xff] %vm6417_vm9, %v6264_v23  ;;  %v7018_v5 = vpop.f32.mrf.mxu0 }
 0x5df   : > { %v6043_v34 = vpop.f32.mrf.mxu1 }
 0x5e0   : > { %v6044_v42 = vadd.f32 %v12025_v45, %v6043_v34 }
 0x5e1   : > { %v6045_v61 = vpop.f32.mrf.mxu1 }
 0x5e2   : > { %v6269_v20 = vadd.f32 %v6268_v26, %v6044_v42 }
 0x5e3   : > { %v6048_v55 = vpop.f32.mrf.mxu1 }
 0x5e4   : > { %6420 = vst.msk [vmem:[%s12033_s22 + $0x10] sm:$0xff] %vm6417_vm9, %v6269_v20  ;;  %v6049_v53 = vadd.f32 %v12025_v45, %v6048_v55 }
 0x5e5   : > { %v6050_v4 = vpop.f32.mrf.mxu1 }
 0x5e6   : > { %v6274_v35 = vadd.f32 %v7000_v41, %v6049_v53  ;;  %v6328_v41 = vpop.f32.mrf.mxu0 }
 0x5e8   : > { %6421 = vst.msk [vmem:[%s12033_s22 + $0x18] sm:$0xff] %vm6417_vm9, %v6274_v35  ;;  %v7021_v53 = vpop.f32.mrf.mxu0 }
 0x5eb   : > { %v6053_v31 = vpop.f32.mrf.mxu1 }
 0x5ec   : > { %v6054_v59 = vadd.f32 %v12025_v45, %v6053_v31 }
 0x5ed   : > { %v6055_v24 = vpop.f32.mrf.mxu1 }
 0x5ee   : > { %v6279_v63 = vadd.f32 %v6278_v60, %v6054_v59 }
 0x5ef   : > { %v6058_v10 = vpop.f32.mrf.mxu1 }
 0x5f0   : > { %6422 = vst.msk [vmem:[%s12033_s22 + $0x20] sm:$0xff] %vm6417_vm9, %v6279_v63  ;;  %v6059_v51 = vadd.f32 %v12025_v45, %v6058_v10 }
 0x5f1   : > { %v6060_v27 = vpop.f32.mrf.mxu1 }
 0x5f2   : > { %v6284_v17 = vadd.f32 %v7003_v18, %v6059_v51  ;;  %v6338_v18 = vpop.f32.mrf.mxu0 }
 0x5f4   : > { %6423 = vst.msk [vmem:[%s12033_s22 + $0x28] sm:$0xff] %vm6417_vm9, %v6284_v17  ;;  %v7024_v51 = vpop.f32.mrf.mxu0 }
 0x5f7   : > { %v6063_v62 = vpop.f32.mrf.mxu1 }
 0x5f8   : > { %v6064_v12 = vadd.f32 %v12025_v45, %v6063_v62 }
 0x5f9   : > { %v6065_v47 = vpop.f32.mrf.mxu1 }
 0x5fa   : > { %v6289_v22 = vadd.f32 %v6288_v40, %v6064_v12 }
 0x5fb   : > { %v6068_v52 = vpop.f32.mrf.mxu1 }
 0x5fc   : > { %6424 = vst.msk [vmem:[%s12033_s22 + $0x30] sm:$0xff] %vm6417_vm9, %v6289_v22  ;;  %v6069_v2 = vadd.f32 %v12025_v45, %v6068_v52 }
 0x5fd   : > { %v6070_v15 = vpop.f32.mrf.mxu1 }
 0x5fe   : > { %v6294_v46 = vadd.f32 %v7006_v48, %v6069_v2  ;;  %v6348_v48 = vpop.f32.mrf.mxu0 }
 0x600   : > { %6425 = vst.msk [vmem:[%s12033_s22 + $0x38] sm:$0xff] %vm6417_vm9, %v6294_v46  ;;  %v7027_v2 = vpop.f32.mrf.mxu0 }
 0x603   : > { %v6073_v33 = vpop.f32.mrf.mxu1 }
 0x604   : > { %v6074_v21 = vadd.f32 %v12025_v45, %v6073_v33 }
 0x605   : > { %v6075_v13 = vpop.f32.mrf.mxu1 }
 0x606   : > { %v6299_v16 = vadd.f32 %v6298_v49, %v6074_v21 }
 0x607   : > { %v6078_v30 = vpop.f32.mrf.mxu1 }
 0x608   : > { %6426 = vst.msk [vmem:[%s12033_s22 + $0x40] sm:$0xff] %vm6417_vm9, %v6299_v16  ;;  %v6079_v56 = vadd.f32 %v12025_v45, %v6078_v30 }
 0x609   : > { %v6080_v32 = vpop.f32.mrf.mxu1 }
 0x60a   : > { %v6304_v37 = vadd.f32 %v7009_v7, %v6079_v56  ;;  %v6358_v7 = vpop.f32.mrf.mxu0 }
 0x60c   : > { %6427 = vst.msk [vmem:[%s12033_s22 + $0x48] sm:$0xff] %vm6417_vm9, %v6304_v37  ;;  %v7030_v56 = vpop.f32.mrf.mxu0 }
 0x60f   : > { %v6083_v39 = vpop.f32.mrf.mxu1 }
 0x610   : > { %v6084_v54 = vadd.f32 %v12025_v45, %v6083_v39 }
 0x611   : > { %v6085_v58 = vpop.f32.mrf.mxu1 }
 0x612   : > { %v6309_v3 = vadd.f32 %v6308_v38, %v6084_v54 }
 0x613   : > { %v6088_v11 = vpop.f32.mrf.mxu1 }
 0x614   : > { %6428 = vst.msk [vmem:[%s12033_s22 + $0x50] sm:$0xff] %vm6417_vm9, %v6309_v3  ;;  %v6089_v6 = vadd.f32 %v12025_v45, %v6088_v11 }
 0x615   : > { %v6090_v25 = vpop.f32.mrf.mxu1 }
 0x616   : > { %v6314_v1 = vadd.f32 %v7012_v9, %v6089_v6  ;;  %v6368_v9 = vpop.f32.mrf.mxu0 }
 0x618   : > { %6429 = vst.msk [vmem:[%s12033_s22 + $0x58] sm:$0xff] %vm6417_vm9, %v6314_v1  ;;  %v7033_v6 = vpop.f32.mrf.mxu0 }
 0x61b   : > { %v6093_v50 = vpop.f32.mrf.mxu1 }
 0x61c   : > { %v6094_v57 = vadd.f32 %v12025_v45, %v6093_v50 }
 0x61d   : > { %v6095_v8 = vpop.f32.mrf.mxu1 }
 0x61e   : > { %v6319_v44 = vadd.f32 %v6318_v28, %v6094_v57 }
 0x61f   : > { %v6098_v19 = vpop.f32.mrf.mxu1 }
 0x620   : > { %6430 = vst.msk [vmem:[%s12033_s22 + $0x60] sm:$0xff] %vm6417_vm9, %v6319_v44  ;;  %v6099_v29 = vadd.f32 %v12025_v45, %v6098_v19 }
 0x621   : > { %v6100_v43 = vpop.f32.mrf.mxu1 }
 0x622   : > { %v6324_v0 = vadd.f32 %v7015_v36, %v6099_v29  ;;  %v6378_v36 = vpop.f32.mrf.mxu0 }
 0x624   : > { %6431 = vst.msk [vmem:[%s12033_s22 + $0x68] sm:$0xff] %vm6417_vm9, %v6324_v0  ;;  %v7036_v44 = vpop.f32.mrf.mxu0 }
 0x627   : > { %v6103_v14 = vpop.f32.mrf.mxu1 }
 0x628   : > { %v6104_v23 = vadd.f32 %v12025_v45, %v6103_v14 }
 0x629   : > { %v6105_v34 = vpop.f32.mrf.mxu1 }
 0x62a   : > { %v6329_v42 = vadd.f32 %v6328_v41, %v6104_v23 }
 0x62b   : > { %v6108_v26 = vpop.f32.mrf.mxu1 }
 0x62c   : > { %6432 = vst.msk [vmem:[%s12033_s22 + $0x70] sm:$0xff] %vm6417_vm9, %v6329_v42  ;;  %v6109_v61 = vadd.f32 %v12025_v45, %v6108_v26 }
 0x62d   : > { %v6110_v20 = vpop.f32.mrf.mxu1 }
 0x62e   : > { %v6334_v55 = vadd.f32 %v7018_v5, %v6109_v61  ;;  %v6388_v5 = vpop.f32.mrf.mxu0 }
 0x630   : > { %6433 = vst.msk [vmem:[%s12033_s22 + $0x78] sm:$0xff] %vm6417_vm9, %v6334_v55  ;;  %v7039_v26 = vpop.f32.mrf.mxu0 }
 0x633   : > { %v6113_v4 = vpop.f32.mrf.mxu1 }
 0x634   : > { %v6114_v35 = vadd.f32 %v12025_v45, %v6113_v4 }
 0x635   : > { %v6115_v31 = vpop.f32.mrf.mxu1 }
 0x636   : > { %v6339_v59 = vadd.f32 %v6338_v18, %v6114_v35 }
 0x637   : > { %v6118_v60 = vpop.f32.mrf.mxu1 }
 0x638   : > { %6434 = vst.msk [vmem:[%s12033_s22 + $0x80] sm:$0xff] %vm6417_vm9, %v6339_v59  ;;  %v6119_v24 = vadd.f32 %v12025_v45, %v6118_v60 }
 0x639   : > { %v6120_v63 = vpop.f32.mrf.mxu1 }
 0x63a   : > { %v6344_v10 = vadd.f32 %v7021_v53, %v6119_v24  ;;  %v6398_v53 = vpop.f32.mrf.mxu0 }
 0x63c   : > { %6435 = vst.msk [vmem:[%s12033_s22 + $0x88] sm:$0xff] %vm6417_vm9, %v6344_v10  ;;  %v7042_v24 = vpop.f32.mrf.mxu0 }
 0x63e   : > { %v6408_v10 = vpop.f32.mrf.mxu0 }
 0x63f   : > { %v6123_v27 = vpop.f32.mrf.mxu1 }
 0x640   : > { %v6124_v17 = vadd.f32 %v12025_v45, %v6123_v27 }
 0x641   : > { %v6125_v62 = vpop.f32.mrf.mxu1 }
 0x642   : > { %v6349_v12 = vadd.f32 %v6348_v48, %v6124_v17 }
 0x643   : > { %v6128_v40 = vpop.f32.mrf.mxu1 }
 0x644   : > { %6436 = vst.msk [vmem:[%s12033_s22 + $0x90] sm:$0xff] %vm6417_vm9, %v6349_v12  ;;  %v6129_v47 = vadd.f32 %v12025_v45, %v6128_v40 }
 0x645   : > { %v6130_v22 = vpop.f32.mrf.mxu1 }
 0x646   : > { %v6354_v52 = vadd.f32 %v7024_v51, %v6129_v47 }
 0x648   : > { %6437 = vst.msk [vmem:[%s12033_s22 + $0x98] sm:$0xff] %vm6417_vm9, %v6354_v52 }
 0x64b   : > { %v6133_v15 = vpop.f32.mrf.mxu1 }
 0x64c   : > { %v6134_v46 = vadd.f32 %v12025_v45, %v6133_v15 }
 0x64d   : > { %v6135_v33 = vpop.f32.mrf.mxu1 }
 0x64e   : > { %v6359_v21 = vadd.f32 %v6358_v7, %v6134_v46 }
 0x64f   : > { %v6138_v49 = vpop.f32.mrf.mxu1 }
 0x650   : > { %6438 = vst.msk [vmem:[%s12033_s22 + $0xa0] sm:$0xff] %vm6417_vm9, %v6359_v21  ;;  %v6139_v13 = vadd.f32 %v12025_v45, %v6138_v49 }
 0x651   : > { %v6140_v16 = vpop.f32.mrf.mxu1 }
 0x652   : > { %v6364_v30 = vadd.f32 %v7027_v2, %v6139_v13 }
 0x654   : > { %6439 = vst.msk [vmem:[%s12033_s22 + $0xa8] sm:$0xff] %vm6417_vm9, %v6364_v30 }
 0x657   : > { %v6143_v32 = vpop.f32.mrf.mxu1 }
 0x658   : > { %v6144_v37 = vadd.f32 %v12025_v45, %v6143_v32 }
 0x659   : > { %v6145_v39 = vpop.f32.mrf.mxu1 }
 0x65a   : > { %v6369_v54 = vadd.f32 %v6368_v9, %v6144_v37 }
 0x65b   : > { %v6148_v38 = vpop.f32.mrf.mxu1 }
 0x65c   : > { %6440 = vst.msk [vmem:[%s12033_s22 + $0xb0] sm:$0xff] %vm6417_vm9, %v6369_v54  ;;  %v6149_v58 = vadd.f32 %v12025_v45, %v6148_v38 }
 0x65d   : > { %v6150_v3 = vpop.f32.mrf.mxu1 }
 0x65e   : > { %v6374_v11 = vadd.f32 %v7030_v56, %v6149_v58 }
 0x660   : > { %6441 = vst.msk [vmem:[%s12033_s22 + $0xb8] sm:$0xff] %vm6417_vm9, %v6374_v11 }
 0x663   : > { %v6153_v25 = vpop.f32.mrf.mxu1 }
 0x664   : > { %v6154_v1 = vadd.f32 %v12025_v45, %v6153_v25 }
 0x665   : > { %v6155_v50 = vpop.f32.mrf.mxu1 }
 0x666   : > { %v6379_v57 = vadd.f32 %v6378_v36, %v6154_v1 }
 0x667   : > { %v6158_v28 = vpop.f32.mrf.mxu1 }
 0x668   : > { %6442 = vst.msk [vmem:[%s12033_s22 + $0xc0] sm:$0xff] %vm6417_vm9, %v6379_v57  ;;  %v6159_v8 = vadd.f32 %v12025_v45, %v6158_v28 }
 0x669   : > { %v6160_v19 = vpop.f32.mrf.mxu1 }
 0x66a   : > { %v6384_v29 = vadd.f32 %v7033_v6, %v6159_v8 }
 0x66b   : > { %v6163_v43 = vpop.f32.mrf.mxu1 }
 0x66c   : > { %6443 = vst.msk [vmem:[%s12033_s22 + $0xc8] sm:$0xff] %vm6417_vm9, %v6384_v29  ;;  %v6164_v0 = vadd.f32 %v12025_v45, %v6163_v43 }
 0x66d   : > { %v6165_v14 = vpop.f32.mrf.mxu1 }
 0x66e   : > { %v6389_v23 = vadd.f32 %v6388_v5, %v6164_v0 }
 0x66f   : > { %v6168_v41 = vpop.f32.mrf.mxu1 }
 0x670   : > { %6444 = vst.msk [vmem:[%s12033_s22 + $0xd0] sm:$0xff] %vm6417_vm9, %v6389_v23  ;;  %v6169_v34 = vadd.f32 %v12025_v45, %v6168_v41 }
 0x671   : > { %v6170_v42 = vpop.f32.mrf.mxu1 }
 0x672   : > { %v6394_v61 = vadd.f32 %v7036_v44, %v6169_v34 }
 0x674   : > { %6445 = vst.msk [vmem:[%s12033_s22 + $0xd8] sm:$0xff] %vm6417_vm9, %v6394_v61 }
 0x675   : > { %v6173_v20 = vpop.f32.mrf.mxu1 }
 0x676   : > { %v6174_v55 = vadd.f32 %v12025_v45, %v6173_v20 }
 0x677   : > { %v6175_v4 = vpop.f32.mrf.mxu1 }
 0x678   : > { %v6399_v35 = vadd.f32 %v6398_v53, %v6174_v55 }
 0x67a   : > { %6446 = vst.msk [vmem:[%s12033_s22 + $0xe0] sm:$0xff] %vm6417_vm9, %v6399_v35  ;;  %v6178_v18 = vpop.f32.mrf.mxu1 }
 0x67b   : > { %v6179_v31 = vadd.f32 %v12025_v45, %v6178_v18 }
 0x67c   : > { %v6180_v59 = vpop.f32.mrf.mxu1 }
 0x67d   : > { %v6404_v60 = vadd.f32 %v7039_v26, %v6179_v31 }
 0x67f   : > { %6447 = vst.msk [vmem:[%s12033_s22 + $0xe8] sm:$0xff] %vm6417_vm9, %v6404_v60 }
 0x681   : > { %v6183_v63 = vpop.f32.mrf.mxu1 }
 0x682   : > { %v6184_v51 = vadd.f32 %v12025_v45, %v6183_v63 }
 0x683   : > { %v6185_v27 = vpop.f32.mrf.mxu1 }
 0x684   : > { %v6409_v17 = vadd.f32 %v6408_v10, %v6184_v51 }
 0x686   : > { %6448 = vst.msk [vmem:[%s12033_s22 + $0xf0] sm:$0xff] %vm6417_vm9, %v6409_v17  ;;  %v6188_v48 = vpop.f32.mrf.mxu1 }
 0x687   : > { %v6189_v62 = vadd.f32 %v12025_v45, %v6188_v48 }
 0x688   : > { %v6190_v12 = vpop.f32.mrf.mxu1 }
 0x689   : > { %v6414_v40 = vadd.f32 %v7042_v24, %v6189_v62 }
 0x68b   : > { %6449 = vst.msk [vmem:[%s12033_s22 + $0xf8] sm:$0xff] %vm6417_vm9, %v6414_v40 }
 0x68c PF: > { %s19_s30 = sadd.s32 1, %s8251_s30  }
 0x68d   : > { %p16_p4 = scmp.ge.s32.totalorder %s19_s30, 4  }
 0x68f   :  { %18 = sbr.rel (!%p16_p4) target bundleno = 1 (0x1), region = 95 }

</bundles_post_ra>
